<compile_context>
chip_gen: v5e
topology: v5e:2x2
jax: 0.10.0
libtpu: 0.0.40
codegen_flags: <defaults>
</compile_context>

<pallas_src>
import functools

import jax
import jax.numpy as jnp
import numpy as np
from jax.experimental import pallas as pl
from jax.experimental.pallas import tpu as pltpu

ALPHA = 0.25
GAMMA = 2.0  # gamma == 2.0, implemented as x*x inside the kernel
EPS = 1e-8


def _round_up(x, m):
    return -(-x // m) * m


def _cost_kernel(cost_class_w, l1_dtype,
                 logits_ref, onehot_ref, kp_ref, tkp_ref, mask_ref, c_ref):
    # --- classification (focal) cost ---------------------------------------
    # Focal math on the (tn, C) tile first; the gather `focal[:, tgt_ids]` is a
    # (tn,C)@(C,tT) matmul against an exact 0/1 one-hot (runs on the MXU).
    logits = logits_ref[...]                                   # (tn, C)
    p = jax.nn.sigmoid(logits)
    one_m_p = 1.0 - p
    neg = (1.0 - ALPHA) * (p * p) * (-jnp.log(one_m_p + EPS))
    pos = ALPHA * (one_m_p * one_m_p) * (-jnp.log(p + EPS))
    focal = cost_class_w * (pos - neg)                         # (tn, C)
    cost_class = jnp.dot(focal, onehot_ref[...],
                         preferred_element_type=jnp.float32)   # (tn, tT)

    # --- keypoint (L1 / cdist p=1) cost -------------------------------------
    kp = kp_ref[...].astype(l1_dtype)                          # (tn, dp)
    tkp = tkp_ref[...].astype(l1_dtype)                        # (tT, dp)
    diff = jnp.abs(kp[:, None, :] - tkp[None, :, :])           # (tn, tT, dp)
    # TODO(synk): MXU ones-vector contraction for this reduce was evaluated but
    # introduces a (tn*tT,1)->(tn,tT) relayout; keeping the lane reduce.
    l1 = jnp.sum(diff.astype(jnp.float32), axis=-1)            # (tn, tT)

    # mask already carries the cost_keypoint weight (0 for non-hand / padded
    # targets), so the epilogue is a single fused multiply-add.
    c_ref[...] = l1 * mask_ref[...] + cost_class


def assembly_matcher_cost(pred_logits, pred_keypoints, tgt_ids, tgt_kp, *,
                          cost_class=1.0, cost_keypoint=1.0,
                          tn=256, tt=128, l1_dtype=jnp.float32):
    """Computes the matching cost matrix C of shape [B, Q, T] with Pallas."""
    bs, nq, num_classes = pred_logits.shape
    n = bs * nq
    t = int(tgt_ids.shape[0])

    logits = pred_logits.reshape(n, num_classes).astype(jnp.float32)
    kp = pred_keypoints.reshape(n, -1).astype(jnp.float32)
    tkp = tgt_kp.reshape(t, -1).astype(jnp.float32)
    d = kp.shape[1]

    # ---- padding: lane-dense keypoint dim, target dim, and row tiles --------
    dp = _round_up(d, 128)                       # keypoint coords -> lane axis
    assert tt % 128 == 0
    t_pad = _round_up(t, tt)                     # lane-dense target axis
    tn_eff = min(tn, _round_up(n, 8))            # clamp row tile to (padded) N
    n_pad = _round_up(n, tn_eff)

    logits = jnp.pad(logits, ((0, n_pad - n), (0, 0)))
    kp = jnp.pad(kp, ((0, n_pad - n), (0, dp - d)))
    tkp = jnp.pad(tkp, ((0, t_pad - t), (0, dp - d)))

    # One-hot gather matrix (C, T_pad): padded columns are all-zero so their
    # class cost is exactly 0.  Mask (1, T_pad) folds the cost_keypoint weight
    # and zeroes non-hand (tgt_ids == 0) and padded targets.
    onehot = jax.nn.one_hot(tgt_ids, num_classes, dtype=jnp.float32).T
    onehot = jnp.pad(onehot, ((0, 0), (0, t_pad - t)))
    mask = float(cost_keypoint) * (tgt_ids != 0).astype(jnp.float32)
    mask = jnp.pad(mask, (0, t_pad - t))[None, :]

    grid = (t_pad // tt, n_pad // tn_eff)        # row axis innermost

    kernel = functools.partial(_cost_kernel, float(cost_class), l1_dtype)
    c = pl.pallas_call(
        kernel,
        out_shape=jax.ShapeDtypeStruct((n_pad, t_pad), jnp.float32),
        grid_spec=pltpu.PrefetchScalarGridSpec(
            num_scalar_prefetch=0,
            grid=grid,
            in_specs=[
                pl.BlockSpec((tn_eff, num_classes), lambda jt, i: (i, 0)),  # logits tile (streamed)
                pl.BlockSpec((num_classes, tt), lambda jt, i: (0, jt)),     # one-hot (resident on inner axis)
                pl.BlockSpec((tn_eff, dp), lambda jt, i: (i, 0)),           # pred keypoints tile (streamed)
                pl.BlockSpec((tt, dp), lambda jt, i: (jt, 0)),              # target keypoints (resident)
                pl.BlockSpec((1, tt), lambda jt, i: (0, jt)),               # weighted hand mask (resident)
            ],
            out_specs=pl.BlockSpec((tn_eff, tt), lambda jt, i: (i, jt)),
        ),
        compiler_params=pltpu.CompilerParams(
            dimension_semantics=("parallel", "parallel"),
            vmem_limit_bytes=48 * 1024 * 1024,   # v7x-safe (<64 MiB/TC), above default scoped limit
        ),
    )(logits, onehot, kp, tkp, mask)

    return c[:n, :t].reshape(bs, nq, t)


def reference_cost(pred_logits, pred_keypoints, tgt_ids, tgt_kp,
                   *, cost_class=1.0, cost_keypoint=1.0):
    """Plain-JAX reimplementation of the torch forward (cost matrix only)."""
    bs, nq, _ = pred_logits.shape
    out_prob = jax.nn.sigmoid(pred_logits.reshape(bs * nq, -1))
    out_kp = pred_keypoints.reshape(bs * nq, -1)
    neg = (1.0 - ALPHA) * out_prob ** GAMMA * (-jnp.log(1.0 - out_prob + EPS))
    pos = ALPHA * (1.0 - out_prob) ** GAMMA * (-jnp.log(out_prob + EPS))
    cc = pos[:, tgt_ids] - neg[:, tgt_ids]
    tkp = tgt_kp.reshape(tgt_ids.shape[0], -1)
    l1 = jnp.sum(jnp.abs(out_kp[:, None, :] - tkp[None, :, :]), axis=-1)
    ckp = jnp.where((tgt_ids != 0)[None, :], l1, 0.0)
    c = cost_keypoint * ckp + cost_class * cc
    return c.reshape(bs, nq, -1)


if __name__ == "__main__":
    key = jax.random.PRNGKey(0)
    bs, nq, num_classes = 2, 8, 4
    num_kp, kp_dim = 21, 3  # 63 keypoint coordinates, as in the module

    k1, k2, k3, k4 = jax.random.split(key, 4)
    pred_logits = jax.random.normal(k1, (bs, nq, num_classes), dtype=jnp.float32)
    pred_keypoints = jax.random.normal(k2, (bs, nq, num_kp * kp_dim), dtype=jnp.float32)

    # targets: batch 0 has 3 objects, batch 1 has 2 objects (concatenated)
    sizes = [3, 2]
    t_total = sum(sizes)
    tgt_ids = jax.random.randint(k3, (t_total,), 0, num_classes, dtype=jnp.int32)
    tgt_kp = jax.random.normal(k4, (t_total, num_kp, kp_dim), dtype=jnp.float32)

    c_kernel = assembly_matcher_cost(pred_logits, pred_keypoints, tgt_ids, tgt_kp,
                                     cost_class=1.0, cost_keypoint=1.0)
    c_kernel = jax.block_until_ready(c_kernel)

    c_ref = reference_cost(pred_logits, pred_keypoints, tgt_ids, tgt_kp,
                           cost_class=1.0, cost_keypoint=1.0)
    c_ref = jax.block_until_ready(c_ref)

    if not np.allclose(np.asarray(c_kernel), np.asarray(c_ref), rtol=1e-5, atol=1e-5):
        raise AssertionError("Pallas cost matrix does not match the reference")

    # TODO(synk): per-batch Hungarian assignment (linear_sum_assignment) on
    # C.split(sizes, axis=-1) stays on the host; not translated to Pallas.
    print("KERNEL_OK")
</pallas_src>

<mosaic_0001>
module attributes {stable_mosaic.version = 11 : i64} {
  func.func @_cost_kernel(%arg0: i32, %arg1: i32, %arg2: memref<16x4xf32, #tpu.memory_space<vmem>>, %arg3: memref<4x128xf32, #tpu.memory_space<vmem>>, %arg4: memref<16x128xf32, #tpu.memory_space<vmem>>, %arg5: memref<128x128xf32, #tpu.memory_space<vmem>>, %arg6: memref<1x128xf32, #tpu.memory_space<vmem>>, %arg7: memref<16x128xf32, #tpu.memory_space<vmem>>) attributes {dimension_semantics = [#tpu.dimension_semantics<parallel>, #tpu.dimension_semantics<parallel>], iteration_bounds = array<i64: 1, 1>, scalar_prefetch = 0 : i64, scratch_operands = 0 : i64, tpu.core_type = #tpu.core_type<tc>, window_params = [{transform_indices = @transform_0, window_bounds = array<i64: 16, 4>}, {transform_indices = @transform_1, window_bounds = array<i64: 4, 128>}, {transform_indices = @transform_2, window_bounds = array<i64: 16, 128>}, {transform_indices = @transform_3, window_bounds = array<i64: 128, 128>}, {transform_indices = @transform_4, window_bounds = array<i64: 1, 128>}, {transform_indices = @transform_5, window_bounds = array<i64: 16, 128>}]} {
    %c0 = arith.constant 0 : index
    %c0_0 = arith.constant 0 : index
    %0 = vector.load %arg2[%c0, %c0_0] : memref<16x4xf32, #tpu.memory_space<vmem>>, vector<16x4xf32>
    %1 = arith.negf %0 : vector<16x4xf32>
    %2 = math.exp %1 : vector<16x4xf32>
    %cst = arith.constant 1.000000e+00 : f32
    %3 = vector.broadcast %cst : f32 to vector<16x4xf32>
    %4 = arith.addf %3, %2 : vector<16x4xf32>
    %5 = arith.divf %3, %4 : vector<16x4xf32>
    %cst_1 = arith.constant 1.000000e+00 : f32
    %6 = vector.broadcast %cst_1 : f32 to vector<16x4xf32>
    %7 = arith.subf %6, %5 : vector<16x4xf32>
    %8 = arith.mulf %5, %5 : vector<16x4xf32>
    %cst_2 = arith.constant 7.500000e-01 : f32
    %9 = vector.broadcast %cst_2 : f32 to vector<16x4xf32>
    %10 = arith.mulf %9, %8 : vector<16x4xf32>
    %cst_3 = arith.constant 9.99999993E-9 : f32
    %11 = vector.broadcast %cst_3 : f32 to vector<16x4xf32>
    %12 = arith.addf %7, %11 : vector<16x4xf32>
    %13 = math.log %12 : vector<16x4xf32>
    %cst_4 = arith.constant 0.000000e+00 : f32
    %14 = vector.broadcast %cst_4 : f32 to vector<16x4xf32>
    %15 = arith.subf %14, %13 : vector<16x4xf32>
    %16 = arith.mulf %10, %15 : vector<16x4xf32>
    %17 = arith.mulf %7, %7 : vector<16x4xf32>
    %cst_5 = arith.constant 2.500000e-01 : f32
    %18 = vector.broadcast %cst_5 : f32 to vector<16x4xf32>
    %19 = arith.mulf %18, %17 : vector<16x4xf32>
    %cst_6 = arith.constant 9.99999993E-9 : f32
    %20 = vector.broadcast %cst_6 : f32 to vector<16x4xf32>
    %21 = arith.addf %5, %20 : vector<16x4xf32>
    %22 = math.log %21 : vector<16x4xf32>
    %cst_7 = arith.constant 0.000000e+00 : f32
    %23 = vector.broadcast %cst_7 : f32 to vector<16x4xf32>
    %24 = arith.subf %23, %22 : vector<16x4xf32>
    %25 = arith.mulf %19, %24 : vector<16x4xf32>
    %26 = arith.subf %25, %16 : vector<16x4xf32>
    %cst_8 = arith.constant 1.000000e+00 : f32
    %27 = vector.broadcast %cst_8 : f32 to vector<16x4xf32>
    %28 = arith.mulf %27, %26 : vector<16x4xf32>
    %c0_9 = arith.constant 0 : index
    %c0_10 = arith.constant 0 : index
    %29 = vector.load %arg3[%c0_9, %c0_10] : memref<4x128xf32, #tpu.memory_space<vmem>>, vector<4x128xf32>
    %cst_11 = arith.constant dense<0.000000e+00> : vector<16x128xf32>
    %30 = tpu.matmul %28, %29, %cst_11 {dimension_numbers = #tpu.dot_dimension_numbers<[1], [0], [0], [1], [0, 0, 1, 1], [], []>} : vector<16x4xf32>, vector<4x128xf32>, vector<16x128xf32> -> vector<16x128xf32>
    %c0_12 = arith.constant 0 : index
    %c0_13 = arith.constant 0 : index
    %31 = vector.load %arg4[%c0_12, %c0_13] : memref<16x128xf32, #tpu.memory_space<vmem>>, vector<16x128xf32>
    %c0_14 = arith.constant 0 : index
    %c0_15 = arith.constant 0 : index
    %32 = vector.load %arg5[%c0_14, %c0_15] : memref<128x128xf32, #tpu.memory_space<vmem>>, vector<128x128xf32>
    %33 = vector.shape_cast %31 : vector<16x128xf32> to vector<16x1x128xf32>
    %34 = vector.shape_cast %32 : vector<128x128xf32> to vector<1x128x128xf32>
    %35 = vector.broadcast %33 : vector<16x1x128xf32> to vector<16x128x128xf32>
    %36 = vector.broadcast %34 : vector<1x128x128xf32> to vector<16x128x128xf32>
    %37 = arith.subf %35, %36 : vector<16x128x128xf32>
    %38 = math.absf %37 : vector<16x128x128xf32>
    %cst_16 = arith.constant dense<0.000000e+00> : vector<16x128xf32>
    %39 = vector.multi_reduction <add>, %38, %cst_16 [2] : vector<16x128x128xf32> to vector<16x128xf32>
    %c0_17 = arith.constant 0 : index
    %c0_18 = arith.constant 0 : index
    %40 = vector.load %arg6[%c0_17, %c0_18] : memref<1x128xf32, #tpu.memory_space<vmem>>, vector<1x128xf32>
    %41 = vector.broadcast %40 : vector<1x128xf32> to vector<16x128xf32>
    %42 = arith.mulf %39, %41 : vector<16x128xf32>
    %43 = arith.addf %42, %30 : vector<16x128xf32>
    %c0_19 = arith.constant 0 : index
    %c0_20 = arith.constant 0 : index
    %44 = vector.load %arg7[%c0_19, %c0_20] : memref<16x128xf32, #tpu.memory_space<vmem>>, vector<16x128xf32>
    tpu.vector_store %arg7[%c0_19, %c0_20], %43 {strides = array<i32>} : memref<16x128xf32, #tpu.memory_space<vmem>>, vector<16x128xf32>,
    return
  }
  func.func @transform_0(%arg0: i32, %arg1: i32) -> (i32, i32) {
    %c0_i32 = arith.constant 0 : i32
    %c0_i32_0 = arith.constant 0 : i32
    return %arg1, %c0_i32 : i32, i32
  }
  func.func @transform_1(%arg0: i32, %arg1: i32) -> (i32, i32) {
    %c0_i32 = arith.constant 0 : i32
    %c0_i32_0 = arith.constant 0 : i32
    return %c0_i32, %arg0 : i32, i32
  }
  func.func @transform_2(%arg0: i32, %arg1: i32) -> (i32, i32) {
    %c0_i32 = arith.constant 0 : i32
    %c0_i32_0 = arith.constant 0 : i32
    return %arg1, %c0_i32 : i32, i32
  }
  func.func @transform_3(%arg0: i32, %arg1: i32) -> (i32, i32) {
    %c0_i32 = arith.constant 0 : i32
    %c0_i32_0 = arith.constant 0 : i32
    return %arg0, %c0_i32 : i32, i32
  }
  func.func @transform_4(%arg0: i32, %arg1: i32) -> (i32, i32) {
    %c0_i32 = arith.constant 0 : i32
    %c0_i32_0 = arith.constant 0 : i32
    return %c0_i32, %arg0 : i32, i32
  }
  func.func @transform_5(%arg0: i32, %arg1: i32) -> (i32, i32) {
    %c0_i32 = arith.constant 0 : i32
    return %arg1, %arg0 : i32, i32
  }
}

</mosaic_0001>

<bundles_post_ra>
// kernel: tpu_custom_call.1
= control target key start
LH: loop header
LB: loop body
LE: loop exit
PB: predicated region body
PF: predicated region fallthrough
CT: control target
= control target key end

     0   :  { %10 = vsyncpa [#allocation3], 0  ;;  %s9667_s0 = inlined_call_operand.vmem [shape: f32[16,4], index: 0, kind: input, shape index: {}]   ;;  %s9668_s1 = inlined_call_operand.vmem [shape: f32[4,128], index: 1, kind: input, shape index: {}]   ;;  %s9669_s2 = inlined_call_operand.vmem [shape: f32[16,128], index: 2, kind: input, shape index: {}]   ;;  %s9670_s3 = inlined_call_operand.hbm [shape: f32[128,128], index: 3, kind: input, shape index: {}]   ;;  %s9671_s4 = inlined_call_operand.vmem [shape: f32[1,128], index: 4, kind: input, shape index: {}]   ;;  %s9672_s5 = inlined_call_operand.hbm [shape: f32[16,128], index: 5, kind: output, shape index: {}]  }
   0x1   :  { %11 = vsyncpa [#allocation4], 0  ;;  %s22_s20 = sshll.u32 %s9670_s3, 4  ;;  %s5601_s21 = smov [#allocation2]   ;;  %s23_s20 = int_to_ptr.hbm [resolvable:$true] %s22_s20 }
   0x2   :  { %s24_s22 = sshll.u32 %s5601_s21, 4  ;;  %s5602_s23 = smov 128   ;;  %s25_s22 = int_to_ptr.vmem [resolvable:$true] %s24_s22 }
   0x3   :  { %s5603_s24 = smov 8  }
   0x4   :  { %30 = dma.hbm_to_vmem [thread:$0]  %s23_s20, 2048, %s25_s22, [#allocation3], %s5602_s23, %s5602_s23, %s5603_s24  }
   0x5   :  { %5597 = dma.done.wait [#allocation3], 2048  }
   0x6   :  { %5598 = vsyncadd [#allocation3], 4294965248  ;;  %v5645_v0 = vld [vmem:[%s9669_s2] sm:$0xff]  ;;  %v5649_v2 = vld [vmem:[#allocation2 + $0x10] sm:$0xff]  ;;  %vm117_vm7 = vcmask 1043456   ;;  %vm110_vm8 = vcmask 31744  }
   0x7   :  { %v5647_v1 = vld [vmem:[#allocation2 + $0x20] sm:$0xff]  ;;  %v5652_v3 = vperm.slane %v5645_v0, 0  ;;  %v5662_v8 = vld [vmem:[#allocation2 + $0x28] sm:$0xff]  ;;  %v5664_v9 = vld [vmem:[#allocation2 + $0x18] sm:$0xff]  ;;  %v164_v43 = vrot.slane %v5645_v0, 1  ;;  %vm4700_vm10 = vcmask 130112  }
   0x8   :  { %v5654_v4 = vld [vmem:[#allocation2] sm:$0xff]  ;;  %v5666_v10 = vld [vmem:[#allocation2 + $0x8] sm:$0xff]  ;;  %v5676_v21 = vld [vmem:[#allocation2 + $0x38] sm:$0xff]  ;;  %vm4704_vm11 = vcmask 195712   ;;  %vm4708_vm12 = vcmask 261312   ;;  %vm4712_vm13 = vcmask 326912  }
   0x9   :  { %v214_v5 = vsub.f32 %v5652_v3, %v5647_v1  ;;  %v212_v6 = vsub.f32 %v5652_v3, %v5649_v2  ;;  %v210_v7 = vsub.f32 %v5652_v3, %v5654_v4  ;;  %v215_v14 = vsub.f32 %v5652_v3, %v5662_v8  ;;  %v5674_v20 = vld [vmem:[#allocation2 + $0x40] sm:$0xff]  ;;  %v5678_v22 = vld [vmem:[#allocation2 + $0x30] sm:$0xff]  ;;  %v5686_v29 = vld [vmem:[#allocation2 + $0x58] sm:$0xff]  ;;  %s5254_s13 = sshll.u32 %s9672_s5, 4  ;;  %s5255_s13 = int_to_ptr.hbm [resolvable:$true] %s5254_s13 }
   0xa   :  { %v213_v15 = vsub.f32 %v5652_v3, %v5664_v9  ;;  %v211_v16 = vsub.f32 %v5652_v3, %v5666_v10  ;;  %v218_v23 = vsub.f32 %v5652_v3, %v5674_v20  ;;  %v217_v24 = vsub.f32 %v5652_v3, %v5676_v21  ;;  %v5688_v30 = vld [vmem:[#allocation2 + $0x50] sm:$0xff]  ;;  %v5690_v31 = vld [vmem:[#allocation2 + $0x48] sm:$0xff]  ;;  %v5702_v40 = vld [vmem:[#allocation2 + $0x60] sm:$0xff] }
   0xb   :  { %v470_v11 = vand.u32 2147483647, %v214_v5  ;;  %v468_v12 = vand.u32 2147483647, %v212_v6  ;;  %v466_v13 = vand.u32 2147483647, %v210_v7  ;;  %v216_v25 = vsub.f32 %v5652_v3, %v5678_v22 }
   0xc   :  { %v471_v17 = vand.u32 2147483647, %v215_v14  ;;  %v469_v18 = vand.u32 2147483647, %v213_v15  ;;  %v467_v19 = vand.u32 2147483647, %v211_v16  ;;  %v221_v32 = vsub.f32 %v5652_v3, %v5686_v29 }
   0xd   :  { %730 = vadd.xlane.f32.xlu2 %v470_v11  ;;  %726 = vadd.xlane.f32.xlu1 %v468_v12  ;;  %v474_v26 = vand.u32 2147483647, %v218_v23  ;;  %v473_v27 = vand.u32 2147483647, %v217_v24  ;;  %v472_v28 = vand.u32 2147483647, %v216_v25  ;;  %v220_v33 = vsub.f32 %v5652_v3, %v5688_v30 }
   0xe   :  { %722 = vadd.xlane.f32.xlu0 %v466_v13  ;;  %v219_v34 = vsub.f32 %v5652_v3, %v5690_v31  ;;  %v477_v35 = vand.u32 2147483647, %v221_v32  ;;  %v5698_v38 = vld [vmem:[#allocation2 + $0x70] sm:$0xff]  ;;  %v5700_v39 = vld [vmem:[#allocation2 + $0x68] sm:$0xff]  ;;  %v222_v44 = vsub.f32 %v5652_v3, %v5702_v40  ;;  %v179_v47 = vperm.slane %v164_v43, 0  ;;  %v5711_v49 = vld [vmem:[#allocation2 + $0x78] sm:$0xff] }
   0xf   :  { %v476_v36 = vand.u32 2147483647, %v220_v33  ;;  %v224_v41 = vsub.f32 %v5652_v3, %v5698_v38  ;;  %v223_v42 = vsub.f32 %v5652_v3, %v5700_v39  ;;  %v225_v52 = vsub.f32 %v5652_v3, %v5711_v49 }
  0x10   :  { %v475_v37 = vand.u32 2147483647, %v219_v34  ;;  %v478_v48 = vand.u32 2147483647, %v222_v44  ;;  %v227_v50 = vsub.f32 %v179_v47, %v5666_v10  ;;  %v226_v51 = vsub.f32 %v179_v47, %v5654_v4 }
  0x11   :  { %v480_v45 = vand.u32 2147483647, %v224_v41  ;;  %v479_v46 = vand.u32 2147483647, %v223_v42  ;;  %v481_v55 = vand.u32 2147483647, %v225_v52  ;;  %v230_v56 = vsub.f32 %v179_v47, %v5647_v1 }
  0x12   :  { %v483_v53 = vand.u32 2147483647, %v227_v50  ;;  %v482_v54 = vand.u32 2147483647, %v226_v51  ;;  %v229_v57 = vsub.f32 %v179_v47, %v5664_v9  ;;  %v228_v58 = vsub.f32 %v179_v47, %v5649_v2 }
  0x13   :  { %v486_v59 = vand.u32 2147483647, %v230_v56  ;;  %v233_v62 = vsub.f32 %v179_v47, %v5676_v21  ;;  %v232_v63 = vsub.f32 %v179_v47, %v5678_v22  ;;  %v231_v3 = vsub.f32 %v179_v47, %v5662_v8 }
  0x14   :  { %v485_v60 = vand.u32 2147483647, %v229_v57  ;;  %v484_v61 = vand.u32 2147483647, %v228_v58  ;;  %v236_v11 = vsub.f32 %v179_v47, %v5688_v30  ;;  %v235_v12 = vsub.f32 %v179_v47, %v5690_v31 }
  0x15   :  { %732 = vadd.xlane.f32.xlu2 %v471_v17  ;;  %728 = vadd.xlane.f32.xlu1 %v469_v18  ;;  %v489_v5 = vand.u32 2147483647, %v233_v62  ;;  %v488_v6 = vand.u32 2147483647, %v232_v63  ;;  %v487_v7 = vand.u32 2147483647, %v231_v3  ;;  %v234_v13 = vsub.f32 %v179_v47, %v5674_v20 }
  0x16   :  { %724 = vadd.xlane.f32.xlu0 %v467_v19  ;;  %v492_v14 = vand.u32 2147483647, %v236_v11  ;;  %v491_v15 = vand.u32 2147483647, %v235_v12  ;;  %v239_v17 = vsub.f32 %v179_v47, %v5700_v39  ;;  %v238_v18 = vsub.f32 %v179_v47, %v5702_v40 }
  0x17   :  { %v490_v16 = vand.u32 2147483647, %v234_v13  ;;  %v165_v19 = vrot.slane %v5645_v0, 2  ;;  %v237_v23 = vsub.f32 %v179_v47, %v5686_v29  ;;  %v241_v32 = vsub.f32 %v179_v47, %v5711_v49 }
  0x18   :  { %v495_v24 = vand.u32 2147483647, %v239_v17  ;;  %v494_v25 = vand.u32 2147483647, %v238_v18  ;;  %v240_v33 = vsub.f32 %v179_v47, %v5698_v38  ;;  %vm4716_vm14 = vcmask 392512  }
  0x19   :  { %vm4720_vm15 = vcmask 458112  }
  0x1d   :  { %738 = vadd.xlane.f32.xlu2 %v474_v26  ;;  %736 = vadd.xlane.f32.xlu1 %v473_v27  ;;  %v180_v26 = vperm.slane %v165_v19, 0  ;;  %v493_v27 = vand.u32 2147483647, %v237_v23 }
  0x1e   :  { %734 = vadd.xlane.f32.xlu0 %v472_v28 }
  0x1f   :  { %v242_v28 = vsub.f32 %v180_v26, %v5654_v4  ;;  %v244_v41 = vsub.f32 %v180_v26, %v5649_v2  ;;  %v243_v42 = vsub.f32 %v180_v26, %v5666_v10  ;;  %v247_v47 = vsub.f32 %v180_v26, %v5662_v8 }
  0x20   :  { %v255_v11 = vsub.f32 %v180_v26, %v5700_v39 }
  0x21   :  { %v498_v34 = vand.u32 2147483647, %v242_v28  ;;  %v500_v44 = vand.u32 2147483647, %v244_v41  ;;  %v503_v51 = vand.u32 2147483647, %v247_v47 }
  0x25   :  { %744 = vadd.xlane.f32.xlu2 %v477_v35  ;;  %742 = vadd.xlane.f32.xlu1 %v476_v36  ;;  %v497_v35 = vand.u32 2147483647, %v241_v32  ;;  %v496_v36 = vand.u32 2147483647, %v240_v33 }
  0x26   :  { %740 = vadd.xlane.f32.xlu0 %v475_v37  ;;  %v245_v37 = vsub.f32 %v180_v26, %v5664_v9 }
  0x28   :  { %v501_v43 = vand.u32 2147483647, %v245_v37 }
  0x2d   :  { %750 = vadd.xlane.f32.xlu2 %v480_v45  ;;  %748 = vadd.xlane.f32.xlu1 %v479_v46  ;;  %v499_v45 = vand.u32 2147483647, %v243_v42  ;;  %v248_v46 = vsub.f32 %v180_v26, %v5678_v22 }
  0x2e   :  { %746 = vadd.xlane.f32.xlu0 %v478_v48  ;;  %v246_v48 = vsub.f32 %v180_v26, %v5647_v1 }
  0x2f   :  { %v504_v50 = vand.u32 2147483647, %v248_v46 }
  0x30   :  { %v502_v52 = vand.u32 2147483647, %v246_v48 }
  0x35   :  { %756 = vadd.xlane.f32.xlu2 %v483_v53  ;;  %754 = vadd.xlane.f32.xlu1 %v482_v54  ;;  %v251_v53 = vsub.f32 %v180_v26, %v5690_v31  ;;  %v250_v54 = vsub.f32 %v180_v26, %v5674_v20 }
  0x36   :  { %752 = vadd.xlane.f32.xlu0 %v481_v55  ;;  %v249_v55 = vsub.f32 %v180_v26, %v5676_v21 }
  0x37   :  { %v507_v56 = vand.u32 2147483647, %v251_v53  ;;  %v506_v57 = vand.u32 2147483647, %v250_v54 }
  0x38   :  { %v505_v58 = vand.u32 2147483647, %v249_v55 }
  0x3d   :  { %762 = vadd.xlane.f32.xlu2 %v486_v59  ;;  %760 = vadd.xlane.f32.xlu1 %v485_v60  ;;  %v254_v59 = vsub.f32 %v180_v26, %v5702_v40  ;;  %v253_v60 = vsub.f32 %v180_v26, %v5686_v29 }
  0x3e   :  { %758 = vadd.xlane.f32.xlu0 %v484_v61  ;;  %v252_v61 = vsub.f32 %v180_v26, %v5688_v30 }
  0x3f   :  { %v510_v62 = vand.u32 2147483647, %v254_v59  ;;  %v509_v63 = vand.u32 2147483647, %v253_v60 }
  0x40   :  { %v508_v3 = vand.u32 2147483647, %v252_v61 }
  0x45   :  { %768 = vadd.xlane.f32.xlu2 %v489_v5  ;;  %766 = vadd.xlane.f32.xlu1 %v488_v6  ;;  %v257_v5 = vsub.f32 %v180_v26, %v5711_v49  ;;  %v256_v6 = vsub.f32 %v180_v26, %v5698_v38 }
  0x46   :  { %764 = vadd.xlane.f32.xlu0 %v487_v7  ;;  %v166_v7 = vrot.slane %v5645_v0, 3 }
  0x47   :  { %v513_v12 = vand.u32 2147483647, %v257_v5  ;;  %v512_v13 = vand.u32 2147483647, %v256_v6 }
  0x4d   :  { %774 = vadd.xlane.f32.xlu2 %v492_v14  ;;  %772 = vadd.xlane.f32.xlu1 %v491_v15  ;;  %v5751_v15 = vperm.slane %v166_v7, 0 }
  0x4e   :  { %770 = vadd.xlane.f32.xlu0 %v490_v16  ;;  %v511_v16 = vand.u32 2147483647, %v255_v11 }
  0x4f   :  { %v260_v17 = vsub.f32 %v5751_v15, %v5649_v2  ;;  %v259_v18 = vsub.f32 %v5751_v15, %v5666_v10  ;;  %v258_v19 = vsub.f32 %v5751_v15, %v5654_v4  ;;  %v262_v28 = vsub.f32 %v5751_v15, %v5647_v1 }
  0x50   :  { %v261_v32 = vsub.f32 %v5751_v15, %v5664_v9  ;;  %v266_v37 = vsub.f32 %v5751_v15, %v5674_v20  ;;  %v265_v41 = vsub.f32 %v5751_v15, %v5676_v21  ;;  %v264_v42 = vsub.f32 %v5751_v15, %v5678_v22 }
  0x51   :  { %v516_v23 = vand.u32 2147483647, %v260_v17  ;;  %v514_v26 = vand.u32 2147483647, %v258_v19  ;;  %v269_v47 = vsub.f32 %v5751_v15, %v5686_v29  ;;  %v268_v48 = vsub.f32 %v5751_v15, %v5688_v30 }
  0x52   :  { %v520_v46 = vand.u32 2147483647, %v264_v42  ;;  %v272_v55 = vsub.f32 %v5751_v15, %v5698_v38  ;;  %v273_v6 = vsub.f32 %v5751_v15, %v5711_v49 }
  0x54   :  { %v528_v59 = vand.u32 2147483647, %v272_v55 }
  0x55   :  { %780 = vadd.xlane.f32.xlu2 %v495_v24  ;;  %778 = vadd.xlane.f32.xlu1 %v494_v25  ;;  %v515_v24 = vand.u32 2147483647, %v259_v18 }
  0x56   :  { %776 = vadd.xlane.f32.xlu0 %v493_v27  ;;  %v263_v27 = vsub.f32 %v5751_v15, %v5662_v8 }
  0x58   :  { %v519_v33 = vand.u32 2147483647, %v263_v27 }
  0x5d   :  { %786 = vadd.xlane.f32.xlu2 %v498_v34  ;;  %784 = vadd.xlane.f32.xlu1 %v497_v35  ;;  %v518_v34 = vand.u32 2147483647, %v262_v28 }
  0x5e   :  { %782 = vadd.xlane.f32.xlu0 %v496_v36  ;;  %v517_v36 = vand.u32 2147483647, %v261_v32 }
  0x65   :  { %792 = vadd.xlane.f32.xlu2 %v501_v43  ;;  %790 = vadd.xlane.f32.xlu1 %v500_v44  ;;  %v522_v43 = vand.u32 2147483647, %v266_v37  ;;  %v521_v44 = vand.u32 2147483647, %v265_v41 }
  0x66   :  { %788 = vadd.xlane.f32.xlu0 %v499_v45 }
  0x6d   :  { %798 = vadd.xlane.f32.xlu2 %v504_v50  ;;  %796 = vadd.xlane.f32.xlu1 %v503_v51  ;;  %v267_v50 = vsub.f32 %v5751_v15, %v5690_v31  ;;  %v525_v51 = vand.u32 2147483647, %v269_v47 }
  0x6e   :  { %794 = vadd.xlane.f32.xlu0 %v502_v52  ;;  %v524_v52 = vand.u32 2147483647, %v268_v48 }
  0x6f   :  { %v523_v54 = vand.u32 2147483647, %v267_v50 }
  0x75   :  { %804 = vadd.xlane.f32.xlu2 %v507_v56  ;;  %802 = vadd.xlane.f32.xlu1 %v506_v57  ;;  %v271_v56 = vsub.f32 %v5751_v15, %v5700_v39  ;;  %v167_v57 = vrot.slane %v5645_v0, 4 }
  0x76   :  { %800 = vadd.xlane.f32.xlu0 %v505_v58  ;;  %v270_v58 = vsub.f32 %v5751_v15, %v5702_v40 }
  0x77   :  { %v527_v60 = vand.u32 2147483647, %v271_v56 }
  0x7d   :  { %810 = vadd.xlane.f32.xlu2 %v510_v62  ;;  %808 = vadd.xlane.f32.xlu1 %v509_v63  ;;  %v5794_v62 = vperm.slane %v167_v57, 0  ;;  %v526_v63 = vand.u32 2147483647, %v270_v58 }
  0x7e   :  { %806 = vadd.xlane.f32.xlu0 %v508_v3 }
  0x7f   :  { %v275_v3 = vsub.f32 %v5794_v62, %v5666_v10  ;;  %v274_v5 = vsub.f32 %v5794_v62, %v5654_v4  ;;  %v277_v17 = vsub.f32 %v5794_v62, %v5664_v9  ;;  %v276_v18 = vsub.f32 %v5794_v62, %v5649_v2 }
  0x80   :  { %v280_v27 = vsub.f32 %v5794_v62, %v5678_v22  ;;  %v279_v28 = vsub.f32 %v5794_v62, %v5662_v8  ;;  %v284_v37 = vsub.f32 %v5794_v62, %v5688_v30  ;;  %v283_v41 = vsub.f32 %v5794_v62, %v5690_v31 }
  0x81   :  { %v5749_v14 = vpop.xlane.xlu0 %722  ;;  %v531_v7 = vand.u32 2147483647, %v275_v3  ;;  %v530_v11 = vand.u32 2147483647, %v274_v5  ;;  %v282_v42 = vsub.f32 %v5794_v62, %v5674_v20  ;;  %v287_v48 = vsub.f32 %v5794_v62, %v5700_v39 }
  0x82   :  { %9768 = vst [vmem:[#allocation8_spill] sm:$0xff] %v5749_v14  ;;  %v286_v50 = vsub.f32 %v5794_v62, %v5702_v40 }
  0x83   :  { %v538_v47 = vand.u32 2147483647, %v282_v42 }
  0x84   :  { %v542_v55 = vand.u32 2147483647, %v286_v50 }
  0x85   :  { %816 = vadd.xlane.f32.xlu2 %v513_v12  ;;  %814 = vadd.xlane.f32.xlu1 %v512_v13  ;;  %v529_v13 = vand.u32 2147483647, %v273_v6 }
  0x86   :  { %812 = vadd.xlane.f32.xlu0 %v511_v16  ;;  %v278_v16 = vsub.f32 %v5794_v62, %v5647_v1 }
  0x88   :  { %v534_v19 = vand.u32 2147483647, %v278_v16 }
  0x89   :  { %v5759_v25 = vpop.xlane.xlu0 %724 }
  0x8a   :  { %9769 = vst [vmem:[#allocation9_spill] sm:$0xff] %v5759_v25 }
  0x8d   :  { %822 = vadd.xlane.f32.xlu2 %v516_v23  ;;  %820 = vadd.xlane.f32.xlu1 %v515_v24  ;;  %v533_v23 = vand.u32 2147483647, %v277_v17  ;;  %v532_v24 = vand.u32 2147483647, %v276_v18 }
  0x8e   :  { %818 = vadd.xlane.f32.xlu0 %v514_v26  ;;  %v281_v26 = vsub.f32 %v5794_v62, %v5676_v21 }
  0x90   :  { %v537_v32 = vand.u32 2147483647, %v281_v26 }
  0x91   :  { %v5767_v35 = vpop.xlane.xlu0 %734 }
  0x92   :  { %9770 = vst [vmem:[#allocation10_spill] sm:$0xff] %v5767_v35 }
  0x95   :  { %828 = vadd.xlane.f32.xlu2 %v519_v33  ;;  %826 = vadd.xlane.f32.xlu1 %v518_v34  ;;  %v536_v33 = vand.u32 2147483647, %v280_v27 }
  0x96   :  { %824 = vadd.xlane.f32.xlu0 %v517_v36  ;;  %v535_v36 = vand.u32 2147483647, %v279_v28 }
  0x99   :  { %v5775_v45 = vpop.xlane.xlu0 %740 }
  0x9a   :  { %9771 = vst [vmem:[#allocation11_spill] sm:$0xff] %v5775_v45 }
  0x9d   :  { %834 = vadd.xlane.f32.xlu2 %v522_v43  ;;  %832 = vadd.xlane.f32.xlu1 %v521_v44  ;;  %v540_v43 = vand.u32 2147483647, %v284_v37  ;;  %v539_v44 = vand.u32 2147483647, %v283_v41 }
  0x9e   :  { %830 = vadd.xlane.f32.xlu0 %v520_v46 }
  0xa1   :  { %v5783_v53 = vpop.xlane.xlu0 %746 }
  0xa2   :  { %9772 = vst [vmem:[#allocation12_spill] sm:$0xff] %v5783_v53 }
  0xa5   :  { %840 = vadd.xlane.f32.xlu2 %v525_v51  ;;  %838 = vadd.xlane.f32.xlu1 %v524_v52  ;;  %v168_v51 = vrot.slane %v5645_v0, 5  ;;  %v285_v52 = vsub.f32 %v5794_v62, %v5686_v29 }
  0xa6   :  { %836 = vadd.xlane.f32.xlu0 %v523_v54  ;;  %v543_v54 = vand.u32 2147483647, %v287_v48 }
  0xa7   :  { %v5837_v57 = vperm.slane %v168_v51, 0  ;;  %v541_v58 = vand.u32 2147483647, %v285_v52 }
  0xa9   :  { %v5792_v61 = vpop.xlane.xlu0 %752  ;;  %v291_v16 = vsub.f32 %v5837_v57, %v5666_v10  ;;  %v294_v26 = vsub.f32 %v5837_v57, %v5647_v1  ;;  %v298_v37 = vsub.f32 %v5837_v57, %v5674_v20  ;;  %v297_v41 = vsub.f32 %v5837_v57, %v5676_v21 }
  0xaa   :  { %9773 = vst [vmem:[#allocation13_spill] sm:$0xff] %v5792_v61  ;;  %v302_v48 = vsub.f32 %v5837_v57, %v5702_v40  ;;  %v301_v50 = vsub.f32 %v5837_v57, %v5686_v29  ;;  %v300_v51 = vsub.f32 %v5837_v57, %v5688_v30 }
  0xac   :  { %v558_v52 = vand.u32 2147483647, %v302_v48 }
  0xad   :  { %846 = vadd.xlane.f32.xlu2 %v528_v59  ;;  %844 = vadd.xlane.f32.xlu1 %v527_v60  ;;  %v290_v59 = vsub.f32 %v5837_v57, %v5654_v4  ;;  %v289_v60 = vsub.f32 %v5794_v62, %v5711_v49 }
  0xae   :  { %842 = vadd.xlane.f32.xlu0 %v526_v63  ;;  %v288_v63 = vsub.f32 %v5794_v62, %v5698_v38 }
  0xaf   :  { %v546_v3 = vand.u32 2147483647, %v290_v59  ;;  %v545_v5 = vand.u32 2147483647, %v289_v60  ;;  %v305_v59 = vsub.f32 %v5837_v57, %v5711_v49  ;;  %v304_v60 = vsub.f32 %v5837_v57, %v5698_v38 }
  0xb1   :  { %v5802_v12 = vpop.xlane.xlu0 %758 }
  0xb2   :  { %9774 = vst [vmem:[#allocation14_spill] sm:$0xff] %v5802_v12 }
  0xb5   :  { %852 = vadd.xlane.f32.xlu2 %v531_v7  ;;  %850 = vadd.xlane.f32.xlu1 %v530_v11  ;;  %v544_v7 = vand.u32 2147483647, %v288_v63  ;;  %v293_v11 = vsub.f32 %v5837_v57, %v5664_v9  ;;  %v169_v63 = vrot.slane %v5645_v0, 6 }
  0xb6   :  { %848 = vadd.xlane.f32.xlu0 %v529_v13  ;;  %v292_v13 = vsub.f32 %v5837_v57, %v5649_v2 }
  0xb7   :  { %v549_v17 = vand.u32 2147483647, %v293_v11 }
  0xb8   :  { %v548_v18 = vand.u32 2147483647, %v292_v13  ;;  %v5888_v13 = vperm.slane %v169_v63, 0 }
  0xb9   :  { %v5810_v15 = vpop.xlane.xlu0 %764 }
  0xba   :  { %9775 = vst [vmem:[#allocation15_spill] sm:$0xff] %v5810_v15  ;;  %v312_v48 = vsub.f32 %v5888_v13, %v5678_v22 }
  0xbd   :  { %858 = vadd.xlane.f32.xlu2 %v534_v19  ;;  %856 = vadd.xlane.f32.xlu1 %v533_v23  ;;  %v547_v19 = vand.u32 2147483647, %v291_v16  ;;  %v296_v23 = vsub.f32 %v5837_v57, %v5678_v22 }
  0xbe   :  { %854 = vadd.xlane.f32.xlu0 %v532_v24  ;;  %v295_v24 = vsub.f32 %v5837_v57, %v5662_v8 }
  0xbf   :  { %v552_v27 = vand.u32 2147483647, %v296_v23 }
  0xc0   :  { %v551_v28 = vand.u32 2147483647, %v295_v24 }
  0xc1   :  { %v5818_v34 = vpop.xlane.xlu0 %770 }
  0xc2   :  { %9776 = vst [vmem:[#allocation16_spill] sm:$0xff] %v5818_v34 }
  0xc5   :  { %864 = vadd.xlane.f32.xlu2 %v537_v32  ;;  %862 = vadd.xlane.f32.xlu1 %v536_v33  ;;  %v550_v33 = vand.u32 2147483647, %v294_v26 }
  0xc6   :  { %860 = vadd.xlane.f32.xlu0 %v535_v36  ;;  %v299_v36 = vsub.f32 %v5837_v57, %v5690_v31 }
  0xc8   :  { %v555_v42 = vand.u32 2147483647, %v299_v36 }
  0xc9   :  { %v5826_v46 = vpop.xlane.xlu0 %776 }
  0xca   :  { %9777 = vst [vmem:[#allocation17_spill] sm:$0xff] %v5826_v46 }
  0xcd   :  { %870 = vadd.xlane.f32.xlu2 %v540_v43  ;;  %868 = vadd.xlane.f32.xlu1 %v539_v44  ;;  %v554_v43 = vand.u32 2147483647, %v298_v37 }
  0xce   :  { %866 = vadd.xlane.f32.xlu0 %v538_v47  ;;  %v553_v47 = vand.u32 2147483647, %v297_v41 }
  0xd1   :  { %v5835_v56 = vpop.xlane.xlu0 %782 }
  0xd2   :  { %9778 = vst [vmem:[#allocation18_spill] sm:$0xff] %v5835_v56 }
  0xd5   :  { %876 = vadd.xlane.f32.xlu2 %v543_v54  ;;  %874 = vadd.xlane.f32.xlu1 %v542_v55  ;;  %v557_v54 = vand.u32 2147483647, %v301_v50 }
  0xd6   :  { %872 = vadd.xlane.f32.xlu0 %v541_v58  ;;  %v556_v58 = vand.u32 2147483647, %v300_v51 }
  0xd9   :  { %v5845_v6 = vpop.xlane.xlu0 %788 }
  0xda   :  { %9779 = vst [vmem:[#allocation19_spill] sm:$0xff] %v5845_v6 }
  0xdd   :  { %882 = vadd.xlane.f32.xlu2 %v546_v3  ;;  %880 = vadd.xlane.f32.xlu1 %v545_v5  ;;  %v303_v3 = vsub.f32 %v5837_v57, %v5700_v39  ;;  %v561_v5 = vand.u32 2147483647, %v305_v59  ;;  %v316_v59 = vsub.f32 %v5888_v13, %v5688_v30 }
  0xde   :  { %878 = vadd.xlane.f32.xlu0 %v544_v7  ;;  %v560_v7 = vand.u32 2147483647, %v304_v60  ;;  %v315_v60 = vsub.f32 %v5888_v13, %v5690_v31 }
  0xdf   :  { %v559_v16 = vand.u32 2147483647, %v303_v3  ;;  %v572_v3 = vand.u32 2147483647, %v316_v59 }
  0xe1   :  { %v5853_v62 = vpop.xlane.xlu0 %794 }
  0xe2   :  { %9780 = vst [vmem:[#allocation20_spill] sm:$0xff] %v5853_v62  ;;  %v6192_v62 = vld [vmem:[#allocation2 + $0x58] sm:$0xff] }
  0xe5   :  { %888 = vadd.xlane.f32.xlu2 %v549_v17  ;;  %886 = vadd.xlane.f32.xlu1 %v548_v18  ;;  %v308_v17 = vsub.f32 %v5888_v13, %v5649_v2  ;;  %v307_v18 = vsub.f32 %v5888_v13, %v5666_v10 }
  0xe6   :  { %884 = vadd.xlane.f32.xlu0 %v547_v19  ;;  %v306_v19 = vsub.f32 %v5888_v13, %v5654_v4 }
  0xe7   :  { %v564_v57 = vand.u32 2147483647, %v308_v17  ;;  %v563_v23 = vand.u32 2147483647, %v307_v18  ;;  %v319_v17 = vsub.f32 %v5888_v13, %v5700_v39  ;;  %v170_v18 = vrot.slane %v5645_v0, 7 }
  0xe8   :  { %v562_v26 = vand.u32 2147483647, %v306_v19  ;;  %v318_v19 = vsub.f32 %v5888_v13, %v5702_v40  ;;  %v321_v0 = vsub.f32 %v5888_v13, %v5711_v49 }
  0xe9   :  { %v5861_v32 = vpop.xlane.xlu0 %800 }
  0xea   :  { %9781 = vst [vmem:[#allocation21_spill] sm:$0xff] %v5861_v32 }
  0xed   :  { %894 = vadd.xlane.f32.xlu2 %v552_v27  ;;  %892 = vadd.xlane.f32.xlu1 %v551_v28  ;;  %v311_v27 = vsub.f32 %v5888_v13, %v5662_v8  ;;  %v310_v28 = vsub.f32 %v5888_v13, %v5647_v1 }
  0xee   :  { %890 = vadd.xlane.f32.xlu0 %v550_v33  ;;  %v309_v33 = vsub.f32 %v5888_v13, %v5664_v9 }
  0xef   :  { %v567_v36 = vand.u32 2147483647, %v311_v27  ;;  %v566_v37 = vand.u32 2147483647, %v310_v28  ;;  %v5931_v27 = vperm.slane %v170_v18, 0 }
  0xf0   :  { %v574_v28 = vand.u32 2147483647, %v318_v19 }
  0xf1   :  { %v5869_v44 = vpop.xlane.xlu0 %806  ;;  %v332_v19 = vsub.f32 %v5931_v27, %v5688_v30 }
  0xf2   :  { %9782 = vst [vmem:[#allocation22_spill] sm:$0xff] %v5869_v44 }
  0xf5   :  { %900 = vadd.xlane.f32.xlu2 %v555_v42  ;;  %898 = vadd.xlane.f32.xlu1 %v554_v43  ;;  %v565_v42 = vand.u32 2147483647, %v309_v33  ;;  %v314_v43 = vsub.f32 %v5888_v13, %v5674_v20  ;;  %v323_v33 = vsub.f32 %v5931_v27, %v5666_v10 }
  0xf6   :  { %896 = vadd.xlane.f32.xlu0 %v553_v47  ;;  %v313_v47 = vsub.f32 %v5888_v13, %v5676_v21 }
  0xf7   :  { %v570_v50 = vand.u32 2147483647, %v314_v43 }
  0xf8   :  { %v569_v51 = vand.u32 2147483647, %v313_v47  ;;  %v577_v47 = vand.u32 2147483647, %v321_v0 }
  0xf9   :  { %v5877_v55 = vpop.xlane.xlu0 %812 }
  0xfa   :  { %9783 = vst [vmem:[#allocation23_spill] sm:$0xff] %v5877_v55  ;;  %v6171_v55 = vld [vmem:[#allocation2 + $0x50] sm:$0xff] }
  0xfd   :  { %906 = vadd.xlane.f32.xlu2 %v558_v52  ;;  %904 = vadd.xlane.f32.xlu1 %v557_v54  ;;  %v568_v54 = vand.u32 2147483647, %v312_v48  ;;  %v326_v48 = vsub.f32 %v5931_v27, %v5647_v1 }
  0xfe   :  { %902 = vadd.xlane.f32.xlu0 %v556_v58  ;;  %v317_v58 = vsub.f32 %v5888_v13, %v5686_v29 }
 0x100   :  { %v573_v63 = vand.u32 2147483647, %v317_v58 }
 0x101   :  { %v5886_v11 = vpop.xlane.xlu0 %818 }
 0x102   :  { %9784 = vst [vmem:[#allocation24_spill] sm:$0xff] %v5886_v11 }
 0x105   :  { %912 = vadd.xlane.f32.xlu2 %v561_v5  ;;  %910 = vadd.xlane.f32.xlu1 %v560_v7  ;;  %v571_v7 = vand.u32 2147483647, %v315_v60  ;;  %v329_v60 = vsub.f32 %v5931_v27, %v5676_v21 }
 0x106   :  { %908 = vadd.xlane.f32.xlu0 %v559_v16  ;;  %v320_v16 = vsub.f32 %v5888_v13, %v5698_v38 }
 0x109   :  { %v5896_v24 = vpop.xlane.xlu0 %824 }
 0x10a   :  { %9785 = vst [vmem:[#allocation25_spill] sm:$0xff] %v5896_v24 }
 0x10d   :  { %918 = vadd.xlane.f32.xlu2 %v564_v57  ;;  %916 = vadd.xlane.f32.xlu1 %v563_v23  ;;  %v576_v57 = vand.u32 2147483647, %v320_v16  ;;  %v575_v23 = vand.u32 2147483647, %v319_v17 }
 0x10e   :  { %914 = vadd.xlane.f32.xlu0 %v562_v26 }
 0x111   :  { %v5904_v41 = vpop.xlane.xlu0 %830 }
 0x112   :  { %9786 = vst [vmem:[#allocation26_spill] sm:$0xff] %v5904_v41  ;;  %v6153_v41 = vld [vmem:[#allocation2 + $0x10] sm:$0xff] }
 0x115   :  { %924 = vadd.xlane.f32.xlu2 %v567_v36  ;;  %922 = vadd.xlane.f32.xlu1 %v566_v37  ;;  %v322_v36 = vsub.f32 %v5931_v27, %v5654_v4  ;;  %v579_v37 = vand.u32 2147483647, %v323_v33 }
 0x116   :  { %920 = vadd.xlane.f32.xlu0 %v565_v42 }
 0x117   :  { %v578_v42 = vand.u32 2147483647, %v322_v36 }
 0x119   :  { %v5912_v52 = vpop.xlane.xlu0 %836 }
 0x11a   :  { %9787 = vst [vmem:[#allocation27_spill] sm:$0xff] %v5912_v52 }
 0x11d   :  { %930 = vadd.xlane.f32.xlu2 %v570_v50  ;;  %928 = vadd.xlane.f32.xlu1 %v569_v51  ;;  %v325_v50 = vsub.f32 %v5931_v27, %v5664_v9  ;;  %v324_v51 = vsub.f32 %v5931_v27, %v5649_v2 }
 0x11e   :  { %926 = vadd.xlane.f32.xlu0 %v568_v54  ;;  %v582_v54 = vand.u32 2147483647, %v326_v48  ;;  %v333_v48 = vsub.f32 %v5931_v27, %v5686_v29 }
 0x11f   :  { %v581_v58 = vand.u32 2147483647, %v325_v50  ;;  %v580_v59 = vand.u32 2147483647, %v324_v51  ;;  %v5976_v50 = vld [vmem:[%s9669_s2 + $0x8] sm:$0xff]  ;;  %v5978_v51 = vpop.xlane.xlu1 %726 }
 0x121   :  { %v5920_v5 = vpop.xlane.xlu0 %842 }
 0x122   :  { %9788 = vst [vmem:[#allocation28_spill] sm:$0xff] %v5920_v5  ;;  %v6139_v5 = vld [vmem:[#allocation2 + $0x78] sm:$0xff] }
 0x125   :  { %936 = vadd.xlane.f32.xlu2 %v573_v63  ;;  %934 = vadd.xlane.f32.xlu1 %v572_v3  ;;  %v328_v63 = vsub.f32 %v5931_v27, %v5678_v22  ;;  %v327_v3 = vsub.f32 %v5931_v27, %v5662_v8 }
 0x126   :  { %932 = vadd.xlane.f32.xlu0 %v571_v7  ;;  %v585_v7 = vand.u32 2147483647, %v329_v60  ;;  %v5983_v60 = vperm.slane %v5976_v50, 0 }
 0x127   :  { %v584_v16 = vand.u32 2147483647, %v328_v63  ;;  %v583_v18 = vand.u32 2147483647, %v327_v3  ;;  %v589_v63 = vand.u32 2147483647, %v333_v48 }
 0x128   :  { %v338_v3 = vsub.f32 %v5983_v60, %v5654_v4  ;;  %v341_v4 = vsub.f32 %v5983_v60, %v5664_v9  ;;  %v344_v9 = vsub.f32 %v5983_v60, %v5678_v22  ;;  %v347_v22 = vsub.f32 %v5983_v60, %v5690_v31 }
 0x129   :  { %v5929_v26 = vpop.xlane.xlu0 %848 }
 0x12a   :  { %9789 = vst [vmem:[#allocation29_spill] sm:$0xff] %v5929_v26 }
 0x12d   :  { %942 = vadd.xlane.f32.xlu2 %v576_v57  ;;  %940 = vadd.xlane.f32.xlu1 %v575_v23  ;;  %v331_v57 = vsub.f32 %v5931_v27, %v5690_v31  ;;  %v330_v23 = vsub.f32 %v5931_v27, %v5674_v20  ;;  %v349_v31 = vsub.f32 %v5983_v60, %v5686_v29 }
 0x12e   :  { %938 = vadd.xlane.f32.xlu0 %v574_v28  ;;  %v588_v28 = vand.u32 2147483647, %v332_v19  ;;  %v5993_v19 = vpop.xlane.xlu1 %728 }
 0x12f   :  { %v587_v33 = vand.u32 2147483647, %v331_v57  ;;  %v586_v0 = vand.u32 2147483647, %v330_v23  ;;  %9797 = vst [vmem:[#allocation37_spill] sm:$0xff] %v5993_v19 }
 0x130   :  { %v594_v57 = vand.u32 2147483647, %v338_v3  ;;  %v343_v3 = vsub.f32 %v5983_v60, %v5662_v8  ;;  %v346_v8 = vsub.f32 %v5983_v60, %v5674_v20  ;;  %v348_v20 = vsub.f32 %v5983_v60, %v5688_v30 }
 0x131   :  { %v5939_v43 = vpop.xlane.xlu0 %854 }
 0x132   :  { %9790 = vst [vmem:[#allocation30_spill] sm:$0xff] %v5939_v43 }
 0x135   :  { %948 = vadd.xlane.f32.xlu2 %v579_v37  ;;  %946 = vadd.xlane.f32.xlu1 %v578_v42  ;;  %v335_v37 = vsub.f32 %v5931_v27, %v5700_v39  ;;  %v334_v42 = vsub.f32 %v5931_v27, %v5702_v40 }
 0x136   :  { %944 = vadd.xlane.f32.xlu0 %v577_v47  ;;  %v5969_v47 = vpop.xlane.xlu2 %730 }
 0x137   :  { %9794 = vst [vmem:[#allocation34_spill] sm:$0xff] %v5969_v47 }
 0x139   :  { %v5947_v13 = vpop.xlane.xlu0 %860 }
 0x13a   :  { %9791 = vst [vmem:[#allocation31_spill] sm:$0xff] %v5947_v13  ;;  %v6121_v13 = vld [vmem:[#allocation2 + $0x60] sm:$0xff] }
 0x13d   :  { %954 = vadd.xlane.f32.xlu2 %v582_v54  ;;  %952 = vadd.xlane.f32.xlu1 %v581_v58  ;;  %v591_v54 = vand.u32 2147483647, %v335_v37  ;;  %v590_v58 = vand.u32 2147483647, %v334_v42  ;;  %v597_v37 = vand.u32 2147483647, %v341_v4 }
 0x13e   :  { %950 = vadd.xlane.f32.xlu0 %v580_v59 }
 0x141   :  { %v5955_v17 = vpop.xlane.xlu0 %866 }
 0x142   :  { %9792 = vst [vmem:[#allocation32_spill] sm:$0xff] %v5955_v17 }
 0x145   :  { %960 = vadd.xlane.f32.xlu2 %v585_v7  ;;  %958 = vadd.xlane.f32.xlu1 %v584_v16  ;;  %v337_v7 = vsub.f32 %v5931_v27, %v5711_v49  ;;  %v336_v16 = vsub.f32 %v5931_v27, %v5698_v38  ;;  %v339_v27 = vsub.f32 %v5983_v60, %v5666_v10 }
 0x146   :  { %956 = vadd.xlane.f32.xlu0 %v583_v18  ;;  %v5991_v18 = vpop.xlane.xlu2 %732 }
 0x147   :  { %9796 = vst [vmem:[#allocation36_spill] sm:$0xff] %v5991_v18  ;;  %v593_v23 = vand.u32 2147483647, %v337_v7  ;;  %v342_v7 = vsub.f32 %v5983_v60, %v5647_v1  ;;  %v345_v1 = vsub.f32 %v5983_v60, %v5676_v21 }
 0x149   :  { %v5963_v36 = vpop.xlane.xlu0 %872 }
 0x14a   :  { %9793 = vst [vmem:[#allocation33_spill] sm:$0xff] %v5963_v36 }
 0x14d   :  { %966 = vadd.xlane.f32.xlu2 %v588_v28  ;;  %964 = vadd.xlane.f32.xlu1 %v587_v33  ;;  %v592_v33 = vand.u32 2147483647, %v336_v16  ;;  %v600_v16 = vand.u32 2147483647, %v344_v9  ;;  %v350_v9 = vsub.f32 %v5983_v60, %v5702_v40  ;;  %v353_v40 = vsub.f32 %v5983_v60, %v5711_v49 }
 0x14e   :  { %962 = vadd.xlane.f32.xlu0 %v586_v0  ;;  %v340_v0 = vsub.f32 %v5983_v60, %v5649_v2 }
 0x150   :  { %v596_v42 = vand.u32 2147483647, %v340_v0 }
 0x151   :  { %v5980_v59 = vpop.xlane.xlu0 %878 }
 0x152   :  { %9795 = vst [vmem:[#allocation35_spill] sm:$0xff] %v5980_v59 }
 0x155   :  { %972 = vadd.xlane.f32.xlu2 %v591_v54  ;;  %970 = vadd.xlane.f32.xlu1 %v590_v58  ;;  %v6005_v54 = vpop.xlane.xlu2 %738  ;;  %v595_v58 = vand.u32 2147483647, %v339_v27  ;;  %v603_v27 = vand.u32 2147483647, %v347_v22  ;;  %v352_v22 = vsub.f32 %v5983_v60, %v5698_v38 }
 0x156   :  { %968 = vadd.xlane.f32.xlu0 %v589_v63  ;;  %9800 = vst [vmem:[#allocation40_spill] sm:$0xff] %v6005_v54  ;;  %v6007_v63 = vpop.xlane.xlu1 %736 }
 0x159   :  { %v5995_v28 = vpop.xlane.xlu0 %884 }
 0x15a   :  { %9798 = vst [vmem:[#allocation38_spill] sm:$0xff] %v5995_v28 }
 0x15d   :  { %978 = vadd.xlane.f32.xlu2 %v594_v57  ;;  %976 = vadd.xlane.f32.xlu1 %v593_v23  ;;  %v599_v57 = vand.u32 2147483647, %v343_v3  ;;  %v6017_v4 = vpop.xlane.xlu2 %744 }
 0x15e   :  { %974 = vadd.xlane.f32.xlu0 %v592_v33  ;;  %v598_v33 = vand.u32 2147483647, %v342_v7  ;;  %9802 = vst [vmem:[#allocation42_spill] sm:$0xff] %v6017_v4  ;;  %v6019_v0 = vpop.xlane.xlu1 %742  ;;  %v606_v7 = vand.u32 2147483647, %v350_v9 }
 0x15f   :  { %v608_v9 = vand.u32 2147483647, %v352_v22 }
 0x161   :  { %v6003_v48 = vpop.xlane.xlu0 %890 }
 0x162   :  { %9799 = vst [vmem:[#allocation39_spill] sm:$0xff] %v6003_v48  ;;  %v6092_v48 = vld [vmem:[#allocation2 + $0x38] sm:$0xff] }
 0x165   :  { %984 = vadd.xlane.f32.xlu2 %v597_v37  ;;  %982 = vadd.xlane.f32.xlu1 %v596_v42  ;;  %v602_v37 = vand.u32 2147483647, %v346_v8  ;;  %v6033_v3 = vpop.xlane.xlu2 %750  ;;  %v171_v8 = vrot.slane %v5976_v50, 1 }
 0x166   :  { %980 = vadd.xlane.f32.xlu0 %v595_v58  ;;  %v601_v58 = vand.u32 2147483647, %v345_v1  ;;  %9804 = vst [vmem:[#allocation44_spill] sm:$0xff] %v6033_v3  ;;  %v6037_v21 = vpop.xlane.xlu1 %748  ;;  %v351_v1 = vsub.f32 %v5983_v60, %v5700_v39  ;;  %v6060_v60 = vld [vmem:[#allocation2] sm:$0xff] }
 0x168   :  { %v607_v49 = vand.u32 2147483647, %v351_v1 }
 0x169   :  { %v6015_v23 = vpop.xlane.xlu0 %896 }
 0x16a   :  { %9801 = vst [vmem:[#allocation41_spill] sm:$0xff] %v6015_v23  ;;  %v6088_v23 = vld [vmem:[#allocation2 + $0x40] sm:$0xff] }
 0x16d   :  { %990 = vadd.xlane.f32.xlu2 %v600_v16  ;;  %988 = vadd.xlane.f32.xlu1 %v599_v57  ;;  %v605_v16 = vand.u32 2147483647, %v349_v31 }
 0x16e   :  { %986 = vadd.xlane.f32.xlu0 %v598_v33  ;;  %v604_v33 = vand.u32 2147483647, %v348_v20  ;;  %v6054_v20 = vperm.slane %v171_v8, 0 }
 0x170   :  { %v365_v59 = vsub.f32 %v6054_v20, %v5686_v29  ;;  %v364_v36 = vsub.f32 %v6054_v20, %v5688_v30  ;;  %v368_v29 = vsub.f32 %v6054_v20, %v5698_v38  ;;  %v367_v30 = vsub.f32 %v6054_v20, %v5700_v39  ;;  %v6133_v39 = vld [vmem:[#allocation2 + $0x8] sm:$0xff] }
 0x171   :  { %v6027_v42 = vpop.xlane.xlu0 %902 }
 0x172   :  { %9803 = vst [vmem:[#allocation43_spill] sm:$0xff] %v6027_v42 }
 0x175   :  { %996 = vadd.xlane.f32.xlu2 %v603_v27  ;;  %994 = vadd.xlane.f32.xlu1 %v602_v37  ;;  %v6048_v27 = vpop.xlane.xlu2 %756  ;;  %v6050_v37 = vpop.xlane.xlu1 %754 }
 0x176   :  { %992 = vadd.xlane.f32.xlu0 %v601_v58  ;;  %9806 = vst [vmem:[#allocation46_spill] sm:$0xff] %v6048_v27  ;;  %v609_v58 = vand.u32 2147483647, %v353_v40 }
 0x179   :  { %v6039_v57 = vpop.xlane.xlu0 %908 }
 0x17a   :  { %9805 = vst [vmem:[#allocation45_spill] sm:$0xff] %v6039_v57 }
 0x17d   :  { %1002 = vadd.xlane.f32.xlu2 %v606_v7  ;;  %1000 = vadd.xlane.f32.xlu1 %v605_v16  ;;  %v356_v7 = vsub.f32 %v6054_v20, %v5649_v2  ;;  %v355_v16 = vsub.f32 %v6054_v20, %v5666_v10  ;;  %v6066_v8 = vpop.xlane.xlu2 %762  ;;  %v6070_v2 = vld [vmem:[#allocation2 + $0x28] sm:$0xff] }
 0x17e   :  { %998 = vadd.xlane.f32.xlu0 %v604_v33  ;;  %v354_v33 = vsub.f32 %v6054_v20, %v6060_v60  ;;  %9809 = vst [vmem:[#allocation49_spill] sm:$0xff] %v6066_v8  ;;  %v359_v10 = vsub.f32 %v6054_v20, %v6070_v2 }
 0x17f   :  { %v612_v40 = vand.u32 2147483647, %v356_v7  ;;  %v611_v22 = vand.u32 2147483647, %v355_v16  ;;  %v6078_v7 = vld [vmem:[#allocation2 + $0x18] sm:$0xff] }
 0x180   :  { %v610_v1 = vand.u32 2147483647, %v354_v33  ;;  %v357_v16 = vsub.f32 %v6054_v20, %v6078_v7  ;;  %v615_v33 = vand.u32 2147483647, %v359_v10  ;;  %v361_v10 = vsub.f32 %v6054_v20, %v6092_v48 }
 0x181   :  { %v6052_v31 = vpop.xlane.xlu0 %914 }
 0x182   :  { %9807 = vst [vmem:[#allocation47_spill] sm:$0xff] %v6052_v31  ;;  %v617_v28 = vand.u32 2147483647, %v361_v10 }
 0x185   :  { %1008 = vadd.xlane.f32.xlu2 %v609_v58  ;;  %1006 = vadd.xlane.f32.xlu1 %v608_v9  ;;  %v6068_v58 = vpop.xlane.xlu1 %760  ;;  %v6074_v9 = vld [vmem:[#allocation2 + $0x20] sm:$0xff]  ;;  %v6084_v57 = vpop.xlane.xlu2 %768 }
 0x186   :  { %1004 = vadd.xlane.f32.xlu0 %v607_v49  ;;  %v358_v49 = vsub.f32 %v6054_v20, %v6074_v9  ;;  %9811 = vst [vmem:[#allocation51_spill] sm:$0xff] %v6084_v57 }
 0x189   :  { %v6064_v31 = vpop.xlane.xlu0 %920 }
 0x18a   :  { %9808 = vst [vmem:[#allocation48_spill] sm:$0xff] %v6064_v31  ;;  %v614_v31 = vand.u32 2147483647, %v358_v49  ;;  %v6096_v49 = vld [vmem:[#allocation2 + $0x30] sm:$0xff] }
 0x18d   :  { %1014 = vadd.xlane.f32.xlu2 %v612_v40  ;;  %1012 = vadd.xlane.f32.xlu1 %v611_v22  ;;  %v613_v22 = vand.u32 2147483647, %v357_v16  ;;  %v6086_v42 = vpop.xlane.xlu1 %766  ;;  %v360_v16 = vsub.f32 %v6054_v20, %v6096_v49  ;;  %v6106_v17 = vpop.xlane.xlu2 %774 }
 0x18e   :  { %1010 = vadd.xlane.f32.xlu0 %v610_v1  ;;  %v362_v1 = vsub.f32 %v6054_v20, %v6088_v23  ;;  %9813 = vst [vmem:[#allocation53_spill] sm:$0xff] %v6106_v17 }
 0x191   :  { %v6082_v40 = vpop.xlane.xlu0 %926 }
 0x192   :  { %9810 = vst [vmem:[#allocation50_spill] sm:$0xff] %v6082_v40  ;;  %v618_v40 = vand.u32 2147483647, %v362_v1 }
 0x195   :  { %1020 = vadd.xlane.f32.xlu2 %v615_v33  ;;  %1018 = vadd.xlane.f32.xlu1 %v614_v31  ;;  %v616_v31 = vand.u32 2147483647, %v360_v16  ;;  %v6112_v10 = vpop.xlane.xlu1 %772  ;;  %v620_v16 = vand.u32 2147483647, %v364_v36  ;;  %v6125_v36 = vpop.xlane.xlu2 %780 }
 0x196   :  { %1016 = vadd.xlane.f32.xlu0 %v613_v22  ;;  %v6108_v22 = vld [vmem:[#allocation2 + $0x48] sm:$0xff]  ;;  %9815 = vst [vmem:[#allocation55_spill] sm:$0xff] %v6125_v36  ;;  %v6208_v36 = vld [vmem:[#allocation2 + $0x70] sm:$0xff] }
 0x197   :  { %v363_v1 = vsub.f32 %v6054_v20, %v6108_v22 }
 0x199   :  { %v6100_v33 = vpop.xlane.xlu0 %932 }
 0x19a   :  { %9812 = vst [vmem:[#allocation52_spill] sm:$0xff] %v6100_v33  ;;  %v621_v33 = vand.u32 2147483647, %v365_v59  ;;  %v366_v59 = vsub.f32 %v6054_v20, %v6121_v13 }
 0x19c   :  { %v622_v43 = vand.u32 2147483647, %v366_v59 }
 0x19d   :  { %1026 = vadd.xlane.f32.xlu2 %v618_v40  ;;  %1024 = vadd.xlane.f32.xlu1 %v617_v28  ;;  %v619_v28 = vand.u32 2147483647, %v363_v1  ;;  %v623_v1 = vand.u32 2147483647, %v367_v30  ;;  %v6145_v59 = vpop.xlane.xlu2 %786 }
 0x19e   :  { %1022 = vadd.xlane.f32.xlu0 %v616_v31  ;;  %v172_v31 = vrot.slane %v5976_v50, 2  ;;  %9818 = vst [vmem:[#allocation58_spill] sm:$0xff] %v6145_v59 }
 0x1a0   :  { %v6131_v38 = vperm.slane %v172_v31, 0 }
 0x1a1   :  { %v6114_v40 = vpop.xlane.xlu0 %938 }
 0x1a2   :  { %9814 = vst [vmem:[#allocation54_spill] sm:$0xff] %v6114_v40  ;;  %v6127_v40 = vpop.xlane.xlu1 %778  ;;  %v370_v26 = vsub.f32 %v6131_v38, %v6060_v60  ;;  %v374_v52 = vsub.f32 %v6131_v38, %v6074_v9  ;;  %v385_v59 = vsub.f32 %v6131_v38, %v6139_v5 }
 0x1a4   :  { %v626_v31 = vand.u32 2147483647, %v370_v26  ;;  %v372_v26 = vsub.f32 %v6131_v38, %v6153_v41 }
 0x1a5   :  { %1032 = vadd.xlane.f32.xlu2 %v621_v33  ;;  %1030 = vadd.xlane.f32.xlu1 %v620_v16  ;;  %v624_v33 = vand.u32 2147483647, %v368_v29  ;;  %v369_v29 = vsub.f32 %v6054_v20, %v6139_v5  ;;  %v630_v20 = vand.u32 2147483647, %v374_v52  ;;  %v6159_v24 = vpop.xlane.xlu2 %792  ;;  %v375_v52 = vsub.f32 %v6131_v38, %v6070_v2 }
 0x1a6   :  { %1028 = vadd.xlane.f32.xlu0 %v619_v28  ;;  %v371_v28 = vsub.f32 %v6131_v38, %v6133_v39  ;;  %9820 = vst [vmem:[#allocation60_spill] sm:$0xff] %v6159_v24 }
 0x1a8   :  { %v627_v30 = vand.u32 2147483647, %v371_v28 }
 0x1a9   :  { %v6129_v16 = vpop.xlane.xlu0 %944 }
 0x1aa   :  { %9816 = vst [vmem:[#allocation56_spill] sm:$0xff] %v6129_v16 }
 0x1ad   :  { %1038 = vadd.xlane.f32.xlu2 %v624_v33  ;;  %1036 = vadd.xlane.f32.xlu1 %v623_v1  ;;  %v625_v33 = vand.u32 2147483647, %v369_v29  ;;  %v6147_v1 = vpop.xlane.xlu1 %784  ;;  %v628_v29 = vand.u32 2147483647, %v372_v26  ;;  %v631_v26 = vand.u32 2147483647, %v375_v52  ;;  %v6177_v44 = vpop.xlane.xlu2 %798 }
 0x1ae   :  { %1034 = vadd.xlane.f32.xlu0 %v622_v43  ;;  %v373_v43 = vsub.f32 %v6131_v38, %v6078_v7  ;;  %9822 = vst [vmem:[#allocation62_spill] sm:$0xff] %v6177_v44  ;;  %v173_v44 = vrot.slane %v5976_v50, 3 }
 0x1b0   :  { %v629_v28 = vand.u32 2147483647, %v373_v43  ;;  %v6202_v24 = vperm.slane %v173_v44, 0 }
 0x1b1   :  { %v6143_v16 = vpop.xlane.xlu0 %950 }
 0x1b2   :  { %9817 = vst [vmem:[#allocation57_spill] sm:$0xff] %v6143_v16 }
 0x1b5   :  { %1044 = vadd.xlane.f32.xlu2 %v627_v30  ;;  %1042 = vadd.xlane.f32.xlu1 %v626_v31  ;;  %v6161_v30 = vpop.xlane.xlu1 %790  ;;  %v377_v31 = vsub.f32 %v6131_v38, %v6092_v48 }
 0x1b6   :  { %1040 = vadd.xlane.f32.xlu0 %v625_v33  ;;  %v376_v33 = vsub.f32 %v6131_v38, %v6096_v49 }
 0x1b7   :  { %v633_v43 = vand.u32 2147483647, %v377_v31 }
 0x1b8   :  { %v632_v11 = vand.u32 2147483647, %v376_v33 }
 0x1b9   :  { %v6157_v16 = vpop.xlane.xlu0 %956 }
 0x1ba   :  { %9819 = vst [vmem:[#allocation59_spill] sm:$0xff] %v6157_v16 }
 0x1bd   :  { %1050 = vadd.xlane.f32.xlu2 %v630_v20  ;;  %1048 = vadd.xlane.f32.xlu1 %v629_v28  ;;  %v380_v20 = vsub.f32 %v6131_v38, %v6171_v55  ;;  %v379_v28 = vsub.f32 %v6131_v38, %v6108_v22  ;;  %v6181_v31 = vpop.xlane.xlu1 %796 }
 0x1be   :  { %1046 = vadd.xlane.f32.xlu0 %v628_v29  ;;  %v378_v29 = vsub.f32 %v6131_v38, %v6088_v23 }
 0x1bf   :  { %v636_v33 = vand.u32 2147483647, %v380_v20  ;;  %v635_v52 = vand.u32 2147483647, %v379_v28  ;;  %v381_v20 = vsub.f32 %v6131_v38, %v6192_v62  ;;  %v6196_v28 = vpop.xlane.xlu2 %804 }
 0x1c0   :  { %9824 = vst [vmem:[#allocation64_spill] sm:$0xff] %v6196_v28  ;;  %v641_v28 = vand.u32 2147483647, %v385_v59 }
 0x1c1   :  { %v6169_v16 = vpop.xlane.xlu0 %962  ;;  %v637_v6 = vand.u32 2147483647, %v381_v20 }
 0x1c2   :  { %9821 = vst [vmem:[#allocation61_spill] sm:$0xff] %v6169_v16  ;;  %v6185_v16 = vld [vmem:[#allocation2 + $0x68] sm:$0xff] }
 0x1c3   :  { %v383_v32 = vsub.f32 %v6131_v38, %v6185_v16 }
 0x1c5   :  { %1056 = vadd.xlane.f32.xlu2 %v633_v43  ;;  %1054 = vadd.xlane.f32.xlu1 %v632_v11  ;;  %v634_v11 = vand.u32 2147483647, %v378_v29  ;;  %v6198_v29 = vpop.xlane.xlu1 %802 }
 0x1c6   :  { %1052 = vadd.xlane.f32.xlu0 %v631_v26  ;;  %v382_v26 = vsub.f32 %v6131_v38, %v6121_v13 }
 0x1c7   :  { %v6214_v44 = vpop.xlane.xlu2 %810 }
 0x1c8   :  { %9827 = vst [vmem:[#allocation67_spill] sm:$0xff] %v6214_v44 }
 0x1c9   :  { %v6183_v43 = vpop.xlane.xlu0 %968 }
 0x1ca   :  { %9823 = vst [vmem:[#allocation63_spill] sm:$0xff] %v6183_v43 }
 0x1cd   :  { %1062 = vadd.xlane.f32.xlu2 %v636_v33  ;;  %1060 = vadd.xlane.f32.xlu1 %v635_v52  ;;  %v639_v33 = vand.u32 2147483647, %v383_v32  ;;  %v638_v52 = vand.u32 2147483647, %v382_v26  ;;  %v384_v32 = vsub.f32 %v6131_v38, %v6208_v36  ;;  %v387_v38 = vsub.f32 %v6202_v24, %v6133_v39 }
 0x1ce   :  { %1058 = vadd.xlane.f32.xlu0 %v634_v11  ;;  %v386_v11 = vsub.f32 %v6202_v24, %v6060_v60 }
 0x1cf   :  { %v640_v20 = vand.u32 2147483647, %v384_v32  ;;  %v643_v44 = vand.u32 2147483647, %v387_v38  ;;  %v6226_v32 = vpop.xlane.xlu2 %816 }
 0x1d0   :  { %v642_v26 = vand.u32 2147483647, %v386_v11  ;;  %9829 = vst [vmem:[#allocation69_spill] sm:$0xff] %v6226_v32 }
 0x1d1   :  { %v6200_v43 = vpop.xlane.xlu0 %974 }
 0x1d2   :  { %9825 = vst [vmem:[#allocation65_spill] sm:$0xff] %v6200_v43 }
 0x1d5   :  { %1068 = vadd.xlane.f32.xlu2 %v639_v33  ;;  %1066 = vadd.xlane.f32.xlu1 %v638_v52  ;;  %v6216_v33 = vpop.xlane.xlu1 %808  ;;  %v389_v52 = vsub.f32 %v6202_v24, %v6078_v7 }
 0x1d6   :  { %1064 = vadd.xlane.f32.xlu0 %v637_v6  ;;  %v388_v6 = vsub.f32 %v6202_v24, %v6153_v41 }
 0x1d7   :  { %v645_v59 = vand.u32 2147483647, %v389_v52  ;;  %v6242_v32 = vpop.xlane.xlu2 %822 }
 0x1d8   :  { %v644_v11 = vand.u32 2147483647, %v388_v6  ;;  %9831 = vst [vmem:[#allocation71_spill] sm:$0xff] %v6242_v32 }
 0x1d9   :  { %v6212_v43 = vpop.xlane.xlu0 %980 }
 0x1da   :  { %9826 = vst [vmem:[#allocation66_spill] sm:$0xff] %v6212_v43 }
 0x1dd   :  { %1074 = vadd.xlane.f32.xlu2 %v642_v26  ;;  %1072 = vadd.xlane.f32.xlu1 %v641_v28  ;;  %v6228_v56 = vpop.xlane.xlu1 %814  ;;  %v392_v28 = vsub.f32 %v6202_v24, %v6096_v49  ;;  %v391_v26 = vsub.f32 %v6202_v24, %v6070_v2 }
 0x1de   :  { %1070 = vadd.xlane.f32.xlu0 %v640_v20  ;;  %v390_v20 = vsub.f32 %v6202_v24, %v6074_v9 }
 0x1df   :  { %v648_v52 = vand.u32 2147483647, %v392_v28  ;;  %v647_v6 = vand.u32 2147483647, %v391_v26  ;;  %v6256_v32 = vpop.xlane.xlu2 %828 }
 0x1e0   :  { %v646_v38 = vand.u32 2147483647, %v390_v20  ;;  %9833 = vst [vmem:[#allocation73_spill] sm:$0xff] %v6256_v32  ;;  %v399_v32 = vsub.f32 %v6202_v24, %v6185_v16 }
 0x1e1   :  { %v6224_v43 = vpop.xlane.xlu0 %986 }
 0x1e2   :  { %9828 = vst [vmem:[#allocation68_spill] sm:$0xff] %v6224_v43 }
 0x1e5   :  { %1080 = vadd.xlane.f32.xlu2 %v645_v59  ;;  %1078 = vadd.xlane.f32.xlu1 %v644_v11  ;;  %v395_v59 = vsub.f32 %v6202_v24, %v6108_v22  ;;  %v394_v11 = vsub.f32 %v6202_v24, %v6088_v23  ;;  %v6246_v46 = vpop.xlane.xlu1 %820 }
 0x1e6   :  { %1076 = vadd.xlane.f32.xlu0 %v643_v44  ;;  %v393_v44 = vsub.f32 %v6202_v24, %v6092_v48 }
 0x1e7   :  { %v651_v28 = vand.u32 2147483647, %v395_v59  ;;  %v650_v26 = vand.u32 2147483647, %v394_v11 }
 0x1e8   :  { %v649_v20 = vand.u32 2147483647, %v393_v44 }
 0x1e9   :  { %v6236_v43 = vpop.xlane.xlu0 %992 }
 0x1ea   :  { %9830 = vst [vmem:[#allocation70_spill] sm:$0xff] %v6236_v43 }
 0x1ed   :  { %1086 = vadd.xlane.f32.xlu2 %v648_v52  ;;  %1084 = vadd.xlane.f32.xlu1 %v647_v6  ;;  %v398_v52 = vsub.f32 %v6202_v24, %v6121_v13  ;;  %v397_v6 = vsub.f32 %v6202_v24, %v6192_v62  ;;  %v6258_v17 = vpop.xlane.xlu1 %826 }
 0x1ee   :  { %1082 = vadd.xlane.f32.xlu0 %v646_v38  ;;  %v396_v38 = vsub.f32 %v6202_v24, %v6171_v55 }
 0x1ef   :  { %v654_v59 = vand.u32 2147483647, %v398_v52  ;;  %v653_v11 = vand.u32 2147483647, %v397_v6 }
 0x1f0   :  { %v652_v44 = vand.u32 2147483647, %v396_v38  ;;  %v6273_v38 = vpop.xlane.xlu2 %834 }
 0x1f1   :  { %v6248_v43 = vpop.xlane.xlu0 %998  ;;  %9836 = vst [vmem:[#allocation76_spill] sm:$0xff] %v6273_v38 }
 0x1f2   :  { %9832 = vst [vmem:[#allocation72_spill] sm:$0xff] %v6248_v43 }
 0x1f5   :  { %1092 = vadd.xlane.f32.xlu2 %v651_v28  ;;  %1090 = vadd.xlane.f32.xlu1 %v650_v26  ;;  %v401_v28 = vsub.f32 %v6202_v24, %v6139_v5  ;;  %v400_v26 = vsub.f32 %v6202_v24, %v6208_v36  ;;  %v6278_v57 = vpop.xlane.xlu1 %832 }
 0x1f6   :  { %1088 = vadd.xlane.f32.xlu0 %v649_v20  ;;  %v174_v20 = vrot.slane %v5976_v50, 4 }
 0x1f7   :  { %v657_v34 = vand.u32 2147483647, %v401_v28  ;;  %v656_v52 = vand.u32 2147483647, %v400_v26 }
 0x1f9   :  { %v6260_v43 = vpop.xlane.xlu0 %1004 }
 0x1fa   :  { %9834 = vst [vmem:[#allocation74_spill] sm:$0xff] %v6260_v43  ;;  %v6271_v43 = vperm.slane %v174_v20, 0 }
 0x1fc   :  { %v404_v24 = vsub.f32 %v6271_v43, %v6153_v41  ;;  %v409_v8 = vsub.f32 %v6271_v43, %v6092_v48 }
 0x1fd   :  { %1098 = vadd.xlane.f32.xlu2 %v654_v59  ;;  %1096 = vadd.xlane.f32.xlu1 %v653_v11  ;;  %v655_v59 = vand.u32 2147483647, %v399_v32  ;;  %v37_v11 = vld [vmem:[%s9667_s0] sm:$0xff]  ;;  %v402_v32 = vsub.f32 %v6271_v43, %v6060_v60 }
 0x1fe   :  { %1094 = vadd.xlane.f32.xlu0 %v652_v44  ;;  %v5267_v15 = vmul.f32 -1.442695, %v37_v11  ;;  %v403_v44 = vsub.f32 %v6271_v43, %v6133_v39  ;;  %v660_v28 = vand.u32 2147483647, %v404_v24  ;;  %v6288_v11 = vpop.xlane.xlu2 %840  ;;  %v405_v24 = vsub.f32 %v6271_v43, %v6078_v7 }
 0x1ff   :  { %9838 = vst [vmem:[#allocation78_spill] sm:$0xff] %v6288_v11 }
 0x200   :  { %5516 = vpow2.f32 %v5267_v15  ;;  %v659_v26 = vand.u32 2147483647, %v403_v44  ;;  %v407_v15 = vsub.f32 %v6271_v43, %v6070_v2 }
 0x201   :  { %v6269_v6 = vpop.xlane.xlu0 %1010 }
 0x202   :  { %9835 = vst [vmem:[#allocation75_spill] sm:$0xff] %v6269_v6  ;;  %v658_v6 = vand.u32 2147483647, %v402_v32  ;;  %v663_v44 = vand.u32 2147483647, %v407_v15 }
 0x205   :  { %1104 = vadd.xlane.f32.xlu2 %v657_v34  ;;  %1102 = vadd.xlane.f32.xlu1 %v656_v52  ;;  %v6290_v52 = vpop.xlane.xlu1 %838 }
 0x206   :  { %1100 = vadd.xlane.f32.xlu0 %v655_v59  ;;  %v5517_v38 = vpop.eup %5516  ;;  %9839 = vst [vmem:[#allocation79_spill] sm:$0xff] %v6290_v52  ;;  %v406_v59 = vsub.f32 %v6271_v43, %v6074_v9  ;;  %v6307_v15 = vpop.xlane.xlu2 %846  ;;  %v9692_v52 = vmov 0  }
 0x207   :  { %v45_v34 = vadd.f32 1.0, %v5517_v38  ;;  %v661_v38 = vand.u32 2147483647, %v405_v24  ;;  %9841 = vst [vmem:[#allocation81_spill] sm:$0xff] %v6307_v15 }
 0x208   :  { %v662_v32 = vand.u32 2147483647, %v406_v59  ;;  %v408_v59 = vsub.f32 %v6271_v43, %v6096_v49 }
 0x209   :  { %v6286_v20 = vpop.xlane.xlu0 %1016  ;;  %5518 = vrcp.f32 %v45_v34  ;;  %v58_v3 = vand.u32 2147483648, %v45_v34  ;;  %vm52_vm0 = vweird.f32 %v45_v34 }
 0x20a   :  { %9837 = vst [vmem:[#allocation77_spill] sm:$0xff] %v6286_v20  ;;  %v664_v61 = vand.u32 2147483647, %v408_v59 }
 0x20b   :  { %v59_v15 = vor.u32 1.1754944e-38, %v58_v3 }
 0x20d   :  { %1110 = vadd.xlane.f32.xlu2 %v660_v28  ;;  %1108 = vadd.xlane.f32.xlu1 %v659_v26  ;;  %v38_v28 = vld [vmem:[%s9667_s0 + $0x8] sm:$0xff]  ;;  %v6311_v24 = vpop.xlane.xlu1 %844 }
 0x20e   :  { %1106 = vadd.xlane.f32.xlu0 %v658_v6  ;;  %v5268_v26 = vmul.f32 -1.442695, %v38_v28  ;;  %v410_v6 = vsub.f32 %v6271_v43, %v6088_v23  ;;  %9842 = vst [vmem:[#allocation82_spill] sm:$0xff] %v6311_v24  ;;  %v6324_v59 = vpop.xlane.xlu2 %852 }
 0x20f   :  { %v5519_v11 = vpop.eup %5518  ;;  %9844 = vst [vmem:[#allocation84_spill] sm:$0xff] %v6324_v59 }
 0x210   :  { %v48_v27 = vmul.f32 %v5519_v11, %v45_v34  ;;  %5520 = vpow2.f32 %v5268_v26  ;;  %vm53_vm1 = vweird.f32 %v5519_v11  ;;  %v56_v26 = vand.u32 2147483647, %v45_v34 }
 0x211   :  { %v6298_v20 = vpop.xlane.xlu0 %1022  ;;  %vm54_vm2 = vmor %vm52_vm0, %vm53_vm1  ;;  %vm4724_vm0 = vcmask 523712   ;;  %vm4728_vm1 = vcmask 589312  }
 0x212   :  { %9840 = vst [vmem:[#allocation80_spill] sm:$0xff] %v6298_v20  ;;  %v49_v28 = vsub.f32 1.0, %v48_v27  ;;  %v666_v20 = vand.u32 2147483647, %v410_v6  ;;  %v412_v27 = vsub.f32 %v6271_v43, %v6171_v55  ;;  %vm57_vm3 = vcmp.eq.f32.partialorder %v56_v26, 8.507059e+37 }
 0x213   :  { %v415_v26 = vsub.f32 %v6271_v43, %v6185_v16 }
 0x214   :  { %v50_v12 = vmul.f32 %v5519_v11, %v49_v28 }
 0x215   :  { %1116 = vadd.xlane.f32.xlu2 %v663_v44  ;;  %1114 = vadd.xlane.f32.xlu1 %v662_v32  ;;  %v665_v44 = vand.u32 2147483647, %v409_v8 }
 0x216   :  { %1112 = vadd.xlane.f32.xlu0 %v661_v38  ;;  %v5521_v53 = vpop.eup %5520  ;;  %v51_v4 = vadd.f32 %v5519_v11, %v50_v12  ;;  %v413_v38 = vsub.f32 %v6271_v43, %v6192_v62  ;;  %v411_v12 = vsub.f32 %v6271_v43, %v6108_v22  ;;  %v6342_v18 = vpop.xlane.xlu2 %858 }
 0x217   :  { %v6317_v54 = vadd.f32 1.0, %v5521_v53  ;;  %v6326_v53 = vpop.xlane.xlu1 %850  ;;  %9848 = vst [vmem:[#allocation88_spill] sm:$0xff] %v6342_v18 }
 0x218   :  { %v55_v8 = vsel %vm54_vm2, %v5519_v11, %v51_v4  ;;  %v669_v3 = vand.u32 2147483647, %v413_v38  ;;  %9845 = vst [vmem:[#allocation85_spill] sm:$0xff] %v6326_v53  ;;  %v667_v4 = vand.u32 2147483647, %v411_v12  ;;  %vm9759_vm2 = vcmask 654912  }
 0x219   :  { %v6313_v32 = vpop.xlane.xlu0 %1028  ;;  %v60_v6 = vsel %vm57_vm3, %v59_v15, %v55_v8  ;;  %5522 = vrcp.f32 %v6317_v54  ;;  %v416_v15 = vsub.f32 %v6271_v43, %v6208_v36  ;;  %vm67_vm4 = vweird.f32 %v6317_v54 }
 0x21a   :  { %9843 = vst [vmem:[#allocation83_spill] sm:$0xff] %v6313_v32  ;;  %v77_v34 = vsub.f32 1.0, %v60_v6  ;;  %v97_v32 = vadd.f32 1e-08, %v60_v6  ;;  %v79_v35 = vmul.f32 %v60_v6, %v60_v6  ;;  %vm9762_vm3 = vcmask 720512  }
 0x21d   :  { %1122 = vadd.xlane.f32.xlu2 %v666_v20  ;;  %1120 = vadd.xlane.f32.xlu1 %v665_v44  ;;  %v668_v20 = vand.u32 2147483647, %v412_v27  ;;  %v83_v44 = vadd.f32 1e-08, %v77_v34  ;;  %v414_v27 = vsub.f32 %v6271_v43, %v6121_v13 }
 0x21e   :  { %1118 = vadd.xlane.f32.xlu0 %v664_v61  ;;  %v175_v61 = vrot.slane %v5976_v50, 5 }
 0x21f   :  { %5524 = vlog2.f32 %v83_v44  ;;  %v5523_v11 = vpop.eup %5522  ;;  %v670_v45 = vand.u32 2147483647, %v414_v27  ;;  %v6344_v47 = vpop.xlane.xlu1 %856 }
 0x220   :  { %5526 = vlog2.f32 %v97_v32  ;;  %v63_v38 = vmul.f32 %v5523_v11, %v6317_v54  ;;  %v6338_v8 = vperm.slane %v175_v61, 0  ;;  %v671_v32 = vand.u32 2147483647, %v415_v26  ;;  %9849 = vst [vmem:[#allocation89_spill] sm:$0xff] %v6344_v47 }
 0x221   :  { %v6328_v28 = vpop.xlane.xlu0 %1034  ;;  %v93_v61 = vmul.f32 %v77_v34, %v77_v34  ;;  %v81_v26 = vmul.f32 0.75, %v79_v35  ;;  %vm68_vm5 = vweird.f32 %v5523_v11  ;;  %v73_v35 = vand.u32 2147483648, %v6317_v54 }
 0x222   :  { %9846 = vst [vmem:[#allocation86_spill] sm:$0xff] %v6328_v28  ;;  %v64_v12 = vsub.f32 1.0, %v63_v38  ;;  %v672_v28 = vand.u32 2147483647, %v416_v15  ;;  %v418_v15 = vsub.f32 %v6338_v8, %v6060_v60  ;;  %vm6353_vm6 = vmor %vm67_vm4, %vm68_vm5  ;;  %vm9761_vm4 = vcmask 786112  }
 0x223   :  { %v95_v27 = vmul.f32 0.25, %v93_v61  ;;  %vm9764_vm5 = vcmask 851712  }
 0x225   :  { %1128 = vadd.xlane.f32.xlu2 %v669_v3  ;;  %1126 = vadd.xlane.f32.xlu1 %v668_v20  ;;  %v5525_v44 = vpop.eup %5524  ;;  %v65_v20 = vmul.f32 %v5523_v11, %v64_v12 }
 0x226   :  { %1124 = vadd.xlane.f32.xlu0 %v667_v4  ;;  %v5527_v59 = vpop.eup %5526  ;;  %v419_v4 = vsub.f32 %v6338_v8, %v6133_v39  ;;  %v86_v19 = vmul.f32 0.6931472, %v5525_v44 }
 0x227   :  { %v100_v25 = vmul.f32 0.6931472, %v5527_v59  ;;  %v66_v38 = vadd.f32 %v5523_v11, %v65_v20  ;;  %v71_v59 = vand.u32 2147483647, %v6317_v54  ;;  %v74_v54 = vor.u32 1.1754944e-38, %v73_v35 }
 0x228   :  { %v89_v6 = vsub.f32 0.0, %v86_v19  ;;  %v109_v19 = vld [vmem:[%s9668_s1] sm:$0xf] }
 0x229   :  { %v6340_v3 = vpop.xlane.xlu0 %1040  ;;  %v103_v12 = vsub.f32 0.0, %v100_v25  ;;  %v70_v25 = vsel %vm6353_vm6, %v5523_v11, %v66_v38  ;;  %vm72_vm9 = vcmp.eq.f32.partialorder %v71_v59, 8.507059e+37  ;;  %5269 = vmatpush.msk.msra.mxu0 %vm117_vm7, %v109_v19  ;;  %5272 = vmatpush.msk.msra.mxu1 %vm117_vm7, %v109_v19  ;;  %v422_v11 = vsub.f32 %v6338_v8, %v6074_v9 }
 0x22a   :  { %9847 = vst [vmem:[#allocation87_spill] sm:$0xff] %v6340_v3  ;;  %v417_v3 = vsub.f32 %v6271_v43, %v6139_v5  ;;  %v91_v44 = vmul.f32 %v89_v6, %v81_v26  ;;  %v674_v43 = vand.u32 2147483647, %v418_v15  ;;  %v75_v26 = vsel %vm72_vm9, %v74_v54, %v70_v25 }
 0x22b   :  { %v105_v20 = vmul.f32 %v103_v12, %v95_v27  ;;  %v78_v6 = vsub.f32 1.0, %v75_v26  ;;  %v6367_v27 = vpop.xlane.xlu2 %864  ;;  %v6369_v12 = vpop.xlane.xlu1 %862  ;;  %v98_v15 = vadd.f32 1e-08, %v75_v26  ;;  %v678_v34 = vand.u32 2147483647, %v422_v11 }
 0x22c   :  { %v673_v61 = vand.u32 2147483647, %v417_v3  ;;  %9853 = vst [vmem:[#allocation91_spill] sm:$0xff] %v6367_v27  ;;  %v420_v3 = vsub.f32 %v6338_v8, %v6153_v41  ;;  %v423_v54 = vsub.f32 %v6338_v8, %v6070_v2  ;;  %vm4748_vm6 = vcmask 917312  }
 0x22d   :  { %1134 = vadd.xlane.f32.xlu2 %v672_v28  ;;  %1132 = vadd.xlane.f32.xlu1 %v671_v32  ;;  %v107_v32 = vsub.f32 %v105_v20, %v91_v44  ;;  %9854 = vst [vmem:[#allocation92_spill] sm:$0xff] %v6369_v12  ;;  %v84_v38 = vadd.f32 1e-08, %v78_v6  ;;  %5528 = vlog2.f32 %v98_v15  ;;  %v80_v20 = vmul.f32 %v75_v26, %v75_v26 }
 0x22e   :  { %1130 = vadd.xlane.f32.xlu0 %v670_v45  ;;  %v675_v45 = vand.u32 2147483647, %v419_v4  ;;  %v421_v4 = vsub.f32 %v6338_v8, %v6078_v7  ;;  %v676_v44 = vand.u32 2147483647, %v420_v3  ;;  %v94_v19 = vmul.f32 %v78_v6, %v78_v6 }
 0x22f   :  { %5270 = vmatmul.msk.f32.vlgmr.msra.gmra.mxu0 %vm110_vm8, %v107_v32  ;;  %5530 = vlog2.f32 %v84_v38  ;;  %v82_v6 = vmul.f32 0.75, %v80_v20  ;;  %v426_v20 = vsub.f32 %v6338_v8, %v6088_v23  ;;  %vm4752_vm7 = vcmask 982912  }
 0x230   :  { %v677_v59 = vand.u32 2147483647, %v421_v4  ;;  %vm9760_vm9 = vcmask 1041409  }
 0x231   :  { %v6364_v28 = vpop.xlane.xlu0 %1046 }
 0x232   :  { %9852 = vst [vmem:[#allocation90_spill] sm:$0xff] %v6364_v28  ;;  %v679_v28 = vand.u32 2147483647, %v423_v54 }
 0x233   :  { %v5529_v25 = vpop.eup %5528  ;;  %v6385_v4 = vpop.xlane.xlu2 %870 }
 0x234   :  { %v102_v11 = vmul.f32 0.6931472, %v5529_v25  ;;  %9856 = vst [vmem:[#allocation94_spill] sm:$0xff] %v6385_v4  ;;  %v6387_v26 = vpop.xlane.xlu1 %868  ;;  %v427_v25 = vsub.f32 %v6338_v8, %v6108_v22 }
 0x235   :  { %1140 = vadd.xlane.f32.xlu2 %v675_v45  ;;  %1138 = vadd.xlane.f32.xlu1 %v674_v43  ;;  %v425_v45 = vsub.f32 %v6338_v8, %v6092_v48  ;;  %v424_v43 = vsub.f32 %v6338_v8, %v6096_v49  ;;  %v5531_v32 = vpop.eup %5530  ;;  %9857 = vst [vmem:[#allocation95_spill] sm:$0xff] %v6387_v26 }
 0x236   :  { %1136 = vadd.xlane.f32.xlu0 %v673_v61  ;;  %v96_v61 = vmul.f32 0.25, %v94_v19  ;;  %v88_v15 = vmul.f32 0.6931472, %v5531_v32  ;;  %v104_v3 = vsub.f32 0.0, %v102_v11  ;;  %v428_v19 = vsub.f32 %v6338_v8, %v6171_v55 }
 0x237   :  { %v681_v38 = vand.u32 2147483647, %v425_v45  ;;  %v683_v54 = vand.u32 2147483647, %v427_v25 }
 0x238   :  { %v106_v27 = vmul.f32 %v104_v3, %v96_v61  ;;  %v684_v32 = vand.u32 2147483647, %v428_v19  ;;  %v682_v61 = vand.u32 2147483647, %v426_v20  ;;  %v432_v20 = vsub.f32 %v6338_v8, %v6208_v36 }
 0x239   :  { %v6377_v35 = vpop.xlane.xlu0 %1052 }
 0x23a   :  { %9855 = vst [vmem:[#allocation93_spill] sm:$0xff] %v6377_v35 }
 0x23b   :  { %v6398_v45 = vpop.xlane.xlu2 %876 }
 0x23c   :  { %9859 = vst [vmem:[#allocation97_spill] sm:$0xff] %v6398_v45 }
 0x23d   :  { %1146 = vadd.xlane.f32.xlu2 %v678_v34  ;;  %1144 = vadd.xlane.f32.xlu1 %v677_v59  ;;  %v680_v34 = vand.u32 2147483647, %v424_v43  ;;  %v90_v59 = vsub.f32 0.0, %v88_v15  ;;  %v6400_v43 = vpop.xlane.xlu1 %874 }
 0x23e   :  { %1142 = vadd.xlane.f32.xlu0 %v676_v44  ;;  %9860 = vst [vmem:[#allocation98_spill] sm:$0xff] %v6400_v43 }
 0x23f   :  { %v92_v44 = vmul.f32 %v90_v59, %v82_v6  ;;  %v176_v6 = vrot.slane %v5976_v50, 6  ;;  %v433_v50 = vsub.f32 %v6338_v8, %v6139_v5 }
 0x241   :  { %v6389_v35 = vpop.xlane.xlu0 %1058  ;;  %v108_v4 = vsub.f32 %v106_v27, %v92_v44  ;;  %v431_v27 = vsub.f32 %v6338_v8, %v6185_v16 }
 0x242   :  { %9858 = vst [vmem:[#allocation96_spill] sm:$0xff] %v6389_v35 }
 0x243   :  { %5271 = vmatmul.msk.f32.vlgmr.msra.gmra.mxu1 %vm110_vm8, %v108_v4  ;;  %v429_v4 = vsub.f32 %v6338_v8, %v6192_v62  ;;  %v687_v15 = vand.u32 2147483647, %v431_v27  ;;  %v6413_v59 = vpop.xlane.xlu2 %882  ;;  %vm4756_vm8 = vcmask 1048512  }
 0x244   :  { %9862 = vst [vmem:[#allocation100_spill] sm:$0xff] %v6413_v59 }
 0x245   :  { %1152 = vadd.xlane.f32.xlu2 %v681_v38  ;;  %1150 = vadd.xlane.f32.xlu1 %v680_v34  ;;  %v6411_v38 = vperm.slane %v176_v6, 0  ;;  %v685_v34 = vand.u32 2147483647, %v429_v4  ;;  %v6415_v44 = vpop.xlane.xlu1 %880 }
 0x246   :  { %1148 = vadd.xlane.f32.xlu0 %v679_v28  ;;  %v430_v28 = vsub.f32 %v6338_v8, %v6121_v13  ;;  %9863 = vst [vmem:[#allocation101_spill] sm:$0xff] %v6415_v44 }
 0x247   :  { %v434_v19 = vsub.f32 %v6411_v38, %v6060_v60  ;;  %v437_v6 = vsub.f32 %v6411_v38, %v6078_v7  ;;  %v436_v4 = vsub.f32 %v6411_v38, %v6153_v41 }
 0x248   :  { %v686_v3 = vand.u32 2147483647, %v430_v28 }
 0x249   :  { %v6402_v11 = vpop.xlane.xlu0 %1064 }
 0x24a   :  { %9861 = vst [vmem:[#allocation99_spill] sm:$0xff] %v6402_v11 }
 0x24b   :  { %v6425_v27 = vpop.xlane.xlu2 %888 }
 0x24c   :  { %9865 = vst [vmem:[#allocation103_spill] sm:$0xff] %v6425_v27 }
 0x24d   :  { %1158 = vadd.xlane.f32.xlu2 %v684_v32  ;;  %1156 = vadd.xlane.f32.xlu1 %v683_v54  ;;  %v690_v32 = vand.u32 2147483647, %v434_v19  ;;  %v689_v54 = vand.u32 2147483647, %v433_v50  ;;  %v6427_v28 = vpop.xlane.xlu1 %886  ;;  %v440_v50 = vsub.f32 %v6411_v38, %v6096_v49 }
 0x24e   :  { %1154 = vadd.xlane.f32.xlu0 %v682_v61  ;;  %v688_v61 = vand.u32 2147483647, %v432_v20  ;;  %9866 = vst [vmem:[#allocation104_spill] sm:$0xff] %v6427_v28  ;;  %v439_v20 = vsub.f32 %v6411_v38, %v6070_v2 }
 0x251   :  { %v6421_v25 = vpop.xlane.xlu0 %1070 }
 0x252   :  { %9864 = vst [vmem:[#allocation102_spill] sm:$0xff] %v6421_v25 }
 0x255   :  { %1164 = vadd.xlane.f32.xlu2 %v687_v15  ;;  %1162 = vadd.xlane.f32.xlu1 %v686_v3  ;;  %v435_v15 = vsub.f32 %v6411_v38, %v6133_v39  ;;  %v693_v3 = vand.u32 2147483647, %v437_v6  ;;  %v695_v6 = vand.u32 2147483647, %v439_v20 }
 0x256   :  { %1160 = vadd.xlane.f32.xlu0 %v685_v34  ;;  %v692_v34 = vand.u32 2147483647, %v436_v4 }
 0x257   :  { %v691_v19 = vand.u32 2147483647, %v435_v15 }
 0x259   :  { %v6435_v8 = vpop.xlane.xlu0 %1076 }
 0x25a   :  { %9867 = vst [vmem:[#allocation105_spill] sm:$0xff] %v6435_v8  ;;  %v696_v8 = vand.u32 2147483647, %v440_v50 }
 0x25d   :  { %1170 = vadd.xlane.f32.xlu2 %v690_v32  ;;  %1168 = vadd.xlane.f32.xlu1 %v689_v54  ;;  %v438_v32 = vsub.f32 %v6411_v38, %v6074_v9  ;;  %v6443_v54 = vpop.xlane.xlu2 %894 }
 0x25e   :  { %1166 = vadd.xlane.f32.xlu0 %v688_v61  ;;  %9868 = vst [vmem:[#allocation106_spill] sm:$0xff] %v6443_v54  ;;  %v6445_v61 = vpop.xlane.xlu1 %892 }
 0x25f   :  { %9869 = vst [vmem:[#allocation107_spill] sm:$0xff] %v6445_v61  ;;  %v694_v15 = vand.u32 2147483647, %v438_v32 }
 0x261   :  { %v6447_v4 = vpop.xlane.xlu0 %1082 }
 0x262   :  { %9870 = vst [vmem:[#allocation108_spill] sm:$0xff] %v6447_v4 }
 0x265   :  { %1176 = vadd.xlane.f32.xlu2 %v693_v3  ;;  %1174 = vadd.xlane.f32.xlu1 %v692_v34  ;;  %v443_v3 = vsub.f32 %v6411_v38, %v6108_v22  ;;  %v442_v34 = vsub.f32 %v6411_v38, %v6088_v23  ;;  %v6455_v25 = vpop.xlane.xlu2 %900 }
 0x266   :  { %1172 = vadd.xlane.f32.xlu0 %v691_v19  ;;  %v441_v19 = vsub.f32 %v6411_v38, %v6092_v48  ;;  %9871 = vst [vmem:[#allocation109_spill] sm:$0xff] %v6455_v25  ;;  %v6457_v11 = vpop.xlane.xlu1 %898 }
 0x267   :  { %9872 = vst [vmem:[#allocation110_spill] sm:$0xff] %v6457_v11  ;;  %v699_v50 = vand.u32 2147483647, %v443_v3  ;;  %v698_v20 = vand.u32 2147483647, %v442_v34 }
 0x268   :  { %v697_v4 = vand.u32 2147483647, %v441_v19  ;;  %v449_v19 = vsub.f32 %v6411_v38, %v6139_v5 }
 0x269   :  { %v6459_v32 = vpop.xlane.xlu0 %1088 }
 0x26a   :  { %9873 = vst [vmem:[#allocation111_spill] sm:$0xff] %v6459_v32 }
 0x26d   :  { %1182 = vadd.xlane.f32.xlu2 %v696_v8  ;;  %1180 = vadd.xlane.f32.xlu1 %v695_v6  ;;  %v446_v8 = vsub.f32 %v6411_v38, %v6121_v13  ;;  %v445_v6 = vsub.f32 %v6411_v38, %v6192_v62  ;;  %v6467_v3 = vpop.xlane.xlu2 %906 }
 0x26e   :  { %1178 = vadd.xlane.f32.xlu0 %v694_v15  ;;  %v444_v15 = vsub.f32 %v6411_v38, %v6171_v55  ;;  %9874 = vst [vmem:[#allocation112_spill] sm:$0xff] %v6467_v3  ;;  %v6469_v34 = vpop.xlane.xlu1 %904 }
 0x26f   :  { %v702_v35 = vand.u32 2147483647, %v446_v8  ;;  %v701_v25 = vand.u32 2147483647, %v445_v6  ;;  %9875 = vst [vmem:[#allocation113_spill] sm:$0xff] %v6469_v34  ;;  %v447_v6 = vsub.f32 %v6411_v38, %v6185_v16 }
 0x270   :  { %v700_v54 = vand.u32 2147483647, %v444_v15  ;;  %v705_v15 = vand.u32 2147483647, %v449_v19 }
 0x271   :  { %v6478_v8 = vpop.xlane.xlu0 %1094  ;;  %v703_v32 = vand.u32 2147483647, %v447_v6 }
 0x272   :  { %9876 = vst [vmem:[#allocation114_spill] sm:$0xff] %v6478_v8 }
 0x275   :  { %1188 = vadd.xlane.f32.xlu2 %v699_v50  ;;  %1186 = vadd.xlane.f32.xlu1 %v698_v20  ;;  %v448_v50 = vsub.f32 %v6411_v38, %v6208_v36  ;;  %v6484_v3 = vpop.xlane.xlu2 %912 }
 0x276   :  { %1184 = vadd.xlane.f32.xlu0 %v697_v4  ;;  %v5548_v4 = vld [vmem:[%s9669_s2 + $0x8] sm:$0xff]  ;;  %9877 = vst [vmem:[#allocation115_spill] sm:$0xff] %v6484_v3  ;;  %v6486_v27 = vpop.xlane.xlu1 %910 }
 0x277   :  { %v177_v20 = vrot.slane %v5548_v4, 7  ;;  %9878 = vst [vmem:[#allocation116_spill] sm:$0xff] %v6486_v27 }
 0x279   :  { %v6494_v19 = vpop.xlane.xlu0 %1100 }
 0x27a   :  { %9879 = vst [vmem:[#allocation117_spill] sm:$0xff] %v6494_v19 }
 0x27d   :  { %1194 = vadd.xlane.f32.xlu2 %v702_v35  ;;  %1192 = vadd.xlane.f32.xlu1 %v701_v25  ;;  %v704_v35 = vand.u32 2147483647, %v448_v50  ;;  %v6482_v25 = vperm.slane %v177_v20, 0 }
 0x27e   :  { %1190 = vadd.xlane.f32.xlu0 %v700_v54 }
 0x27f   :  { %v452_v4 = vsub.f32 %v6482_v25, %v6153_v41  ;;  %v451_v54 = vsub.f32 %v6482_v25, %v6133_v39  ;;  %v450_v38 = vsub.f32 %v6482_v25, %v6060_v60  ;;  %v454_v41 = vsub.f32 %v6482_v25, %v6074_v9  ;;  %v6504_v60 = vpop.xlane.xlu1 %916 }
 0x280   :  { %v453_v39 = vsub.f32 %v6482_v25, %v6078_v7  ;;  %9881 = vst [vmem:[#allocation119_spill] sm:$0xff] %v6504_v60  ;;  %v457_v9 = vsub.f32 %v6482_v25, %v6092_v48  ;;  %v456_v7 = vsub.f32 %v6482_v25, %v6096_v49  ;;  %v461_v48 = vsub.f32 %v6482_v25, %v6192_v62 }
 0x281   :  { %v708_v50 = vand.u32 2147483647, %v452_v4  ;;  %v707_v20 = vand.u32 2147483647, %v451_v54  ;;  %v706_v6 = vand.u32 2147483647, %v450_v38  ;;  %v6506_v54 = vpop.xlane.xlu0 %1106  ;;  %v460_v49 = vsub.f32 %v6482_v25, %v6171_v55 }
 0x282   :  { %v710_v4 = vand.u32 2147483647, %v454_v41  ;;  %9882 = vst [vmem:[#allocation120_spill] sm:$0xff] %v6506_v54  ;;  %v709_v38 = vand.u32 2147483647, %v453_v39  ;;  %v464_v55 = vsub.f32 %v6482_v25, %v6208_v36  ;;  %v465_v36 = vsub.f32 %v6482_v25, %v6139_v5 }
 0x283   :  { %v713_v41 = vand.u32 2147483647, %v457_v9  ;;  %v712_v39 = vand.u32 2147483647, %v456_v7  ;;  %v717_v9 = vand.u32 2147483647, %v461_v48 }
 0x284   :  { %v716_v7 = vand.u32 2147483647, %v460_v49  ;;  %v720_v48 = vand.u32 2147483647, %v464_v55 }
 0x285   :  { %1200 = vadd.xlane.f32.xlu2 %v705_v15  ;;  %1198 = vadd.xlane.f32.xlu1 %v704_v35  ;;  %v455_v15 = vsub.f32 %v6482_v25, %v6070_v2  ;;  %v458_v2 = vsub.f32 %v6482_v25, %v6088_v23 }
 0x286   :  { %1196 = vadd.xlane.f32.xlu0 %v703_v32  ;;  %v6502_v32 = vpop.xlane.xlu2 %918 }
 0x287   :  { %9880 = vst [vmem:[#allocation118_spill] sm:$0xff] %v6502_v32  ;;  %v711_v35 = vand.u32 2147483647, %v455_v15  ;;  %v714_v15 = vand.u32 2147483647, %v458_v2 }
 0x28d   :  { %1206 = vadd.xlane.f32.xlu2 %v708_v50  ;;  %1204 = vadd.xlane.f32.xlu1 %v707_v20  ;;  %v9673_v50 = vlaneseq }
 0x28e   :  { %1202 = vadd.xlane.f32.xlu0 %v706_v6  ;;  %v6514_v20 = vpop.xlane.xlu2 %924  ;;  %v6516_v6 = vpop.xlane.xlu1 %922 }
 0x28f   :  { %9883 = vst [vmem:[#allocation121_spill] sm:$0xff] %v6514_v20 }
 0x290   :  { %9884 = vst [vmem:[#allocation122_spill] sm:$0xff] %v6516_v6 }
 0x295   :  { %1212 = vadd.xlane.f32.xlu2 %v711_v35  ;;  %1210 = vadd.xlane.f32.xlu1 %v710_v4  ;;  %v6519_v35 = vshrl.u32 %v9673_v50, 7  ;;  %v6521_v4 = vpop.xlane.xlu0 %1112 }
 0x296   :  { %1208 = vadd.xlane.f32.xlu0 %v709_v38  ;;  %9885 = vst [vmem:[#allocation123_spill] sm:$0xff] %v6521_v4  ;;  %v459_v38 = vsub.f32 %v6482_v25, %v6108_v22  ;;  %v6540_v62 = vpop.xlane.xlu1 %928  ;;  %v463_v22 = vsub.f32 %v6482_v25, %v6185_v16 }
 0x297   :  { %v6524_v23 = vadd.s32 8, %v6519_v35  ;;  %5278 = vset.pattern.permute.xlu1 %v6519_v35  ;;  %v6535_v2 = vadd.s32 16, %v6519_v35  ;;  %9887 = vst [vmem:[#allocation125_spill] sm:$0xff] %v6540_v62  ;;  %v6574_v5 = vadd.s32 24, %v6519_v35  ;;  %v6677_v14 = vadd.s32 104, %v6519_v35 }
 0x298   :  { %v715_v50 = vand.u32 2147483647, %v459_v38  ;;  %v719_v49 = vand.u32 2147483647, %v463_v22 }
 0x299   :  { %5279 = vset.pattern.permute.xlu2 %v6524_v23  ;;  %5280 = vset.pattern.permute.xlu0 %v6535_v2 }
 0x29d   :  { %1218 = vadd.xlane.f32.xlu2 %v714_v15  ;;  %1216 = vadd.xlane.f32.xlu1 %v713_v41  ;;  %v6538_v15 = vpop.xlane.xlu2 %930  ;;  %v6546_v41 = vpop.xlane.xlu0 %1118 }
 0x29e   :  { %1214 = vadd.xlane.f32.xlu0 %v712_v39  ;;  %9886 = vst [vmem:[#allocation124_spill] sm:$0xff] %v6538_v15  ;;  %v462_v39 = vsub.f32 %v6482_v25, %v6121_v13  ;;  %v6552_v54 = vpop.xlane.xlu1 %934  ;;  %v6563_v13 = vld [vmem:[%s9671_s4] ss:$0 sm:$0xff]  ;;  %v6578_v25 = vadd.s32 32, %v6519_v35  ;;  %s5605_s4 = smov [#allocation5]  }
 0x29f   :  { %9888 = vst [vmem:[#allocation126_spill] sm:$0xff] %v6546_v41  ;;  %v6610_v41 = vadd.s32 48, %v6519_v35  ;;  %s5252_s10 = sshll.u32 %s5605_s4, 4  ;;  %s5253_s10 = int_to_ptr.vmem [resolvable:$true] %s5252_s10 }
 0x2a0   :  { %v718_v38 = vand.u32 2147483647, %v462_v39  ;;  %9890 = vst [vmem:[#allocation128_spill] sm:$0xff] %v6552_v54 }
 0x2a5   :  { %1224 = vadd.xlane.f32.xlu2 %v717_v9  ;;  %1222 = vadd.xlane.f32.xlu1 %v716_v7  ;;  %v6550_v4 = vpop.xlane.xlu2 %936  ;;  %v6556_v16 = vpop.xlane.xlu0 %1124  ;;  %v721_v9 = vand.u32 2147483647, %v465_v36 }
 0x2a6   :  { %1220 = vadd.xlane.f32.xlu0 %v715_v50  ;;  %9889 = vst [vmem:[#allocation127_spill] sm:$0xff] %v6550_v4  ;;  %v6570_v22 = vpop.xlane.xlu1 %940  ;;  %v6633_v4 = vadd.s32 64, %v6519_v35 }
 0x2a7   :  { %9891 = vst [vmem:[#allocation129_spill] sm:$0xff] %v6556_v16 }
 0x2a8   :  { %9895 = vst [vmem:[#allocation133_spill] sm:$0xff] %v6570_v22 }
 0x2ac   :  { %v6580_v39 = vpop.f32.mrf.mxu0 }
 0x2ad   :  { %1230 = vadd.xlane.f32.xlu2 %v720_v48  ;;  %1228 = vadd.xlane.f32.xlu1 %v719_v49  ;;  %v6558_v50 = vpop.xlane.xlu0 %1130  ;;  %v6567_v55 = vpop.xlane.xlu2 %942  ;;  %v6587_v49 = vperm.slane %v6580_v39, 1 }
 0x2ae   :  { %1226 = vadd.xlane.f32.xlu0 %v718_v38  ;;  %9892 = vst [vmem:[#allocation130_spill] sm:$0xff] %v6558_v50  ;;  %v6591_v36 = vpop.xlane.xlu1 %946  ;;  %v6604_v50 = vadd.s32 40, %v6519_v35 }
 0x2af   :  { %9894 = vst [vmem:[#allocation132_spill] sm:$0xff] %v6567_v55  ;;  %v6629_v55 = vadd.s32 56, %v6519_v35 }
 0x2b0   :  { %9898 = vst [vmem:[#allocation136_spill] sm:$0xff] %v6591_v36 }
 0x2b5   :  { %v6565_v7 = vpop.xlane.xlu0 %1136  ;;  %v6589_v38 = vpop.xlane.xlu2 %948 }
 0x2b6   :  { %1232 = vadd.xlane.f32.xlu0 %v721_v9  ;;  %9893 = vst [vmem:[#allocation131_spill] sm:$0xff] %v6565_v7  ;;  %v6596_v9 = vperm.slane %v6580_v39, 6  ;;  %v6606_v16 = vpop.xlane.xlu1 %952 }
 0x2b7   :  { %9897 = vst [vmem:[#allocation135_spill] sm:$0xff] %v6589_v38 }
 0x2b8   :  { %9901 = vst [vmem:[#allocation139_spill] sm:$0xff] %v6606_v16 }
 0x2bd   :  { %v6583_v48 = vpop.xlane.xlu0 %1142 }
 0x2be   :  { %9896 = vst [vmem:[#allocation134_spill] sm:$0xff] %v6583_v48  ;;  %v6601_v48 = vpop.xlane.xlu2 %954  ;;  %v6624_v38 = vpop.xlane.xlu1 %958 }
 0x2bf   :  { %9900 = vst [vmem:[#allocation138_spill] sm:$0xff] %v6601_v48 }
 0x2c0   :  { %v6612_v19 = vpop.f32.mrf.mxu1  ;;  %9905 = vst [vmem:[#allocation143_spill] sm:$0xff] %v6624_v38 }
 0x2c5   :  { %1247 = vperm.xlu2 %5279, %v6563_v13   ;;  %v6599_v7 = vpop.xlane.xlu0 %1148 }
 0x2c6   :  { %1241 = vperm.xlu1 %5278, %v6563_v13   ;;  %9899 = vst [vmem:[#allocation137_spill] sm:$0xff] %v6599_v7  ;;  %v6617_v7 = vperm.slane %v6612_v19, 3  ;;  %v6622_v48 = vpop.xlane.xlu2 %960 }
 0x2c7   :  { %9904 = vst [vmem:[#allocation142_spill] sm:$0xff] %v6622_v48  ;;  %v6640_v48 = vpop.xlane.xlu1 %964 }
 0x2c8   :  { %9902 = vst [vmem:[#allocation140_spill] sm:$0xff] %v6617_v7 }
 0x2c9   :  { %9908 = vst [vmem:[#allocation146_spill] sm:$0xff] %v6640_v48  ;;  %v6707_v48 = vperm.slane %v6580_v39, 0 }
 0x2ca   :  { %1253 = vperm.xlu0 %5280, %v6563_v13  }
 0x2cd   :  { %5281 = vset.pattern.permute.xlu2 %v6574_v5  ;;  %v6619_v8 = vpop.xlane.xlu0 %1154 }
 0x2ce   :  { %5282 = vset.pattern.permute.xlu1 %v6578_v25  ;;  %9903 = vst [vmem:[#allocation141_spill] sm:$0xff] %v6619_v8  ;;  %v6637_v8 = vpop.xlane.xlu2 %966 }
 0x2cf   :  { %9907 = vst [vmem:[#allocation145_spill] sm:$0xff] %v6637_v8  ;;  %v6650_v3 = vpop.xlane.xlu1 %970  ;;  %v6657_v8 = vadd.s32 88, %v6519_v35 }
 0x2d0   :  { %9911 = vst [vmem:[#allocation149_spill] sm:$0xff] %v6650_v3 }
 0x2d2   :  { %1721 = vperm.xlu0 %5280, %v6587_v49  }
 0x2d5   :  { %1259 = vperm.xlu2 %5281, %v6563_v13   ;;  %v6635_v15 = vpop.xlane.xlu0 %1160 }
 0x2d6   :  { %1265 = vperm.xlu1 %5282, %v6563_v13   ;;  %9906 = vst [vmem:[#allocation144_spill] sm:$0xff] %v6635_v15  ;;  %v6648_v32 = vpop.xlane.xlu2 %972  ;;  %v6653_v15 = vadd.s32 80, %v6519_v35 }
 0x2d7   :  { %9910 = vst [vmem:[#allocation148_spill] sm:$0xff] %v6648_v32  ;;  %v6665_v45 = vpop.xlane.xlu1 %976  ;;  %v6671_v32 = vadd.s32 96, %v6519_v35 }
 0x2d8   :  { %9914 = vst [vmem:[#allocation152_spill] sm:$0xff] %v6665_v45 }
 0x2da   :  { %2206 = vperm.xlu0 %5280, %v6596_v9  }
 0x2dd   :  { %5283 = vset.pattern.permute.xlu2 %v6604_v50  ;;  %v6645_v20 = vpop.xlane.xlu0 %1166 }
 0x2de   :  { %5284 = vset.pattern.permute.xlu1 %v6610_v41  ;;  %9909 = vst [vmem:[#allocation147_spill] sm:$0xff] %v6645_v20  ;;  %v6663_v20 = vpop.xlane.xlu2 %978 }
 0x2df   :  { %9913 = vst [vmem:[#allocation151_spill] sm:$0xff] %v6663_v20  ;;  %v6681_v20 = vpop.xlane.xlu1 %982 }
 0x2e0   :  { %9917 = vst [vmem:[#allocation155_spill] sm:$0xff] %v6681_v20 }
 0x2e2   :  { %2691 = vperm.xlu0 %5280, %v6617_v7  }
 0x2e5   :  { %1271 = vperm.xlu2 %5283, %v6563_v13   ;;  %v6661_v59 = vpop.xlane.xlu0 %1172 }
 0x2e6   :  { %1277 = vperm.xlu1 %5284, %v6563_v13   ;;  %9912 = vst [vmem:[#allocation150_spill] sm:$0xff] %v6661_v59  ;;  %v6679_v59 = vpop.xlane.xlu2 %984 }
 0x2e7   :  { %9916 = vst [vmem:[#allocation154_spill] sm:$0xff] %v6679_v59  ;;  %v6695_v59 = vadd.s32 120, %v6519_v35 }
 0x2ea   :  { %5435 = vset.pattern.permute.xlu0 %v6629_v55 }
 0x2ed   :  { %5285 = vset.pattern.permute.xlu2 %v6629_v55  ;;  %v6673_v18 = vpop.xlane.xlu0 %1178 }
 0x2ee   :  { %5286 = vset.pattern.permute.xlu1 %v6633_v4  ;;  %9915 = vst [vmem:[#allocation153_spill] sm:$0xff] %v6673_v18  ;;  %v6688_v3 = vpop.xlane.xlu2 %990  ;;  %v6691_v18 = vpop.xlane.xlu1 %988 }
 0x2ef   :  { %9919 = vst [vmem:[#allocation157_spill] sm:$0xff] %v6688_v3 }
 0x2f0   :  { %9920 = vst [vmem:[#allocation158_spill] sm:$0xff] %v6691_v18 }
 0x2f2   :  { %1751 = vperm.xlu0 %5435, %v6587_v49  }
 0x2f5   :  { %1283 = vperm.xlu2 %5285, %v6563_v13   ;;  %v6686_v45 = vpop.xlane.xlu0 %1184 }
 0x2f6   :  { %1289 = vperm.xlu1 %5286, %v6563_v13   ;;  %9918 = vst [vmem:[#allocation156_spill] sm:$0xff] %v6686_v45  ;;  %v6702_v45 = vpop.xlane.xlu2 %996  ;;  %v6704_v3 = vpop.xlane.xlu1 %994 }
 0x2f7   :  { %9922 = vst [vmem:[#allocation160_spill] sm:$0xff] %v6702_v45  ;;  %v6722_v45 = vperm.slane %v6580_v39, 2 }
 0x2f8   :  { %9923 = vst [vmem:[#allocation161_spill] sm:$0xff] %v6704_v3 }
 0x2fa   :  { %2236 = vperm.xlu0 %5435, %v6596_v9  }
 0x2fd   :  { %5287 = vset.pattern.permute.xlu2 %v6653_v15  ;;  %v6699_v20 = vpop.xlane.xlu0 %1190 }
 0x2fe   :  { %5288 = vset.pattern.permute.xlu1 %v6657_v8  ;;  %9921 = vst [vmem:[#allocation159_spill] sm:$0xff] %v6699_v20  ;;  %v6714_v38 = vpop.xlane.xlu2 %1002  ;;  %v6716_v20 = vpop.xlane.xlu1 %1000 }
 0x2ff   :  { %9925 = vst [vmem:[#allocation163_spill] sm:$0xff] %v6714_v38  ;;  %v6734_v38 = vperm.slane %v6580_v39, 7 }
 0x300   :  { %9926 = vst [vmem:[#allocation164_spill] sm:$0xff] %v6716_v20 }
 0x301   :  { %9930 = vst [vmem:[#allocation168_spill] sm:$0xff] %v6734_v38 }
 0x302   :  { %2721 = vperm.xlu0 %5435, %v6617_v7  }
 0x305   :  { %1301 = vperm.xlu2 %5287, %v6563_v13   ;;  %v6712_v18 = vpop.xlane.xlu0 %1196 }
 0x306   :  { %1307 = vperm.xlu1 %5288, %v6563_v13   ;;  %9924 = vst [vmem:[#allocation162_spill] sm:$0xff] %v6712_v18  ;;  %v6727_v3 = vpop.xlane.xlu2 %1008  ;;  %v6729_v18 = vpop.xlane.xlu1 %1006 }
 0x307   :  { %9928 = vst [vmem:[#allocation166_spill] sm:$0xff] %v6727_v3  ;;  %v6745_v3 = vperm.slane %v6612_v19, 4 }
 0x308   :  { %9929 = vst [vmem:[#allocation167_spill] sm:$0xff] %v6729_v18 }
 0x309   :  { %9934 = vst [vmem:[#allocation172_spill] sm:$0xff] %v6745_v3 }
 0x30a   :  { %5440 = vset.pattern.permute.xlu0 %v6671_v32 }
 0x30d   :  { %5289 = vset.pattern.permute.xlu2 %v6671_v32 }
 0x30e   :  { %5290 = vset.pattern.permute.xlu1 %v6677_v14  ;;  %v6739_v16 = vpop.xlane.xlu2 %1014 }
 0x30f   :  { %9932 = vst [vmem:[#allocation170_spill] sm:$0xff] %v6739_v16 }
 0x312   :  { %1781 = vperm.xlu0 %5440, %v6587_v49  }
 0x315   :  { %1313 = vperm.xlu2 %5289, %v6563_v13  }
 0x316   :  { %1319 = vperm.xlu1 %5290, %v6563_v13  }
 0x31a   :  { %2266 = vperm.xlu0 %5440, %v6596_v9  }
 0x31d   :  { %5291 = vset.pattern.permute.xlu2 %v6695_v59 }
 0x31e   :  { %5292 = vset.pattern.permute.xlu1 %v6519_v35 }
 0x322   :  { %2751 = vperm.xlu0 %5440, %v6617_v7   ;;  %v6724_v7 = vpop.xlane.xlu0 %1202 }
 0x323   :  { %9927 = vst [vmem:[#allocation165_spill] sm:$0xff] %v6724_v7  ;;  %v6742_v7 = vpop.xlane.xlu1 %1012 }
 0x324   :  { %9933 = vst [vmem:[#allocation171_spill] sm:$0xff] %v6742_v7 }
 0x325   :  { %1331 = vperm.xlu2 %5291, %v6563_v13  }
 0x326   :  { %1612 = vperm.xlu1 %5292, %v6707_v48  }
 0x32a   :  { %5445 = vset.pattern.permute.xlu0 %v6524_v23  ;;  %v6737_v20 = vpop.xlane.xlu0 %1208 }
 0x32b   :  { %9931 = vst [vmem:[#allocation169_spill] sm:$0xff] %v6737_v20  ;;  %v6753_v20 = vpop.xlane.xlu2 %1020  ;;  %v6755_v16 = vpop.xlane.xlu1 %1018 }
 0x32c   :  { %9936 = vst [vmem:[#allocation174_spill] sm:$0xff] %v6753_v20 }
 0x32d   :  { %5293 = vset.pattern.permute.xlu2 %v6524_v23  ;;  %9937 = vst [vmem:[#allocation175_spill] sm:$0xff] %v6755_v16 }
 0x32e   :  { %5294 = vset.pattern.permute.xlu1 %v6535_v2 }
 0x332   :  { %1812 = vperm.xlu0 %5445, %v6722_v45   ;;  %v6750_v18 = vpop.xlane.xlu0 %1214 }
 0x333   :  { %9935 = vst [vmem:[#allocation173_spill] sm:$0xff] %v6750_v18  ;;  %v6762_v36 = vpop.xlane.xlu2 %1026  ;;  %v6764_v22 = vpop.xlane.xlu1 %1024  ;;  %v6770_v18 = vadd.s32 72, %v6519_v35 }
 0x334   :  { %9939 = vst [vmem:[#allocation177_spill] sm:$0xff] %v6762_v36 }
 0x335   :  { %1618 = vperm.xlu2 %5293, %v6707_v48   ;;  %9940 = vst [vmem:[#allocation178_spill] sm:$0xff] %v6764_v22 }
 0x336   :  { %1624 = vperm.xlu1 %5294, %v6707_v48  }
 0x33a   :  { %2297 = vperm.xlu0 %5445, %v6734_v38   ;;  %v6760_v7 = vpop.xlane.xlu0 %1220 }
 0x33b   :  { %9938 = vst [vmem:[#allocation176_spill] sm:$0xff] %v6760_v7  ;;  %v6775_v16 = vpop.xlane.xlu2 %1032  ;;  %v6777_v7 = vpop.xlane.xlu1 %1030 }
 0x33c   :  { %9942 = vst [vmem:[#allocation180_spill] sm:$0xff] %v6775_v16 }
 0x33d   :  { %5295 = vset.pattern.permute.xlu2 %v6578_v25  ;;  %9943 = vst [vmem:[#allocation181_spill] sm:$0xff] %v6777_v7 }
 0x33e   :  { %5296 = vset.pattern.permute.xlu1 %v6604_v50 }
 0x342   :  { %2782 = vperm.xlu0 %5445, %v6745_v3   ;;  %v6772_v20 = vpop.xlane.xlu0 %1226 }
 0x343   :  { %9941 = vst [vmem:[#allocation179_spill] sm:$0xff] %v6772_v20  ;;  %v6784_v22 = vpop.xlane.xlu2 %1038  ;;  %v6787_v54 = vpop.xlane.xlu1 %1036 }
 0x344   :  { %9945 = vst [vmem:[#allocation183_spill] sm:$0xff] %v6784_v22 }
 0x345   :  { %1636 = vperm.xlu2 %5295, %v6707_v48   ;;  %9946 = vst [vmem:[#allocation184_spill] sm:$0xff] %v6787_v54  ;;  %v6807_v54 = vadd.s32 112, %v6519_v35 }
 0x346   :  { %1642 = vperm.xlu1 %5296, %v6707_v48  }
 0x34a   :  { %5450 = vset.pattern.permute.xlu0 %v6610_v41  ;;  %v6782_v36 = vpop.xlane.xlu0 %1232 }
 0x34b   :  { %9944 = vst [vmem:[#allocation182_spill] sm:$0xff] %v6782_v36  ;;  %v6795_v16 = vpop.xlane.xlu2 %1044  ;;  %v6797_v7 = vpop.xlane.xlu1 %1042 }
 0x34c   :  { %9948 = vst [vmem:[#allocation186_spill] sm:$0xff] %v6795_v16 }
 0x34d   :  { %5297 = vset.pattern.permute.xlu2 %v6610_v41  ;;  %9949 = vst [vmem:[#allocation187_spill] sm:$0xff] %v6797_v7 }
 0x34e   :  { %5298 = vset.pattern.permute.xlu1 %v6629_v55 }
 0x352   :  { %1842 = vperm.xlu0 %5450, %v6722_v45   ;;  %v6792_v20 = vpop.permute.xlu0 %1253 }
 0x353   :  { %9947 = vst [vmem:[#allocation185_spill] sm:$0xff] %v6792_v20  ;;  %v6804_v22 = vpop.xlane.xlu2 %1050  ;;  %v6809_v62 = vpop.xlane.xlu1 %1048 }
 0x354   :  { %9951 = vst [vmem:[#allocation189_spill] sm:$0xff] %v6804_v22 }
 0x355   :  { %1648 = vperm.xlu2 %5297, %v6707_v48   ;;  %9952 = vst [vmem:[#allocation190_spill] sm:$0xff] %v6809_v62 }
 0x356   :  { %1654 = vperm.xlu1 %5298, %v6707_v48  }
 0x35a   :  { %2327 = vperm.xlu0 %5450, %v6734_v38   ;;  %v6802_v36 = vpop.permute.xlu0 %1721 }
 0x35b   :  { %9950 = vst [vmem:[#allocation188_spill] sm:$0xff] %v6802_v36  ;;  %v6817_v7 = vpop.xlane.xlu2 %1056  ;;  %v6819_v36 = vpop.xlane.xlu1 %1054 }
 0x35c   :  { %9954 = vst [vmem:[#allocation192_spill] sm:$0xff] %v6817_v7  ;;  %v6833_v7 = vperm.slane %v6580_v39, 3 }
 0x35d   :  { %5299 = vset.pattern.permute.xlu2 %v6770_v18  ;;  %9955 = vst [vmem:[#allocation193_spill] sm:$0xff] %v6819_v36 }
 0x35e   :  { %5300 = vset.pattern.permute.xlu1 %v6653_v15 }
 0x362   :  { %2812 = vperm.xlu0 %5450, %v6745_v3   ;;  %v6814_v16 = vpop.permute.xlu0 %2206 }
 0x363   :  { %9953 = vst [vmem:[#allocation191_spill] sm:$0xff] %v6814_v16  ;;  %v6826_v62 = vpop.xlane.xlu2 %1062  ;;  %v6829_v6 = vpop.xlane.xlu1 %1060 }
 0x364   :  { %9957 = vst [vmem:[#allocation195_spill] sm:$0xff] %v6826_v62 }
 0x365   :  { %1666 = vperm.xlu2 %5299, %v6707_v48   ;;  %9958 = vst [vmem:[#allocation196_spill] sm:$0xff] %v6829_v6  ;;  %v6850_v6 = vperm.slane %v6612_v19, 5 }
 0x366   :  { %1672 = vperm.xlu1 %5300, %v6707_v48  }
 0x367   :  { %9963 = vst [vmem:[#allocation201_spill] sm:$0xff] %v6850_v6 }
 0x36a   :  { %5455 = vset.pattern.permute.xlu0 %v6657_v8  ;;  %v6824_v22 = vpop.permute.xlu0 %2691 }
 0x36b   :  { %9956 = vst [vmem:[#allocation194_spill] sm:$0xff] %v6824_v22  ;;  %v6843_v62 = vpop.xlane.xlu2 %1068  ;;  %v6845_v22 = vpop.xlane.xlu1 %1066 }
 0x36c   :  { %9961 = vst [vmem:[#allocation199_spill] sm:$0xff] %v6843_v62 }
 0x36d   :  { %5301 = vset.pattern.permute.xlu2 %v6657_v8  ;;  %9962 = vst [vmem:[#allocation200_spill] sm:$0xff] %v6845_v22 }
 0x36e   :  { %5302 = vset.pattern.permute.xlu1 %v6671_v32 }
 0x372   :  { %1872 = vperm.xlu0 %5455, %v6722_v45   ;;  %v6836_v16 = vpop.permute.xlu0 %1751 }
 0x373   :  { %9959 = vst [vmem:[#allocation197_spill] sm:$0xff] %v6836_v16  ;;  %v6855_v16 = vpop.xlane.xlu2 %1074  ;;  %v6857_v60 = vpop.xlane.xlu1 %1072 }
 0x374   :  { %9965 = vst [vmem:[#allocation203_spill] sm:$0xff] %v6855_v16 }
 0x375   :  { %1678 = vperm.xlu2 %5301, %v6707_v48   ;;  %9966 = vst [vmem:[#allocation204_spill] sm:$0xff] %v6857_v60 }
 0x376   :  { %1684 = vperm.xlu1 %5302, %v6707_v48  }
 0x37a   :  { %2357 = vperm.xlu0 %5455, %v6734_v38   ;;  %v6852_v36 = vpop.permute.xlu0 %2236 }
 0x37b   :  { %9964 = vst [vmem:[#allocation202_spill] sm:$0xff] %v6852_v36  ;;  %v6865_v22 = vpop.xlane.xlu2 %1080  ;;  %v6867_v27 = vpop.xlane.xlu1 %1078 }
 0x37c   :  { %9968 = vst [vmem:[#allocation206_spill] sm:$0xff] %v6865_v22 }
 0x37d   :  { %5303 = vset.pattern.permute.xlu2 %v6807_v54  ;;  %9969 = vst [vmem:[#allocation207_spill] sm:$0xff] %v6867_v27 }
 0x37e   :  { %5304 = vset.pattern.permute.xlu1 %v6695_v59 }
 0x382   :  { %2842 = vperm.xlu0 %5455, %v6745_v3   ;;  %v6840_v3 = vperm.slane %v6612_v19, 0  ;;  %v6862_v62 = vpop.permute.xlu0 %2721 }
 0x383   :  { %9967 = vst [vmem:[#allocation205_spill] sm:$0xff] %v6862_v62  ;;  %v6874_v60 = vpop.xlane.xlu2 %1086  ;;  %v6877_v36 = vpop.xlane.xlu1 %1084 }
 0x384   :  { %9960 = vst [vmem:[#allocation198_spill] sm:$0xff] %v6840_v3 }
 0x385   :  { %1696 = vperm.xlu2 %5303, %v6707_v48   ;;  %9970 = vst [vmem:[#allocation208_spill] sm:$0xff] %v6874_v60 }
 0x386   :  { %1702 = vperm.xlu1 %5304, %v6707_v48   ;;  %9971 = vst [vmem:[#allocation209_spill] sm:$0xff] %v6877_v36 }
 0x38a   :  { %5460 = vset.pattern.permute.xlu0 %v6519_v35  ;;  %v6871_v16 = vpop.permute.xlu0 %1781 }
 0x38b   :  { %v6885_v22 = vpop.xlane.xlu2 %1092  ;;  %v6887_v27 = vpop.xlane.xlu1 %1090 }
 0x38c   :  { %9973 = vst [vmem:[#allocation211_spill] sm:$0xff] %v6885_v22 }
 0x38d   :  { %5305 = vset.pattern.permute.xlu2 %v6519_v35  ;;  %9974 = vst [vmem:[#allocation212_spill] sm:$0xff] %v6887_v27 }
 0x38e   :  { %5306 = vset.pattern.permute.xlu1 %v6524_v23 }
 0x392   :  { %1903 = vperm.xlu0 %5460, %v6833_v7   ;;  %v6880_v62 = vpop.permute.xlu0 %2266 }
 0x393   :  { %9972 = vst [vmem:[#allocation210_spill] sm:$0xff] %v6880_v62  ;;  %v6894_v36 = vpop.xlane.xlu2 %1098  ;;  %v6896_v62 = vpop.xlane.xlu1 %1096 }
 0x394   :  { %9976 = vst [vmem:[#allocation214_spill] sm:$0xff] %v6894_v36 }
 0x395   :  { %1709 = vperm.xlu2 %5305, %v6587_v49   ;;  %9977 = vst [vmem:[#allocation215_spill] sm:$0xff] %v6896_v62 }
 0x396   :  { %1715 = vperm.xlu1 %5306, %v6587_v49  }
 0x39a   :  { %2388 = vperm.xlu0 %5460, %v6840_v3   ;;  %v6890_v60 = vpop.permute.xlu0 %2751 }
 0x39b   :  { %9975 = vst [vmem:[#allocation213_spill] sm:$0xff] %v6890_v60  ;;  %v6904_v22 = vpop.xlane.xlu2 %1104  ;;  %v6906_v60 = vpop.xlane.xlu1 %1102 }
 0x39c   :  { %9979 = vst [vmem:[#allocation217_spill] sm:$0xff] %v6904_v22 }
 0x39d   :  { %5307 = vset.pattern.permute.xlu2 %v6574_v5  ;;  %9980 = vst [vmem:[#allocation218_spill] sm:$0xff] %v6906_v60 }
 0x39e   :  { %5308 = vset.pattern.permute.xlu1 %v6578_v25 }
 0x3a2   :  { %2873 = vperm.xlu0 %5460, %v6850_v6  }
 0x3a3   :  { %v6913_v36 = vpop.xlane.xlu2 %1110 }
 0x3a4   :  { %v6899_v34 = vpop.permute.xlu0 %1812  ;;  %9982 = vst [vmem:[#allocation220_spill] sm:$0xff] %v6913_v36 }
 0x3a5   :  { %1727 = vperm.xlu2 %5307, %v6587_v49   ;;  %9978 = vst [vmem:[#allocation216_spill] sm:$0xff] %v6899_v34  ;;  %v6916_v34 = vpop.xlane.xlu1 %1108 }
 0x3a6   :  { %1733 = vperm.xlu1 %5308, %v6587_v49   ;;  %9983 = vst [vmem:[#allocation221_spill] sm:$0xff] %v6916_v34 }
 0x3aa   :  { %5465 = vset.pattern.permute.xlu0 %v6604_v50 }
 0x3ab   :  { %v6924_v22 = vpop.xlane.xlu2 %1116 }
 0x3ac   :  { %v6909_v27 = vpop.permute.xlu0 %2297  ;;  %9985 = vst [vmem:[#allocation223_spill] sm:$0xff] %v6924_v22 }
 0x3ad   :  { %5309 = vset.pattern.permute.xlu2 %v6604_v50  ;;  %9981 = vst [vmem:[#allocation219_spill] sm:$0xff] %v6909_v27  ;;  %v6926_v27 = vpop.xlane.xlu1 %1114 }
 0x3ae   :  { %5310 = vset.pattern.permute.xlu1 %v6610_v41  ;;  %9986 = vst [vmem:[#allocation224_spill] sm:$0xff] %v6926_v27 }
 0x3b2   :  { %1933 = vperm.xlu0 %5465, %v6833_v7  }
 0x3b3   :  { %v6933_v36 = vpop.xlane.xlu2 %1122 }
 0x3b4   :  { %v6919_v62 = vpop.permute.xlu0 %2782  ;;  %9988 = vst [vmem:[#allocation226_spill] sm:$0xff] %v6933_v36 }
 0x3b5   :  { %1739 = vperm.xlu2 %5309, %v6587_v49   ;;  %9984 = vst [vmem:[#allocation222_spill] sm:$0xff] %v6919_v62  ;;  %v6935_v62 = vpop.xlane.xlu1 %1120 }
 0x3b6   :  { %1745 = vperm.xlu1 %5310, %v6587_v49   ;;  %9989 = vst [vmem:[#allocation227_spill] sm:$0xff] %v6935_v62 }
 0x3ba   :  { %2418 = vperm.xlu0 %5465, %v6840_v3  }
 0x3bb   :  { %v6943_v22 = vpop.xlane.xlu2 %1128 }
 0x3bc   :  { %9991 = vst [vmem:[#allocation229_spill] sm:$0xff] %v6943_v22 }
 0x3bd   :  { %5311 = vset.pattern.permute.xlu2 %v6633_v4 }
 0x3be   :  { %5312 = vset.pattern.permute.xlu1 %v6770_v18 }
 0x3c2   :  { %2903 = vperm.xlu0 %5465, %v6850_v6  }
 0x3c3   :  { %v6954_v62 = vpop.xlane.xlu2 %1134 }
 0x3c4   :  { %v6928_v60 = vpop.permute.xlu0 %1842  ;;  %9994 = vst [vmem:[#allocation232_spill] sm:$0xff] %v6954_v62  ;;  %v6970_v62 = vperm.slane %v6580_v39, 4 }
 0x3c5   :  { %1757 = vperm.xlu2 %5311, %v6587_v49   ;;  %9987 = vst [vmem:[#allocation225_spill] sm:$0xff] %v6928_v60  ;;  %v6945_v60 = vpop.xlane.xlu1 %1126 }
 0x3c6   :  { %1763 = vperm.xlu1 %5312, %v6587_v49   ;;  %9992 = vst [vmem:[#allocation230_spill] sm:$0xff] %v6945_v60 }
 0x3ca   :  { %5470 = vset.pattern.permute.xlu0 %v6653_v15 }
 0x3cc   :  { %v6937_v34 = vpop.permute.xlu0 %2327 }
 0x3cd   :  { %5313 = vset.pattern.permute.xlu2 %v6653_v15  ;;  %9990 = vst [vmem:[#allocation228_spill] sm:$0xff] %v6937_v34 }
 0x3ce   :  { %5314 = vset.pattern.permute.xlu1 %v6657_v8 }
 0x3d2   :  { %1963 = vperm.xlu0 %5470, %v6833_v7  }
 0x3d4   :  { %v6947_v27 = vpop.permute.xlu0 %2812 }
 0x3d5   :  { %1769 = vperm.xlu2 %5313, %v6587_v49   ;;  %9993 = vst [vmem:[#allocation231_spill] sm:$0xff] %v6947_v27  ;;  %v6965_v27 = vpop.xlane.xlu2 %1140 }
 0x3d6   :  { %1775 = vperm.xlu1 %5314, %v6587_v49   ;;  %9997 = vst [vmem:[#allocation235_spill] sm:$0xff] %v6965_v27  ;;  %v6987_v27 = vperm.slane %v6612_v19, 6 }
 0x3d8   :  { %10003 = vst [vmem:[#allocation241_spill] sm:$0xff] %v6987_v27 }
 0x3da   :  { %2448 = vperm.xlu0 %5470, %v6840_v3  }
 0x3dd   :  { %5315 = vset.pattern.permute.xlu2 %v6677_v14 }
 0x3de   :  { %5316 = vset.pattern.permute.xlu1 %v6807_v54 }
 0x3e2   :  { %2933 = vperm.xlu0 %5470, %v6850_v6  }
 0x3e4   :  { %v6952_v36 = vpop.permute.xlu0 %1872 }
 0x3e5   :  { %1787 = vperm.xlu2 %5315, %v6587_v49  }
 0x3e6   :  { %1793 = vperm.xlu1 %5316, %v6587_v49  }
 0x3ea   :  { %5475 = vset.pattern.permute.xlu0 %v6695_v59 }
 0x3ec   :  { %v6962_v22 = vpop.permute.xlu0 %2357 }
 0x3ed   :  { %5317 = vset.pattern.permute.xlu2 %v6695_v59  ;;  %9996 = vst [vmem:[#allocation234_spill] sm:$0xff] %v6962_v22  ;;  %v6980_v22 = vpop.xlane.xlu2 %1146 }
 0x3ee   :  { %5318 = vset.pattern.permute.xlu1 %v6519_v35  ;;  %10001 = vst [vmem:[#allocation239_spill] sm:$0xff] %v6980_v22 }
 0x3f2   :  { %1993 = vperm.xlu0 %5475, %v6833_v7  }
 0x3f5   :  { %1799 = vperm.xlu2 %5317, %v6587_v49   ;;  %v6957_v49 = vpop.xlane.xlu1 %1132 }
 0x3f6   :  { %1806 = vperm.xlu1 %5318, %v6722_v45   ;;  %9995 = vst [vmem:[#allocation233_spill] sm:$0xff] %v6957_v49  ;;  %v6975_v49 = vperm.slane %v6612_v19, 1 }
 0x3f8   :  { %9999 = vst [vmem:[#allocation237_spill] sm:$0xff] %v6975_v49 }
 0x3fa   :  { %2478 = vperm.xlu0 %5475, %v6840_v3   ;;  %v6993_v3 = vpop.xlane.xlu2 %1152 }
 0x3fb   :  { %10005 = vst [vmem:[#allocation243_spill] sm:$0xff] %v6993_v3 }
 0x3fd   :  { %5319 = vset.pattern.permute.xlu2 %v6535_v2  ;;  %v6967_v60 = vpop.xlane.xlu1 %1138 }
 0x3fe   :  { %5320 = vset.pattern.permute.xlu1 %v6574_v5  ;;  %9998 = vst [vmem:[#allocation236_spill] sm:$0xff] %v6967_v60 }
 0x402   :  { %2963 = vperm.xlu0 %5475, %v6850_v6   ;;  %v6978_v6 = vpop.permute.xlu0 %2842 }
 0x403   :  { %10000 = vst [vmem:[#allocation238_spill] sm:$0xff] %v6978_v6 }
 0x405   :  { %1818 = vperm.xlu2 %5319, %v6722_v45   ;;  %v6982_v34 = vpop.xlane.xlu1 %1144 }
 0x406   :  { %1824 = vperm.xlu1 %5320, %v6722_v45   ;;  %10002 = vst [vmem:[#allocation240_spill] sm:$0xff] %v6982_v34  ;;  %v7002_v34 = vpop.xlane.xlu2 %1158 }
 0x407   :  { %10008 = vst [vmem:[#allocation246_spill] sm:$0xff] %v7002_v34 }
 0x40a   :  { %5480 = vset.pattern.permute.xlu0 %v6578_v25  ;;  %v6990_v60 = vpop.permute.xlu0 %1903 }
 0x40b   :  { %10004 = vst [vmem:[#allocation242_spill] sm:$0xff] %v6990_v60 }
 0x40d   :  { %5321 = vset.pattern.permute.xlu2 %v6578_v25  ;;  %v6995_v6 = vpop.xlane.xlu1 %1150 }
 0x40e   :  { %5322 = vset.pattern.permute.xlu1 %v6604_v50  ;;  %10006 = vst [vmem:[#allocation244_spill] sm:$0xff] %v6995_v6  ;;  %v7013_v60 = vpop.xlane.xlu2 %1164 }
 0x40f   :  { %10011 = vst [vmem:[#allocation249_spill] sm:$0xff] %v7013_v60 }
 0x412   :  { %2024 = vperm.xlu0 %5480, %v6970_v62   ;;  %v6999_v22 = vpop.permute.xlu0 %2388 }
 0x413   :  { %10007 = vst [vmem:[#allocation245_spill] sm:$0xff] %v6999_v22 }
 0x415   :  { %1830 = vperm.xlu2 %5321, %v6722_v45   ;;  %v7005_v11 = vpop.xlane.xlu1 %1156 }
 0x416   :  { %1836 = vperm.xlu1 %5322, %v6722_v45   ;;  %10009 = vst [vmem:[#allocation247_spill] sm:$0xff] %v7005_v11  ;;  %v7022_v11 = vpop.xlane.xlu2 %1170 }
 0x417   :  { %10014 = vst [vmem:[#allocation252_spill] sm:$0xff] %v7022_v11 }
 0x41a   :  { %2509 = vperm.xlu0 %5480, %v6975_v49   ;;  %v7009_v3 = vpop.permute.xlu0 %2873 }
 0x41b   :  { %10010 = vst [vmem:[#allocation248_spill] sm:$0xff] %v7009_v3 }
 0x41d   :  { %5323 = vset.pattern.permute.xlu2 %v6629_v55  ;;  %v7015_v22 = vpop.xlane.xlu1 %1162 }
 0x41e   :  { %5324 = vset.pattern.permute.xlu1 %v6633_v4  ;;  %10012 = vst [vmem:[#allocation250_spill] sm:$0xff] %v7015_v22  ;;  %v7032_v60 = vpop.xlane.xlu2 %1176 }
 0x41f   :  { %10017 = vst [vmem:[#allocation255_spill] sm:$0xff] %v7032_v60 }
 0x422   :  { %2994 = vperm.xlu0 %5480, %v6987_v27  }
 0x424   :  { %v7018_v34 = vpop.permute.xlu0 %1933 }
 0x425   :  { %1848 = vperm.xlu2 %5323, %v6722_v45   ;;  %10013 = vst [vmem:[#allocation251_spill] sm:$0xff] %v7018_v34  ;;  %v7024_v6 = vpop.xlane.xlu1 %1168 }
 0x426   :  { %1854 = vperm.xlu1 %5324, %v6722_v45   ;;  %10015 = vst [vmem:[#allocation253_spill] sm:$0xff] %v7024_v6  ;;  %v7041_v6 = vpop.xlane.xlu2 %1182 }
 0x427   :  { %10020 = vst [vmem:[#allocation258_spill] sm:$0xff] %v7041_v6 }
 0x42a   :  { %5485 = vset.pattern.permute.xlu0 %v6770_v18 }
 0x42c   :  { %v7028_v3 = vpop.permute.xlu0 %2418 }
 0x42d   :  { %5325 = vset.pattern.permute.xlu2 %v6770_v18  ;;  %10016 = vst [vmem:[#allocation254_spill] sm:$0xff] %v7028_v3  ;;  %v7034_v34 = vpop.xlane.xlu1 %1174 }
 0x42e   :  { %5326 = vset.pattern.permute.xlu1 %v6653_v15  ;;  %10018 = vst [vmem:[#allocation256_spill] sm:$0xff] %v7034_v34  ;;  %v7052_v60 = vpop.xlane.xlu2 %1188 }
 0x42f   :  { %10023 = vst [vmem:[#allocation261_spill] sm:$0xff] %v7052_v60 }
 0x432   :  { %1295 = vperm.xlu0 %5485, %v6563_v13  }
 0x434   :  { %v7038_v11 = vpop.permute.xlu0 %2903 }
 0x435   :  { %1860 = vperm.xlu2 %5325, %v6722_v45   ;;  %10019 = vst [vmem:[#allocation257_spill] sm:$0xff] %v7038_v11  ;;  %v7044_v22 = vpop.xlane.xlu1 %1180 }
 0x436   :  { %1866 = vperm.xlu1 %5326, %v6722_v45   ;;  %10021 = vst [vmem:[#allocation259_spill] sm:$0xff] %v7044_v22 }
 0x43a   :  { %2054 = vperm.xlu0 %5485, %v6970_v62  }
 0x43d   :  { %5327 = vset.pattern.permute.xlu2 %v6671_v32  ;;  %v7054_v11 = vpop.xlane.xlu1 %1186 }
 0x43e   :  { %5328 = vset.pattern.permute.xlu1 %v6677_v14  ;;  %10024 = vst [vmem:[#allocation262_spill] sm:$0xff] %v7054_v11 }
 0x442   :  { %2539 = vperm.xlu0 %5485, %v6975_v49  }
 0x444   :  { %v7047_v3 = vpop.permute.xlu0 %1963 }
 0x445   :  { %1878 = vperm.xlu2 %5327, %v6722_v45   ;;  %10022 = vst [vmem:[#allocation260_spill] sm:$0xff] %v7047_v3  ;;  %v7063_v6 = vpop.xlane.xlu1 %1192 }
 0x446   :  { %1884 = vperm.xlu1 %5328, %v6722_v45   ;;  %10027 = vst [vmem:[#allocation265_spill] sm:$0xff] %v7063_v6 }
 0x44a   :  { %3024 = vperm.xlu0 %5485, %v6987_v27  }
 0x44c   :  { %v7056_v34 = vpop.permute.xlu0 %2448 }
 0x44d   :  { %5329 = vset.pattern.permute.xlu2 %v6807_v54  ;;  %10025 = vst [vmem:[#allocation263_spill] sm:$0xff] %v7056_v34  ;;  %v7073_v34 = vpop.xlane.xlu1 %1198 }
 0x44e   :  { %5330 = vset.pattern.permute.xlu1 %v6695_v59  ;;  %10030 = vst [vmem:[#allocation268_spill] sm:$0xff] %v7073_v34 }
 0x452   :  { %5490 = vset.pattern.permute.xlu0 %v6807_v54 }
 0x455   :  { %1890 = vperm.xlu2 %5329, %v6722_v45  }
 0x456   :  { %1896 = vperm.xlu1 %5330, %v6722_v45   ;;  %v7061_v45 = vpop.xlane.xlu2 %1194 }
 0x457   :  { %10026 = vst [vmem:[#allocation264_spill] sm:$0xff] %v7061_v45 }
 0x45a   :  { %1325 = vperm.xlu0 %5490, %v6563_v13   ;;  %v7066_v13 = vpop.permute.xlu0 %2933 }
 0x45b   :  { %10028 = vst [vmem:[#allocation266_spill] sm:$0xff] %v7066_v13  ;;  %v7083_v13 = vpop.xlane.xlu1 %1204 }
 0x45c   :  { %10033 = vst [vmem:[#allocation271_spill] sm:$0xff] %v7083_v13 }
 0x45d   :  { %5331 = vset.pattern.permute.xlu2 %v6524_v23 }
 0x45e   :  { %5332 = vset.pattern.permute.xlu1 %v6535_v2  ;;  %v7071_v60 = vpop.xlane.xlu2 %1200 }
 0x45f   :  { %10029 = vst [vmem:[#allocation267_spill] sm:$0xff] %v7071_v60 }
 0x462   :  { %2084 = vperm.xlu0 %5490, %v6970_v62  }
 0x464   :  { %v7075_v11 = vpop.permute.xlu0 %1993 }
 0x465   :  { %1909 = vperm.xlu2 %5331, %v6833_v7   ;;  %10031 = vst [vmem:[#allocation269_spill] sm:$0xff] %v7075_v11  ;;  %v7094_v11 = vperm.slane %v6580_v39, 5  ;;  %v7115_v39 = vperm.slane %v6612_v19, 7 }
 0x466   :  { %1915 = vperm.xlu1 %5332, %v6833_v7   ;;  %v7080_v45 = vpop.xlane.xlu2 %1206 }
 0x467   :  { %10032 = vst [vmem:[#allocation270_spill] sm:$0xff] %v7080_v45  ;;  %v7096_v45 = vpop.xlane.xlu1 %1210 }
 0x468   :  { %10036 = vst [vmem:[#allocation274_spill] sm:$0xff] %v7096_v45 }
 0x469   :  { %10042 = vst [vmem:[#allocation280_spill] sm:$0xff] %v7115_v39 }
 0x46a   :  { %2569 = vperm.xlu0 %5490, %v6975_v49  }
 0x46c   :  { %v7085_v6 = vpop.permute.xlu0 %2478 }
 0x46d   :  { %5333 = vset.pattern.permute.xlu2 %v6574_v5  ;;  %10034 = vst [vmem:[#allocation272_spill] sm:$0xff] %v7085_v6  ;;  %v7103_v6 = vperm.slane %v6612_v19, 2 }
 0x46e   :  { %5334 = vset.pattern.permute.xlu1 %v6578_v25  ;;  %v7091_v60 = vpop.xlane.xlu2 %1212 }
 0x46f   :  { %10035 = vst [vmem:[#allocation273_spill] sm:$0xff] %v7091_v60  ;;  %v7110_v60 = vpop.xlane.xlu1 %1216 }
 0x470   :  { %10038 = vst [vmem:[#allocation276_spill] sm:$0xff] %v7103_v6 }
 0x471   :  { %10041 = vst [vmem:[#allocation279_spill] sm:$0xff] %v7110_v60 }
 0x472   :  { %3054 = vperm.xlu0 %5490, %v6987_v27  }
 0x474   :  { %v7098_v34 = vpop.permute.xlu0 %2963 }
 0x475   :  { %1921 = vperm.xlu2 %5333, %v6833_v7   ;;  %10037 = vst [vmem:[#allocation275_spill] sm:$0xff] %v7098_v34 }
 0x476   :  { %1927 = vperm.xlu1 %5334, %v6833_v7   ;;  %v7108_v22 = vpop.xlane.xlu2 %1218 }
 0x477   :  { %10040 = vst [vmem:[#allocation278_spill] sm:$0xff] %v7108_v22 }
 0x47a   :  { %5495 = vset.pattern.permute.xlu0 %v6574_v5 }
 0x47d   :  { %5335 = vset.pattern.permute.xlu2 %v6610_v41 }
 0x47e   :  { %5336 = vset.pattern.permute.xlu1 %v6629_v55  ;;  %v7121_v34 = vpop.xlane.xlu2 %1224 }
 0x47f   :  { %10044 = vst [vmem:[#allocation282_spill] sm:$0xff] %v7121_v34 }
 0x482   :  { %1630 = vperm.xlu0 %5495, %v6707_v48  }
 0x484   :  { %v7106_v13 = vpop.permute.xlu0 %2024 }
 0x485   :  { %1939 = vperm.xlu2 %5335, %v6833_v7   ;;  %10039 = vst [vmem:[#allocation277_spill] sm:$0xff] %v7106_v13  ;;  %v7123_v13 = vpop.xlane.xlu1 %1222 }
 0x486   :  { %1945 = vperm.xlu1 %5336, %v6833_v7   ;;  %10045 = vst [vmem:[#allocation283_spill] sm:$0xff] %v7123_v13  ;;  %v7130_v19 = vpop.xlane.xlu2 %1230 }
 0x487   :  { %10047 = vst [vmem:[#allocation285_spill] sm:$0xff] %v7130_v19 }
 0x48a   :  { %2115 = vperm.xlu0 %5495, %v7094_v11  }
 0x48c   :  { %v7118_v45 = vpop.permute.xlu0 %2509 }
 0x48d   :  { %5337 = vset.pattern.permute.xlu2 %v6633_v4  ;;  %10043 = vst [vmem:[#allocation281_spill] sm:$0xff] %v7118_v45  ;;  %v7133_v60 = vpop.xlane.xlu1 %1228 }
 0x48e   :  { %5338 = vset.pattern.permute.xlu1 %v6770_v18  ;;  %10048 = vst [vmem:[#allocation286_spill] sm:$0xff] %v7133_v60  ;;  %v7143_v27 = vpop.permute.xlu2 %1247 }
 0x48f   :  { %10051 = vst [vmem:[#allocation289_spill] sm:$0xff] %v7143_v27 }
 0x492   :  { %2600 = vperm.xlu0 %5495, %v7103_v6  }
 0x494   :  { %v7128_v22 = vpop.permute.xlu0 %2994 }
 0x495   :  { %1951 = vperm.xlu2 %5337, %v6833_v7   ;;  %10046 = vst [vmem:[#allocation284_spill] sm:$0xff] %v7128_v22  ;;  %v7140_v13 = vpop.permute.xlu1 %1241 }
 0x496   :  { %1957 = vperm.xlu1 %5338, %v6833_v7   ;;  %10050 = vst [vmem:[#allocation288_spill] sm:$0xff] %v7140_v13  ;;  %v7152_v60 = vpop.permute.xlu2 %1259 }
 0x497   :  { %10054 = vst [vmem:[#allocation292_spill] sm:$0xff] %v7152_v60 }
 0x49a   :  { %3085 = vperm.xlu0 %5495, %v7115_v39  }
 0x49d   :  { %5339 = vset.pattern.permute.xlu2 %v6657_v8  ;;  %v7147_v19 = vpop.permute.xlu1 %1265 }
 0x49e   :  { %5340 = vset.pattern.permute.xlu1 %v6671_v32  ;;  %10052 = vst [vmem:[#allocation290_spill] sm:$0xff] %v7147_v19  ;;  %v7161_v61 = vpop.permute.xlu2 %1271 }
 0x49f   :  { %10057 = vst [vmem:[#allocation295_spill] sm:$0xff] %v7161_v61 }
 0x4a2   :  { %5500 = vset.pattern.permute.xlu0 %v6633_v4 }
 0x4a4   :  { %v7137_v34 = vpop.permute.xlu0 %1295 }
 0x4a5   :  { %1969 = vperm.xlu2 %5339, %v6833_v7   ;;  %10049 = vst [vmem:[#allocation287_spill] sm:$0xff] %v7137_v34  ;;  %v7156_v45 = vpop.permute.xlu1 %1277 }
 0x4a6   :  { %1975 = vperm.xlu1 %5340, %v6833_v7   ;;  %10055 = vst [vmem:[#allocation293_spill] sm:$0xff] %v7156_v45 }
 0x4aa   :  { %1660 = vperm.xlu0 %5500, %v6707_v48  }
 0x4ac   :  { %v7149_v22 = vpop.permute.xlu0 %2054 }
 0x4ad   :  { %5341 = vset.pattern.permute.xlu2 %v6677_v14  ;;  %10053 = vst [vmem:[#allocation291_spill] sm:$0xff] %v7149_v22  ;;  %v7165_v28 = vpop.permute.xlu1 %1289 }
 0x4ae   :  { %5342 = vset.pattern.permute.xlu1 %v6807_v54  ;;  %10058 = vst [vmem:[#allocation296_spill] sm:$0xff] %v7165_v28 }
 0x4b2   :  { %2145 = vperm.xlu0 %5500, %v7094_v11  }
 0x4b4   :  { %v7159_v49 = vpop.permute.xlu0 %2539 }
 0x4b5   :  { %1981 = vperm.xlu2 %5341, %v6833_v7   ;;  %10056 = vst [vmem:[#allocation294_spill] sm:$0xff] %v7159_v49  ;;  %v7174_v44 = vpop.permute.xlu1 %1307 }
 0x4b6   :  { %1987 = vperm.xlu1 %5342, %v6833_v7   ;;  %v7168_v7 = vpop.permute.xlu2 %1283  ;;  %10061 = vst [vmem:[#allocation299_spill] sm:$0xff] %v7174_v44 }
 0x4b7   :  { %10059 = vst [vmem:[#allocation297_spill] sm:$0xff] %v7168_v7 }
 0x4ba   :  { %2630 = vperm.xlu0 %5500, %v7103_v6  }
 0x4bc   :  { %v7170_v38 = vpop.permute.xlu0 %3024 }
 0x4bd   :  { %5343 = vset.pattern.permute.xlu2 %v6519_v35  ;;  %10060 = vst [vmem:[#allocation298_spill] sm:$0xff] %v7170_v38  ;;  %v7183_v22 = vpop.permute.xlu1 %1319 }
 0x4be   :  { %5344 = vset.pattern.permute.xlu1 %v6524_v23  ;;  %v7177_v49 = vpop.permute.xlu2 %1301  ;;  %10064 = vst [vmem:[#allocation302_spill] sm:$0xff] %v7183_v22 }
 0x4bf   :  { %10062 = vst [vmem:[#allocation300_spill] sm:$0xff] %v7177_v49 }
 0x4c2   :  { %3115 = vperm.xlu0 %5500, %v7115_v39  }
 0x4c5   :  { %2000 = vperm.xlu2 %5343, %v6970_v62   ;;  %v7192_v12 = vpop.permute.xlu1 %1612 }
 0x4c6   :  { %2006 = vperm.xlu1 %5344, %v6970_v62   ;;  %v7186_v38 = vpop.permute.xlu2 %1313  ;;  %10067 = vst [vmem:[#allocation305_spill] sm:$0xff] %v7192_v12  ;;  %v1351_v12 = vmul.f32 %v6792_v20, %v5978_v51 }
 0x4c7   :  { %10065 = vst [vmem:[#allocation303_spill] sm:$0xff] %v7186_v38 }
 0x4ca   :  { %5505 = vset.pattern.permute.xlu0 %v6677_v14 }
 0x4cc   :  { %v7179_v43 = vpop.permute.xlu0 %1325 }
 0x4cd   :  { %5345 = vset.pattern.permute.xlu2 %v6535_v2  ;;  %10063 = vst [vmem:[#allocation301_spill] sm:$0xff] %v7179_v43 }
 0x4ce   :  { %5346 = vset.pattern.permute.xlu1 %v6574_v5  ;;  %v7195_v47 = vpop.permute.xlu2 %1331 }
 0x4cf   :  { %10068 = vst [vmem:[#allocation306_spill] sm:$0xff] %v7195_v47 }
 0x4d2   :  { %1690 = vperm.xlu0 %5505, %v6707_v48   ;;  %v1625_v48 = vpop.permute.xlu1 %1624 }
 0x4d4   :  { %v7189_v26 = vpop.permute.xlu0 %2084 }
 0x4d5   :  { %2012 = vperm.xlu2 %5345, %v6970_v62   ;;  %10066 = vst [vmem:[#allocation304_spill] sm:$0xff] %v7189_v26 }
 0x4d6   :  { %2018 = vperm.xlu1 %5346, %v6970_v62   ;;  %v7202_v24 = vpop.permute.xlu2 %1618 }
 0x4d7   :  { %10070 = vst [vmem:[#allocation308_spill] sm:$0xff] %v7202_v24 }
 0x4da   :  { %2175 = vperm.xlu0 %5505, %v7094_v11   ;;  %v7206_v26 = vpop.permute.xlu1 %1642 }
 0x4db   :  { %10071 = vst [vmem:[#allocation309_spill] sm:$0xff] %v7206_v26  ;;  %v1356_v26 = vmul.f32 %v7168_v7, %v6007_v63 }
 0x4dc   :  { %v7199_v53 = vpop.permute.xlu0 %2569 }
 0x4dd   :  { %5347 = vset.pattern.permute.xlu2 %v6604_v50  ;;  %10069 = vst [vmem:[#allocation307_spill] sm:$0xff] %v7199_v53  ;;  %v3417_v53 = vadd.f32 %v1625_v48, %v1351_v12 }
 0x4de   :  { %5348 = vset.pattern.permute.xlu1 %v6610_v41  ;;  %v7213_v3 = vpop.permute.xlu2 %1636 }
 0x4df   :  { %10073 = vst [vmem:[#allocation311_spill] sm:$0xff] %v7213_v3 }
 0x4e2   :  { %2660 = vperm.xlu0 %5505, %v7103_v6   ;;  %v1655_v24 = vpop.permute.xlu1 %1654 }
 0x4e4   :  { %v7211_v6 = vpop.permute.xlu0 %3054 }
 0x4e5   :  { %2030 = vperm.xlu2 %5347, %v6970_v62   ;;  %10072 = vst [vmem:[#allocation310_spill] sm:$0xff] %v7211_v6  ;;  %v3422_v6 = vadd.f32 %v1655_v24, %v1356_v26 }
 0x4e6   :  { %2036 = vperm.xlu1 %5348, %v6970_v62   ;;  %v7222_v51 = vpop.permute.xlu2 %1648 }
 0x4e7   :  { %10075 = vst [vmem:[#allocation313_spill] sm:$0xff] %v7222_v51 }
 0x4ea   :  { %3145 = vperm.xlu0 %5505, %v7115_v39   ;;  %v1673_v12 = vpop.permute.xlu1 %1672 }
 0x4ed   :  { %5349 = vset.pattern.permute.xlu2 %v6629_v55 }
 0x4ee   :  { %5350 = vset.pattern.permute.xlu1 %v6633_v4  ;;  %v7228_v48 = vpop.permute.xlu2 %1666 }
 0x4ef   :  { %10076 = vst [vmem:[#allocation314_spill] sm:$0xff] %v7228_v48 }
 0x4f2   :  { %5514 = vset.pattern.permute.xlu0 %v9692_v52 }
 0x4f3   :  { %3934 = vperm.xlu0 %5514, %v3417_v53   ;;  %v1359_v53 = vmul.f32 %v7177_v49, %v6019_v0  ;;  %v7242_v0 = vpop.permute.xlu1 %1684 }
 0x4f4   :  { %v7220_v39 = vpop.permute.xlu0 %1630  ;;  %10081 = vst [vmem:[#allocation319_spill] sm:$0xff] %v7242_v0 }
 0x4f5   :  { %2042 = vperm.xlu2 %5349, %v6970_v62   ;;  %10074 = vst [vmem:[#allocation312_spill] sm:$0xff] %v7220_v39  ;;  %v3425_v52 = vadd.f32 %v1673_v12, %v1359_v53 }
 0x4f6   :  { %2048 = vperm.xlu1 %5350, %v6970_v62   ;;  %v7234_v63 = vpop.permute.xlu2 %1678 }
 0x4f7   :  { %10078 = vst [vmem:[#allocation316_spill] sm:$0xff] %v7234_v63 }
 0x4fb   :  { %3949 = vperm.xlu0 %5514, %v3422_v6   ;;  %v7248_v12 = vpop.permute.xlu1 %1702 }
 0x4fc   :  { %v7230_v3 = vpop.permute.xlu0 %2115  ;;  %10083 = vst [vmem:[#allocation321_spill] sm:$0xff] %v7248_v12 }
 0x4fd   :  { %5351 = vset.pattern.permute.xlu2 %v6653_v15  ;;  %10077 = vst [vmem:[#allocation315_spill] sm:$0xff] %v7230_v3 }
 0x4fe   :  { %5352 = vset.pattern.permute.xlu1 %v6657_v8  ;;  %v7240_v26 = vpop.permute.xlu2 %1696 }
 0x4ff   :  { %10080 = vst [vmem:[#allocation318_spill] sm:$0xff] %v7240_v26 }
 0x503   :  { %3958 = vperm.xlu0 %5514, %v3425_v52   ;;  %v7254_v63 = vpop.permute.xlu1 %1715 }
 0x504   :  { %v7236_v24 = vpop.permute.xlu0 %2600  ;;  %10085 = vst [vmem:[#allocation323_spill] sm:$0xff] %v7254_v63 }
 0x505   :  { %2060 = vperm.xlu2 %5351, %v6970_v62   ;;  %10079 = vst [vmem:[#allocation317_spill] sm:$0xff] %v7236_v24  ;;  %v1365_v24 = vmul.f32 %v7140_v13, %v6050_v37 }
 0x506   :  { %2066 = vperm.xlu1 %5352, %v6970_v62   ;;  %v1710_v52 = vpop.permute.xlu2 %1709 }
 0x50b   :  { %v7262_v0 = vpop.permute.xlu1 %1733 }
 0x50c   :  { %v7245_v6 = vpop.permute.xlu0 %3085  ;;  %10088 = vst [vmem:[#allocation326_spill] sm:$0xff] %v7262_v0 }
 0x50d   :  { %5353 = vset.pattern.permute.xlu2 %v6671_v32  ;;  %10082 = vst [vmem:[#allocation320_spill] sm:$0xff] %v7245_v6 }
 0x50e   :  { %5354 = vset.pattern.permute.xlu1 %v6677_v14  ;;  %v1728_v3 = vpop.permute.xlu2 %1727 }
 0x513   :  { %v1746_v48 = vpop.permute.xlu1 %1745 }
 0x515   :  { %2072 = vperm.xlu2 %5353, %v6970_v62  }
 0x516   :  { %2078 = vperm.xlu1 %5354, %v6970_v62   ;;  %v7260_v6 = vpop.permute.xlu2 %1739 }
 0x517   :  { %10087 = vst [vmem:[#allocation325_spill] sm:$0xff] %v7260_v6 }
 0x51b   :  { %v1764_v63 = vpop.permute.xlu1 %1763 }
 0x51c   :  { %v7251_v53 = vpop.permute.xlu0 %1660 }
 0x51d   :  { %5355 = vset.pattern.permute.xlu2 %v6695_v59  ;;  %10084 = vst [vmem:[#allocation322_spill] sm:$0xff] %v7251_v53 }
 0x51e   :  { %5356 = vset.pattern.permute.xlu1 %v6519_v35  ;;  %v7266_v12 = vpop.permute.xlu2 %1757 }
 0x51f   :  { %10089 = vst [vmem:[#allocation327_spill] sm:$0xff] %v7266_v12 }
 0x523   :  { %v7280_v0 = vpop.permute.xlu1 %1775 }
 0x524   :  { %v7258_v26 = vpop.permute.xlu0 %2145 }
 0x525   :  { %2090 = vperm.xlu2 %5355, %v6970_v62   ;;  %10086 = vst [vmem:[#allocation324_spill] sm:$0xff] %v7258_v26  ;;  %v3431_v26 = vadd.f32 %v1710_v52, %v1365_v24  ;;  %v1371_v24 = vmul.f32 %v7156_v45, %v6086_v42 }
 0x526   :  { %2097 = vperm.xlu1 %5356, %v7094_v11   ;;  %v7272_v62 = vpop.permute.xlu2 %1769 }
 0x527   :  { %10091 = vst [vmem:[#allocation329_spill] sm:$0xff] %v7272_v62 }
 0x52c   :  { %v7268_v53 = vpop.permute.xlu0 %2630 }
 0x52d   :  { %5357 = vset.pattern.permute.xlu2 %v6524_v23  ;;  %10090 = vst [vmem:[#allocation328_spill] sm:$0xff] %v7268_v53  ;;  %v1362_v53 = vmul.f32 %v7183_v22, %v6037_v21 }
 0x52e   :  { %5358 = vset.pattern.permute.xlu1 %v6535_v2  ;;  %v7278_v6 = vpop.permute.xlu2 %1787 }
 0x52f   :  { %10093 = vst [vmem:[#allocation331_spill] sm:$0xff] %v7278_v6 }
 0x534   :  { %v7274_v51 = vpop.permute.xlu0 %3115 }
 0x535   :  { %2103 = vperm.xlu2 %5357, %v7094_v11   ;;  %10092 = vst [vmem:[#allocation330_spill] sm:$0xff] %v7274_v51  ;;  %v7286_v51 = vpop.permute.xlu1 %1793 }
 0x536   :  { %2109 = vperm.xlu1 %5358, %v7094_v11   ;;  %v1800_v62 = vpop.permute.xlu2 %1799 }
 0x53d   :  { %5359 = vset.pattern.permute.xlu2 %v6578_v25  ;;  %v7292_v6 = vpop.permute.xlu1 %1806 }
 0x53e   :  { %5360 = vset.pattern.permute.xlu1 %v6604_v50  ;;  %v1819_v21 = vpop.permute.xlu2 %1818 }
 0x544   :  { %v1691_v12 = vpop.permute.xlu0 %1690 }
 0x545   :  { %v3428_v39 = vadd.f32 %v1691_v12, %v1362_v53  ;;  %2121 = vperm.xlu2 %5359, %v7094_v11   ;;  %v1368_v12 = vmul.f32 %v7152_v60, %v6068_v58  ;;  %v7300_v37 = vpop.permute.xlu1 %1824  ;;  %v1374_v58 = vmul.f32 %v7137_v34, %v6112_v10 }
 0x546   :  { %2127 = vperm.xlu1 %5360, %v7094_v11  }
 0x547   :  { %3967 = vperm.xlu0 %5514, %v3428_v39   ;;  %v3434_v53 = vadd.f32 %v1728_v3, %v1368_v12  ;;  %v7298_v39 = vpop.permute.xlu2 %1830  ;;  %v3440_v12 = vadd.f32 %v1764_v63, %v1374_v58  ;;  %v1380_v63 = vmul.f32 %v7195_v47, %v6147_v1 }
 0x549   :  { %v3446_v58 = vadd.f32 %v1800_v62, %v1380_v63  ;;  %v1386_v62 = vmul.f32 %v7161_v61, %v6181_v31 }
 0x54d   :  { %5361 = vset.pattern.permute.xlu2 %v6610_v41  ;;  %v1837_v52 = vpop.permute.xlu1 %1836 }
 0x54e   :  { %5362 = vset.pattern.permute.xlu1 %v6629_v55  ;;  %v3452_v63 = vadd.f32 %v1837_v52, %v1386_v62 }
 0x54f   :  { %3976 = vperm.xlu0 %5514, %v3431_v26   ;;  %v3437_v26 = vadd.f32 %v1746_v48, %v1371_v24  ;;  %v7308_v3 = vpop.permute.xlu2 %1848  ;;  %v1377_v48 = vmul.f32 %v7186_v38, %v6127_v40 }
 0x551   :  { %v3443_v24 = vadd.f32 %v6871_v16, %v1377_v48 }
 0x555   :  { %2133 = vperm.xlu2 %5361, %v7094_v11   ;;  %v1855_v42 = vpop.permute.xlu1 %1854 }
 0x556   :  { %2139 = vperm.xlu1 %5362, %v7094_v11  }
 0x557   :  { %3985 = vperm.xlu0 %5514, %v3434_v53   ;;  %v7312_v53 = vpop.permute.xlu2 %1860 }
 0x55d   :  { %5363 = vset.pattern.permute.xlu2 %v6770_v18 }
 0x55e   :  { %5364 = vset.pattern.permute.xlu1 %v6653_v15 }
 0x55f   :  { %3994 = vperm.xlu0 %5514, %v3437_v26   ;;  %v7319_v10 = vpop.permute.xlu2 %1878  ;;  %v7321_v26 = vpop.permute.xlu1 %1866 }
 0x565   :  { %2151 = vperm.xlu2 %5363, %v7094_v11  }
 0x566   :  { %2157 = vperm.xlu1 %5364, %v7094_v11  }
 0x567   :  { %4003 = vperm.xlu0 %5514, %v3440_v12   ;;  %v1891_v40 = vpop.permute.xlu2 %1890  ;;  %v7327_v16 = vpop.permute.xlu1 %1884  ;;  %v1383_v12 = vmul.f32 %v6792_v20, %v6161_v30 }
 0x569   :  { %v3449_v48 = vadd.f32 %v1819_v21, %v1383_v12  ;;  %v1389_v21 = vmul.f32 %v7165_v28, %v6198_v29  ;;  %v1395_v29 = vmul.f32 %v7179_v43, %v6228_v56 }
 0x56b   :  { %v3455_v12 = vadd.f32 %v1855_v42, %v1389_v21  ;;  %v1398_v21 = vmul.f32 %v7143_v27, %v6246_v46 }
 0x56d   :  { %5365 = vset.pattern.permute.xlu2 %v6657_v8 }
 0x56e   :  { %5366 = vset.pattern.permute.xlu1 %v6671_v32 }
 0x56f   :  { %4012 = vperm.xlu0 %5514, %v3443_v24   ;;  %v1910_v24 = vpop.permute.xlu2 %1909  ;;  %v7333_v1 = vpop.permute.xlu1 %1896 }
 0x575   :  { %2163 = vperm.xlu2 %5365, %v7094_v11  }
 0x576   :  { %2169 = vperm.xlu1 %5366, %v7094_v11  }
 0x577   :  { %4021 = vperm.xlu0 %5514, %v3446_v58   ;;  %v7339_v58 = vpop.permute.xlu2 %1921  ;;  %v7341_v30 = vpop.permute.xlu1 %1915 }
 0x57d   :  { %5367 = vset.pattern.permute.xlu2 %v6807_v54 }
 0x57e   :  { %5368 = vset.pattern.permute.xlu1 %v6695_v59 }
 0x57f   :  { %4030 = vperm.xlu0 %5514, %v3449_v48   ;;  %v7347_v31 = vpop.permute.xlu2 %1939  ;;  %v1928_v52 = vpop.permute.xlu1 %1927 }
 0x585   :  { %2181 = vperm.xlu2 %5367, %v7094_v11  }
 0x586   :  { %2187 = vperm.xlu1 %5368, %v7094_v11   ;;  %v1392_v11 = vmul.f32 %v7174_v44, %v6216_v33 }
 0x587   :  { %4039 = vperm.xlu0 %5514, %v3452_v63   ;;  %v7356_v42 = vpop.permute.xlu2 %1951  ;;  %v1946_v62 = vpop.permute.xlu1 %1945  ;;  %v3461_v63 = vadd.f32 %v1891_v40, %v1395_v29  ;;  %v1401_v40 = vmul.f32 %v7147_v19, %v6258_v17 }
 0x588   :  { %v3458_v48 = vadd.f32 %v6952_v36, %v1392_v11 }
 0x58d   :  { %5369 = vset.pattern.permute.xlu2 %v6519_v35 }
 0x58e   :  { %5370 = vset.pattern.permute.xlu1 %v6524_v23 }
 0x58f   :  { %4048 = vperm.xlu0 %5514, %v3455_v12   ;;  %v7360_v33 = vpop.permute.xlu2 %1969  ;;  %v7362_v36 = vpop.permute.xlu1 %1957  ;;  %v3464_v12 = vadd.f32 %v1910_v24, %v1398_v21  ;;  %v1404_v24 = vmul.f32 %v7168_v7, %v6278_v57 }
 0x595   :  { %2194 = vperm.xlu2 %5369, %v6596_v9  }
 0x596   :  { %2200 = vperm.xlu1 %5370, %v6596_v9  }
 0x597   :  { %4057 = vperm.xlu0 %5514, %v3458_v48   ;;  %v1982_v56 = vpop.permute.xlu2 %1981  ;;  %v7368_v11 = vpop.permute.xlu1 %1975  ;;  %v3467_v48 = vadd.f32 %v1928_v52, %v1401_v40  ;;  %v10097_v52 = vld [vmem:[#allocation79_spill] sm:$0xff]  ;;  %v10098_v40 = vld [vmem:[#allocation260_spill] sm:$0xff] }
 0x59d   :  { %5371 = vset.pattern.permute.xlu2 %v6574_v5 }
 0x59e   :  { %5372 = vset.pattern.permute.xlu1 %v6578_v25 }
 0x59f   :  { %4066 = vperm.xlu0 %5514, %v3461_v63   ;;  %v2001_v29 = vpop.permute.xlu2 %2000  ;;  %v7374_v46 = vpop.permute.xlu1 %1987  ;;  %v3470_v63 = vadd.f32 %v1946_v62, %v1404_v24  ;;  %v10100_v24 = vld [vmem:[#allocation82_spill] sm:$0xff] }
 0x5a0   :  { %10094 = vst [vmem:[#allocation332_spill] sm:$0xff] %v7374_v46 }
 0x5a5   :  { %2212 = vperm.xlu2 %5371, %v6596_v9  }
 0x5a6   :  { %2218 = vperm.xlu1 %5372, %v6596_v9  }
 0x5a7   :  { %4075 = vperm.xlu0 %5514, %v3464_v12   ;;  %v7380_v21 = vpop.permute.xlu2 %2012  ;;  %v7382_v17 = vpop.permute.xlu1 %2006  ;;  %v1407_v12 = vmul.f32 %v7177_v49, %v10097_v52 }
 0x5a8   :  { %10095 = vst [vmem:[#allocation333_spill] sm:$0xff] %v7380_v21 }
 0x5a9   :  { %10096 = vst [vmem:[#allocation334_spill] sm:$0xff] %v7382_v17 }
 0x5ad   :  { %5373 = vset.pattern.permute.xlu2 %v6604_v50 }
 0x5ae   :  { %5374 = vset.pattern.permute.xlu1 %v6610_v41 }
 0x5af   :  { %4084 = vperm.xlu0 %5514, %v3467_v48   ;;  %v3473_v48 = vadd.f32 %v10098_v40, %v1407_v12  ;;  %v7389_v57 = vpop.permute.xlu2 %2030  ;;  %v2019_v62 = vpop.permute.xlu1 %2018  ;;  %v10102_v40 = vld [vmem:[#allocation85_spill] sm:$0xff] }
 0x5b0   :  { %10099 = vst [vmem:[#allocation79_spill] sm:$0xff] %v7389_v57  ;;  %v1413_v21 = vmul.f32 %v7140_v13, %v10102_v40 }
 0x5b2   :  { %v3479_v17 = vadd.f32 %v2001_v29, %v1413_v21  ;;  %v10107_v21 = vld [vmem:[#allocation92_spill] sm:$0xff] }
 0x5b5   :  { %2224 = vperm.xlu2 %5373, %v6596_v9  }
 0x5b6   :  { %2230 = vperm.xlu1 %5374, %v6596_v9  }
 0x5b7   :  { %4093 = vperm.xlu0 %5514, %v3470_v63   ;;  %v1410_v63 = vmul.f32 %v7183_v22, %v10100_v24  ;;  %v7395_v52 = vpop.permute.xlu2 %2042  ;;  %v2037_v12 = vpop.permute.xlu1 %2036  ;;  %v10105_v24 = vld [vmem:[#allocation89_spill] sm:$0xff] }
 0x5b8   :  { %10101 = vst [vmem:[#allocation260_spill] sm:$0xff] %v7395_v52  ;;  %v1419_v52 = vmul.f32 %v7156_v45, %v10107_v21 }
 0x5b9   :  { %v3476_v46 = vadd.f32 %v1982_v56, %v1410_v63  ;;  %v1416_v63 = vmul.f32 %v7152_v60, %v10105_v24 }
 0x5bd   :  { %5375 = vset.pattern.permute.xlu2 %v6633_v4 }
 0x5be   :  { %5376 = vset.pattern.permute.xlu1 %v6770_v18 }
 0x5bf   :  { %4102 = vperm.xlu0 %5514, %v3473_v48   ;;  %v7401_v48 = vpop.permute.xlu2 %2060  ;;  %v7403_v56 = vpop.permute.xlu1 %2048 }
 0x5c0   :  { %10103 = vst [vmem:[#allocation82_spill] sm:$0xff] %v7401_v48 }
 0x5c1   :  { %10104 = vst [vmem:[#allocation85_spill] sm:$0xff] %v7403_v56  ;;  %v10110_v56 = vld [vmem:[#allocation291_spill] sm:$0xff] }
 0x5c5   :  { %2242 = vperm.xlu2 %5375, %v6596_v9  }
 0x5c6   :  { %2248 = vperm.xlu1 %5376, %v6596_v9  }
 0x5c7   :  { %4111 = vperm.xlu0 %5514, %v3476_v46   ;;  %v3482_v46 = vadd.f32 %v2019_v62, %v1416_v63  ;;  %v2073_v40 = vpop.permute.xlu2 %2072  ;;  %v7409_v29 = vpop.permute.xlu1 %2066  ;;  %v10109_v62 = vld [vmem:[#allocation95_spill] sm:$0xff] }
 0x5c8   :  { %10106 = vst [vmem:[#allocation89_spill] sm:$0xff] %v7409_v29  ;;  %v1422_v63 = vmul.f32 %v7137_v34, %v10109_v62 }
 0x5cd   :  { %5377 = vset.pattern.permute.xlu2 %v6653_v15 }
 0x5ce   :  { %5378 = vset.pattern.permute.xlu1 %v6657_v8 }
 0x5cf   :  { %4120 = vperm.xlu0 %5514, %v3479_v17   ;;  %v3485_v17 = vadd.f32 %v2037_v12, %v1419_v52  ;;  %v2091_v48 = vpop.permute.xlu2 %2090  ;;  %v7415_v24 = vpop.permute.xlu1 %2078  ;;  %v10113_v12 = vld [vmem:[#allocation98_spill] sm:$0xff] }
 0x5d0   :  { %10108 = vst [vmem:[#allocation92_spill] sm:$0xff] %v7415_v24 }
 0x5d5   :  { %2254 = vperm.xlu2 %5377, %v6596_v9  }
 0x5d6   :  { %2260 = vperm.xlu1 %5378, %v6596_v9  }
 0x5d7   :  { %4129 = vperm.xlu0 %5514, %v3482_v46   ;;  %v3488_v46 = vadd.f32 %v10110_v56, %v1422_v63  ;;  %v7422_v21 = vpop.permute.xlu2 %2103  ;;  %v7424_v52 = vpop.permute.xlu1 %2097  ;;  %v10114_v63 = vld [vmem:[#allocation101_spill] sm:$0xff] }
 0x5d8   :  { %10111 = vst [vmem:[#allocation95_spill] sm:$0xff] %v7422_v21  ;;  %v1428_v24 = vmul.f32 %v7195_v47, %v10114_v63  ;;  %v10115_v21 = vld [vmem:[#allocation168_spill] sm:$0xff] }
 0x5d9   :  { %10112 = vst [vmem:[#allocation291_spill] sm:$0xff] %v7424_v52 }
 0x5dd   :  { %5379 = vset.pattern.permute.xlu2 %v6677_v14 }
 0x5de   :  { %5380 = vset.pattern.permute.xlu1 %v6807_v54 }
 0x5df   :  { %4138 = vperm.xlu0 %5514, %v3485_v17   ;;  %v1425_v17 = vmul.f32 %v7186_v38, %v10113_v12  ;;  %v7430_v62 = vpop.permute.xlu2 %2121  ;;  %v2110_v56 = vpop.permute.xlu1 %2109  ;;  %v10117_v12 = vld [vmem:[#allocation104_spill] sm:$0xff] }
 0x5e1   :  { %v3491_v29 = vadd.f32 %v2073_v40, %v1425_v17  ;;  %v1431_v17 = vmul.f32 %v6792_v20, %v10117_v12  ;;  %v10122_v12 = vld [vmem:[#allocation110_spill] sm:$0xff] }
 0x5e3   :  { %v3497_v57 = vadd.f32 %v2110_v56, %v1431_v17  ;;  %v1437_v17 = vmul.f32 %v7165_v28, %v10122_v12 }
 0x5e5   :  { %2272 = vperm.xlu2 %5379, %v6596_v9  }
 0x5e6   :  { %2278 = vperm.xlu1 %5380, %v6596_v9  }
 0x5e7   :  { %4147 = vperm.xlu0 %5514, %v3488_v46   ;;  %v3494_v46 = vadd.f32 %v2091_v48, %v1428_v24  ;;  %v7436_v52 = vpop.permute.xlu2 %2133  ;;  %v2128_v40 = vpop.permute.xlu1 %2127 }
 0x5e8   :  { %10116 = vst [vmem:[#allocation98_spill] sm:$0xff] %v7436_v52 }
 0x5ed   :  { %5381 = vset.pattern.permute.xlu2 %v6695_v59 }
 0x5ee   :  { %5382 = vset.pattern.permute.xlu1 %v6519_v35 }
 0x5ef   :  { %4156 = vperm.xlu0 %5514, %v3491_v29   ;;  %v7442_v29 = vpop.permute.xlu2 %2151  ;;  %v7444_v48 = vpop.permute.xlu1 %2139 }
 0x5f0   :  { %10118 = vst [vmem:[#allocation101_spill] sm:$0xff] %v7442_v29 }
 0x5f1   :  { %10119 = vst [vmem:[#allocation168_spill] sm:$0xff] %v7444_v48 }
 0x5f5   :  { %2284 = vperm.xlu2 %5381, %v6596_v9   ;;  %v10120_v9 = vld [vmem:[#allocation107_spill] sm:$0xff] }
 0x5f6   :  { %2291 = vperm.xlu1 %5382, %v10115_v21   ;;  %v1434_v24 = vmul.f32 %v7161_v61, %v10120_v9 }
 0x5f7   :  { %4165 = vperm.xlu0 %5514, %v3494_v46   ;;  %v2164_v46 = vpop.permute.xlu2 %2163  ;;  %v7450_v56 = vpop.permute.xlu1 %2157 }
 0x5f8   :  { %v3500_v63 = vadd.f32 %v2128_v40, %v1434_v24  ;;  %10121 = vst [vmem:[#allocation104_spill] sm:$0xff] %v7450_v56  ;;  %v10125_v24 = vld [vmem:[#allocation113_spill] sm:$0xff] }
 0x5f9   :  { %v1440_v29 = vmul.f32 %v7174_v44, %v10125_v24 }
 0x5fd   :  { %5383 = vset.pattern.permute.xlu2 %v6535_v2 }
 0x5fe   :  { %5384 = vset.pattern.permute.xlu1 %v6574_v5 }
 0x5ff   :  { %4174 = vperm.xlu0 %5514, %v3497_v57   ;;  %v10123_v57 = vld [vmem:[#allocation324_spill] sm:$0xff]  ;;  %v2182_v9 = vpop.permute.xlu2 %2181  ;;  %v7457_v40 = vpop.permute.xlu1 %2169 }
 0x600   :  { %v3503_v52 = vadd.f32 %v10123_v57, %v1437_v17  ;;  %10124 = vst [vmem:[#allocation107_spill] sm:$0xff] %v7457_v40  ;;  %v10128_v57 = vld [vmem:[#allocation116_spill] sm:$0xff] }
 0x601   :  { %v1443_v56 = vmul.f32 %v7179_v43, %v10128_v57 }
 0x605   :  { %2303 = vperm.xlu2 %5383, %v10115_v21  }
 0x606   :  { %2309 = vperm.xlu1 %5384, %v10115_v21  }
 0x607   :  { %4183 = vperm.xlu0 %5514, %v3500_v63   ;;  %v3506_v63 = vadd.f32 %v2164_v46, %v1440_v29  ;;  %v7463_v12 = vpop.permute.xlu2 %2194  ;;  %v7465_v17 = vpop.permute.xlu1 %2187  ;;  %v10130_v46 = vld [vmem:[#allocation119_spill] sm:$0xff] }
 0x608   :  { %10126 = vst [vmem:[#allocation110_spill] sm:$0xff] %v7463_v12  ;;  %v1446_v40 = vmul.f32 %v7143_v27, %v10130_v46  ;;  %v10135_v46 = vld [vmem:[#allocation202_spill] sm:$0xff] }
 0x609   :  { %10127 = vst [vmem:[#allocation324_spill] sm:$0xff] %v7465_v17 }
 0x60d   :  { %5385 = vset.pattern.permute.xlu2 %v6578_v25 }
 0x60e   :  { %5386 = vset.pattern.permute.xlu1 %v6604_v50 }
 0x60f   :  { %4192 = vperm.xlu0 %5514, %v3503_v52   ;;  %v3509_v52 = vadd.f32 %v2182_v9, %v1443_v56  ;;  %v7471_v24 = vpop.permute.xlu2 %2212  ;;  %v2201_v29 = vpop.permute.xlu1 %2200  ;;  %v10132_v9 = vld [vmem:[#allocation122_spill] sm:$0xff] }
 0x610   :  { %10129 = vst [vmem:[#allocation113_spill] sm:$0xff] %v7471_v24  ;;  %v1449_v57 = vmul.f32 %v7147_v19, %v10132_v9  ;;  %v10136_v9 = vld [vmem:[#allocation128_spill] sm:$0xff] }
 0x615   :  { %2315 = vperm.xlu2 %5385, %v10115_v21  }
 0x616   :  { %2321 = vperm.xlu1 %5386, %v10115_v21  }
 0x617   :  { %4201 = vperm.xlu0 %5514, %v3506_v63   ;;  %v3512_v63 = vadd.f32 %v2201_v29, %v1446_v40  ;;  %v7477_v12 = vpop.permute.xlu2 %2224  ;;  %v10134_v40 = vld [vmem:[#allocation125_spill] sm:$0xff] }
 0x618   :  { %10131 = vst [vmem:[#allocation116_spill] sm:$0xff] %v7477_v12  ;;  %v2219_v56 = vpop.permute.xlu1 %2218  ;;  %v1452_v29 = vmul.f32 %v7168_v7, %v10134_v40  ;;  %v10181_v12 = vld [vmem:[#allocation281_spill] sm:$0xff] }
 0x619   :  { %v3515_v17 = vadd.f32 %v2219_v56, %v1449_v57  ;;  %v1455_v56 = vmul.f32 %v7177_v49, %v10136_v9  ;;  %v10142_v9 = vld [vmem:[#allocation198_spill] sm:$0xff] }
 0x61a   :  { %v3518_v24 = vadd.f32 %v10135_v46, %v1452_v29 }
 0x61d   :  { %5387 = vset.pattern.permute.xlu2 %v6629_v55 }
 0x61e   :  { %5388 = vset.pattern.permute.xlu1 %v6633_v4 }
 0x61f   :  { %4210 = vperm.xlu0 %5514, %v3509_v52   ;;  %v7483_v52 = vpop.permute.xlu2 %2242 }
 0x620   :  { %10133 = vst [vmem:[#allocation119_spill] sm:$0xff] %v7483_v52  ;;  %v10137_v52 = vld [vmem:[#allocation133_spill] sm:$0xff] }
 0x621   :  { %v1458_v40 = vmul.f32 %v7183_v22, %v10137_v52 }
 0x625   :  { %2333 = vperm.xlu2 %5387, %v10115_v21  }
 0x626   :  { %2339 = vperm.xlu1 %5388, %v10115_v21  }
 0x627   :  { %4219 = vperm.xlu0 %5514, %v3512_v63  }
 0x62d   :  { %5389 = vset.pattern.permute.xlu2 %v6770_v18 }
 0x62e   :  { %5390 = vset.pattern.permute.xlu1 %v6653_v15 }
 0x62f   :  { %4228 = vperm.xlu0 %5514, %v3515_v17   ;;  %v2255_v63 = vpop.permute.xlu2 %2254 }
 0x630   :  { %v3521_v57 = vadd.f32 %v2255_v63, %v1455_v56  ;;  %v10143_v56 = vld [vmem:[#allocation136_spill] sm:$0xff] }
 0x635   :  { %2345 = vperm.xlu2 %5389, %v10115_v21  }
 0x636   :  { %2351 = vperm.xlu1 %5390, %v10115_v21  }
 0x637   :  { %4237 = vperm.xlu0 %5514, %v3518_v24   ;;  %v7498_v24 = vpop.permute.xlu1 %2230 }
 0x638   :  { %10138 = vst [vmem:[#allocation122_spill] sm:$0xff] %v7498_v24 }
 0x63d   :  { %5391 = vset.pattern.permute.xlu2 %v6671_v32 }
 0x63e   :  { %5392 = vset.pattern.permute.xlu1 %v6677_v14 }
 0x63f   :  { %4246 = vperm.xlu0 %5514, %v3521_v57   ;;  %v2273_v17 = vpop.permute.xlu2 %2272  ;;  %v7502_v46 = vpop.permute.xlu1 %2248  ;;  %v1461_v57 = vmul.f32 %v7140_v13, %v10143_v56 }
 0x640   :  { %v3524_v29 = vadd.f32 %v2273_v17, %v1458_v40  ;;  %10139 = vst [vmem:[#allocation125_spill] sm:$0xff] %v7502_v46 }
 0x645   :  { %2363 = vperm.xlu2 %5391, %v10115_v21  }
 0x646   :  { %2369 = vperm.xlu1 %5392, %v10115_v21  }
 0x647   :  { %4255 = vperm.xlu0 %5514, %v3524_v29  }
 0x648   :  { %v7506_v63 = vpop.permute.xlu1 %2260 }
 0x649   :  { %10140 = vst [vmem:[#allocation202_spill] sm:$0xff] %v7506_v63 }
 0x64d   :  { %5393 = vset.pattern.permute.xlu2 %v6807_v54 }
 0x64e   :  { %5394 = vset.pattern.permute.xlu1 %v6695_v59 }
 0x655   :  { %2375 = vperm.xlu2 %5393, %v10115_v21  }
 0x656   :  { %2381 = vperm.xlu1 %5394, %v10115_v21   ;;  %v7518_v21 = vpop.permute.xlu2 %2284 }
 0x657   :  { %10144 = vst [vmem:[#allocation133_spill] sm:$0xff] %v7518_v21  ;;  %v10149_v21 = vld [vmem:[#allocation228_spill] sm:$0xff] }
 0x658   :  { %v7510_v52 = vpop.permute.xlu1 %2278 }
 0x659   :  { %10141 = vst [vmem:[#allocation128_spill] sm:$0xff] %v7510_v52  ;;  %v10146_v52 = vld [vmem:[#allocation139_spill] sm:$0xff] }
 0x65a   :  { %v1464_v63 = vmul.f32 %v7152_v60, %v10146_v52 }
 0x65d   :  { %5395 = vset.pattern.permute.xlu2 %v6524_v23 }
 0x65e   :  { %5396 = vset.pattern.permute.xlu1 %v6535_v2 }
 0x65f   :  { %v7522_v29 = vpop.permute.xlu2 %2303 }
 0x660   :  { %10145 = vst [vmem:[#allocation198_spill] sm:$0xff] %v7522_v29 }
 0x665   :  { %2394 = vperm.xlu2 %5395, %v10142_v9  }
 0x666   :  { %2400 = vperm.xlu1 %5396, %v10142_v9  }
 0x668   :  { %v2292_v17 = vpop.permute.xlu1 %2291 }
 0x669   :  { %v3527_v40 = vadd.f32 %v2292_v17, %v1461_v57  ;;  %v10147_v57 = vld [vmem:[#allocation143_spill] sm:$0xff] }
 0x66a   :  { %v1467_v17 = vmul.f32 %v7156_v45, %v10147_v57 }
 0x66b   :  { %4264 = vperm.xlu0 %5514, %v3527_v40  }
 0x66c   :  { %v3533_v24 = vadd.f32 %v10149_v21, %v1467_v17 }
 0x66d   :  { %5397 = vset.pattern.permute.xlu2 %v6574_v5 }
 0x66e   :  { %5398 = vset.pattern.permute.xlu1 %v6578_v25 }
 0x66f   :  { %v7530_v40 = vpop.permute.xlu2 %2315 }
 0x670   :  { %10148 = vst [vmem:[#allocation136_spill] sm:$0xff] %v7530_v40 }
 0x675   :  { %2406 = vperm.xlu2 %5397, %v10142_v9  }
 0x676   :  { %2412 = vperm.xlu1 %5398, %v10142_v9  }
 0x678   :  { %v2310_v46 = vpop.permute.xlu1 %2309 }
 0x679   :  { %v3530_v56 = vadd.f32 %v2310_v46, %v1464_v63  ;;  %v10151_v46 = vld [vmem:[#allocation146_spill] sm:$0xff] }
 0x67a   :  { %v1470_v63 = vmul.f32 %v7137_v34, %v10151_v46 }
 0x67b   :  { %4273 = vperm.xlu0 %5514, %v3530_v56  }
 0x67d   :  { %5399 = vset.pattern.permute.xlu2 %v6610_v41 }
 0x67e   :  { %5400 = vset.pattern.permute.xlu1 %v6629_v55 }
 0x67f   :  { %v7535_v52 = vpop.permute.xlu2 %2333 }
 0x680   :  { %10150 = vst [vmem:[#allocation139_spill] sm:$0xff] %v7535_v52 }
 0x683   :  { %4282 = vperm.xlu0 %5514, %v3533_v24   ;;  %v10152_v24 = vld [vmem:[#allocation149_spill] sm:$0xff] }
 0x684   :  { %v1473_v21 = vmul.f32 %v7186_v38, %v10152_v24  ;;  %v10158_v24 = vld [vmem:[#allocation152_spill] sm:$0xff] }
 0x685   :  { %2424 = vperm.xlu2 %5399, %v10142_v9  }
 0x686   :  { %2430 = vperm.xlu1 %5400, %v10142_v9  }
 0x688   :  { %v7549_v46 = vpop.permute.xlu1 %2321 }
 0x689   :  { %10153 = vst [vmem:[#allocation143_spill] sm:$0xff] %v7549_v46 }
 0x68d   :  { %5401 = vset.pattern.permute.xlu2 %v6633_v4 }
 0x68e   :  { %5402 = vset.pattern.permute.xlu1 %v6770_v18 }
 0x68f   :  { %v2346_v56 = vpop.permute.xlu2 %2345 }
 0x690   :  { %v3536_v57 = vadd.f32 %v2346_v56, %v1470_v63 }
 0x692   :  { %4291 = vperm.xlu0 %5514, %v3536_v57   ;;  %v10157_v57 = vld [vmem:[#allocation237_spill] sm:$0xff] }
 0x695   :  { %2436 = vperm.xlu2 %5401, %v10142_v9  }
 0x696   :  { %2442 = vperm.xlu1 %5402, %v10142_v9  }
 0x698   :  { %v7553_v63 = vpop.permute.xlu1 %2339 }
 0x699   :  { %10154 = vst [vmem:[#allocation228_spill] sm:$0xff] %v7553_v63 }
 0x69d   :  { %5403 = vset.pattern.permute.xlu2 %v6657_v8 }
 0x69e   :  { %5404 = vset.pattern.permute.xlu1 %v6671_v32 }
 0x69f   :  { %v2364_v17 = vpop.permute.xlu2 %2363 }
 0x6a0   :  { %v3539_v52 = vadd.f32 %v2364_v17, %v1473_v21  ;;  %v1476_v21 = vmul.f32 %v7195_v47, %v10158_v24 }
 0x6a2   :  { %4300 = vperm.xlu0 %5514, %v3539_v52  }
 0x6a5   :  { %2454 = vperm.xlu2 %5403, %v10142_v9  }
 0x6a6   :  { %2460 = vperm.xlu1 %5404, %v10142_v9  }
 0x6a8   :  { %v7557_v56 = vpop.permute.xlu1 %2351 }
 0x6a9   :  { %10155 = vst [vmem:[#allocation146_spill] sm:$0xff] %v7557_v56  ;;  %v10161_v56 = vld [vmem:[#allocation155_spill] sm:$0xff] }
 0x6aa   :  { %v1479_v46 = vmul.f32 %v6792_v20, %v10161_v56 }
 0x6ad   :  { %5405 = vset.pattern.permute.xlu2 %v6677_v14 }
 0x6ae   :  { %5406 = vset.pattern.permute.xlu1 %v6807_v54 }
 0x6b5   :  { %2466 = vperm.xlu2 %5405, %v10142_v9  }
 0x6b6   :  { %2472 = vperm.xlu1 %5406, %v10142_v9   ;;  %v7569_v9 = vpop.permute.xlu2 %2375 }
 0x6b7   :  { %10159 = vst [vmem:[#allocation237_spill] sm:$0xff] %v7569_v9  ;;  %v10164_v9 = vld [vmem:[#allocation254_spill] sm:$0xff] }
 0x6b8   :  { %v7561_v52 = vpop.permute.xlu1 %2369 }
 0x6b9   :  { %10156 = vst [vmem:[#allocation149_spill] sm:$0xff] %v7561_v52 }
 0x6bd   :  { %5407 = vset.pattern.permute.xlu2 %v6519_v35 }
 0x6be   :  { %5408 = vset.pattern.permute.xlu1 %v6524_v23 }
 0x6bf   :  { %v7573_v52 = vpop.permute.xlu2 %2394 }
 0x6c0   :  { %10160 = vst [vmem:[#allocation152_spill] sm:$0xff] %v7573_v52 }
 0x6c5   :  { %2485 = vperm.xlu2 %5407, %v10157_v57  }
 0x6c6   :  { %2491 = vperm.xlu1 %5408, %v10157_v57  }
 0x6c8   :  { %v2382_v17 = vpop.permute.xlu1 %2381 }
 0x6c9   :  { %v3542_v63 = vadd.f32 %v2382_v17, %v1476_v21 }
 0x6cb   :  { %4309 = vperm.xlu0 %5514, %v3542_v63   ;;  %v10162_v63 = vld [vmem:[#allocation158_spill] sm:$0xff] }
 0x6cc   :  { %v1482_v21 = vmul.f32 %v7161_v61, %v10162_v63 }
 0x6cd   :  { %5409 = vset.pattern.permute.xlu2 %v6535_v2 }
 0x6ce   :  { %5410 = vset.pattern.permute.xlu1 %v6574_v5  ;;  %v3548_v29 = vadd.f32 %v10164_v9, %v1482_v21 }
 0x6cf   :  { %v7581_v17 = vpop.permute.xlu2 %2406 }
 0x6d0   :  { %10163 = vst [vmem:[#allocation155_spill] sm:$0xff] %v7581_v17 }
 0x6d5   :  { %2497 = vperm.xlu2 %5409, %v10157_v57  }
 0x6d6   :  { %2503 = vperm.xlu1 %5410, %v10157_v57  }
 0x6d8   :  { %v2401_v40 = vpop.permute.xlu1 %2400 }
 0x6d9   :  { %v3545_v24 = vadd.f32 %v2401_v40, %v1479_v46  ;;  %v10166_v40 = vld [vmem:[#allocation161_spill] sm:$0xff] }
 0x6da   :  { %v1485_v46 = vmul.f32 %v7165_v28, %v10166_v40 }
 0x6db   :  { %4318 = vperm.xlu0 %5514, %v3545_v24  }
 0x6dd   :  { %5411 = vset.pattern.permute.xlu2 %v6604_v50 }
 0x6de   :  { %5412 = vset.pattern.permute.xlu1 %v6610_v41 }
 0x6df   :  { %v7586_v56 = vpop.permute.xlu2 %2424 }
 0x6e0   :  { %10165 = vst [vmem:[#allocation158_spill] sm:$0xff] %v7586_v56 }
 0x6e3   :  { %4327 = vperm.xlu0 %5514, %v3548_v29   ;;  %v10167_v29 = vld [vmem:[#allocation164_spill] sm:$0xff] }
 0x6e4   :  { %v1488_v9 = vmul.f32 %v7174_v44, %v10167_v29  ;;  %v10173_v29 = vld [vmem:[#allocation167_spill] sm:$0xff] }
 0x6e5   :  { %2515 = vperm.xlu2 %5411, %v10157_v57  }
 0x6e6   :  { %2521 = vperm.xlu1 %5412, %v10157_v57  }
 0x6e8   :  { %v7600_v40 = vpop.permute.xlu1 %2412 }
 0x6e9   :  { %10168 = vst [vmem:[#allocation254_spill] sm:$0xff] %v7600_v40  ;;  %v7618_v40 = vpop.permute.xlu0 %2175 }
 0x6ed   :  { %5413 = vset.pattern.permute.xlu2 %v6629_v55 }
 0x6ee   :  { %5414 = vset.pattern.permute.xlu1 %v6633_v4 }
 0x6ef   :  { %v2437_v24 = vpop.permute.xlu2 %2436 }
 0x6f0   :  { %v3551_v63 = vadd.f32 %v2437_v24, %v1485_v46 }
 0x6f2   :  { %4336 = vperm.xlu0 %5514, %v3551_v63   ;;  %v10172_v63 = vld [vmem:[#allocation276_spill] sm:$0xff] }
 0x6f3   :  { %10174 = vst [vmem:[#allocation276_spill] sm:$0xff] %v7618_v40 }
 0x6f5   :  { %2527 = vperm.xlu2 %5413, %v10157_v57  }
 0x6f6   :  { %2533 = vperm.xlu1 %5414, %v10157_v57  }
 0x6f8   :  { %v7604_v46 = vpop.permute.xlu1 %2430 }
 0x6f9   :  { %10169 = vst [vmem:[#allocation161_spill] sm:$0xff] %v7604_v46 }
 0x6fd   :  { %5415 = vset.pattern.permute.xlu2 %v6653_v15 }
 0x6fe   :  { %5416 = vset.pattern.permute.xlu1 %v6657_v8 }
 0x6ff   :  { %v2455_v21 = vpop.permute.xlu2 %2454 }
 0x700   :  { %v3554_v56 = vadd.f32 %v2455_v21, %v1488_v9  ;;  %v1491_v9 = vmul.f32 %v7179_v43, %v10173_v29 }
 0x702   :  { %4345 = vperm.xlu0 %5514, %v3554_v56  }
 0x705   :  { %2545 = vperm.xlu2 %5415, %v10157_v57  }
 0x706   :  { %2551 = vperm.xlu1 %5416, %v10157_v57  }
 0x708   :  { %v7608_v24 = vpop.permute.xlu1 %2442 }
 0x709   :  { %10170 = vst [vmem:[#allocation164_spill] sm:$0xff] %v7608_v24 }
 0x70d   :  { %5417 = vset.pattern.permute.xlu2 %v6671_v32 }
 0x70e   :  { %5418 = vset.pattern.permute.xlu1 %v6677_v14 }
 0x70f   :  { %v7622_v24 = vpop.permute.xlu2 %2466 }
 0x710   :  { %10175 = vst [vmem:[#allocation167_spill] sm:$0xff] %v7622_v24 }
 0x715   :  { %2557 = vperm.xlu2 %5417, %v10157_v57  }
 0x716   :  { %2563 = vperm.xlu1 %5418, %v10157_v57  }
 0x718   :  { %v7612_v56 = vpop.permute.xlu1 %2460 }
 0x719   :  { %10171 = vst [vmem:[#allocation335_spill] sm:$0xff] %v7612_v56  ;;  %v10177_v56 = vld [vmem:[#allocation171_spill] sm:$0xff] }
 0x71a   :  { %v1494_v29 = vmul.f32 %v7143_v27, %v10177_v56  ;;  %v10183_v56 = vld [vmem:[#allocation178_spill] sm:$0xff] }
 0x71d   :  { %5419 = vset.pattern.permute.xlu2 %v6695_v59 }
 0x71e   :  { %5420 = vset.pattern.permute.xlu1 %v6519_v35 }
 0x725   :  { %2575 = vperm.xlu2 %5419, %v10157_v57   ;;  %v7626_v57 = vpop.permute.xlu2 %2485 }
 0x726   :  { %2582 = vperm.xlu1 %5420, %v10172_v63   ;;  %10176 = vst [vmem:[#allocation336_spill] sm:$0xff] %v7626_v57 }
 0x728   :  { %v2473_v21 = vpop.permute.xlu1 %2472 }
 0x729   :  { %v3557_v46 = vadd.f32 %v2473_v21, %v1491_v9  ;;  %v7630_v9 = vpop.permute.xlu0 %2660 }
 0x72a   :  { %10178 = vst [vmem:[#allocation171_spill] sm:$0xff] %v7630_v9 }
 0x72b   :  { %4354 = vperm.xlu0 %5514, %v3557_v46   ;;  %v10179_v46 = vld [vmem:[#allocation175_spill] sm:$0xff] }
 0x72c   :  { %v1497_v24 = vmul.f32 %v7147_v19, %v10179_v46 }
 0x72d   :  { %5421 = vset.pattern.permute.xlu2 %v6524_v23 }
 0x72e   :  { %5422 = vset.pattern.permute.xlu1 %v6535_v2  ;;  %v3563_v40 = vadd.f32 %v10181_v12, %v1497_v24  ;;  %v10185_v12 = vld [vmem:[#allocation181_spill] sm:$0xff] }
 0x72f   :  { %v7636_v52 = vpop.permute.xlu2 %2497 }
 0x730   :  { %10180 = vst [vmem:[#allocation175_spill] sm:$0xff] %v7636_v52 }
 0x731   :  { %v7639_v57 = vpop.permute.xlu0 %3145 }
 0x735   :  { %2588 = vperm.xlu2 %5421, %v10172_v63  }
 0x736   :  { %2594 = vperm.xlu1 %5422, %v10172_v63  }
 0x738   :  { %v2492_v17 = vpop.permute.xlu1 %2491 }
 0x739   :  { %v3560_v21 = vadd.f32 %v2492_v17, %v1494_v29  ;;  %v1500_v29 = vmul.f32 %v7168_v7, %v10183_v56  ;;  %v7649_v9 = vpop.permute.xlu0 %3934 }
 0x73a   :  { %10184 = vst [vmem:[#allocation178_spill] sm:$0xff] %v7649_v9  ;;  %v10200_v9 = vld [vmem:[#allocation317_spill] sm:$0xff] }
 0x73b   :  { %4363 = vperm.xlu0 %5514, %v3560_v21  }
 0x73d   :  { %5423 = vset.pattern.permute.xlu2 %v6578_v25 }
 0x73e   :  { %5424 = vset.pattern.permute.xlu1 %v6604_v50 }
 0x73f   :  { %v7643_v17 = vpop.permute.xlu2 %2515 }
 0x740   :  { %10182 = vst [vmem:[#allocation281_spill] sm:$0xff] %v7643_v17 }
 0x741   :  { %v7657_v52 = vpop.permute.xlu0 %3949 }
 0x742   :  { %10186 = vst [vmem:[#allocation181_spill] sm:$0xff] %v7657_v52 }
 0x743   :  { %4372 = vperm.xlu0 %5514, %v3563_v40   ;;  %v1503_v40 = vmul.f32 %v7177_v49, %v10185_v12 }
 0x745   :  { %2606 = vperm.xlu2 %5423, %v10172_v63  }
 0x746   :  { %2612 = vperm.xlu1 %5424, %v10172_v63  }
 0x748   :  { %v7661_v56 = vpop.permute.xlu1 %2503 }
 0x749   :  { %10187 = vst [vmem:[#allocation337_spill] sm:$0xff] %v7661_v56  ;;  %v10194_v56 = vld [vmem:[#allocation140_spill] sm:$0xff] }
 0x74d   :  { %5425 = vset.pattern.permute.xlu2 %v6610_v41 }
 0x74e   :  { %5426 = vset.pattern.permute.xlu1 %v6629_v55 }
 0x74f   :  { %v2528_v21 = vpop.permute.xlu2 %2527 }
 0x750   :  { %v3566_v46 = vadd.f32 %v2528_v21, %v1500_v29 }
 0x752   :  { %4381 = vperm.xlu0 %5514, %v3566_v46   ;;  %v10191_v46 = vld [vmem:[#allocation184_spill] sm:$0xff] }
 0x753   :  { %v1506_v12 = vmul.f32 %v7183_v22, %v10191_v46 }
 0x755   :  { %2618 = vperm.xlu2 %5425, %v10172_v63  }
 0x756   :  { %2624 = vperm.xlu1 %5426, %v10172_v63  }
 0x758   :  { %v7665_v29 = vpop.permute.xlu1 %2521 }
 0x759   :  { %10188 = vst [vmem:[#allocation338_spill] sm:$0xff] %v7665_v29  ;;  %v7679_v29 = vpop.permute.xlu0 %3958 }
 0x75a   :  { %10192 = vst [vmem:[#allocation184_spill] sm:$0xff] %v7679_v29 }
 0x75d   :  { %5427 = vset.pattern.permute.xlu2 %v6770_v18 }
 0x75e   :  { %5428 = vset.pattern.permute.xlu1 %v6653_v15 }
 0x75f   :  { %v2546_v24 = vpop.permute.xlu2 %2545 }
 0x760   :  { %v3569_v17 = vadd.f32 %v2546_v24, %v1503_v40 }
 0x762   :  { %4390 = vperm.xlu0 %5514, %v3569_v17  }
 0x765   :  { %2636 = vperm.xlu2 %5427, %v10172_v63  }
 0x766   :  { %2642 = vperm.xlu1 %5428, %v10172_v63  }
 0x768   :  { %v7669_v21 = vpop.permute.xlu1 %2533 }
 0x769   :  { %10189 = vst [vmem:[#allocation339_spill] sm:$0xff] %v7669_v21 }
 0x76d   :  { %5429 = vset.pattern.permute.xlu2 %v6657_v8 }
 0x76e   :  { %5430 = vset.pattern.permute.xlu1 %v6671_v32 }
 0x76f   :  { %v7683_v21 = vpop.permute.xlu2 %2557 }
 0x770   :  { %10193 = vst [vmem:[#allocation341_spill] sm:$0xff] %v7683_v21 }
 0x775   :  { %2648 = vperm.xlu2 %5429, %v10172_v63  }
 0x776   :  { %2654 = vperm.xlu1 %5430, %v10172_v63  }
 0x778   :  { %v7673_v17 = vpop.permute.xlu1 %2551 }
 0x779   :  { %10190 = vst [vmem:[#allocation340_spill] sm:$0xff] %v7673_v17 }
 0x77d   :  { %5431 = vset.pattern.permute.xlu2 %v6807_v54 }
 0x77e   :  { %5432 = vset.pattern.permute.xlu1 %v6695_v59 }
 0x77f   :  { %v7687_v17 = vpop.permute.xlu2 %2575 }
 0x780   :  { %10195 = vst [vmem:[#allocation140_spill] sm:$0xff] %v7687_v17 }
 0x785   :  { %2666 = vperm.xlu2 %5431, %v10172_v63  }
 0x786   :  { %2672 = vperm.xlu1 %5432, %v10172_v63   ;;  %v10196_v63 = vld [vmem:[#allocation187_spill] sm:$0xff] }
 0x787   :  { %v1509_v46 = vmul.f32 %v7140_v13, %v10196_v63  ;;  %v10203_v63 = vld [vmem:[#allocation193_spill] sm:$0xff] }
 0x788   :  { %v2564_v40 = vpop.permute.xlu1 %2563 }
 0x789   :  { %v3572_v24 = vadd.f32 %v2564_v40, %v1506_v12  ;;  %v7691_v12 = vpop.permute.xlu0 %3967 }
 0x78a   :  { %10197 = vst [vmem:[#allocation187_spill] sm:$0xff] %v7691_v12 }
 0x78b   :  { %4399 = vperm.xlu0 %5514, %v3572_v24   ;;  %v10198_v24 = vld [vmem:[#allocation190_spill] sm:$0xff] }
 0x78c   :  { %v1512_v21 = vmul.f32 %v7152_v60, %v10198_v24 }
 0x78d   :  { %5433 = vset.pattern.permute.xlu2 %v6519_v35 }
 0x78e   :  { %5434 = vset.pattern.permute.xlu1 %v6524_v23  ;;  %v3578_v48 = vadd.f32 %v10200_v9, %v1512_v21 }
 0x78f   :  { %v7697_v29 = vpop.permute.xlu2 %2588 }
 0x790   :  { %10199 = vst [vmem:[#allocation190_spill] sm:$0xff] %v7697_v29 }
 0x791   :  { %v7700_v17 = vpop.permute.xlu0 %3976 }
 0x792   :  { %10201 = vst [vmem:[#allocation317_spill] sm:$0xff] %v7700_v17 }
 0x795   :  { %2679 = vperm.xlu2 %5433, %v10194_v56  }
 0x796   :  { %2685 = vperm.xlu1 %5434, %v10194_v56  }
 0x798   :  { %v2583_v52 = vpop.permute.xlu1 %2582 }
 0x799   :  { %v3575_v40 = vadd.f32 %v2583_v52, %v1509_v46  ;;  %v1515_v46 = vmul.f32 %v7156_v45, %v10203_v63  ;;  %v7710_v29 = vpop.permute.xlu0 %3985 }
 0x79a   :  { %10204 = vst [vmem:[#allocation193_spill] sm:$0xff] %v7710_v29 }
 0x79b   :  { %4408 = vperm.xlu0 %5514, %v3575_v40  }
 0x79d   :  { %5436 = vset.pattern.permute.xlu2 %v6574_v5 }
 0x79e   :  { %5437 = vset.pattern.permute.xlu1 %v6578_v25 }
 0x79f   :  { %v7704_v52 = vpop.permute.xlu2 %2606 }
 0x7a0   :  { %10202 = vst [vmem:[#allocation342_spill] sm:$0xff] %v7704_v52 }
 0x7a1   :  { %v7718_v17 = vpop.permute.xlu0 %3994 }
 0x7a3   :  { %4417 = vperm.xlu0 %5514, %v3578_v48   ;;  %v10205_v48 = vld [vmem:[#allocation196_spill] sm:$0xff] }
 0x7a4   :  { %v1518_v9 = vmul.f32 %v7137_v34, %v10205_v48  ;;  %10206 = vst [vmem:[#allocation196_spill] sm:$0xff] %v7718_v17  ;;  %v10216_v17 = vld [vmem:[#allocation204_spill] sm:$0xff] }
 0x7a5   :  { %2697 = vperm.xlu2 %5436, %v10194_v56  }
 0x7a6   :  { %2703 = vperm.xlu1 %5437, %v10194_v56  }
 0x7a8   :  { %v7722_v63 = vpop.permute.xlu1 %2594 }
 0x7a9   :  { %10207 = vst [vmem:[#allocation343_spill] sm:$0xff] %v7722_v63 }
 0x7ad   :  { %5438 = vset.pattern.permute.xlu2 %v6604_v50 }
 0x7ae   :  { %5439 = vset.pattern.permute.xlu1 %v6610_v41 }
 0x7af   :  { %v2619_v40 = vpop.permute.xlu2 %2618 }
 0x7b0   :  { %v3581_v24 = vadd.f32 %v2619_v40, %v1515_v46 }
 0x7b2   :  { %4426 = vperm.xlu0 %5514, %v3581_v24   ;;  %v10211_v24 = vld [vmem:[#allocation200_spill] sm:$0xff] }
 0x7b3   :  { %v1521_v48 = vmul.f32 %v7186_v38, %v10211_v24  ;;  %v1524_v24 = vmul.f32 %v7195_v47, %v10216_v17  ;;  %v10223_v17 = vld [vmem:[#allocation209_spill] sm:$0xff] }
 0x7b5   :  { %2709 = vperm.xlu2 %5438, %v10194_v56  }
 0x7b6   :  { %2715 = vperm.xlu1 %5439, %v10194_v56  }
 0x7b8   :  { %v7726_v46 = vpop.permute.xlu1 %2612 }
 0x7b9   :  { %10208 = vst [vmem:[#allocation344_spill] sm:$0xff] %v7726_v46  ;;  %v7740_v46 = vpop.permute.xlu0 %4003 }
 0x7ba   :  { %10212 = vst [vmem:[#allocation200_spill] sm:$0xff] %v7740_v46  ;;  %v10220_v46 = vld [vmem:[#allocation194_spill] sm:$0xff] }
 0x7bd   :  { %5441 = vset.pattern.permute.xlu2 %v6633_v4 }
 0x7be   :  { %5442 = vset.pattern.permute.xlu1 %v6770_v18 }
 0x7bf   :  { %v2637_v21 = vpop.permute.xlu2 %2636 }
 0x7c0   :  { %v3584_v52 = vadd.f32 %v2637_v21, %v1518_v9 }
 0x7c2   :  { %4435 = vperm.xlu0 %5514, %v3584_v52  }
 0x7c5   :  { %2727 = vperm.xlu2 %5441, %v10194_v56  }
 0x7c6   :  { %2733 = vperm.xlu1 %5442, %v10194_v56  }
 0x7c8   :  { %v7730_v40 = vpop.permute.xlu1 %2624 }
 0x7c9   :  { %10209 = vst [vmem:[#allocation345_spill] sm:$0xff] %v7730_v40 }
 0x7cd   :  { %5443 = vset.pattern.permute.xlu2 %v6653_v15 }
 0x7ce   :  { %5444 = vset.pattern.permute.xlu1 %v6657_v8 }
 0x7cf   :  { %v7744_v40 = vpop.permute.xlu2 %2648 }
 0x7d0   :  { %10213 = vst [vmem:[#allocation347_spill] sm:$0xff] %v7744_v40 }
 0x7d5   :  { %2739 = vperm.xlu2 %5443, %v10194_v56  }
 0x7d6   :  { %2745 = vperm.xlu1 %5444, %v10194_v56  }
 0x7d8   :  { %v7734_v52 = vpop.permute.xlu1 %2642 }
 0x7d9   :  { %10210 = vst [vmem:[#allocation346_spill] sm:$0xff] %v7734_v52  ;;  %v10214_v52 = vld [vmem:[#allocation172_spill] sm:$0xff] }
 0x7dd   :  { %5446 = vset.pattern.permute.xlu2 %v6677_v14 }
 0x7de   :  { %5447 = vset.pattern.permute.xlu1 %v6807_v54 }
 0x7df   :  { %v7748_v63 = vpop.permute.xlu2 %2666 }
 0x7e0   :  { %10215 = vst [vmem:[#allocation172_spill] sm:$0xff] %v7748_v63 }
 0x7e5   :  { %2757 = vperm.xlu2 %5446, %v10194_v56  }
 0x7e6   :  { %2763 = vperm.xlu1 %5447, %v10194_v56  }
 0x7e8   :  { %v2655_v9 = vpop.permute.xlu1 %2654 }
 0x7e9   :  { %v3587_v21 = vadd.f32 %v2655_v9, %v1521_v48  ;;  %v7752_v48 = vpop.permute.xlu0 %4012 }
 0x7ea   :  { %10217 = vst [vmem:[#allocation204_spill] sm:$0xff] %v7752_v48 }
 0x7eb   :  { %4444 = vperm.xlu0 %5514, %v3587_v21   ;;  %v10218_v21 = vld [vmem:[#allocation207_spill] sm:$0xff] }
 0x7ec   :  { %v1527_v40 = vmul.f32 %v6792_v20, %v10218_v21 }
 0x7ed   :  { %5448 = vset.pattern.permute.xlu2 %v6695_v59 }
 0x7ee   :  { %5449 = vset.pattern.permute.xlu1 %v6519_v35  ;;  %v3593_v12 = vadd.f32 %v10220_v46, %v1527_v40 }
 0x7f1   :  { %v7761_v63 = vpop.permute.xlu0 %4021 }
 0x7f2   :  { %10221 = vst [vmem:[#allocation194_spill] sm:$0xff] %v7761_v63 }
 0x7f5   :  { %2769 = vperm.xlu2 %5448, %v10194_v56   ;;  %v7758_v56 = vpop.permute.xlu2 %2679 }
 0x7f6   :  { %2776 = vperm.xlu1 %5449, %v10214_v52   ;;  %10219 = vst [vmem:[#allocation207_spill] sm:$0xff] %v7758_v56 }
 0x7f8   :  { %v2673_v29 = vpop.permute.xlu1 %2672 }
 0x7f9   :  { %v3590_v9 = vadd.f32 %v2673_v29, %v1524_v24  ;;  %v1530_v24 = vmul.f32 %v7161_v61, %v10223_v17  ;;  %v7771_v56 = vpop.permute.xlu0 %4030 }
 0x7fa   :  { %10224 = vst [vmem:[#allocation209_spill] sm:$0xff] %v7771_v56 }
 0x7fb   :  { %4453 = vperm.xlu0 %5514, %v3590_v9  }
 0x7fd   :  { %5451 = vset.pattern.permute.xlu2 %v6535_v2 }
 0x7fe   :  { %5452 = vset.pattern.permute.xlu1 %v6574_v5 }
 0x7ff   :  { %v7765_v29 = vpop.permute.xlu2 %2697 }
 0x800   :  { %10222 = vst [vmem:[#allocation348_spill] sm:$0xff] %v7765_v29 }
 0x801   :  { %v7779_v63 = vpop.permute.xlu0 %4039 }
 0x803   :  { %4462 = vperm.xlu0 %5514, %v3593_v12   ;;  %v10225_v12 = vld [vmem:[#allocation212_spill] sm:$0xff] }
 0x804   :  { %v1533_v46 = vmul.f32 %v7165_v28, %v10225_v12  ;;  %10226 = vst [vmem:[#allocation212_spill] sm:$0xff] %v7779_v63 }
 0x805   :  { %2788 = vperm.xlu2 %5451, %v10214_v52  }
 0x806   :  { %2794 = vperm.xlu1 %5452, %v10214_v52  }
 0x808   :  { %v7783_v17 = vpop.permute.xlu1 %2685 }
 0x809   :  { %10227 = vst [vmem:[#allocation349_spill] sm:$0xff] %v7783_v17  ;;  %v10235_v17 = vld [vmem:[#allocation218_spill] sm:$0xff] }
 0x80d   :  { %5453 = vset.pattern.permute.xlu2 %v6578_v25 }
 0x80e   :  { %5454 = vset.pattern.permute.xlu1 %v6604_v50 }
 0x80f   :  { %v2710_v9 = vpop.permute.xlu2 %2709 }
 0x810   :  { %v3596_v21 = vadd.f32 %v2710_v9, %v1530_v24 }
 0x812   :  { %4471 = vperm.xlu0 %5514, %v3596_v21   ;;  %v10231_v21 = vld [vmem:[#allocation215_spill] sm:$0xff] }
 0x813   :  { %v1536_v12 = vmul.f32 %v7174_v44, %v10231_v21  ;;  %v1539_v21 = vmul.f32 %v7179_v43, %v10235_v17  ;;  %v10241_v17 = vld [vmem:[#allocation201_spill] sm:$0xff] }
 0x815   :  { %2800 = vperm.xlu2 %5453, %v10214_v52  }
 0x816   :  { %2806 = vperm.xlu1 %5454, %v10214_v52  }
 0x818   :  { %v7787_v24 = vpop.permute.xlu1 %2703 }
 0x819   :  { %10228 = vst [vmem:[#allocation350_spill] sm:$0xff] %v7787_v24  ;;  %v7801_v24 = vpop.permute.xlu0 %4048 }
 0x81a   :  { %10232 = vst [vmem:[#allocation215_spill] sm:$0xff] %v7801_v24 }
 0x81d   :  { %5456 = vset.pattern.permute.xlu2 %v6629_v55 }
 0x81e   :  { %5457 = vset.pattern.permute.xlu1 %v6633_v4 }
 0x81f   :  { %v2728_v40 = vpop.permute.xlu2 %2727 }
 0x820   :  { %v3599_v29 = vadd.f32 %v2728_v40, %v1533_v46 }
 0x822   :  { %4480 = vperm.xlu0 %5514, %v3599_v29  }
 0x825   :  { %2818 = vperm.xlu2 %5456, %v10214_v52  }
 0x826   :  { %2824 = vperm.xlu1 %5457, %v10214_v52  }
 0x828   :  { %v7791_v9 = vpop.permute.xlu1 %2715 }
 0x829   :  { %10229 = vst [vmem:[#allocation351_spill] sm:$0xff] %v7791_v9 }
 0x82d   :  { %5458 = vset.pattern.permute.xlu2 %v6770_v18 }
 0x82e   :  { %5459 = vset.pattern.permute.xlu1 %v6653_v15 }
 0x82f   :  { %v7805_v9 = vpop.permute.xlu2 %2739 }
 0x830   :  { %10233 = vst [vmem:[#allocation353_spill] sm:$0xff] %v7805_v9 }
 0x835   :  { %2830 = vperm.xlu2 %5458, %v10214_v52  }
 0x836   :  { %2836 = vperm.xlu1 %5459, %v10214_v52  }
 0x838   :  { %v7795_v29 = vpop.permute.xlu1 %2733 }
 0x839   :  { %10230 = vst [vmem:[#allocation352_spill] sm:$0xff] %v7795_v29 }
 0x83d   :  { %5461 = vset.pattern.permute.xlu2 %v6671_v32 }
 0x83e   :  { %5462 = vset.pattern.permute.xlu1 %v6677_v14 }
 0x83f   :  { %v7809_v29 = vpop.permute.xlu2 %2757 }
 0x840   :  { %10234 = vst [vmem:[#allocation354_spill] sm:$0xff] %v7809_v29 }
 0x845   :  { %2848 = vperm.xlu2 %5461, %v10214_v52  }
 0x846   :  { %2854 = vperm.xlu1 %5462, %v10214_v52  }
 0x848   :  { %v2746_v46 = vpop.permute.xlu1 %2745 }
 0x849   :  { %v3602_v40 = vadd.f32 %v2746_v46, %v1536_v12  ;;  %v7813_v12 = vpop.permute.xlu0 %4057 }
 0x84a   :  { %10236 = vst [vmem:[#allocation218_spill] sm:$0xff] %v7813_v12 }
 0x84b   :  { %4489 = vperm.xlu0 %5514, %v3602_v40   ;;  %v10237_v40 = vld [vmem:[#allocation221_spill] sm:$0xff] }
 0x84c   :  { %v1542_v9 = vmul.f32 %v7143_v27, %v10237_v40 }
 0x84d   :  { %5463 = vset.pattern.permute.xlu2 %v6807_v54 }
 0x84e   :  { %5464 = vset.pattern.permute.xlu1 %v6695_v59 }
 0x84f   :  { %v7819_v24 = vpop.permute.xlu2 %2769 }
 0x850   :  { %10238 = vst [vmem:[#allocation221_spill] sm:$0xff] %v7819_v24 }
 0x851   :  { %v7822_v29 = vpop.permute.xlu0 %4066 }
 0x855   :  { %2860 = vperm.xlu2 %5463, %v10214_v52  }
 0x856   :  { %2866 = vperm.xlu1 %5464, %v10214_v52   ;;  %v10239_v52 = vld [vmem:[#allocation222_spill] sm:$0xff] }
 0x857   :  { %v3608_v56 = vadd.f32 %v10239_v52, %v1542_v9  ;;  %10240 = vst [vmem:[#allocation222_spill] sm:$0xff] %v7822_v29 }
 0x858   :  { %v2764_v63 = vpop.permute.xlu1 %2763 }
 0x859   :  { %v3605_v46 = vadd.f32 %v2764_v63, %v1539_v21  ;;  %v10243_v21 = vld [vmem:[#allocation224_spill] sm:$0xff]  ;;  %v7832_v12 = vpop.permute.xlu0 %4075 }
 0x85a   :  { %10244 = vst [vmem:[#allocation224_spill] sm:$0xff] %v7832_v12 }
 0x85b   :  { %4498 = vperm.xlu0 %5514, %v3605_v46   ;;  %v1545_v46 = vmul.f32 %v7147_v19, %v10243_v21 }
 0x85d   :  { %5466 = vset.pattern.permute.xlu2 %v6524_v23 }
 0x85e   :  { %5467 = vset.pattern.permute.xlu1 %v6535_v2 }
 0x85f   :  { %v7826_v63 = vpop.permute.xlu2 %2788 }
 0x860   :  { %10242 = vst [vmem:[#allocation201_spill] sm:$0xff] %v7826_v63 }
 0x861   :  { %v7840_v29 = vpop.permute.xlu0 %4084  ;;  %v10604_v48 = vld [vmem:[#allocation224_spill] sm:$0xff] }
 0x863   :  { %4507 = vperm.xlu0 %5514, %v3608_v56   ;;  %v10245_v56 = vld [vmem:[#allocation227_spill] sm:$0xff] }
 0x864   :  { %v1548_v9 = vmul.f32 %v7168_v7, %v10245_v56  ;;  %10246 = vst [vmem:[#allocation227_spill] sm:$0xff] %v7840_v29 }
 0x865   :  { %2879 = vperm.xlu2 %5466, %v10241_v17  }
 0x866   :  { %2885 = vperm.xlu1 %5467, %v10241_v17  }
 0x86d   :  { %5468 = vset.pattern.permute.xlu2 %v6574_v5 }
 0x86e   :  { %5469 = vset.pattern.permute.xlu1 %v6578_v25 }
 0x86f   :  { %v2801_v40 = vpop.permute.xlu2 %2800 }
 0x870   :  { %v3611_v24 = vadd.f32 %v2801_v40, %v1545_v46  ;;  %v10251_v40 = vld [vmem:[#allocation230_spill] sm:$0xff] }
 0x871   :  { %v1551_v56 = vmul.f32 %v7177_v49, %v10251_v40 }
 0x872   :  { %4516 = vperm.xlu0 %5514, %v3611_v24   ;;  %v7844_v24 = vpop.permute.xlu1 %2776 }
 0x873   :  { %10247 = vst [vmem:[#allocation355_spill] sm:$0xff] %v7844_v24  ;;  %v10255_v24 = vld [vmem:[#allocation233_spill] sm:$0xff] }
 0x874   :  { %v1554_v40 = vmul.f32 %v7183_v22, %v10255_v24  ;;  %v10261_v24 = vld [vmem:[#allocation241_spill] sm:$0xff] }
 0x875   :  { %2891 = vperm.xlu2 %5468, %v10241_v17  }
 0x876   :  { %2897 = vperm.xlu1 %5469, %v10241_v17  }
 0x87a   :  { %v7848_v21 = vpop.permute.xlu1 %2794 }
 0x87b   :  { %10248 = vst [vmem:[#allocation356_spill] sm:$0xff] %v7848_v21  ;;  %v7862_v21 = vpop.permute.xlu0 %4093 }
 0x87c   :  { %10252 = vst [vmem:[#allocation230_spill] sm:$0xff] %v7862_v21 }
 0x87d   :  { %5471 = vset.pattern.permute.xlu2 %v6610_v41 }
 0x87e   :  { %5472 = vset.pattern.permute.xlu1 %v6629_v55 }
 0x87f   :  { %v2819_v52 = vpop.permute.xlu2 %2818 }
 0x880   :  { %v3614_v63 = vadd.f32 %v2819_v52, %v1548_v9 }
 0x882   :  { %4525 = vperm.xlu0 %5514, %v3614_v63  }
 0x885   :  { %2909 = vperm.xlu2 %5471, %v10241_v17  }
 0x886   :  { %2915 = vperm.xlu1 %5472, %v10241_v17  }
 0x888   :  { %v7852_v46 = vpop.permute.xlu1 %2806 }
 0x889   :  { %10249 = vst [vmem:[#allocation357_spill] sm:$0xff] %v7852_v46 }
 0x88d   :  { %5473 = vset.pattern.permute.xlu2 %v6633_v4 }
 0x88e   :  { %5474 = vset.pattern.permute.xlu1 %v6770_v18 }
 0x88f   :  { %v7866_v46 = vpop.permute.xlu2 %2830 }
 0x890   :  { %10253 = vst [vmem:[#allocation359_spill] sm:$0xff] %v7866_v46 }
 0x895   :  { %2921 = vperm.xlu2 %5473, %v10241_v17  }
 0x896   :  { %2927 = vperm.xlu1 %5474, %v10241_v17  }
 0x898   :  { %v7856_v63 = vpop.permute.xlu1 %2824 }
 0x899   :  { %10250 = vst [vmem:[#allocation358_spill] sm:$0xff] %v7856_v63 }
 0x89d   :  { %5476 = vset.pattern.permute.xlu2 %v6657_v8 }
 0x89e   :  { %5477 = vset.pattern.permute.xlu1 %v6671_v32 }
 0x89f   :  { %v7870_v63 = vpop.permute.xlu2 %2848 }
 0x8a0   :  { %10254 = vst [vmem:[#allocation360_spill] sm:$0xff] %v7870_v63 }
 0x8a5   :  { %2939 = vperm.xlu2 %5476, %v10241_v17  }
 0x8a6   :  { %2945 = vperm.xlu1 %5477, %v10241_v17  }
 0x8a8   :  { %v2837_v9 = vpop.permute.xlu1 %2836 }
 0x8a9   :  { %v3617_v52 = vadd.f32 %v2837_v9, %v1551_v56  ;;  %v7874_v56 = vpop.permute.xlu0 %4102 }
 0x8aa   :  { %10256 = vst [vmem:[#allocation233_spill] sm:$0xff] %v7874_v56 }
 0x8ab   :  { %4534 = vperm.xlu0 %5514, %v3617_v52   ;;  %v10257_v52 = vld [vmem:[#allocation236_spill] sm:$0xff] }
 0x8ac   :  { %v1557_v46 = vmul.f32 %v7140_v13, %v10257_v52 }
 0x8ad   :  { %5478 = vset.pattern.permute.xlu2 %v6677_v14 }
 0x8ae   :  { %5479 = vset.pattern.permute.xlu1 %v6807_v54 }
 0x8af   :  { %v7880_v21 = vpop.permute.xlu2 %2860 }
 0x8b0   :  { %10258 = vst [vmem:[#allocation236_spill] sm:$0xff] %v7880_v21 }
 0x8b1   :  { %v7883_v63 = vpop.permute.xlu0 %4111 }
 0x8b5   :  { %2951 = vperm.xlu2 %5478, %v10241_v17  }
 0x8b6   :  { %2957 = vperm.xlu1 %5479, %v10241_v17   ;;  %v10259_v17 = vld [vmem:[#allocation248_spill] sm:$0xff] }
 0x8b7   :  { %v3623_v12 = vadd.f32 %v10259_v17, %v1557_v46  ;;  %10260 = vst [vmem:[#allocation248_spill] sm:$0xff] %v7883_v63 }
 0x8b8   :  { %v2855_v29 = vpop.permute.xlu1 %2854 }
 0x8b9   :  { %v3620_v9 = vadd.f32 %v2855_v29, %v1554_v40  ;;  %v10263_v40 = vld [vmem:[#allocation240_spill] sm:$0xff]  ;;  %v7893_v56 = vpop.permute.xlu0 %4120 }
 0x8bb   :  { %4543 = vperm.xlu0 %5514, %v3620_v9   ;;  %v1560_v9 = vmul.f32 %v7152_v60, %v10263_v40 }
 0x8bd   :  { %5481 = vset.pattern.permute.xlu2 %v6519_v35 }
 0x8be   :  { %5482 = vset.pattern.permute.xlu1 %v6524_v23 }
 0x8bf   :  { %v7887_v29 = vpop.permute.xlu2 %2879 }
 0x8c0   :  { %10262 = vst [vmem:[#allocation241_spill] sm:$0xff] %v7887_v29 }
 0x8c1   :  { %v7901_v29 = vpop.permute.xlu0 %4129 }
 0x8c2   :  { %10265 = vst [vmem:[#allocation240_spill] sm:$0xff] %v7901_v29 }
 0x8c3   :  { %4552 = vperm.xlu0 %5514, %v3623_v12   ;;  %v10264_v12 = vld [vmem:[#allocation244_spill] sm:$0xff] }
 0x8c4   :  { %v1563_v46 = vmul.f32 %v7156_v45, %v10264_v12  ;;  %v10270_v12 = vld [vmem:[#allocation247_spill] sm:$0xff] }
 0x8c5   :  { %2970 = vperm.xlu2 %5481, %v10261_v24  }
 0x8c6   :  { %2976 = vperm.xlu1 %5482, %v10261_v24  }
 0x8cd   :  { %5483 = vset.pattern.permute.xlu2 %v6535_v2 }
 0x8ce   :  { %5484 = vset.pattern.permute.xlu1 %v6574_v5 }
 0x8cf   :  { %v2892_v52 = vpop.permute.xlu2 %2891 }
 0x8d0   :  { %v3626_v21 = vadd.f32 %v2892_v52, %v1560_v9 }
 0x8d2   :  { %4561 = vperm.xlu0 %5514, %v3626_v21   ;;  %v7905_v21 = vpop.permute.xlu1 %2866 }
 0x8d3   :  { %10266 = vst [vmem:[#allocation244_spill] sm:$0xff] %v7905_v21 }
 0x8d5   :  { %2982 = vperm.xlu2 %5483, %v10261_v24  }
 0x8d6   :  { %2988 = vperm.xlu1 %5484, %v10261_v24  }
 0x8da   :  { %v7909_v40 = vpop.permute.xlu1 %2885 }
 0x8db   :  { %10267 = vst [vmem:[#allocation361_spill] sm:$0xff] %v7909_v40  ;;  %v10274_v40 = vld [vmem:[#allocation250_spill] sm:$0xff] }
 0x8dd   :  { %5486 = vset.pattern.permute.xlu2 %v6604_v50 }
 0x8de   :  { %5487 = vset.pattern.permute.xlu1 %v6610_v41 }
 0x8df   :  { %v2910_v5 = vpop.permute.xlu2 %2909 }
 0x8e0   :  { %v3629_v17 = vadd.f32 %v2910_v5, %v1563_v46 }
 0x8e2   :  { %4570 = vperm.xlu0 %5514, %v3629_v17   ;;  %v7923_v17 = vpop.permute.xlu0 %4138 }
 0x8e3   :  { %10271 = vst [vmem:[#allocation247_spill] sm:$0xff] %v7923_v17  ;;  %v10277_v17 = vld [vmem:[#allocation275_spill] sm:$0xff] }
 0x8e5   :  { %3000 = vperm.xlu2 %5486, %v10261_v24  }
 0x8e6   :  { %3006 = vperm.xlu1 %5487, %v10261_v24  }
 0x8e8   :  { %v7913_v9 = vpop.permute.xlu1 %2897 }
 0x8e9   :  { %10268 = vst [vmem:[#allocation362_spill] sm:$0xff] %v7913_v9 }
 0x8ed   :  { %5488 = vset.pattern.permute.xlu2 %v6629_v55 }
 0x8ee   :  { %5489 = vset.pattern.permute.xlu1 %v6633_v4  ;;  %v1566_v4 = vmul.f32 %v7137_v34, %v10270_v12  ;;  %v1569_v12 = vmul.f32 %v7186_v38, %v10274_v40  ;;  %v10279_v40 = vld [vmem:[#allocation280_spill] sm:$0xff] }
 0x8ef   :  { %v7927_v9 = vpop.permute.xlu2 %2921 }
 0x8f0   :  { %10272 = vst [vmem:[#allocation364_spill] sm:$0xff] %v7927_v9 }
 0x8f5   :  { %3012 = vperm.xlu2 %5488, %v10261_v24  }
 0x8f6   :  { %3018 = vperm.xlu1 %5489, %v10261_v24  }
 0x8f8   :  { %v7917_v52 = vpop.permute.xlu1 %2915 }
 0x8f9   :  { %10269 = vst [vmem:[#allocation363_spill] sm:$0xff] %v7917_v52 }
 0x8fd   :  { %5491 = vset.pattern.permute.xlu2 %v6653_v15 }
 0x8fe   :  { %5492 = vset.pattern.permute.xlu1 %v6657_v8 }
 0x8ff   :  { %v7931_v52 = vpop.permute.xlu2 %2939 }
 0x900   :  { %10273 = vst [vmem:[#allocation365_spill] sm:$0xff] %v7931_v52 }
 0x905   :  { %3030 = vperm.xlu2 %5491, %v10261_v24  }
 0x906   :  { %3036 = vperm.xlu1 %5492, %v10261_v24  }
 0x908   :  { %v2928_v46 = vpop.permute.xlu1 %2927 }
 0x909   :  { %v3632_v5 = vadd.f32 %v2928_v46, %v1566_v4  ;;  %v7935_v4 = vpop.permute.xlu0 %4147 }
 0x90b   :  { %4579 = vperm.xlu0 %5514, %v3632_v5  }
 0x90d   :  { %5493 = vset.pattern.permute.xlu2 %v6671_v32 }
 0x90e   :  { %5494 = vset.pattern.permute.xlu1 %v6677_v14  ;;  %v10275_v14 = vld [vmem:[#allocation253_spill] sm:$0xff] }
 0x90f   :  { %v1572_v5 = vmul.f32 %v7195_v47, %v10275_v14  ;;  %v7941_v9 = vpop.permute.xlu2 %2951 }
 0x910   :  { %10276 = vst [vmem:[#allocation250_spill] sm:$0xff] %v7941_v9 }
 0x911   :  { %v3638_v29 = vadd.f32 %v10277_v17, %v1572_v5  ;;  %v7944_v52 = vpop.permute.xlu0 %4156 }
 0x912   :  { %10278 = vst [vmem:[#allocation253_spill] sm:$0xff] %v7944_v52 }
 0x915   :  { %3042 = vperm.xlu2 %5493, %v10261_v24  }
 0x916   :  { %3048 = vperm.xlu1 %5494, %v10261_v24  }
 0x918   :  { %v2946_v21 = vpop.permute.xlu1 %2945 }
 0x919   :  { %v3635_v46 = vadd.f32 %v2946_v21, %v1569_v12  ;;  %v7954_v9 = vpop.permute.xlu0 %4165 }
 0x91a   :  { %10282 = vst [vmem:[#allocation280_spill] sm:$0xff] %v7954_v9 }
 0x91b   :  { %4588 = vperm.xlu0 %5514, %v3635_v46  }
 0x91d   :  { %5496 = vset.pattern.permute.xlu2 %v6695_v59 }
 0x91e   :  { %5497 = vset.pattern.permute.xlu1 %v6519_v35  ;;  %v10281_v35 = vld [vmem:[#allocation256_spill] sm:$0xff] }
 0x91f   :  { %v7948_v21 = vpop.permute.xlu2 %2970  ;;  %v1575_v12 = vmul.f32 %v6792_v20, %v10281_v35 }
 0x920   :  { %10280 = vst [vmem:[#allocation275_spill] sm:$0xff] %v7948_v21 }
 0x921   :  { %v7962_v17 = vpop.permute.xlu0 %4174 }
 0x923   :  { %4597 = vperm.xlu0 %5514, %v3638_v29  }
 0x925   :  { %3060 = vperm.xlu2 %5496, %v10261_v24   ;;  %v10283_v24 = vld [vmem:[#allocation259_spill] sm:$0xff] }
 0x926   :  { %3067 = vperm.xlu1 %5497, %v10279_v40  }
 0x928   :  { %v7966_v5 = vpop.permute.xlu1 %2957 }
 0x929   :  { %10284 = vst [vmem:[#allocation256_spill] sm:$0xff] %v7966_v5 }
 0x92d   :  { %5498 = vset.pattern.permute.xlu2 %v6524_v23  ;;  %v1578_v23 = vmul.f32 %v7161_v61, %v10283_v24  ;;  %v10291_v24 = vld [vmem:[#allocation265_spill] sm:$0xff] }
 0x92e   :  { %5499 = vset.pattern.permute.xlu1 %v6535_v2 }
 0x92f   :  { %v2983_v46 = vpop.permute.xlu2 %2982 }
 0x930   :  { %v3641_v14 = vadd.f32 %v2983_v46, %v1575_v12 }
 0x932   :  { %4606 = vperm.xlu0 %5514, %v3641_v14   ;;  %v7984_v14 = vpop.permute.xlu0 %4183 }
 0x935   :  { %3073 = vperm.xlu2 %5498, %v10279_v40  }
 0x936   :  { %3079 = vperm.xlu1 %5499, %v10279_v40  }
 0x93d   :  { %5501 = vset.pattern.permute.xlu2 %v6578_v25  ;;  %v7970_v25 = vpop.permute.xlu1 %2976 }
 0x93e   :  { %5502 = vset.pattern.permute.xlu1 %v6604_v50  ;;  %10285 = vst [vmem:[#allocation259_spill] sm:$0xff] %v7970_v25  ;;  %v10311_v25 = vld [vmem:[#allocation313_spill] sm:$0xff] }
 0x93f   :  { %v3001_v2 = vpop.permute.xlu2 %3000 }
 0x940   :  { %v3644_v29 = vadd.f32 %v3001_v2, %v1578_v23  ;;  %v1584_v23 = vmul.f32 %v7174_v44, %v10291_v24 }
 0x942   :  { %4615 = vperm.xlu0 %5514, %v3644_v29   ;;  %v7996_v29 = vpop.permute.xlu0 %4192 }
 0x945   :  { %3091 = vperm.xlu2 %5501, %v10279_v40  }
 0x946   :  { %3097 = vperm.xlu1 %5502, %v10279_v40  }
 0x948   :  { %v7974_v50 = vpop.permute.xlu1 %2988 }
 0x949   :  { %10286 = vst [vmem:[#allocation366_spill] sm:$0xff] %v7974_v50 }
 0x94d   :  { %5503 = vset.pattern.permute.xlu2 %v6610_v41  ;;  %v10288_v41 = vld [vmem:[#allocation262_spill] sm:$0xff] }
 0x94e   :  { %5504 = vset.pattern.permute.xlu1 %v6629_v55  ;;  %v1581_v55 = vmul.f32 %v7165_v28, %v10288_v41 }
 0x955   :  { %3103 = vperm.xlu2 %5503, %v10279_v40  }
 0x956   :  { %3109 = vperm.xlu1 %5504, %v10279_v40  }
 0x958   :  { %v7978_v35 = vpop.permute.xlu1 %3006 }
 0x959   :  { %10287 = vst [vmem:[#allocation367_spill] sm:$0xff] %v7978_v35  ;;  %v10303_v35 = vld [vmem:[#allocation37_spill] sm:$0xff] }
 0x95d   :  { %5506 = vset.pattern.permute.xlu2 %v6770_v18  ;;  %v7988_v18 = vpop.permute.xlu2 %3012 }
 0x95e   :  { %5507 = vset.pattern.permute.xlu1 %v6653_v15  ;;  %10289 = vst [vmem:[#allocation262_spill] sm:$0xff] %v7988_v18 }
 0x965   :  { %3121 = vperm.xlu2 %5506, %v10279_v40   ;;  %v7992_v15 = vpop.permute.xlu2 %3030 }
 0x966   :  { %3127 = vperm.xlu1 %5507, %v10279_v40   ;;  %10290 = vst [vmem:[#allocation368_spill] sm:$0xff] %v7992_v15  ;;  %v8005_v15 = vpop.permute.xlu0 %4201 }
 0x968   :  { %v3019_v12 = vpop.permute.xlu1 %3018 }
 0x969   :  { %v3647_v46 = vadd.f32 %v3019_v12, %v1581_v55  ;;  %v10294_v12 = vld [vmem:[#allocation310_spill] sm:$0xff] }
 0x96b   :  { %4624 = vperm.xlu0 %5514, %v3647_v46  }
 0x96d   :  { %5508 = vset.pattern.permute.xlu2 %v6657_v8  ;;  %v10292_v8 = vld [vmem:[#allocation268_spill] sm:$0xff] }
 0x96e   :  { %5509 = vset.pattern.permute.xlu1 %v6671_v32  ;;  %v1587_v32 = vmul.f32 %v7179_v43, %v10292_v8  ;;  %10295 = vst [vmem:[#allocation268_spill] sm:$0xff] %v8005_v15  ;;  %v8023_v50 = vpop.permute.xlu0 %4210 }
 0x96f   :  { %v8002_v55 = vpop.permute.xlu2 %3042 }
 0x970   :  { %10293 = vst [vmem:[#allocation265_spill] sm:$0xff] %v8002_v55  ;;  %v3653_v46 = vadd.f32 %v10294_v12, %v1587_v32  ;;  %v10300_v55 = vld [vmem:[#allocation308_spill] sm:$0xff]  ;;  %v10301_v32 = vmov 0   ;;  %v10302_v12 = vld [vmem:[#allocation271_spill] sm:$0xff] }
 0x975   :  { %3133 = vperm.xlu2 %5508, %v10279_v40  }
 0x976   :  { %3139 = vperm.xlu1 %5509, %v10279_v40  }
 0x978   :  { %v3037_v2 = vpop.permute.xlu1 %3036 }
 0x979   :  { %v3650_v41 = vadd.f32 %v3037_v2, %v1584_v23  ;;  %v10297_v23 = vld [vmem:[#allocation8_spill] sm:$0xff] }
 0x97a   :  { %10304 = vst [vmem:[#allocation8_spill] sm:$0xff] %v8023_v50 }
 0x97b   :  { %4633 = vperm.xlu0 %5514, %v3650_v41   ;;  %v10299_v41 = vld [vmem:[#allocation305_spill] sm:$0xff] }
 0x97d   :  { %5510 = vset.pattern.permute.xlu2 %v6807_v54  ;;  %v1349_v54 = vmul.f32 %v7140_v13, %v10297_v23  ;;  %v1352_v23 = vmul.f32 %v7152_v60, %v10303_v35 }
 0x97e   :  { %5511 = vset.pattern.permute.xlu1 %v6695_v59  ;;  %v10298_v59 = vld [vmem:[#allocation9_spill] sm:$0xff] }
 0x97f   :  { %v8009_v24 = vpop.permute.xlu2 %3060  ;;  %v1350_v2 = vmul.f32 %v7143_v27, %v10298_v59  ;;  %v3415_v8 = vadd.f32 %v10299_v41, %v1349_v54  ;;  %v10305_v54 = vld [vmem:[#allocation34_spill] sm:$0xff]  ;;  %v10306_v59 = vld [vmem:[#allocation312_spill] sm:$0xff]  ;;  %v10307_v41 = vld [vmem:[#allocation311_spill] sm:$0xff] }
 0x980   :  { %10296 = vst [vmem:[#allocation310_spill] sm:$0xff] %v8009_v24 }
 0x981   :  { %v3416_v18 = vadd.f32 %v10300_v55, %v1350_v2  ;;  %v1353_v55 = vmul.f32 %v7147_v19, %v10305_v54  ;;  %v3418_v2 = vadd.f32 %v10306_v59, %v1352_v23 }
 0x983   :  { %4642 = vperm.xlu0 %5514, %v3653_v46  }
 0x985   :  { %3151 = vperm.xlu2 %5510, %v10279_v40  }
 0x986   :  { %3157 = vperm.xlu1 %5511, %v10279_v40   ;;  %v1590_v40 = vmul.f32 %v7143_v27, %v10302_v12 }
 0x98d   :  { %5512 = vset.pattern.permute.xlu2 %v10301_v32 }
 0x98e   :  { %3928 = vperm.xlu2 %5512, %v3415_v8   ;;  %5513 = vset.pattern.permute.xlu1 %v10301_v32  ;;  %v3419_v8 = vadd.f32 %v10307_v41, %v1353_v55  ;;  %v10308_v32 = vld [vmem:[#allocation36_spill] sm:$0xff]  ;;  %v10313_v55 = vld [vmem:[#allocation11_spill] sm:$0xff] }
 0x98f   :  { %v3074_v46 = vpop.permute.xlu2 %3073  ;;  %3931 = vperm.xlu1 %5513, %v3416_v18   ;;  %v1354_v12 = vmul.f32 %v7161_v61, %v10308_v32  ;;  %v10309_v18 = vld [vmem:[#allocation10_spill] sm:$0xff]  ;;  %v1358_v59 = vmul.f32 %v7137_v34, %v10313_v55  ;;  %v10321_v55 = vld [vmem:[#allocation319_spill] sm:$0xff] }
 0x990   :  { %v3656_v24 = vadd.f32 %v3074_v46, %v1590_v40  ;;  %v1355_v40 = vmul.f32 %v7156_v45, %v10309_v18  ;;  %v10310_v46 = vld [vmem:[#allocation309_spill] sm:$0xff]  ;;  %v10315_v32 = vld [vmem:[#allocation322_spill] sm:$0xff] }
 0x991   :  { %v3420_v35 = vadd.f32 %v10310_v46, %v1354_v12  ;;  %v10316_v18 = vld [vmem:[#allocation314_spill] sm:$0xff] }
 0x992   :  { %4651 = vperm.xlu0 %5514, %v3656_v24   ;;  %v3421_v21 = vadd.f32 %v10311_v25, %v1355_v40  ;;  %v10312_v24 = vld [vmem:[#allocation274_spill] sm:$0xff]  ;;  %v3424_v25 = vadd.f32 %v10316_v18, %v1358_v59  ;;  %v8045_v40 = vpop.permute.xlu1 %3048 }
 0x993   :  { %v1593_v54 = vmul.f32 %v7147_v19, %v10312_v24  ;;  %10317 = vst [vmem:[#allocation9_spill] sm:$0xff] %v8045_v40  ;;  %v10318_v46 = vld [vmem:[#allocation42_spill] sm:$0xff]  ;;  %v10320_v24 = vld [vmem:[#allocation316_spill] sm:$0xff] }
 0x994   :  { %v10325_v18 = vld [vmem:[#allocation318_spill] sm:$0xff] }
 0x996   :  { %3937 = vperm.xlu2 %5512, %v3418_v2   ;;  %v10314_v2 = vld [vmem:[#allocation40_spill] sm:$0xff] }
 0x997   :  { %3940 = vperm.xlu1 %5513, %v3419_v8   ;;  %v1357_v41 = vmul.f32 %v7165_v28, %v10314_v2  ;;  %v8041_v8 = vpop.permute.xlu0 %4219 }
 0x999   :  { %v3423_v12 = vadd.f32 %v10315_v32, %v1357_v41  ;;  %v10323_v41 = vld [vmem:[#allocation44_spill] sm:$0xff]  ;;  %v10324_v32 = vld [vmem:[#allocation13_spill] sm:$0xff] }
 0x99a   :  { %v1363_v59 = vmul.f32 %v7179_v43, %v10323_v41  ;;  %v10331_v41 = vld [vmem:[#allocation188_spill] sm:$0xff] }
 0x99e   :  { %3943 = vperm.xlu2 %5512, %v3420_v35  }
 0x99f   :  { %v3092_v5 = vpop.permute.xlu2 %3091  ;;  %3946 = vperm.xlu1 %5513, %v3421_v21   ;;  %v1360_v21 = vmul.f32 %v7174_v44, %v10318_v46  ;;  %v10326_v46 = vld [vmem:[#allocation321_spill] sm:$0xff] }
 0x9a0   :  { %v3659_v23 = vadd.f32 %v3092_v5, %v1593_v54  ;;  %v10319_v5 = vld [vmem:[#allocation12_spill] sm:$0xff] }
 0x9a1   :  { %v1361_v35 = vmul.f32 %v7186_v38, %v10319_v5  ;;  %v3426_v54 = vadd.f32 %v10320_v24, %v1360_v21  ;;  %v10328_v21 = vld [vmem:[#allocation14_spill] sm:$0xff] }
 0x9a2   :  { %4660 = vperm.xlu0 %5514, %v3659_v23   ;;  %v8053_v23 = vpop.permute.xlu1 %3067  ;;  %v10329_v24 = vld [vmem:[#allocation46_spill] sm:$0xff] }
 0x9a3   :  { %v3427_v2 = vadd.f32 %v10321_v55, %v1361_v35  ;;  %10322 = vst [vmem:[#allocation305_spill] sm:$0xff] %v8053_v23  ;;  %v1367_v35 = vmul.f32 %v6792_v20, %v10328_v21  ;;  %v10330_v55 = vld [vmem:[#allocation323_spill] sm:$0xff]  ;;  %v10336_v21 = vld [vmem:[#allocation325_spill] sm:$0xff] }
 0x9a5   :  { %v3433_v23 = vadd.f32 %v10331_v41, %v1367_v35 }
 0x9a6   :  { %3952 = vperm.xlu2 %5512, %v3423_v12   ;;  %v1364_v12 = vmul.f32 %v7195_v47, %v10324_v32 }
 0x9a7   :  { %3955 = vperm.xlu1 %5513, %v3424_v25   ;;  %v3429_v25 = vadd.f32 %v10325_v18, %v1363_v59  ;;  %v10333_v59 = vld [vmem:[#allocation49_spill] sm:$0xff] }
 0x9a8   :  { %v3430_v40 = vadd.f32 %v10326_v46, %v1364_v12  ;;  %v1369_v12 = vmul.f32 %v7147_v19, %v10333_v59  ;;  %v10340_v59 = vld [vmem:[#allocation16_spill] sm:$0xff] }
 0x9aa   :  { %v8061_v5 = vpop.permute.xlu1 %3079 }
 0x9ab   :  { %10327 = vst [vmem:[#allocation308_spill] sm:$0xff] %v8061_v5 }
 0x9ae   :  { %3961 = vperm.xlu2 %5512, %v3426_v54   ;;  %v1366_v54 = vmul.f32 %v7143_v27, %v10329_v24 }
 0x9af   :  { %3964 = vperm.xlu1 %5513, %v3427_v2   ;;  %v8077_v24 = vpop.permute.xlu2 %3103 }
 0x9b0   :  { %v3432_v2 = vadd.f32 %v10330_v55, %v1366_v54  ;;  %10337 = vst [vmem:[#allocation37_spill] sm:$0xff] %v8077_v24  ;;  %v10338_v54 = vld [vmem:[#allocation279_spill] sm:$0xff] }
 0x9b1   :  { %v1596_v35 = vmul.f32 %v7168_v7, %v10338_v54 }
 0x9b6   :  { %3970 = vperm.xlu2 %5512, %v3429_v25   ;;  %v10335_v25 = vld [vmem:[#allocation326_spill] sm:$0xff] }
 0x9b7   :  { %3973 = vperm.xlu1 %5513, %v3430_v40   ;;  %v10334_v40 = vld [vmem:[#allocation15_spill] sm:$0xff]  ;;  %v3435_v46 = vadd.f32 %v10335_v25, %v1369_v12  ;;  %v10341_v12 = vld [vmem:[#allocation197_spill] sm:$0xff] }
 0x9b8   :  { %v8069_v32 = vpop.permute.xlu1 %3097  ;;  %v1370_v18 = vmul.f32 %v7161_v61, %v10334_v40  ;;  %v8085_v40 = vpop.permute.xlu0 %4228  ;;  %v10342_v25 = vld [vmem:[#allocation327_spill] sm:$0xff] }
 0x9b9   :  { %10332 = vst [vmem:[#allocation271_spill] sm:$0xff] %v8069_v32  ;;  %v1373_v32 = vmul.f32 %v7165_v28, %v10340_v59 }
 0x9ba   :  { %v3436_v5 = vadd.f32 %v10336_v21, %v1370_v18  ;;  %v10344_v21 = vld [vmem:[#allocation53_spill] sm:$0xff] }
 0x9bb   :  { %v1375_v54 = vmul.f32 %v7177_v49, %v10344_v21 }
 0x9be   :  { %3979 = vperm.xlu2 %5512, %v3432_v2   ;;  %v10339_v2 = vld [vmem:[#allocation51_spill] sm:$0xff] }
 0x9bf   :  { %3982 = vperm.xlu1 %5513, %v3433_v23   ;;  %v1372_v41 = vmul.f32 %v7168_v7, %v10339_v2  ;;  %v10346_v2 = vld [vmem:[#allocation329_spill] sm:$0xff] }
 0x9c0   :  { %v3441_v24 = vadd.f32 %v10346_v2, %v1375_v54  ;;  %v10351_v54 = vld [vmem:[#allocation331_spill] sm:$0xff] }
 0x9c1   :  { %v3438_v18 = vadd.f32 %v10341_v12, %v1372_v41  ;;  %v10348_v41 = vld [vmem:[#allocation283_spill] sm:$0xff] }
 0x9c6   :  { %3988 = vperm.xlu2 %5512, %v3435_v46   ;;  %v3439_v46 = vadd.f32 %v10342_v25, %v1373_v32  ;;  %v1599_v32 = vmul.f32 %v7177_v49, %v10348_v41 }
 0x9c7   :  { %3991 = vperm.xlu1 %5513, %v3436_v5   ;;  %v8089_v5 = vpop.permute.xlu2 %3121 }
 0x9c8   :  { %v3110_v23 = vpop.permute.xlu1 %3109  ;;  %10343 = vst [vmem:[#allocation34_spill] sm:$0xff] %v8089_v5  ;;  %v10350_v5 = vld [vmem:[#allocation55_spill] sm:$0xff] }
 0x9c9   :  { %v3662_v55 = vadd.f32 %v3110_v23, %v1596_v35  ;;  %v10345_v35 = vld [vmem:[#allocation17_spill] sm:$0xff] }
 0x9ca   :  { %v1376_v23 = vmul.f32 %v7174_v44, %v10345_v35  ;;  %v1378_v35 = vmul.f32 %v7183_v22, %v10350_v5 }
 0x9cb   :  { %4669 = vperm.xlu0 %5514, %v3662_v55  }
 0x9cc   :  { %v3442_v59 = vadd.f32 %v7280_v0, %v1376_v23  ;;  %v3444_v0 = vadd.f32 %v10351_v54, %v1378_v35  ;;  %v10352_v23 = vld [vmem:[#allocation286_spill] sm:$0xff] }
 0x9cd   :  { %v1602_v2 = vmul.f32 %v7183_v22, %v10352_v23 }
 0x9ce   :  { %3997 = vperm.xlu2 %5512, %v3438_v18   ;;  %v8101_v18 = vpop.permute.xlu0 %4237 }
 0x9cf   :  { %4000 = vperm.xlu1 %5513, %v3439_v46   ;;  %v8097_v55 = vpop.permute.xlu2 %3133  ;;  %v10349_v46 = vld [vmem:[#allocation18_spill] sm:$0xff]  ;;  %v3668_v41 = vadd.f32 %v7639_v57, %v1602_v2 }
 0x9d0   :  { %10347 = vst [vmem:[#allocation312_spill] sm:$0xff] %v8097_v55  ;;  %v1379_v21 = vmul.f32 %v7179_v43, %v10349_v46  ;;  %v10355_v46 = vld [vmem:[#allocation19_spill] sm:$0xff] }
 0x9d1   :  { %v1382_v5 = vmul.f32 %v7143_v27, %v10355_v46 }
 0x9d6   :  { %4006 = vperm.xlu2 %5512, %v3441_v24   ;;  %v3445_v24 = vadd.f32 %v7286_v51, %v1379_v21  ;;  %v10357_v21 = vld [vmem:[#allocation216_spill] sm:$0xff] }
 0x9d7   :  { %4009 = vperm.xlu1 %5513, %v3442_v59   ;;  %v3448_v35 = vadd.f32 %v10357_v21, %v1382_v5  ;;  %v10362_v5 = vld [vmem:[#allocation21_spill] sm:$0xff] }
 0x9d8   :  { %v3128_v12 = vpop.permute.xlu1 %3127  ;;  %v10363_v21 = vld [vmem:[#allocation225_spill] sm:$0xff] }
 0x9d9   :  { %v3665_v25 = vadd.f32 %v3128_v12, %v1599_v32  ;;  %v10354_v32 = vld [vmem:[#allocation58_spill] sm:$0xff] }
 0x9da   :  { %v1381_v12 = vmul.f32 %v7140_v13, %v10354_v32 }
 0x9db   :  { %4678 = vperm.xlu0 %5514, %v3665_v25   ;;  %v8118_v25 = vpop.permute.xlu0 %4246 }
 0x9dc   :  { %10356 = vst [vmem:[#allocation36_spill] sm:$0xff] %v8118_v25  ;;  %v3447_v51 = vadd.f32 %v7292_v6, %v1381_v12  ;;  %v10361_v12 = vld [vmem:[#allocation62_spill] sm:$0xff] }
 0x9dd   :  { %v1387_v46 = vmul.f32 %v7156_v45, %v10361_v12 }
 0x9de   :  { %4015 = vperm.xlu2 %5512, %v3444_v0   ;;  %v10358_v0 = vld [vmem:[#allocation60_spill] sm:$0xff] }
 0x9df   :  { %v8111_v59 = vpop.permute.xlu2 %3151  ;;  %4018 = vperm.xlu1 %5513, %v3445_v24   ;;  %v1384_v57 = vmul.f32 %v7152_v60, %v10358_v0  ;;  %v10359_v24 = vld [vmem:[#allocation20_spill] sm:$0xff] }
 0x9e0   :  { %10353 = vst [vmem:[#allocation311_spill] sm:$0xff] %v8111_v59  ;;  %v1385_v23 = vmul.f32 %v7147_v19, %v10359_v24 }
 0x9e1   :  { %v3450_v2 = vadd.f32 %v7300_v37, %v1384_v57  ;;  %v10365_v57 = vld [vmem:[#allocation64_spill] sm:$0xff] }
 0x9e2   :  { %v3451_v32 = vadd.f32 %v7298_v39, %v1385_v23  ;;  %v1390_v24 = vmul.f32 %v7137_v34, %v10365_v57  ;;  %v10366_v23 = vld [vmem:[#allocation22_spill] sm:$0xff] }
 0x9e3   :  { %4687 = vperm.xlu0 %5514, %v3668_v41  }
 0x9e6   :  { %4024 = vperm.xlu2 %5512, %v3447_v51   ;;  %v1388_v51 = vmul.f32 %v7168_v7, %v10362_v5  ;;  %v10367_v5 = vld [vmem:[#allocation67_spill] sm:$0xff] }
 0x9e7   :  { %4027 = vperm.xlu1 %5513, %v3448_v35   ;;  %v3453_v35 = vadd.f32 %v10363_v21, %v1387_v46  ;;  %v10368_v21 = vld [vmem:[#allocation23_spill] sm:$0xff] }
 0x9e8   :  { %v8122_v54 = vpop.permute.xlu2 %3928  ;;  %v8130_v41 = vpop.permute.xlu1 %3139  ;;  %v3454_v0 = vadd.f32 %v7308_v3, %v1388_v51  ;;  %v1393_v51 = vmul.f32 %v7186_v38, %v10367_v5  ;;  %v10372_v5 = vld [vmem:[#allocation242_spill] sm:$0xff] }
 0x9e9   :  { %10360 = vst [vmem:[#allocation10_spill] sm:$0xff] %v8130_v41  ;;  %v10391_v41 = vld [vmem:[#allocation269_spill] sm:$0xff] }
 0x9ee   :  { %4033 = vperm.xlu2 %5512, %v3450_v2   ;;  %v1391_v2 = vmul.f32 %v7177_v49, %v10366_v23 }
 0x9ef   :  { %4036 = vperm.xlu1 %5513, %v3451_v32   ;;  %v3456_v32 = vadd.f32 %v7312_v53, %v1390_v24  ;;  %v10370_v24 = vld [vmem:[#allocation69_spill] sm:$0xff] }
 0x9f0   :  { %v8132_v6 = vpop.permute.xlu2 %3937  ;;  %v3457_v12 = vadd.f32 %v7321_v26, %v1391_v2  ;;  %v1396_v23 = vmul.f32 %v7195_v47, %v10370_v24  ;;  %v10371_v2 = vld [vmem:[#allocation24_spill] sm:$0xff] }
 0x9f6   :  { %4042 = vperm.xlu2 %5512, %v3453_v35   ;;  %v1394_v35 = vmul.f32 %v7183_v22, %v10368_v21 }
 0x9f7   :  { %4045 = vperm.xlu1 %5513, %v3454_v0   ;;  %v3459_v0 = vadd.f32 %v7319_v10, %v1393_v51  ;;  %v10374_v51 = vld [vmem:[#allocation71_spill] sm:$0xff] }
 0x9f8   :  { %v8140_v37 = vpop.permute.xlu2 %3943  ;;  %v8142_v39 = vpop.permute.xlu1 %3157  ;;  %v3460_v57 = vadd.f32 %v7327_v16, %v1394_v35  ;;  %v1399_v35 = vmul.f32 %v6792_v20, %v10374_v51  ;;  %v10378_v51 = vld [vmem:[#allocation251_spill] sm:$0xff] }
 0x9f9   :  { %10364 = vst [vmem:[#allocation309_spill] sm:$0xff] %v8142_v39 }
 0x9fa   :  { %v3465_v24 = vadd.f32 %v7341_v30, %v1399_v35 }
 0x9fe   :  { %4051 = vperm.xlu2 %5512, %v3456_v32   ;;  %v1397_v32 = vmul.f32 %v7140_v13, %v10371_v2 }
 0x9ff   :  { %4054 = vperm.xlu1 %5513, %v3457_v12   ;;  %v3462_v12 = vadd.f32 %v7333_v1, %v1396_v23 }
 0xa00   :  { %v8150_v46 = vpop.permute.xlu2 %3952  ;;  %v3463_v21 = vadd.f32 %v10372_v5, %v1397_v32  ;;  %v10376_v32 = vld [vmem:[#allocation73_spill] sm:$0xff]  ;;  %v10377_v5 = vld [vmem:[#allocation26_spill] sm:$0xff] }
 0xa01   :  { %v8152_v3 = vpop.permute.xlu1 %3931 }
 0xa06   :  { %4060 = vperm.xlu2 %5512, %v3459_v0   ;;  %v10375_v0 = vld [vmem:[#allocation25_spill] sm:$0xff] }
 0xa07   :  { %4063 = vperm.xlu1 %5513, %v3460_v57   ;;  %v1400_v57 = vmul.f32 %v7152_v60, %v10375_v0 }
 0xa08   :  { %v8160_v53 = vpop.permute.xlu2 %3961 }
 0xa09   :  { %10369 = vst [vmem:[#allocation313_spill] sm:$0xff] %v8160_v53  ;;  %v8162_v26 = vpop.permute.xlu1 %3940  ;;  %v3466_v2 = vadd.f32 %v7339_v58, %v1400_v57  ;;  %v10380_v58 = vld [vmem:[#allocation27_spill] sm:$0xff] }
 0xa0a   :  { %v1406_v35 = vmul.f32 %v7137_v34, %v10380_v58  ;;  %v10425_v53 = vld [vmem:[#allocation95_spill] sm:$0xff] }
 0xa0e   :  { %4069 = vperm.xlu2 %5512, %v3462_v12   ;;  %v1402_v12 = vmul.f32 %v7161_v61, %v10376_v32 }
 0xa0f   :  { %4072 = vperm.xlu1 %5513, %v3463_v21   ;;  %v1403_v21 = vmul.f32 %v7156_v45, %v10377_v5  ;;  %v3472_v5 = vadd.f32 %v7362_v36, %v1406_v35  ;;  %v10388_v35 = vld [vmem:[#allocation81_spill] sm:$0xff] }
 0xa10   :  { %v8170_v10 = vpop.permute.xlu2 %3970  ;;  %v3468_v39 = vadd.f32 %v10378_v51, %v1402_v12  ;;  %v10386_v51 = vld [vmem:[#allocation28_spill] sm:$0xff] }
 0xa11   :  { %10373 = vst [vmem:[#allocation274_spill] sm:$0xff] %v8170_v10  ;;  %v8172_v16 = vpop.permute.xlu1 %3946  ;;  %v3469_v0 = vadd.f32 %v7347_v31, %v1403_v21 }
 0xa16   :  { %4078 = vperm.xlu2 %5512, %v3465_v24   ;;  %v10382_v24 = vld [vmem:[#allocation76_spill] sm:$0xff] }
 0xa17   :  { %4081 = vperm.xlu1 %5513, %v3466_v2   ;;  %v1405_v2 = vmul.f32 %v7165_v28, %v10382_v24 }
 0xa18   :  { %v8180_v1 = vpop.permute.xlu2 %3979 }
 0xa19   :  { %v8182_v23 = vpop.permute.xlu1 %3955  ;;  %v3471_v32 = vadd.f32 %v7356_v42, %v1405_v2  ;;  %v1411_v2 = vmul.f32 %v7179_v43, %v10388_v35  ;;  %v10396_v35 = vld [vmem:[#allocation334_spill] sm:$0xff] }
 0xa1e   :  { %4087 = vperm.xlu2 %5512, %v3468_v39   ;;  %v10385_v39 = vld [vmem:[#allocation78_spill] sm:$0xff] }
 0xa1f   :  { %4090 = vperm.xlu1 %5513, %v3469_v0   ;;  %v1408_v21 = vmul.f32 %v7174_v44, %v10385_v39  ;;  %v1409_v0 = vmul.f32 %v7186_v38, %v10386_v51  ;;  %v10390_v39 = vld [vmem:[#allocation332_spill] sm:$0xff] }
 0xa20   :  { %v8190_v30 = vpop.permute.xlu2 %3988  ;;  %v3477_v59 = vadd.f32 %v10390_v39, %v1411_v2  ;;  %v10400_v39 = vld [vmem:[#allocation31_spill] sm:$0xff] }
 0xa21   :  { %10379 = vst [vmem:[#allocation11_spill] sm:$0xff] %v8190_v30  ;;  %v8194_v57 = vpop.permute.xlu1 %3964  ;;  %v3474_v58 = vadd.f32 %v7360_v33, %v1408_v21  ;;  %v3475_v24 = vadd.f32 %v7368_v11, %v1409_v0  ;;  %v10393_v11 = vld [vmem:[#allocation30_spill] sm:$0xff] }
 0xa22   :  { %10381 = vst [vmem:[#allocation40_spill] sm:$0xff] %v8194_v57  ;;  %v1415_v21 = vmul.f32 %v6792_v20, %v10393_v11  ;;  %v10401_v11 = vld [vmem:[#allocation277_spill] sm:$0xff] }
 0xa26   :  { %4096 = vperm.xlu2 %5512, %v3471_v32   ;;  %v10389_v32 = vld [vmem:[#allocation29_spill] sm:$0xff] }
 0xa27   :  { %4099 = vperm.xlu1 %5513, %v3472_v5   ;;  %v1412_v5 = vmul.f32 %v7195_v47, %v10389_v32 }
 0xa28   :  { %v8200_v12 = vpop.permute.xlu2 %3997 }
 0xa29   :  { %10383 = vst [vmem:[#allocation322_spill] sm:$0xff] %v8200_v12  ;;  %v8202_v31 = vpop.permute.xlu1 %3973  ;;  %v3478_v51 = vadd.f32 %v10391_v41, %v1412_v5  ;;  %v10399_v41 = vld [vmem:[#allocation88_spill] sm:$0xff]  ;;  %v10408_v12 = vld [vmem:[#allocation85_spill] sm:$0xff] }
 0xa2a   :  { %10384 = vst [vmem:[#allocation314_spill] sm:$0xff] %v8202_v31  ;;  %v1417_v5 = vmul.f32 %v7147_v19, %v10399_v41  ;;  %v10402_v31 = vld [vmem:[#allocation79_spill] sm:$0xff]  ;;  %v10407_v41 = vld [vmem:[#allocation260_spill] sm:$0xff] }
 0xa2e   :  { %4105 = vperm.xlu2 %5512, %v3474_v58   ;;  %v10395_v58 = vld [vmem:[#allocation84_spill] sm:$0xff] }
 0xa2f   :  { %4108 = vperm.xlu1 %5513, %v3475_v24   ;;  %v1414_v24 = vmul.f32 %v7143_v27, %v10395_v58 }
 0xa30   :  { %v8210_v42 = vpop.permute.xlu2 %4006 }
 0xa31   :  { %10387 = vst [vmem:[#allocation42_spill] sm:$0xff] %v8210_v42  ;;  %v8212_v36 = vpop.permute.xlu1 %3982  ;;  %v3480_v55 = vadd.f32 %v10396_v35, %v1414_v24  ;;  %v10397_v42 = vld [vmem:[#allocation333_spill] sm:$0xff]  ;;  %v10406_v35 = vld [vmem:[#allocation32_spill] sm:$0xff] }
 0xa32   :  { %v3481_v32 = vadd.f32 %v10397_v42, %v1415_v21  ;;  %v10405_v42 = vld [vmem:[#allocation91_spill] sm:$0xff] }
 0xa33   :  { %v1420_v21 = vmul.f32 %v7168_v7, %v10405_v42  ;;  %v10413_v42 = vld [vmem:[#allocation82_spill] sm:$0xff] }
 0xa35   :  { %v3486_v10 = vadd.f32 %v10407_v41, %v1420_v21  ;;  %v10417_v41 = vld [vmem:[#allocation97_spill] sm:$0xff] }
 0xa36   :  { %4114 = vperm.xlu2 %5512, %v3477_v59  }
 0xa37   :  { %4117 = vperm.xlu1 %5513, %v3478_v51   ;;  %v1418_v51 = vmul.f32 %v7161_v61, %v10400_v39 }
 0xa38   :  { %v8220_v33 = vpop.permute.xlu2 %4015 }
 0xa39   :  { %10392 = vst [vmem:[#allocation12_spill] sm:$0xff] %v8220_v33  ;;  %v8224_v0 = vpop.permute.xlu1 %3991  ;;  %v3483_v33 = vadd.f32 %v10401_v11, %v1417_v5  ;;  %v3484_v58 = vadd.f32 %v10402_v31, %v1418_v51  ;;  %v10412_v11 = vld [vmem:[#allocation33_spill] sm:$0xff] }
 0xa3a   :  { %10394 = vst [vmem:[#allocation316_spill] sm:$0xff] %v8224_v0  ;;  %v10606_v0 = vld [vmem:[#allocation227_spill] sm:$0xff] }
 0xa3e   :  { %4123 = vperm.xlu2 %5512, %v3480_v55  }
 0xa3f   :  { %4126 = vperm.xlu1 %5513, %v3481_v32   ;;  %v1421_v32 = vmul.f32 %v7165_v28, %v10406_v35 }
 0xa40   :  { %v8230_v2 = vpop.permute.xlu2 %4024 }
 0xa41   :  { %v8232_v59 = vpop.permute.xlu1 %4000  ;;  %v3487_v39 = vadd.f32 %v10408_v12, %v1421_v32 }
 0xa42   :  { %10398 = vst [vmem:[#allocation319_spill] sm:$0xff] %v8232_v59  ;;  %v10414_v59 = vld [vmem:[#allocation89_spill] sm:$0xff] }
 0xa46   :  { %4132 = vperm.xlu2 %5512, %v3483_v33   ;;  %v10411_v33 = vld [vmem:[#allocation94_spill] sm:$0xff] }
 0xa47   :  { %4135 = vperm.xlu1 %5513, %v3484_v58   ;;  %v1423_v51 = vmul.f32 %v7177_v49, %v10411_v33  ;;  %v1424_v58 = vmul.f32 %v7174_v44, %v10412_v11  ;;  %v10418_v33 = vld [vmem:[#allocation92_spill] sm:$0xff] }
 0xa48   :  { %v8240_v24 = vpop.permute.xlu2 %4033 }
 0xa49   :  { %10403 = vst [vmem:[#allocation44_spill] sm:$0xff] %v8240_v24  ;;  %v8242_v55 = vpop.permute.xlu1 %4009  ;;  %v3490_v35 = vadd.f32 %v10414_v59, %v1424_v58  ;;  %v10575_v24 = vld [vmem:[#allocation294_spill] sm:$0xff] }
 0xa4a   :  { %10404 = vst [vmem:[#allocation13_spill] sm:$0xff] %v8242_v55  ;;  %v3489_v55 = vadd.f32 %v10413_v42, %v1423_v51  ;;  %v10423_v42 = vld [vmem:[#allocation38_spill] sm:$0xff] }
 0xa4e   :  { %4141 = vperm.xlu2 %5512, %v3486_v10   ;;  %v10416_v10 = vld [vmem:[#allocation35_spill] sm:$0xff] }
 0xa4f   :  { %4144 = vperm.xlu1 %5513, %v3487_v39   ;;  %v1427_v12 = vmul.f32 %v7179_v43, %v10416_v10  ;;  %v1426_v39 = vmul.f32 %v7183_v22, %v10417_v41  ;;  %v10424_v10 = vld [vmem:[#allocation291_spill] sm:$0xff] }
 0xa50   :  { %v8250_v5 = vpop.permute.xlu2 %4042 }
 0xa51   :  { %10409 = vst [vmem:[#allocation318_spill] sm:$0xff] %v8250_v5  ;;  %v8252_v31 = vpop.permute.xlu1 %4018  ;;  %v10419_v5 = vld [vmem:[#allocation304_spill] sm:$0xff] }
 0xa52   :  { %10410 = vst [vmem:[#allocation321_spill] sm:$0xff] %v8252_v31  ;;  %v3492_v31 = vadd.f32 %v10418_v33, %v1426_v39  ;;  %v3493_v11 = vadd.f32 %v10419_v5, %v1427_v12  ;;  %v10429_v33 = vld [vmem:[#allocation39_spill] sm:$0xff] }
 0xa56   :  { %4150 = vperm.xlu2 %5512, %v3489_v55   ;;  %v10422_v55 = vld [vmem:[#allocation100_spill] sm:$0xff] }
 0xa57   :  { %4153 = vperm.xlu1 %5513, %v3490_v35   ;;  %v1429_v58 = vmul.f32 %v7140_v13, %v10422_v55  ;;  %v1430_v35 = vmul.f32 %v7143_v27, %v10423_v42  ;;  %v10430_v55 = vld [vmem:[#allocation315_spill] sm:$0xff] }
 0xa58   :  { %v8260_v21 = vpop.permute.xlu2 %4051 }
 0xa59   :  { %10415 = vst [vmem:[#allocation14_spill] sm:$0xff] %v8260_v21  ;;  %v8264_v32 = vpop.permute.xlu1 %4027  ;;  %v3495_v21 = vadd.f32 %v10424_v10, %v1429_v58  ;;  %v3496_v41 = vadd.f32 %v10425_v53, %v1430_v35  ;;  %v10434_v10 = vld [vmem:[#allocation41_spill] sm:$0xff] }
 0xa5e   :  { %4159 = vperm.xlu2 %5512, %v3492_v31   ;;  %v10428_v31 = vld [vmem:[#allocation103_spill] sm:$0xff] }
 0xa5f   :  { %4162 = vperm.xlu1 %5513, %v3493_v11   ;;  %v1432_v12 = vmul.f32 %v7152_v60, %v10428_v31  ;;  %v1433_v11 = vmul.f32 %v7147_v19, %v10429_v33  ;;  %v10435_v31 = vld [vmem:[#allocation98_spill] sm:$0xff] }
 0xa60   :  { %v8270_v51 = vpop.permute.xlu2 %4060 }
 0xa61   :  { %10420 = vst [vmem:[#allocation46_spill] sm:$0xff] %v8270_v51  ;;  %v8272_v59 = vpop.permute.xlu1 %4036  ;;  %v3498_v51 = vadd.f32 %v10430_v55, %v1432_v12  ;;  %v3499_v42 = vadd.f32 %v7430_v62, %v1433_v11  ;;  %v10440_v55 = vld [vmem:[#allocation43_spill] sm:$0xff] }
 0xa62   :  { %10421 = vst [vmem:[#allocation323_spill] sm:$0xff] %v8272_v59  ;;  %v10577_v59 = vld [vmem:[#allocation87_spill] sm:$0xff] }
 0xa66   :  { %4168 = vperm.xlu2 %5512, %v3495_v21   ;;  %v10433_v21 = vld [vmem:[#allocation106_spill] sm:$0xff] }
 0xa67   :  { %4171 = vperm.xlu1 %5513, %v3496_v41   ;;  %v1435_v35 = vmul.f32 %v7156_v45, %v10433_v21  ;;  %v1436_v41 = vmul.f32 %v7168_v7, %v10434_v10  ;;  %v10441_v21 = vld [vmem:[#allocation101_spill] sm:$0xff] }
 0xa68   :  { %v8280_v39 = vpop.permute.xlu2 %4069 }
 0xa69   :  { %10426 = vst [vmem:[#allocation188_spill] sm:$0xff] %v8280_v39  ;;  %v8282_v5 = vpop.permute.xlu1 %4045  ;;  %v3501_v39 = vadd.f32 %v10435_v31, %v1435_v35  ;;  %v10446_v31 = vld [vmem:[#allocation45_spill] sm:$0xff] }
 0xa6a   :  { %10427 = vst [vmem:[#allocation49_spill] sm:$0xff] %v8282_v5  ;;  %v10436_v5 = vld [vmem:[#allocation168_spill] sm:$0xff] }
 0xa6b   :  { %v3502_v33 = vadd.f32 %v10436_v5, %v1436_v41  ;;  %v10445_v5 = vld [vmem:[#allocation112_spill] sm:$0xff] }
 0xa6c   :  { %v1441_v41 = vmul.f32 %v7186_v38, %v10445_v5  ;;  %v10453_v5 = vld [vmem:[#allocation324_spill] sm:$0xff] }
 0xa6e   :  { %4177 = vperm.xlu2 %5512, %v3498_v51   ;;  %v10439_v51 = vld [vmem:[#allocation109_spill] sm:$0xff] }
 0xa6f   :  { %4180 = vperm.xlu1 %5513, %v3499_v42   ;;  %v1438_v11 = vmul.f32 %v7137_v34, %v10439_v51  ;;  %v1439_v42 = vmul.f32 %v7177_v49, %v10440_v55  ;;  %v10447_v51 = vld [vmem:[#allocation107_spill] sm:$0xff] }
 0xa70   :  { %v8290_v58 = vpop.permute.xlu2 %4078 }
 0xa71   :  { %10431 = vst [vmem:[#allocation15_spill] sm:$0xff] %v8290_v58  ;;  %v8292_v53 = vpop.permute.xlu1 %4054  ;;  %v10442_v58 = vld [vmem:[#allocation104_spill] sm:$0xff] }
 0xa72   :  { %10432 = vst [vmem:[#allocation326_spill] sm:$0xff] %v8292_v53  ;;  %v3504_v53 = vadd.f32 %v10441_v21, %v1438_v11  ;;  %v3505_v10 = vadd.f32 %v10442_v58, %v1439_v42  ;;  %v10452_v21 = vld [vmem:[#allocation47_spill] sm:$0xff] }
 0xa76   :  { %4186 = vperm.xlu2 %5512, %v3501_v39  }
 0xa77   :  { %4189 = vperm.xlu1 %5513, %v3502_v33   ;;  %v1442_v33 = vmul.f32 %v7183_v22, %v10446_v31 }
 0xa78   :  { %v8300_v12 = vpop.permute.xlu2 %4087 }
 0xa79   :  { %10437 = vst [vmem:[#allocation325_spill] sm:$0xff] %v8300_v12  ;;  %v8302_v62 = vpop.permute.xlu1 %4063  ;;  %v10448_v12 = vld [vmem:[#allocation276_spill] sm:$0xff] }
 0xa7a   :  { %10438 = vst [vmem:[#allocation279_spill] sm:$0xff] %v8302_v62  ;;  %v3507_v62 = vadd.f32 %v10447_v51, %v1441_v41  ;;  %v3508_v55 = vadd.f32 %v10448_v12, %v1442_v33  ;;  %v10458_v51 = vld [vmem:[#allocation48_spill] sm:$0xff] }
 0xa7e   :  { %4195 = vperm.xlu2 %5512, %v3504_v53   ;;  %v10451_v53 = vld [vmem:[#allocation115_spill] sm:$0xff] }
 0xa7f   :  { %4198 = vperm.xlu1 %5513, %v3505_v10   ;;  %v1444_v42 = vmul.f32 %v7195_v47, %v10451_v53  ;;  %v1445_v10 = vmul.f32 %v7140_v13, %v10452_v21  ;;  %v10459_v53 = vld [vmem:[#allocation191_spill] sm:$0xff] }
 0xa80   :  { %v8310_v35 = vpop.permute.xlu2 %4096 }
 0xa81   :  { %10443 = vst [vmem:[#allocation51_spill] sm:$0xff] %v8310_v35  ;;  %v8312_v39 = vpop.permute.xlu1 %4072  ;;  %v3510_v35 = vadd.f32 %v10453_v5, %v1444_v42  ;;  %v10464_v5 = vld [vmem:[#allocation50_spill] sm:$0xff] }
 0xa82   :  { %10444 = vst [vmem:[#allocation16_spill] sm:$0xff] %v8312_v39  ;;  %v10454_v39 = vld [vmem:[#allocation110_spill] sm:$0xff] }
 0xa83   :  { %v3511_v31 = vadd.f32 %v10454_v39, %v1445_v10  ;;  %v10463_v39 = vld [vmem:[#allocation121_spill] sm:$0xff] }
 0xa84   :  { %v1450_v10 = vmul.f32 %v7161_v61, %v10463_v39  ;;  %v10471_v39 = vld [vmem:[#allocation119_spill] sm:$0xff] }
 0xa86   :  { %4204 = vperm.xlu2 %5512, %v3507_v62   ;;  %v10457_v62 = vld [vmem:[#allocation118_spill] sm:$0xff] }
 0xa87   :  { %4207 = vperm.xlu1 %5513, %v3508_v55   ;;  %v1447_v33 = vmul.f32 %v6792_v20, %v10457_v62  ;;  %v1448_v55 = vmul.f32 %v7152_v60, %v10458_v51  ;;  %v10465_v62 = vld [vmem:[#allocation116_spill] sm:$0xff] }
 0xa88   :  { %v8320_v11 = vpop.permute.xlu2 %4105 }
 0xa89   :  { %10449 = vst [vmem:[#allocation197_spill] sm:$0xff] %v8320_v11  ;;  %v8322_v58 = vpop.permute.xlu1 %4081  ;;  %v3513_v11 = vadd.f32 %v10459_v53, %v1447_v33  ;;  %v10470_v53 = vld [vmem:[#allocation52_spill] sm:$0xff] }
 0xa8a   :  { %10450 = vst [vmem:[#allocation327_spill] sm:$0xff] %v8322_v58  ;;  %v10460_v58 = vld [vmem:[#allocation113_spill] sm:$0xff] }
 0xa8b   :  { %v3514_v21 = vadd.f32 %v10460_v58, %v1448_v55  ;;  %v10469_v58 = vld [vmem:[#allocation124_spill] sm:$0xff] }
 0xa8c   :  { %v1453_v55 = vmul.f32 %v7165_v28, %v10469_v58  ;;  %v10477_v58 = vld [vmem:[#allocation202_spill] sm:$0xff] }
 0xa8e   :  { %4213 = vperm.xlu2 %5512, %v3510_v35  }
 0xa8f   :  { %4216 = vperm.xlu1 %5513, %v3511_v31   ;;  %v1451_v31 = vmul.f32 %v7156_v45, %v10464_v5 }
 0xa90   :  { %v8330_v41 = vpop.permute.xlu2 %4114 }
 0xa91   :  { %10455 = vst [vmem:[#allocation53_spill] sm:$0xff] %v8330_v41  ;;  %v8332_v12 = vpop.permute.xlu1 %4090  ;;  %v3516_v41 = vadd.f32 %v10465_v62, %v1450_v10  ;;  %v10476_v62 = vld [vmem:[#allocation54_spill] sm:$0xff] }
 0xa92   :  { %10456 = vst [vmem:[#allocation17_spill] sm:$0xff] %v8332_v12  ;;  %v10466_v12 = vld [vmem:[#allocation122_spill] sm:$0xff] }
 0xa93   :  { %v3517_v51 = vadd.f32 %v10466_v12, %v1451_v31  ;;  %v10475_v12 = vld [vmem:[#allocation127_spill] sm:$0xff] }
 0xa94   :  { %v1456_v31 = vmul.f32 %v7174_v44, %v10475_v12  ;;  %v10483_v12 = vld [vmem:[#allocation128_spill] sm:$0xff] }
 0xa96   :  { %4222 = vperm.xlu2 %5512, %v3513_v11  }
 0xa97   :  { %4225 = vperm.xlu1 %5513, %v3514_v21   ;;  %v1454_v21 = vmul.f32 %v7137_v34, %v10470_v53 }
 0xa98   :  { %v8340_v42 = vpop.permute.xlu2 %4123 }
 0xa99   :  { %10461 = vst [vmem:[#allocation329_spill] sm:$0xff] %v8340_v42  ;;  %v8342_v35 = vpop.permute.xlu1 %4099  ;;  %v10472_v42 = vld [vmem:[#allocation125_spill] sm:$0xff] }
 0xa9a   :  { %10462 = vst [vmem:[#allocation283_spill] sm:$0xff] %v8342_v35  ;;  %v3519_v35 = vadd.f32 %v10471_v39, %v1453_v55  ;;  %v3520_v5 = vadd.f32 %v10472_v42, %v1454_v21  ;;  %v10482_v39 = vld [vmem:[#allocation56_spill] sm:$0xff] }
 0xa9e   :  { %4231 = vperm.xlu2 %5512, %v3516_v41  }
 0xa9f   :  { %4234 = vperm.xlu1 %5513, %v3517_v51   ;;  %v1457_v51 = vmul.f32 %v7186_v38, %v10476_v62 }
 0xaa0   :  { %v8350_v33 = vpop.permute.xlu2 %4132 }
 0xaa1   :  { %10467 = vst [vmem:[#allocation18_spill] sm:$0xff] %v8350_v33  ;;  %v8352_v11 = vpop.permute.xlu1 %4108  ;;  %v10478_v33 = vld [vmem:[#allocation210_spill] sm:$0xff] }
 0xaa2   :  { %10468 = vst [vmem:[#allocation55_spill] sm:$0xff] %v8352_v11  ;;  %v3522_v11 = vadd.f32 %v10477_v58, %v1456_v31  ;;  %v3523_v53 = vadd.f32 %v10478_v33, %v1457_v51  ;;  %v10488_v58 = vld [vmem:[#allocation57_spill] sm:$0xff] }
 0xaa6   :  { %4240 = vperm.xlu2 %5512, %v3519_v35   ;;  %v10481_v35 = vld [vmem:[#allocation132_spill] sm:$0xff] }
 0xaa7   :  { %4243 = vperm.xlu1 %5513, %v3520_v5   ;;  %v1459_v21 = vmul.f32 %v7179_v43, %v10481_v35  ;;  %v1460_v5 = vmul.f32 %v7195_v47, %v10482_v39  ;;  %v10489_v35 = vld [vmem:[#allocation219_spill] sm:$0xff] }
 0xaa8   :  { %v8360_v10 = vpop.permute.xlu2 %4141 }
 0xaa9   :  { %10473 = vst [vmem:[#allocation331_spill] sm:$0xff] %v8360_v10  ;;  %v8362_v41 = vpop.permute.xlu1 %4117  ;;  %v10484_v10 = vld [vmem:[#allocation133_spill] sm:$0xff] }
 0xaaa   :  { %10474 = vst [vmem:[#allocation286_spill] sm:$0xff] %v8362_v41  ;;  %v3525_v41 = vadd.f32 %v10483_v12, %v1459_v21  ;;  %v3526_v62 = vadd.f32 %v10484_v10, %v1460_v5  ;;  %v10494_v12 = vld [vmem:[#allocation59_spill] sm:$0xff] }
 0xaae   :  { %4249 = vperm.xlu2 %5512, %v3522_v11   ;;  %v10487_v11 = vld [vmem:[#allocation135_spill] sm:$0xff] }
 0xaaf   :  { %4252 = vperm.xlu1 %5513, %v3523_v53   ;;  %v1462_v51 = vmul.f32 %v7143_v27, %v10487_v11  ;;  %v1463_v53 = vmul.f32 %v6792_v20, %v10488_v58  ;;  %v10495_v11 = vld [vmem:[#allocation136_spill] sm:$0xff] }
 0xab0   :  { %v8370_v55 = vpop.permute.xlu2 %4150 }
 0xab1   :  { %10479 = vst [vmem:[#allocation58_spill] sm:$0xff] %v8370_v55  ;;  %v8372_v42 = vpop.permute.xlu1 %4126  ;;  %v3528_v55 = vadd.f32 %v10489_v35, %v1462_v51  ;;  %v10500_v35 = vld [vmem:[#allocation61_spill] sm:$0xff] }
 0xab2   :  { %10480 = vst [vmem:[#allocation19_spill] sm:$0xff] %v8372_v42  ;;  %v10490_v42 = vld [vmem:[#allocation198_spill] sm:$0xff] }
 0xab3   :  { %v3529_v39 = vadd.f32 %v10490_v42, %v1463_v53  ;;  %v10499_v42 = vld [vmem:[#allocation142_spill] sm:$0xff] }
 0xab4   :  { %v1468_v53 = vmul.f32 %v7168_v7, %v10499_v42  ;;  %v10507_v42 = vld [vmem:[#allocation146_spill] sm:$0xff] }
 0xab6   :  { %4258 = vperm.xlu2 %5512, %v3525_v41   ;;  %v10493_v41 = vld [vmem:[#allocation138_spill] sm:$0xff] }
 0xab7   :  { %4261 = vperm.xlu1 %5513, %v3526_v62   ;;  %v1465_v5 = vmul.f32 %v7147_v19, %v10493_v41  ;;  %v1466_v62 = vmul.f32 %v7161_v61, %v10494_v12  ;;  %v10501_v41 = vld [vmem:[#allocation139_spill] sm:$0xff] }
 0xab8   :  { %v8380_v31 = vpop.permute.xlu2 %4159 }
 0xab9   :  { %10485 = vst [vmem:[#allocation216_spill] sm:$0xff] %v8380_v31  ;;  %v8382_v33 = vpop.permute.xlu1 %4135  ;;  %v3531_v31 = vadd.f32 %v10495_v11, %v1465_v5  ;;  %v10506_v11 = vld [vmem:[#allocation63_spill] sm:$0xff] }
 0xaba   :  { %10486 = vst [vmem:[#allocation60_spill] sm:$0xff] %v8382_v33  ;;  %v10496_v33 = vld [vmem:[#allocation143_spill] sm:$0xff] }
 0xabb   :  { %v3532_v58 = vadd.f32 %v10496_v33, %v1466_v62  ;;  %v10505_v33 = vld [vmem:[#allocation145_spill] sm:$0xff] }
 0xabc   :  { %v1471_v62 = vmul.f32 %v7177_v49, %v10505_v33  ;;  %v10513_v33 = vld [vmem:[#allocation149_spill] sm:$0xff] }
 0xabe   :  { %4267 = vperm.xlu2 %5512, %v3528_v55  }
 0xabf   :  { %4270 = vperm.xlu1 %5513, %v3529_v39   ;;  %v1469_v39 = vmul.f32 %v7165_v28, %v10500_v35 }
 0xac0   :  { %v8390_v21 = vpop.permute.xlu2 %4168 }
 0xac1   :  { %10491 = vst [vmem:[#allocation20_spill] sm:$0xff] %v8390_v21  ;;  %v8392_v10 = vpop.permute.xlu1 %4144  ;;  %v10502_v21 = vld [vmem:[#allocation228_spill] sm:$0xff] }
 0xac2   :  { %10492 = vst [vmem:[#allocation62_spill] sm:$0xff] %v8392_v10  ;;  %v3534_v10 = vadd.f32 %v10501_v41, %v1468_v53  ;;  %v3535_v12 = vadd.f32 %v10502_v21, %v1469_v39  ;;  %v10512_v41 = vld [vmem:[#allocation65_spill] sm:$0xff] }
 0xac6   :  { %4276 = vperm.xlu2 %5512, %v3531_v31  }
 0xac7   :  { %4279 = vperm.xlu1 %5513, %v3532_v58   ;;  %v1472_v58 = vmul.f32 %v7174_v44, %v10506_v11 }
 0xac8   :  { %v8400_v51 = vpop.permute.xlu2 %4177 }
 0xac9   :  { %10497 = vst [vmem:[#allocation21_spill] sm:$0xff] %v8400_v51  ;;  %v8402_v55 = vpop.permute.xlu1 %4153  ;;  %v10508_v51 = vld [vmem:[#allocation234_spill] sm:$0xff] }
 0xaca   :  { %10498 = vst [vmem:[#allocation225_spill] sm:$0xff] %v8402_v55  ;;  %v3537_v55 = vadd.f32 %v10507_v42, %v1471_v62  ;;  %v3538_v35 = vadd.f32 %v10508_v51, %v1472_v58  ;;  %v10518_v42 = vld [vmem:[#allocation66_spill] sm:$0xff] }
 0xace   :  { %4285 = vperm.xlu2 %5512, %v3534_v10   ;;  %v10511_v10 = vld [vmem:[#allocation148_spill] sm:$0xff] }
 0xacf   :  { %4288 = vperm.xlu1 %5513, %v3535_v12   ;;  %v1474_v39 = vmul.f32 %v7183_v22, %v10511_v10  ;;  %v1475_v12 = vmul.f32 %v7179_v43, %v10512_v41  ;;  %v10519_v10 = vld [vmem:[#allocation245_spill] sm:$0xff] }
 0xad0   :  { %v8410_v5 = vpop.permute.xlu2 %4186 }
 0xad1   :  { %10503 = vst [vmem:[#allocation64_spill] sm:$0xff] %v8410_v5  ;;  %v8412_v31 = vpop.permute.xlu1 %4162  ;;  %v10514_v5 = vld [vmem:[#allocation237_spill] sm:$0xff] }
 0xad2   :  { %10504 = vst [vmem:[#allocation22_spill] sm:$0xff] %v8412_v31  ;;  %v3540_v31 = vadd.f32 %v10513_v33, %v1474_v39  ;;  %v3541_v11 = vadd.f32 %v10514_v5, %v1475_v12  ;;  %v10524_v33 = vld [vmem:[#allocation68_spill] sm:$0xff] }
 0xad6   :  { %4294 = vperm.xlu2 %5512, %v3537_v55   ;;  %v10517_v55 = vld [vmem:[#allocation151_spill] sm:$0xff] }
 0xad7   :  { %4297 = vperm.xlu1 %5513, %v3538_v35   ;;  %v1477_v58 = vmul.f32 %v7140_v13, %v10517_v55  ;;  %v1478_v35 = vmul.f32 %v7143_v27, %v10518_v42  ;;  %v10525_v55 = vld [vmem:[#allocation155_spill] sm:$0xff] }
 0xad8   :  { %v8420_v53 = vpop.permute.xlu2 %4195 }
 0xad9   :  { %10509 = vst [vmem:[#allocation67_spill] sm:$0xff] %v8420_v53  ;;  %v8422_v21 = vpop.permute.xlu1 %4171  ;;  %v3543_v53 = vadd.f32 %v10519_v10, %v1477_v58  ;;  %v10530_v10 = vld [vmem:[#allocation70_spill] sm:$0xff] }
 0xada   :  { %10510 = vst [vmem:[#allocation23_spill] sm:$0xff] %v8422_v21  ;;  %v10520_v21 = vld [vmem:[#allocation152_spill] sm:$0xff] }
 0xadb   :  { %v3544_v41 = vadd.f32 %v10520_v21, %v1478_v35  ;;  %v10529_v21 = vld [vmem:[#allocation157_spill] sm:$0xff] }
 0xadc   :  { %v1483_v35 = vmul.f32 %v7156_v45, %v10529_v21 }
 0xade   :  { %4303 = vperm.xlu2 %5512, %v3540_v31   ;;  %v10523_v31 = vld [vmem:[#allocation154_spill] sm:$0xff] }
 0xadf   :  { %4306 = vperm.xlu1 %5513, %v3541_v11   ;;  %v1480_v12 = vmul.f32 %v7152_v60, %v10523_v31  ;;  %v1481_v11 = vmul.f32 %v7147_v19, %v10524_v33  ;;  %v10531_v31 = vld [vmem:[#allocation158_spill] sm:$0xff]  ;;  %v10533_v33 = vld [vmem:[#allocation161_spill] sm:$0xff] }
 0xae0   :  { %v8430_v62 = vpop.permute.xlu2 %4204 }
 0xae1   :  { %10515 = vst [vmem:[#allocation69_spill] sm:$0xff] %v8430_v62  ;;  %v8432_v51 = vpop.permute.xlu1 %4180  ;;  %v3546_v62 = vadd.f32 %v10525_v55, %v1480_v12 }
 0xae2   :  { %10516 = vst [vmem:[#allocation24_spill] sm:$0xff] %v8432_v51  ;;  %v10526_v51 = vld [vmem:[#allocation254_spill] sm:$0xff] }
 0xae3   :  { %v3547_v42 = vadd.f32 %v10526_v51, %v1481_v11  ;;  %v10536_v11 = vld [vmem:[#allocation160_spill] sm:$0xff] }
 0xae4   :  { %v1486_v55 = vmul.f32 %v7137_v34, %v10536_v11 }
 0xae6   :  { %4312 = vperm.xlu2 %5512, %v3543_v53  }
 0xae7   :  { %4315 = vperm.xlu1 %5513, %v3544_v41   ;;  %v1484_v41 = vmul.f32 %v7168_v7, %v10530_v10 }
 0xae8   :  { %v8440_v39 = vpop.permute.xlu2 %4213 }
 0xae9   :  { %10521 = vst [vmem:[#allocation242_spill] sm:$0xff] %v8440_v39  ;;  %v8442_v5 = vpop.permute.xlu1 %4189  ;;  %v3549_v39 = vadd.f32 %v10531_v31, %v1483_v35  ;;  %v3550_v12 = vadd.f32 %v10533_v33, %v1484_v41  ;;  %v10542_v41 = vlaneseq }
 0xaea   :  { %10522 = vst [vmem:[#allocation71_spill] sm:$0xff] %v8442_v5  ;;  %v8459_v5 = vpop.permute.xlu0 %4255 }
 0xaeb   :  { %10532 = vst [vmem:[#allocation26_spill] sm:$0xff] %v8459_v5  ;;  %v8477_v33 = vand.u32 127, %v10542_v41  ;;  %v10550_v41 = vld [vmem:[#allocation170_spill] sm:$0xff]  ;;  %v10599_v5 = vld [vmem:[#allocation212_spill] sm:$0xff] }
 0xaee   :  { %4321 = vperm.xlu2 %5512, %v3546_v62  }
 0xaef   :  { %4324 = vperm.xlu1 %5513, %v3547_v42   ;;  %v10537_v42 = vld [vmem:[#allocation72_spill] sm:$0xff] }
 0xaf0   :  { %v8450_v58 = vpop.permute.xlu2 %4222  ;;  %v1487_v21 = vmul.f32 %v7177_v49, %v10537_v42 }
 0xaf1   :  { %10527 = vst [vmem:[#allocation25_spill] sm:$0xff] %v8450_v58  ;;  %v8452_v53 = vpop.permute.xlu1 %4198  ;;  %v10539_v58 = vld [vmem:[#allocation263_spill] sm:$0xff] }
 0xaf2   :  { %10528 = vst [vmem:[#allocation73_spill] sm:$0xff] %v8452_v53  ;;  %v10538_v53 = vld [vmem:[#allocation164_spill] sm:$0xff]  ;;  %v3553_v35 = vadd.f32 %v10539_v58, %v1487_v21  ;;  %v8472_v31 = vpop.permute.xlu0 %4264 }
 0xaf3   :  { %v3552_v10 = vadd.f32 %v10538_v53, %v1486_v55  ;;  %10540 = vst [vmem:[#allocation76_spill] sm:$0xff] %v8472_v31  ;;  %v10546_v53 = vld [vmem:[#allocation77_spill] sm:$0xff]  ;;  %v10547_v55 = vld [vmem:[#allocation186_spill] sm:$0xff] }
 0xaf4   :  { %v8487_v58 = vmul.f32 %v7152_v60, %v10546_v53  ;;  %v8491_v21 = vmul.f32 %v7143_v27, %v10547_v55  ;;  %v10554_v53 = vld [vmem:[#allocation83_spill] sm:$0xff] }
 0xaf5   :  { %v1502_v60 = vmul.f32 %v7137_v34, %v10554_v53  ;;  %v10555_v55 = vld [vmem:[#allocation335_spill] sm:$0xff] }
 0xaf6   :  { %4330 = vperm.xlu2 %5512, %v3549_v39   ;;  %10548 = vst [vmem:[#allocation81_spill] sm:$0xff] %v8491_v21  ;;  %v10556_v21 = vld [vmem:[#allocation189_spill] sm:$0xff] }
 0xaf7   :  { %4333 = vperm.xlu1 %5513, %v3550_v12  }
 0xaf8   :  { %v8462_v62 = vpop.permute.xlu2 %4231 }
 0xaf9   :  { %10534 = vst [vmem:[#allocation251_spill] sm:$0xff] %v8462_v62  ;;  %v8464_v51 = vpop.permute.xlu1 %4207  ;;  %v10545_v62 = vld [vmem:[#allocation75_spill] sm:$0xff] }
 0xafa   :  { %10535 = vst [vmem:[#allocation27_spill] sm:$0xff] %v8464_v51  ;;  %v10544_v51 = vld [vmem:[#allocation163_spill] sm:$0xff]  ;;  %v1493_v42 = vmul.f32 %v7140_v13, %v10545_v62  ;;  %v10552_v62 = vld [vmem:[#allocation93_spill] sm:$0xff]  ;;  %v8521_v57 = vpop.permute.xlu0 %4273 }
 0xafb   :  { %v1489_v11 = vmul.f32 %v7186_v38, %v10544_v51  ;;  %v8505_v13 = vmul.f32 %v7161_v61, %v10552_v62  ;;  %10560 = vst [vmem:[#allocation30_spill] sm:$0xff] %v8521_v57  ;;  %v10561_v62 = vld [vmem:[#allocation167_spill] sm:$0xff]  ;;  %v8629_v57 = vadd.s32 4294967264, %v8477_v33 }
 0xafd   :  { %10553 = vst [vmem:[#allocation29_spill] sm:$0xff] %v8505_v13  ;;  %v3555_v27 = vadd.f32 %v10555_v55, %v1489_v11  ;;  %v10562_v13 = vld [vmem:[#allocation80_spill] sm:$0xff]  ;;  %v10563_v11 = vld [vmem:[#allocation195_spill] sm:$0xff] }
 0xafe   :  { %4339 = vperm.xlu2 %5512, %v3552_v10   ;;  %v10549_v10 = vld [vmem:[#allocation74_spill] sm:$0xff]  ;;  %v8526_v53 = vmul.f32 %v7156_v45, %v10562_v13  ;;  %v8530_v55 = vmul.f32 %v7177_v49, %v10563_v11  ;;  %v10572_v45 = vld [vmem:[#allocation180_spill] sm:$0xff] }
 0xaff   :  { %4342 = vperm.xlu1 %5513, %v3553_v35   ;;  %v1490_v35 = vmul.f32 %v7183_v22, %v10549_v10  ;;  %v8512_v10 = vmul.f32 %v7147_v19, %v10556_v21  ;;  %v10558_v22 = vld [vmem:[#allocation192_spill] sm:$0xff]  ;;  %v10565_v21 = vld [vmem:[#allocation166_spill] sm:$0xff]  ;;  %v8537_v19 = vadd.s32 4294967240, %v8477_v33 }
 0xb00   :  { %v8474_v39 = vpop.permute.xlu2 %4240  ;;  %10564 = vst [vmem:[#allocation84_spill] sm:$0xff] %v8530_v55  ;;  %v1492_v34 = vmul.f32 %v7195_v47, %v10565_v21  ;;  %v10570_v49 = vld [vmem:[#allocation86_spill] sm:$0xff]  ;;  %v10574_v55 = vld [vmem:[#allocation272_spill] sm:$0xff] }
 0xb01   :  { %10541 = vst [vmem:[#allocation78_spill] sm:$0xff] %v8474_v39  ;;  %v8479_v12 = vpop.permute.xlu1 %4216  ;;  %v8497_v39 = vmul.f32 %v6792_v20, %v10550_v41  ;;  %v8516_v41 = vmul.f32 %v7168_v7, %v10558_v22  ;;  %v10566_v22 = vld [vmem:[#allocation96_spill] sm:$0xff]  ;;  %v8550_v21 = vmul.f32 %v7186_v38, %v10570_v49  ;;  %v10582_v38 = vld [vmem:[#allocation307_spill] sm:$0xff] }
 0xb02   :  { %10543 = vst [vmem:[#allocation28_spill] sm:$0xff] %v8479_v12  ;;  %v10551_v12 = vld [vmem:[#allocation174_spill] sm:$0xff]  ;;  %v1517_v7 = vmul.f32 %v7165_v28, %v10566_v22  ;;  %v8554_v22 = vmul.f32 %v7174_v44, %v10572_v45  ;;  %v10584_v45 = vld [vmem:[#allocation328_spill] sm:$0xff] }
 0xb03   :  { %v8501_v51 = vmul.f32 %v7161_v61, %v10551_v12  ;;  %10557 = vst [vmem:[#allocation332_spill] sm:$0xff] %v8512_v10  ;;  %v8519_v12 = vadd.s32 4294967280, %v8477_v33  ;;  %v3556_v61 = vadd.f32 %v10561_v62, %v1490_v35  ;;  %v10567_v35 = vld [vmem:[#allocation183_spill] sm:$0xff]  ;;  %v10568_v62 = vld [vmem:[#allocation177_spill] sm:$0xff]  ;;  %v3558_v10 = vadd.f32 %v10574_v55, %v1492_v34  ;;  %v10586_v34 = vld [vmem:[#allocation178_spill] sm:$0xff] }
 0xb04   :  { %10559 = vst [vmem:[#allocation269_spill] sm:$0xff] %v8516_v41  ;;  %v8540_v41 = vadd.s32 4294967216, %v8477_v33  ;;  %v1507_v13 = vmul.f32 %v7179_v43, %v10567_v35  ;;  %v8546_v11 = vmul.f32 %v7165_v28, %v10568_v62  ;;  %v8562_v35 = vmul.f32 %v7195_v47, %v10577_v59  ;;  %v10579_v62 = vld [vmem:[#allocation99_spill] sm:$0xff]  ;;  %v10588_v55 = vld [vmem:[#allocation181_spill] sm:$0xff] }
 0xb05   :  { %10571 = vst [vmem:[#allocation333_spill] sm:$0xff] %v8550_v21  ;;  %v8566_v28 = vmul.f32 %v7174_v44, %v10579_v62  ;;  %v8605_v47 = vadd.s32 4294967176, %v8477_v33 }
 0xb06   :  { %4348 = vperm.xlu2 %5512, %v3555_v27   ;;  %10569 = vst [vmem:[#allocation334_spill] sm:$0xff] %v8546_v11  ;;  %v8558_v27 = vadd.f32 %v10575_v24, %v1502_v60  ;;  %v8571_v43 = vadd.f32 %v10582_v38, %v1507_v13  ;;  %v4703_v60 = vperm.slane %v10586_v34, %v8519_v12  ;;  %v8579_v24 = vadd.s32 4294967288, %v8477_v33 }
 0xb07   :  { %10573 = vst [vmem:[#allocation88_spill] sm:$0xff] %v8554_v22  ;;  %4351 = vperm.xlu1 %5513, %v3556_v61   ;;  %v8574_v61 = vadd.f32 %v10584_v45, %v1517_v7  ;;  %v8588_v38 = vadd.s32 4294967192, %v8477_v33  ;;  %v8591_v7 = vadd.s32 4294967272, %v8477_v33  ;;  %v8594_v13 = vadd.s32 4294967248, %v8477_v33  ;;  %v10593_v22 = vld [vmem:[#allocation317_spill] sm:$0xff] }
 0xb08   :  { %10576 = vst [vmem:[#allocation31_spill] sm:$0xff] %v8558_v27  ;;  %v8568_v49 = vpop.permute.xlu2 %4249  ;;  %v8597_v45 = vadd.s32 4294967224, %v8477_v33  ;;  %v8600_v34 = vadd.s32 4294967200, %v8477_v33  ;;  %v4699_v62 = vperm.slane %v8152_v3, %v8579_v24  ;;  %v4697_v3 = vperm.slane %v8122_v54, %v8477_v33  ;;  %v8635_v54 = vpop.permute.xlu0 %4282 }
 0xb09   :  { %10578 = vst [vmem:[#allocation277_spill] sm:$0xff] %v8562_v35  ;;  %v8581_v59 = vpop.permute.xlu1 %4225  ;;  %v4758_v21 = vperm.slane %v10593_v22, %v8477_v33  ;;  %v4707_v44 = vperm.slane %v8132_v6, %v8591_v7  ;;  %v10612_v6 = vld [vmem:[#allocation337_spill] sm:$0xff] }
 0xb0a   :  { %10580 = vst [vmem:[#allocation79_spill] sm:$0xff] %v8566_v28  ;;  %v8608_v28 = vadd.s32 4294967256, %v8477_v33  ;;  %v4701_v35 = vsel %vm4700_vm10, %v4699_v62, %v4697_v3  ;;  %v3562_v62 = vadd.f32 %v10612_v6, %v8487_v58  ;;  %v4790_v6 = vperm.slane %v8264_v32, %v8579_v24 }
 0xb0b   :  { %10581 = vst [vmem:[#allocation91_spill] sm:$0xff] %v8568_v49  ;;  %v8614_v49 = vadd.s32 4294967208, %v8477_v33  ;;  %v4705_v31 = vsel %vm4704_vm11, %v4703_v60, %v4701_v35  ;;  %v10609_v60 = vld [vmem:[#allocation240_spill] sm:$0xff]  ;;  %v4789_v32 = vperm.slane %v8230_v2, %v8477_v33  ;;  %v4731_v2 = vperm.slane %v8182_v23, %v8597_v45 }
 0xb0c   :  { %10583 = vst [vmem:[#allocation32_spill] sm:$0xff] %v8571_v43  ;;  %v8617_v43 = vadd.s32 4294967184, %v8477_v33  ;;  %v4709_v3 = vsel %vm4708_vm12, %v4707_v44, %v4705_v31  ;;  %v4715_v58 = vperm.slane %v8140_v37, %v8608_v28  ;;  %v4761_v44 = vperm.slane %v8212_v36, %v8519_v12  ;;  %v10622_v23 = vld [vmem:[#allocation76_spill] sm:$0xff] }
 0xb0d   :  { %10585 = vst [vmem:[#allocation260_spill] sm:$0xff] %v8574_v61  ;;  %v8611_v61 = vadd.s32 4294967232, %v8477_v33 }
 0xb0e   :  { %10587 = vst [vmem:[#allocation85_spill] sm:$0xff] %v8581_v59  ;;  %v10591_v59 = vld [vmem:[#allocation336_spill] sm:$0xff]  ;;  %4357 = vperm.xlu2 %5512, %v3558_v10   ;;  %v4719_v10 = vperm.slane %v8172_v16, %v8594_v13 }
 0xb0f   :  { %10590 = vst [vmem:[#allocation94_spill] sm:$0xff] %v8605_v47  ;;  %v3559_v27 = vadd.f32 %v10591_v59, %v1493_v42  ;;  %v10601_v59 = vld [vmem:[#allocation215_spill] sm:$0xff]  ;;  %v4711_v42 = vperm.slane %v8162_v26, %v8629_v57 }
 0xb10   :  { %v8646_v11 = vpop.permute.xlu2 %4258  ;;  %v10610_v26 = vld [vmem:[#allocation175_spill] sm:$0xff] }
 0xb11   :  { %4360 = vperm.xlu1 %5513, %v3559_v27   ;;  %10600 = vst [vmem:[#allocation33_spill] sm:$0xff] %v8646_v11  ;;  %v8656_v30 = vpop.permute.xlu1 %4234  ;;  %v10611_v27 = vld [vmem:[#allocation247_spill] sm:$0xff]  ;;  %v4713_v63 = vsel %vm4712_vm13, %v4711_v42, %v4709_v3  ;;  %v8691_v11 = vpop.permute.xlu0 %4291  ;;  %v10614_v3 = vld [vmem:[#allocation90_spill] sm:$0xff] }
 0xb12   :  { %10605 = vst [vmem:[#allocation82_spill] sm:$0xff] %v8656_v30  ;;  %v3561_v30 = vadd.f32 %v10610_v26, %v8497_v39  ;;  %v4759_v39 = vperm.slane %v8180_v1, %v8579_v24  ;;  %v1511_v36 = vmul.f32 %v6792_v20, %v10614_v3  ;;  %v10617_v3 = vperm.slane %v10588_v55, %v8537_v19  ;;  %v10633_v20 = vld [vmem:[#allocation333_spill] sm:$0xff] }
 0xb13   :  { %10613 = vst [vmem:[#allocation89_spill] sm:$0xff] %v8691_v11  ;;  %v4727_v26 = vperm.slane %v8150_v46, %v8611_v61  ;;  %v10639_v11 = vld [vmem:[#allocation184_spill] sm:$0xff] }
 0xb14   :  { %v4760_v31 = vsel %vm4700_vm10, %v4759_v39, %v4758_v21  ;;  %v10616_v39 = vld [vmem:[#allocation338_spill] sm:$0xff] }
 0xb16   :  { %4366 = vperm.xlu2 %5512, %v3561_v30   ;;  %v10625_v30 = vld [vmem:[#allocation11_spill] sm:$0xff] }
 0xb18   :  { %v8705_v42 = vpop.permute.xlu2 %4267 }
 0xb19   :  { %4369 = vperm.xlu1 %5513, %v3562_v62   ;;  %v4717_v62 = vsel %vm4716_vm14, %v4715_v58, %v4713_v63  ;;  %v8714_v16 = vpop.permute.xlu1 %4243  ;;  %v4762_v63 = vsel %vm4704_vm11, %v4761_v44, %v4760_v31  ;;  %v4791_v31 = vsel %vm4700_vm10, %v4790_v6, %v4789_v32  ;;  %v10618_v58 = vld [vmem:[#allocation193_spill] sm:$0xff]  ;;  %v10623_v6 = vld [vmem:[#allocation30_spill] sm:$0xff]  ;;  %v8756_v46 = vpop.permute.xlu0 %4300 }
 0xb1a   :  { %v4721_v22 = vsel %vm4720_vm15, %v4719_v10, %v4717_v62  ;;  %v10615_v10 = vld [vmem:[#allocation281_spill] sm:$0xff]  ;;  %v3565_v62 = vadd.f32 %v10616_v39, %v8526_v53  ;;  %10624 = vst [vmem:[#allocation35_spill] sm:$0xff] %v8756_v46  ;;  %v10628_v39 = vld [vmem:[#allocation323_spill] sm:$0xff] }
 0xb1b   :  { %v3564_v21 = vadd.f32 %v10615_v10, %v8501_v51  ;;  %v4725_v44 = vsel %vm4724_vm0, %v10617_v3, %v4721_v22  ;;  %v10619_v51 = vperm.slane %v10618_v58, %v8591_v7  ;;  %v10620_v10 = vld [vmem:[#allocation316_spill] sm:$0xff]  ;;  %v4765_v58 = vperm.slane %v10625_v30, %v8629_v57 }
 0xb1c   :  { %v4767_v55 = vperm.slane %v10620_v10, %v8608_v28  ;;  %v4796_v37 = vperm.slane %v10628_v39, %v8629_v57  ;;  %v10632_v39 = vld [vmem:[#allocation339_spill] sm:$0xff]  ;;  %v10638_v22 = vld [vmem:[#allocation140_spill] sm:$0xff] }
 0xb1d   :  { %v4764_v53 = vsel %vm4708_vm12, %v10619_v51, %v4762_v63  ;;  %v10626_v51 = vld [vmem:[#allocation209_spill] sm:$0xff] }
 0xb1e   :  { %4375 = vperm.xlu2 %5512, %v3564_v21   ;;  %v4729_v21 = vsel %vm4728_vm1, %v4727_v26, %v4725_v44  ;;  %v10627_v10 = vperm.slane %v10626_v51, %v8519_v12  ;;  %v4766_v30 = vsel %vm4712_vm13, %v4765_v58, %v4764_v53  ;;  %v10635_v53 = vld [vmem:[#allocation88_spill] sm:$0xff]  ;;  %v10640_v44 = vperm.slane %v10639_v11, %v8540_v41 }
 0xb1f   :  { %v4733_v1 = vsel %vm9759_vm2, %v4731_v2, %v4729_v21  ;;  %v10634_v2 = vld [vmem:[#allocation341_spill] sm:$0xff]  ;;  %v10636_v58 = vld [vmem:[#allocation340_spill] sm:$0xff] }
 0xb20   :  { %v4793_v3 = vsel %vm4704_vm11, %v10627_v10, %v4791_v31  ;;  %v8769_v32 = vpop.permute.xlu2 %4276  ;;  %v10631_v31 = vld [vmem:[#allocation334_spill] sm:$0xff]  ;;  %v4768_v10 = vsel %vm4716_vm14, %v4767_v55, %v4766_v30  ;;  %v3571_v21 = vadd.f32 %v10634_v2, %v10633_v20  ;;  %v3570_v9 = vadd.f32 %v10636_v58, %v10635_v53  ;;  %v10641_v55 = vld [vmem:[#allocation40_spill] sm:$0xff]  ;;  %v10646_v53 = vld [vmem:[#allocation81_spill] sm:$0xff] }
 0xb21   :  { %4378 = vperm.xlu1 %5513, %v3565_v62   ;;  %v10629_v62 = vld [vmem:[#allocation44_spill] sm:$0xff]  ;;  %v8775_v35 = vpop.permute.xlu1 %4252  ;;  %v3567_v51 = vadd.f32 %v10632_v39, %v10631_v31  ;;  %v4737_v46 = vsel %vm9762_vm3, %v10640_v44, %v4733_v1  ;;  %v4743_v30 = vperm.slane %v10641_v55, %v8600_v34  ;;  %v10642_v31 = vld [vmem:[#allocation313_spill] sm:$0xff]  ;;  %v10647_v1 = vld [vmem:[#allocation190_spill] sm:$0xff] }
 0xb22   :  { %v4794_v63 = vperm.slane %v10629_v62, %v8591_v7  ;;  %10630 = vst [vmem:[#allocation97_spill] sm:$0xff] %v8775_v35  ;;  %v10637_v62 = vld [vmem:[#allocation277_spill] sm:$0xff]  ;;  %v4739_v39 = vperm.slane %v10642_v31, %v8614_v49  ;;  %v10643_v2 = vld [vmem:[#allocation196_spill] sm:$0xff]  ;;  %v8810_v44 = vadd.f32 %v10647_v1, %v10646_v53 }
 0xb23   :  { %v8790_v50 = vadd.f32 %v10638_v22, %v10637_v62  ;;  %v10644_v22 = vperm.slane %v10643_v2, %v8594_v13  ;;  %v10648_v58 = vld [vmem:[#allocation332_spill] sm:$0xff]  ;;  %v10649_v62 = vld [vmem:[#allocation342_spill] sm:$0xff]  ;;  %v10653_v2 = vld [vmem:[#allocation343_spill] sm:$0xff] }
 0xb24   :  { %v4795_v26 = vsel %vm4708_vm12, %v4794_v63, %v4793_v3  ;;  %v10645_v63 = vld [vmem:[#allocation319_spill] sm:$0xff]  ;;  %v8814_v55 = vadd.f32 %v10649_v62, %v10648_v58  ;;  %v10652_v31 = vld [vmem:[#allocation16_spill] sm:$0xff]  ;;  %v10655_v1 = vld [vmem:[#allocation49_spill] sm:$0xff] }
 0xb25   :  { %v4797_v20 = vsel %vm4712_vm13, %v4796_v37, %v4795_v26  ;;  %v4770_v3 = vsel %vm4720_vm15, %v10644_v22, %v4768_v10  ;;  %v4773_v11 = vperm.slane %v10645_v63, %v8611_v61  ;;  %v10651_v37 = vld [vmem:[#allocation322_spill] sm:$0xff]  ;;  %v4820_v52 = vperm.slane %v10652_v31, %v8477_v33  ;;  %v10656_v62 = vld [vmem:[#allocation31_spill] sm:$0xff] }
 0xb26   :  { %10650 = vst [vmem:[#allocation92_spill] sm:$0xff] %v8814_v55  ;;  %v4771_v26 = vperm.slane %v10651_v37, %v8537_v19  ;;  %4384 = vperm.xlu2 %5512, %v3567_v51   ;;  %v8821_v10 = vadd.f32 %v10653_v2, %v1511_v36  ;;  %v4741_v22 = vsel %vm9761_vm4, %v4739_v39, %v4737_v46  ;;  %v10657_v36 = vld [vmem:[#allocation318_spill] sm:$0xff]  ;;  %v10658_v46 = vld [vmem:[#allocation29_spill] sm:$0xff]  ;;  %v10659_v39 = vld [vmem:[#allocation344_spill] sm:$0xff] }
 0xb27   :  { %v10654_v63 = vperm.slane %v10599_v5, %v8608_v28  ;;  %v4802_v58 = vperm.slane %v10655_v1, %v8537_v19  ;;  %v4745_v37 = vsel %vm9764_vm5, %v4743_v30, %v4741_v22  ;;  %v4800_v31 = vperm.slane %v10657_v36, %v8594_v13  ;;  %v10662_v1 = vld [vmem:[#allocation274_spill] sm:$0xff]  ;;  %v10678_v55 = vld [vmem:[#allocation345_spill] sm:$0xff] }
 0xb28   :  { %v4772_v51 = vsel %vm4724_vm0, %v4771_v26, %v4770_v3  ;;  %v8835_v2 = vpop.permute.xlu2 %4285  ;;  %v8839_v5 = vadd.f32 %v10659_v39, %v10658_v46  ;;  %v4751_v30 = vperm.slane %v10662_v1, %v8617_v43  ;;  %v10663_v26 = vperm.slane %v10604_v48, %v8579_v24  ;;  %v10665_v46 = vld [vmem:[#allocation187_spill] sm:$0xff]  ;;  %v10669_v48 = vld [vmem:[#allocation314_spill] sm:$0xff] }
 0xb29   :  { %v4799_v53 = vsel %vm4716_vm14, %v10654_v63, %v4797_v20  ;;  %4387 = vperm.xlu1 %5513, %v10656_v62   ;;  %v4774_v20 = vsel %vm4728_vm1, %v4773_v11, %v4772_v51  ;;  %v8842_v63 = vpop.permute.xlu1 %4261  ;;  %v10664_v62 = vld [vmem:[#allocation327_spill] sm:$0xff]  ;;  %v10666_v39 = vperm.slane %v10665_v46, %v8588_v38  ;;  %v10672_v46 = vld [vmem:[#allocation13_spill] sm:$0xff] }
 0xb2a   :  { %10660 = vst [vmem:[#allocation304_spill] sm:$0xff] %v8839_v5  ;;  %v4801_v3 = vsel %vm4720_vm15, %v4800_v31, %v4799_v53  ;;  %v4822_v22 = vsel %vm4700_vm10, %v10663_v26, %v4820_v52  ;;  %v4825_v36 = vperm.slane %v10664_v62, %v8591_v7  ;;  %v10668_v53 = vld [vmem:[#allocation23_spill] sm:$0xff]  ;;  %v4755_v5 = vperm.slane %v10669_v48, %v8605_v47  ;;  %v10670_v52 = vld [vmem:[#allocation200_spill] sm:$0xff] }
 0xb2b   :  { %10661 = vst [vmem:[#allocation100_spill] sm:$0xff] %v8842_v63  ;;  %v4749_v11 = vsel %vm4748_vm6, %v10666_v39, %v4745_v37  ;;  %v4803_v51 = vsel %vm4724_vm0, %v4802_v58, %v4801_v3  ;;  %v10667_v63 = vld [vmem:[#allocation15_spill] sm:$0xff]  ;;  %v4883_v31 = vperm.slane %v10668_v53, %v8579_v24  ;;  %v10671_v26 = vperm.slane %v10670_v52, %v8597_v45  ;;  %v10673_v37 = vld [vmem:[#allocation329_spill] sm:$0xff]  ;;  %v10674_v3 = vld [vmem:[#allocation42_spill] sm:$0xff] }
 0xb2c   :  { %v4823_v1 = vperm.slane %v10667_v63, %v8519_v12  ;;  %v4779_v35 = vperm.slane %v10672_v46, %v8614_v49  ;;  %v4852_v58 = vperm.slane %v10673_v37, %v8579_v24  ;;  %v4777_v63 = vperm.slane %v10674_v3, %v8540_v41  ;;  %v10675_v53 = vld [vmem:[#allocation19_spill] sm:$0xff]  ;;  %v10676_v48 = vld [vmem:[#allocation20_spill] sm:$0xff]  ;;  %v10677_v52 = vld [vmem:[#allocation269_spill] sm:$0xff] }
 0xb2d   :  { %v4776_v62 = vsel %vm9759_vm2, %v10671_v26, %v4774_v20  ;;  %v4854_v25 = vperm.slane %v10675_v53, %v8519_v12  ;;  %v4882_v15 = vperm.slane %v10676_v48, %v8477_v33  ;;  %v8881_v20 = vadd.f32 %v10678_v55, %v10677_v52  ;;  %v10680_v3 = vld [vmem:[#allocation28_spill] sm:$0xff]  ;;  %v10681_v48 = vld [vmem:[#allocation14_spill] sm:$0xff]  ;;  %v8915_v52 = vpop.permute.xlu0 %4309 }
 0xb2e   :  { %v4824_v39 = vsel %vm4704_vm11, %v4823_v1, %v4822_v22  ;;  %v10679_v26 = vperm.slane %v10601_v59, %v8611_v61  ;;  %v4913_v22 = vperm.slane %v10680_v3, %v8477_v33  ;;  %4393 = vperm.xlu2 %5512, %v3570_v9   ;;  %v4753_v1 = vsel %vm4752_vm7, %v4751_v30, %v4749_v11 }
 0xb2f   :  { %v4826_v37 = vsel %vm4708_vm12, %v4825_v36, %v4824_v39  ;;  %v4778_v53 = vsel %vm9762_vm3, %v4777_v63, %v4776_v62  ;;  %v4806_v47 = vperm.slane %v10681_v48, %v8597_v45  ;;  %v4884_v55 = vsel %vm4700_vm10, %v4883_v31, %v4882_v15  ;;  %v10684_v15 = vld [vmem:[#allocation326_spill] sm:$0xff] }
 0xb30   :  { %v4805_v46 = vsel %vm4728_vm1, %v10679_v26, %v4803_v51  ;;  %v8896_v59 = vsel %vm4756_vm8, %v4755_v5, %v4753_v1  ;;  %v10682_v51 = vld [vmem:[#allocation12_spill] sm:$0xff]  ;;  %v4780_v39 = vsel %vm9761_vm4, %v4779_v35, %v4778_v53  ;;  %v10683_v9 = vperm.slane %v7893_v56, %v8477_v33  ;;  %v8905_v11 = vpop.permute.xlu2 %4294  ;;  %v10691_v53 = vld [vmem:[#allocation21_spill] sm:$0xff] }
 0xb31   :  { %4396 = vperm.xlu1 %5513, %v3571_v21   ;;  %v4783_v36 = vperm.slane %v10682_v51, %v8588_v38  ;;  %v4807_v62 = vsel %vm9759_vm2, %v4806_v47, %v4805_v46  ;;  %v4808_v21 = vperm.slane %v10684_v15, %v8540_v41  ;;  %v10685_v5 = vperm.slane %v10606_v0, %v8629_v57  ;;  %v4271_v35 = vpop.permute.xlu1 %4270  ;;  %v10687_v47 = vld [vmem:[#allocation24_spill] sm:$0xff] }
 0xb32   :  { %v4853_v30 = vsel %vm4700_vm10, %v4852_v58, %v10683_v9  ;;  %v10686_v56 = vperm.slane %v7962_v17, %v8519_v12  ;;  %v4889_v26 = vperm.slane %v10687_v47, %v8629_v57  ;;  %v10688_v46 = vperm.slane %v8041_v8, %v8579_v24  ;;  %v10692_v17 = vld [vmem:[#allocation25_spill] sm:$0xff] }
 0xb33   :  { %v4828_v31 = vsel %vm4712_vm13, %v10685_v5, %v4826_v37  ;;  %v4855_v63 = vsel %vm4704_vm11, %v4854_v25, %v4853_v30  ;;  %v10689_v37 = vld [vmem:[#allocation85_spill] sm:$0xff]  ;;  %v4887_v48 = vperm.slane %v10691_v53, %v8591_v7  ;;  %v4945_v9 = vperm.slane %v8705_v42, %v8579_v24  ;;  %v10695_v5 = vld [vmem:[#allocation60_spill] sm:$0xff] }
 0xb34   :  { %v4886_v58 = vsel %vm4704_vm11, %v10686_v56, %v4884_v55  ;;  %v4915_v0 = vsel %vm4700_vm10, %v10688_v46, %v4913_v22  ;;  %v4918_v3 = vperm.slane %v10689_v37, %v8591_v7  ;;  %v10690_v25 = vld [vmem:[#allocation17_spill] sm:$0xff]  ;;  %v4916_v55 = vperm.slane %v10692_v17, %v8519_v12  ;;  %v10696_v37 = vld [vmem:[#allocation18_spill] sm:$0xff]  ;;  %v10697_v17 = vld [vmem:[#allocation204_spill] sm:$0xff] }
 0xb35   :  { %v4831_v1 = vperm.slane %v10690_v25, %v8594_v13  ;;  %v10693_v30 = vld [vmem:[#allocation325_spill] sm:$0xff]  ;;  %v10694_v22 = vperm.slane %v10609_v60, %v8591_v7  ;;  %v4860_v56 = vperm.slane %v10695_v5, %v8608_v28  ;;  %v4947_v47 = vperm.slane %v4271_v35, %v8519_v12  ;;  %v10699_v5 = vld [vmem:[#allocation32_spill] sm:$0xff] }
 0xb36   :  { %v4829_v8 = vperm.slane %v10693_v30, %v8608_v28  ;;  %v4809_v46 = vsel %vm9762_vm3, %v4808_v21, %v4807_v62  ;;  %v4858_v25 = vperm.slane %v10696_v37, %v8629_v57  ;;  %v4888_v42 = vsel %vm4708_vm12, %v4887_v48, %v4886_v58  ;;  %4402 = vperm.xlu2 %5512, %v10699_v5   ;;  %v10700_v62 = vld [vmem:[#allocation321_spill] sm:$0xff] }
 0xb37   :  { %v4857_v15 = vsel %vm4708_vm12, %v10694_v22, %v4855_v63  ;;  %v4917_v53 = vsel %vm4704_vm11, %v4916_v55, %v4915_v0  ;;  %v10698_v30 = vperm.slane %v10697_v17, %v8600_v34  ;;  %v4890_v22 = vsel %vm4712_vm13, %v4889_v26, %v4888_v42  ;;  %v10704_v55 = vld [vmem:[#allocation51_spill] sm:$0xff] }
 0xb38   :  { %v4830_v63 = vsel %vm4716_vm14, %v4829_v8, %v4828_v31  ;;  %v4919_v35 = vsel %vm4708_vm12, %v4918_v3, %v4917_v53  ;;  %v4785_v21 = vperm.slane %v10700_v62, %v8617_v43  ;;  %v4859_v0 = vsel %vm4712_vm13, %v4858_v25, %v4857_v15  ;;  %v10702_v31 = vld [vmem:[#allocation218_spill] sm:$0xff]  ;;  %v8976_v15 = vpop.permute.xlu2 %4303  ;;  %v10712_v62 = vld [vmem:[#allocation64_spill] sm:$0xff] }
 0xb39   :  { %v4782_v60 = vsel %vm9764_vm5, %v10698_v30, %v4780_v39  ;;  %v4832_v58 = vsel %vm4720_vm15, %v4831_v1, %v4830_v63  ;;  %v10701_v48 = vperm.slane %v10622_v23, %v8477_v33  ;;  %4405 = vperm.xlu1 %5513, %v8790_v50   ;;  %v10703_v26 = vperm.slane %v10702_v31, %v8614_v49  ;;  %v10706_v50 = vld [vmem:[#allocation71_spill] sm:$0xff]  ;;  %v10708_v53 = vld [vmem:[#allocation82_spill] sm:$0xff]  ;;  %v4280_v17 = vpop.permute.xlu1 %4279 }
 0xb3a   :  { %v4835_v8 = vperm.slane %v10704_v55, %v8611_v61  ;;  %v4861_v37 = vsel %vm4716_vm14, %v4860_v56, %v4859_v0  ;;  %v10705_v23 = vperm.slane %v7984_v14, %v8608_v28  ;;  %v4895_v25 = vperm.slane %v10706_v50, %v8537_v19  ;;  %v10709_v30 = vld [vmem:[#allocation230_spill] sm:$0xff]  ;;  %v10717_v50 = vld [vmem:[#allocation331_spill] sm:$0xff] }
 0xb3b   :  { %v4946_v39 = vsel %vm4700_vm10, %v4945_v9, %v10701_v48  ;;  %v4811_v3 = vsel %vm9761_vm4, %v10703_v26, %v4809_v46  ;;  %v10707_v46 = vperm.slane %v8085_v40, %v8629_v57  ;;  %v4924_v56 = vperm.slane %v10708_v53, %v8594_v13  ;;  %v10713_v40 = vld [vmem:[#allocation251_spill] sm:$0xff]  ;;  %v10715_v31 = vld [vmem:[#allocation62_spill] sm:$0xff] }
 0xb3c   :  { %v4948_v1 = vsel %vm4704_vm11, %v4947_v47, %v4946_v39  ;;  %v4892_v9 = vsel %vm4716_vm14, %v10705_v23, %v4890_v22  ;;  %v8990_v47 = vpop.permute.xlu0 %4318  ;;  %v10710_v63 = vperm.slane %v10709_v30, %v8537_v19  ;;  %v10711_v22 = vld [vmem:[#allocation283_spill] sm:$0xff]  ;;  %v4893_v0 = vperm.slane %v10712_v62, %v8594_v13 }
 0xb3d   :  { %v4921_v42 = vsel %vm4712_vm13, %v10707_v46, %v4919_v35  ;;  %v4837_v5 = vperm.slane %v10711_v22, %v8597_v45  ;;  %v4922_v35 = vperm.slane %v10713_v40, %v8608_v28  ;;  %v10714_v48 = vperm.slane %v10611_v27, %v8594_v13  ;;  %v10723_v40 = vld [vmem:[#allocation233_spill] sm:$0xff] }
 0xb3e   :  { %v4834_v14 = vsel %vm4724_vm0, %v10710_v63, %v4832_v58  ;;  %v4866_v26 = vperm.slane %v10715_v31, %v8611_v61  ;;  %v10716_v58 = vperm.slane %v10623_v6, %v8591_v7  ;;  %v4953_v23 = vperm.slane %v4280_v17, %v8608_v28  ;;  %4411 = vperm.xlu2 %5512, %v8810_v44  }
 0xb3f   :  { %v4863_v39 = vsel %vm4720_vm15, %v10714_v48, %v4861_v37  ;;  %v4864_v46 = vperm.slane %v10717_v50, %v8537_v19  ;;  %v4894_v53 = vsel %vm4720_vm15, %v4893_v0, %v4892_v9  ;;  %v4923_v30 = vsel %vm4716_vm14, %v4922_v35, %v4921_v42  ;;  %v10718_v37 = vld [vmem:[#allocation46_spill] sm:$0xff]  ;;  %v10725_v48 = vld [vmem:[#allocation67_spill] sm:$0xff] }
 0xb40   :  { %v4950_v55 = vsel %vm4708_vm12, %v10716_v58, %v4948_v1  ;;  %v4951_v27 = vperm.slane %v8769_v32, %v8629_v57  ;;  %v4812_v63 = vperm.slane %v10718_v37, %v8600_v34  ;;  %v4836_v22 = vsel %vm4728_vm1, %v4835_v8, %v4834_v14 }
 0xb41   :  { %v4896_v6 = vsel %vm4724_vm0, %v4895_v25, %v4894_v53  ;;  %v4925_v1 = vsel %vm4720_vm15, %v4924_v56, %v4923_v30  ;;  %v4784_v17 = vsel %vm4748_vm6, %v4783_v36, %v4782_v60  ;;  %v4838_v9 = vsel %vm9759_vm2, %v4837_v5, %v4836_v22  ;;  %4414 = vperm.xlu1 %5513, %v8821_v10   ;;  %v10720_v60 = vld [vmem:[#allocation73_spill] sm:$0xff]  ;;  %v9049_v5 = vpop.permute.xlu2 %4312  ;;  %v10722_v10 = vld [vmem:[#allocation279_spill] sm:$0xff]  ;;  %v10730_v30 = vld [vmem:[#allocation58_spill] sm:$0xff] }
 0xb42   :  { %v4865_v42 = vsel %vm4724_vm0, %v4864_v46, %v4863_v39  ;;  %v4952_v32 = vsel %vm4712_vm13, %v4951_v27, %v4950_v55  ;;  %v4786_v62 = vsel %vm4752_vm7, %v4785_v21, %v4784_v17  ;;  %v4813_v8 = vsel %vm9764_vm5, %v4812_v63, %v4811_v3  ;;  %v10728_v55 = vld [vmem:[#allocation225_spill] sm:$0xff] }
 0xb43   :  { %v4867_v25 = vsel %vm4728_vm1, %v4866_v26, %v4865_v42  ;;  %v4954_v56 = vsel %vm4716_vm14, %v4953_v23, %v4952_v32  ;;  %v10719_v51 = vperm.slane %v7996_v29, %v8611_v61  ;;  %v4901_v14 = vperm.slane %v10720_v60, %v8540_v41  ;;  %v4289_v26 = vpop.permute.xlu1 %4288  ;;  %v10733_v32 = vld [vmem:[#allocation194_spill] sm:$0xff] }
 0xb44   :  { %v10721_v44 = vperm.slane %v8101_v18, %v8537_v19  ;;  %v4930_v3 = vperm.slane %v8714_v16, %v8597_v45  ;;  %v4814_v0 = vperm.slane %v10722_v10, %v8588_v38  ;;  %v10724_v29 = vperm.slane %v10723_v40, %v8540_v41  ;;  %v10726_v18 = vld [vmem:[#allocation78_spill] sm:$0xff]  ;;  %v9078_v22 = vpop.permute.xlu0 %4327  ;;  %v10737_v40 = vld [vmem:[#allocation92_spill] sm:$0xff] }
 0xb45   :  { %v4898_v36 = vsel %vm4728_vm1, %v10719_v51, %v4896_v6  ;;  %v4899_v39 = vperm.slane %v10725_v48, %v8597_v45  ;;  %v4928_v31 = vperm.slane %v10726_v18, %v8611_v61  ;;  %v10727_v16 = vperm.slane %v7935_v4, %v8597_v45  ;;  %v10731_v6 = vld [vmem:[#allocation197_spill] sm:$0xff] }
 0xb46   :  { %v4927_v21 = vsel %vm4724_vm0, %v10721_v44, %v4925_v1  ;;  %v4840_v35 = vsel %vm9762_vm3, %v10724_v29, %v4838_v9  ;;  %v4872_v23 = vperm.slane %v10728_v55, %v8614_v49  ;;  %v10729_v50 = vperm.slane %v8635_v54, %v8594_v13  ;;  %v10732_v54 = vld [vmem:[#allocation55_spill] sm:$0xff]  ;;  %v10736_v44 = vld [vmem:[#allocation188_spill] sm:$0xff]  ;;  %4420 = vperm.xlu2 %5512, %v10737_v40  }
 0xb47   :  { %v4869_v58 = vsel %vm9759_vm2, %v10727_v16, %v4867_v25  ;;  %v4959_v53 = vperm.slane %v4289_v26, %v8611_v61  ;;  %v4870_v27 = vperm.slane %v10730_v30, %v8540_v41  ;;  %v4900_v37 = vsel %vm9759_vm2, %v4899_v39, %v4898_v36  ;;  %v10734_v25 = vld [vmem:[#allocation94_spill] sm:$0xff]  ;;  %v10738_v29 = vld [vmem:[#allocation268_spill] sm:$0xff]  ;;  %v10748_v30 = vld [vmem:[#allocation91_spill] sm:$0xff] }
 0xb48   :  { %v4956_v46 = vsel %vm4720_vm15, %v10729_v50, %v4954_v56  ;;  %v4929_v63 = vsel %vm4728_vm1, %v4928_v31, %v4927_v21  ;;  %v4957_v4 = vperm.slane %v8835_v2, %v8537_v19  ;;  %v4841_v1 = vperm.slane %v10731_v6, %v8614_v49  ;;  %v10741_v39 = vld [vmem:[#allocation36_spill] sm:$0xff]  ;;  %v10750_v6 = vld [vmem:[#allocation253_spill] sm:$0xff] }
 0xb49   :  { %v4843_v17 = vperm.slane %v10732_v54, %v8600_v34  ;;  %v4902_v9 = vsel %vm9762_vm3, %v4901_v14, %v4900_v37  ;;  %v4931_v42 = vsel %vm9759_vm2, %v4930_v3, %v4929_v63  ;;  %v10735_v56 = vperm.slane %v10733_v32, %v10734_v25  ;;  %v10744_v16 = vld [vmem:[#allocation304_spill] sm:$0xff]  ;;  %v9121_v37 = vpop.permute.xlu2 %4321 }
 0xb4a   :  { %v4815_v36 = vsel %vm4748_vm6, %v4814_v0, %v4813_v8  ;;  %v4871_v2 = vsel %vm9762_vm3, %v4870_v27, %v4869_v58  ;;  %v4958_v60 = vsel %vm4724_vm0, %v4957_v4, %v4956_v46  ;;  %v4818_v21 = vperm.slane %v10736_v44, %v10734_v25  ;;  %v10740_v0 = vld [vmem:[#allocation27_spill] sm:$0xff]  ;;  %4423 = vperm.xlu1 %5513, %v10744_v16   ;;  %v10745_v58 = vld [vmem:[#allocation222_spill] sm:$0xff]  ;;  %v10747_v46 = vld [vmem:[#allocation69_spill] sm:$0xff] }
 0xb4b   :  { %v4788_v51 = vsel %vm4756_vm8, %v10735_v56, %v4786_v62  ;;  %v4842_v10 = vsel %vm9761_vm4, %v4841_v1, %v4840_v35  ;;  %v4873_v14 = vsel %vm9761_vm4, %v4872_v23, %v4871_v2  ;;  %v4960_v3 = vsel %vm4728_vm1, %v4959_v53, %v4958_v60  ;;  %v10743_v35 = vld [vmem:[#allocation97_spill] sm:$0xff]  ;;  %v10749_v63 = vld [vmem:[#allocation216_spill] sm:$0xff] }
 0xb4c   :  { %v10739_v62 = vperm.slane %v10738_v29, %v8614_v49  ;;  %v4907_v48 = vperm.slane %v10740_v0, %v8588_v38  ;;  %v10742_v18 = vperm.slane %v10741_v39, %v8540_v41  ;;  %v4936_v26 = vperm.slane %v10743_v35, %v8600_v34  ;;  %v10755_v40 = vld [vmem:[#allocation248_spill] sm:$0xff] }
 0xb4d   :  { %v10746_v55 = vperm.slane %v10745_v58, %v8617_v43  ;;  %v4844_v50 = vsel %vm9764_vm5, %v4843_v17, %v4842_v10  ;;  %v4905_v53 = vperm.slane %v10747_v46, %v8600_v34  ;;  %v4934_v27 = vperm.slane %v10748_v30, %v8614_v49  ;;  %v10753_v17 = vld [vmem:[#allocation89_spill] sm:$0xff]  ;;  %v10761_v30 = vld [vmem:[#allocation26_spill] sm:$0xff] }
 0xb4e   :  { %v4904_v8 = vsel %vm9761_vm4, %v10739_v62, %v4902_v9  ;;  %v4933_v31 = vsel %vm9762_vm3, %v10742_v18, %v4931_v42  ;;  %v4876_v4 = vperm.slane %v10749_v63, %v8588_v38  ;;  %v10751_v1 = vperm.slane %v10750_v6, %v8600_v34  ;;  %v10752_v9 = vld [vmem:[#allocation22_spill] sm:$0xff]  ;;  %v10758_v18 = vld [vmem:[#allocation53_spill] sm:$0xff]  ;;  %4429 = vperm.xlu2 %5512, %v8881_v20   ;;  %v10769_v20 = vld [vmem:[#allocation35_spill] sm:$0xff] }
 0xb4f   :  { %v4817_v23 = vsel %vm4752_vm7, %v10746_v55, %v4815_v36  ;;  %v4878_v42 = vperm.slane %v10752_v9, %v8617_v43  ;;  %v10754_v32 = vperm.slane %v10753_v17, %v8597_v45  ;;  %v4298_v36 = vpop.permute.xlu1 %4297  ;;  %v4906_v2 = vsel %vm9764_vm5, %v4905_v53, %v4904_v8  ;;  %v10757_v62 = vld [vmem:[#allocation286_spill] sm:$0xff]  ;;  %v9148_v8 = vpop.permute.xlu0 %4336  ;;  %v10765_v6 = vld [vmem:[#allocation33_spill] sm:$0xff] }
 0xb50   :  { %v4875_v54 = vsel %vm9764_vm5, %v10751_v1, %v4873_v14  ;;  %v4935_v60 = vsel %vm9761_vm4, %v4934_v27, %v4933_v31  ;;  %v4963_v44 = vperm.slane %v8905_v11, %v8540_v41  ;;  %v4965_v10 = vperm.slane %v4298_v36, %v8614_v49  ;;  %v10763_v27 = vld [vmem:[#allocation100_spill] sm:$0xff]  ;;  %v10764_v63 = vld [vmem:[#allocation242_spill] sm:$0xff] }
 0xb51   :  { %v4962_v56 = vsel %vm9759_vm2, %v10754_v32, %v4960_v3  ;;  %v10756_v14 = vperm.slane %v10755_v40, %v8588_v38  ;;  %v4849_v0 = vperm.slane %v10757_v62, %v10734_v25  ;;  %v4908_v3 = vsel %vm4748_vm6, %v4907_v48, %v4906_v2  ;;  %v4331_v2 = vpop.permute.xlu2 %4330 }
 0xb52   :  { %v4937_v39 = vsel %vm9764_vm5, %v4936_v26, %v4935_v60  ;;  %v4847_v31 = vperm.slane %v10758_v18, %v8617_v43  ;;  %v5224_v11 = vsel %vm9760_vm9, %v4788_v51, %v8896_v59  ;;  %v4877_v35 = vsel %vm4748_vm6, %v4876_v4, %v4875_v54  ;;  %v10766_v54 = vld [vmem:[#allocation260_spill] sm:$0xff] }
 0xb53   :  { %v4846_v29 = vsel %vm4748_vm6, %v10756_v14, %v4844_v50  ;;  %v4964_v16 = vsel %vm9762_vm3, %v4963_v44, %v4962_v56  ;;  %v4819_v58 = vsel %vm4756_vm8, %v4818_v21, %v4817_v23  ;;  %vm9763_vm2 = vcmask 1042434   ;;  %v10759_v50 = vld [vmem:[#allocation8_spill] sm:$0xff]  ;;  %4432 = vperm.xlu1 %5513, %v10766_v54  }
 0xb54   :  { %v4879_v55 = vsel %vm4752_vm7, %v4878_v42, %v4877_v35  ;;  %v4966_v48 = vsel %vm9761_vm4, %v4965_v10, %v4964_v16  ;;  %v4848_v26 = vsel %vm4752_vm7, %v4847_v31, %v4846_v29  ;;  %v10760_v46 = vperm.slane %v10759_v50, %v8617_v43  ;;  %v10767_v42 = vld [vmem:[#allocation280_spill] sm:$0xff] }
 0xb55   :  { %v10762_v59 = vperm.slane %v10761_v30, %v8588_v38  ;;  %v4942_v21 = vperm.slane %v10763_v27, %v10734_v25  ;;  %vm5227_vm9 = vcmask 1043459   ;;  %v4850_v23 = vsel %vm4756_vm8, %v4849_v0, %v4848_v26  ;;  %v10771_v31 = vld [vmem:[#allocation84_spill] sm:$0xff]  ;;  %v10775_v30 = vld [vmem:[#allocation199_spill] sm:$0xff] }
 0xb56   :  { %v4910_v53 = vsel %vm4752_vm7, %v10760_v46, %v4908_v3  ;;  %v4911_v4 = vperm.slane %v10764_v63, %v10734_v25  ;;  %v4940_v1 = vperm.slane %v10765_v6, %v8617_v43  ;;  %v5226_v9 = vsel %vm9763_vm2, %v4819_v58, %v5224_v11  ;;  %v10773_v58 = vld [vmem:[#allocation79_spill] sm:$0xff]  ;;  %v10777_v63 = vld [vmem:[#allocation102_spill] sm:$0xff] }
 0xb57   :  { %v4939_v51 = vsel %vm4748_vm6, %v10762_v59, %v4937_v39  ;;  %v10768_v17 = vperm.slane %v10767_v42, %v10734_v25  ;;  %vm5229_vm4 = vcmask 1044484   ;;  %v10770_v56 = vperm.slane %v10769_v20, %v8600_v34  ;;  %v4307_v40 = vpop.permute.xlu1 %4306  ;;  %v9197_v18 = vpop.permute.xlu0 %4345  ;;  %v10776_v59 = vld [vmem:[#allocation302_spill] sm:$0xff] }
 0xb58   :  { %v4912_v60 = vsel %vm4756_vm8, %v4911_v4, %v4910_v53  ;;  %v4941_v44 = vsel %vm4752_vm7, %v4940_v1, %v4939_v51  ;;  %vm9767_vm3 = vcmask 1045509   ;;  %v4969_v10 = vperm.slane %v8976_v15, %v8588_v38  ;;  %v10772_v15 = vld [vmem:[#allocation346_spill] sm:$0xff]  ;;  %v10778_v4 = vld [vmem:[#allocation301_spill] sm:$0xff]  ;;  %v10779_v1 = vld [vmem:[#allocation171_spill] sm:$0xff] }
 0xb59   :  { %v4881_v32 = vsel %vm4756_vm8, %v10768_v17, %v4879_v55  ;;  %v4968_v36 = vsel %vm9764_vm5, %v10770_v56, %v4966_v48  ;;  %v5228_v14 = vsel %vm5227_vm9, %v4850_v23, %v5226_v9  ;;  %vm9766_vm2 = vcmask 1046534   ;;  %v10774_v55 = vld [vmem:[#allocation347_spill] sm:$0xff]  ;;  %v4340_v46 = vpop.permute.xlu2 %4339 }
 0xb5a   :  { %v4943_v29 = vsel %vm4756_vm8, %v4942_v21, %v4941_v44  ;;  %v4971_v62 = vperm.slane %v4307_v40, %v8617_v43  ;;  %v4973_v0 = vperm.slane %v8915_v52, %v10734_v25  ;;  %v5230_v3 = vsel %vm5229_vm4, %v4881_v32, %v5228_v14  ;;  %v10780_v32 = vld [vmem:[#allocation172_spill] sm:$0xff]  ;;  %v10783_v14 = vld [vmem:[#allocation105_spill] sm:$0xff] }
 0xb5b   :  { %v4970_v39 = vsel %vm4748_vm6, %v4969_v10, %v4968_v36  ;;  %vm9765_vm5 = vcmask 1047559   ;;  %v3585_v11 = vadd.f32 %v10772_v15, %v10771_v31  ;;  %v5232_v35 = vsel %vm9767_vm3, %v4912_v60, %v5230_v3  ;;  %v10781_v60 = vld [vmem:[#allocation203_spill] sm:$0xff]  ;;  %v10782_v44 = vld [vmem:[#allocation288_spill] sm:$0xff] }
 0xb5c   :  { %v4972_v16 = vsel %vm4752_vm7, %v4971_v62, %v4970_v39  ;;  %v3586_v48 = vadd.f32 %v10774_v55, %v10773_v58  ;;  %v5234_v26 = vsel %vm9766_vm2, %v4943_v29, %v5232_v35  ;;  %v1522_v51 = vmul.f32 %v10776_v59, %v10775_v30  ;;  %v10784_v29 = vld [vmem:[#allocation289_spill] sm:$0xff]  ;;  %v10785_v3 = vld [vmem:[#allocation207_spill] sm:$0xff]  ;;  %v10790_v30 = vld [vmem:[#allocation290_spill] sm:$0xff] }
 0xb5d   :  { %v4974_v52 = vsel %vm4756_vm8, %v4973_v0, %v4972_v16  ;;  %4438 = vperm.xlu2 %5512, %v3585_v11   ;;  %v4975_v27 = vperm.slane %v9049_v5, %v8477_v33  ;;  %v4978_v23 = vperm.slane %v8990_v47, %v8519_v12  ;;  %v1523_v6 = vmul.f32 %v10778_v4, %v10777_v63  ;;  %v10786_v11 = vld [vmem:[#allocation349_spill] sm:$0xff] }
 0xb5e   :  { %v5236_v50 = vsel %vm9765_vm5, %v4974_v52, %v5234_v26  ;;  %4441 = vperm.xlu1 %5513, %v3586_v48   ;;  %v3588_v54 = vadd.f32 %v10779_v1, %v1522_v51  ;;  %v4980_v42 = vperm.slane %v9121_v37, %v8591_v7  ;;  %v1525_v10 = vmul.f32 %v10782_v44, %v10781_v60  ;;  %v10787_v48 = vld [vmem:[#allocation206_spill] sm:$0xff]  ;;  %v10788_v26 = vld [vmem:[#allocation292_spill] sm:$0xff]  ;;  %v10796_v60 = vld [vmem:[#allocation111_spill] sm:$0xff] }
 0xb5f   :  { %5246 = vst [vmem:[#allocation5] sm:$0xff] %v5236_v50  ;;  %v4316_v53 = vpop.permute.xlu1 %4315  ;;  %v9218_v9 = vpop.permute.xlu0 %4354  ;;  %v3589_v20 = vadd.f32 %v10780_v32, %v1523_v6  ;;  %v4984_v37 = vperm.slane %v9078_v22, %v8608_v28  ;;  %v1526_v62 = vmul.f32 %v10784_v29, %v10783_v14  ;;  %v4986_v31 = vperm.slane %v4331_v2, %v8594_v13  ;;  %v10792_v6 = vld [vmem:[#allocation350_spill] sm:$0xff] }
 0xb60   :  { %v4976_v21 = vperm.slane %v4316_v53, %v8579_v24  ;;  %v3591_v39 = vadd.f32 %v10785_v3, %v1525_v10  ;;  %v1528_v52 = vmul.f32 %v10788_v26, %v10787_v48  ;;  %v4990_v2 = vperm.slane %v9148_v8, %v8611_v61  ;;  %v10789_v53 = vld [vmem:[#allocation108_spill] sm:$0xff]  ;;  %v10804_v48 = vld [vmem:[#allocation287_spill] sm:$0xff] }
 0xb61   :  { %v4349_v47 = vpop.permute.xlu2 %4348  ;;  %v3592_v35 = vadd.f32 %v10786_v11, %v1526_v62  ;;  %v1529_v51 = vmul.f32 %v10790_v30, %v10789_v53  ;;  %vm10793_vm5 = vcmask 654912   ;;  %vm10799_vm2 = vcmask 720512  }
 0xb62   :  { %v4977_v17 = vsel %vm4700_vm10, %v4976_v21, %v4975_v27  ;;  %v10791_v27 = vld [vmem:[#allocation348_spill] sm:$0xff]  ;;  %v4998_v62 = vperm.slane %v4349_v47, %v8600_v34  ;;  %vm10802_vm3 = vcmask 851712   ;;  %v5002_v47 = vperm.slane %v9218_v9, %v8617_v43 }
 0xb63   :  { %v4979_v5 = vsel %vm4704_vm11, %v4978_v23, %v4977_v17  ;;  %v3594_v21 = vadd.f32 %v10791_v27, %v1528_v52  ;;  %v4992_v23 = vperm.slane %v4340_v46, %v8597_v45  ;;  %v3595_v1 = vadd.f32 %v10792_v6, %v1529_v51  ;;  %v10797_v46 = vld [vmem:[#allocation297_spill] sm:$0xff]  ;;  %v10807_v51 = vld [vmem:[#allocation352_spill] sm:$0xff] }
 0xb64   :  { %v4981_v56 = vsel %vm4708_vm12, %v4980_v42, %v4979_v5  ;;  %v10795_v5 = vld [vmem:[#allocation293_spill] sm:$0xff]  ;;  %v1532_v10 = vmul.f32 %v10797_v46, %v10796_v60 }
 0xb65   :  { %4447 = vperm.xlu2 %5512, %v3588_v54  }
 0xb66   :  { %4450 = vperm.xlu1 %5513, %v3589_v20   ;;  %v10794_v20 = vld [vmem:[#allocation208_spill] sm:$0xff] }
 0xb67   :  { %v4325_v36 = vpop.permute.xlu1 %4324  ;;  %v9233_v0 = vpop.permute.xlu0 %4363 }
 0xb68   :  { %v4982_v40 = vperm.slane %v4325_v36, %v8629_v57 }
 0xb69   :  { %v4358_v22 = vpop.permute.xlu2 %4357 }
 0xb6a   :  { %v4983_v15 = vsel %vm4712_vm13, %v4982_v40, %v4981_v56  ;;  %v1531_v56 = vmul.f32 %v10795_v5, %v10794_v20  ;;  %v4996_v40 = vperm.slane %v9197_v18, %v8614_v49  ;;  %v10809_v20 = vld [vmem:[#allocation214_spill] sm:$0xff] }
 0xb6b   :  { %v4985_v16 = vsel %vm4716_vm14, %v4984_v37, %v4983_v15  ;;  %v10798_v37 = vld [vmem:[#allocation351_spill] sm:$0xff] }
 0xb6c   :  { %v4987_v58 = vsel %vm4720_vm15, %v4986_v31, %v4985_v16  ;;  %v3597_v14 = vadd.f32 %v10798_v37, %v1531_v56  ;;  %v10810_v56 = vld [vmem:[#allocation303_spill] sm:$0xff] }
 0xb6d   :  { %4456 = vperm.xlu2 %5512, %v3591_v39   ;;  %v10800_v39 = vld [vmem:[#allocation205_spill] sm:$0xff] }
 0xb6e   :  { %4459 = vperm.xlu1 %5513, %v3592_v35   ;;  %v3598_v31 = vadd.f32 %v10800_v39, %v1532_v10  ;;  %v10811_v10 = vld [vmem:[#allocation117_spill] sm:$0xff]  ;;  %v10813_v39 = vld [vmem:[#allocation354_spill] sm:$0xff] }
 0xb6f   :  { %v4334_v55 = vpop.permute.xlu1 %4333  ;;  %v4373_v42 = vpop.permute.xlu0 %4372 }
 0xb70   :  { %v4988_v50 = vperm.slane %v4334_v55, %v8537_v19  ;;  %v10803_v55 = vld [vmem:[#allocation211_spill] sm:$0xff] }
 0xb71   :  { %v4367_v32 = vpop.permute.xlu2 %4366  ;;  %v1534_v18 = vmul.f32 %v10804_v48, %v10803_v55  ;;  %v10814_v55 = vld [vmem:[#allocation217_spill] sm:$0xff] }
 0xb72   :  { %v4989_v63 = vsel %vm4724_vm0, %v4988_v50, %v4987_v58  ;;  %v10805_v50 = vld [vmem:[#allocation114_spill] sm:$0xff]  ;;  %v5009_v37 = vperm.slane %v4367_v32, %v8519_v12  ;;  %v5013_v32 = vperm.slane %v4373_v42, %v8629_v57 }
 0xb73   :  { %v4991_v54 = vsel %vm4728_vm1, %v4990_v2, %v4989_v63  ;;  %v10806_v2 = vld [vmem:[#allocation300_spill] sm:$0xff]  ;;  %v3600_v27 = vadd.f32 %v10807_v51, %v1534_v18  ;;  %v10808_v63 = vld [vmem:[#allocation353_spill] sm:$0xff]  ;;  %v10815_v18 = vld [vmem:[#allocation306_spill] sm:$0xff] }
 0xb74   :  { %v4993_v17 = vsel %vm10793_vm5, %v4992_v23, %v4991_v54  ;;  %vm10801_vm5 = vcmask 786112   ;;  %v1535_v53 = vmul.f32 %v10806_v2, %v10805_v50  ;;  %v10816_v50 = vld [vmem:[#allocation120_spill] sm:$0xff]  ;;  %v10817_v51 = vld [vmem:[#allocation221_spill] sm:$0xff] }
 0xb75   :  { %4465 = vperm.xlu2 %5512, %v3594_v21   ;;  %v5004_v21 = vperm.slane %v4358_v22, %v10734_v25  ;;  %v5007_v22 = vperm.slane %v9233_v0, %v8579_v24 }
 0xb76   :  { %4468 = vperm.xlu1 %5513, %v3595_v1   ;;  %v3601_v6 = vadd.f32 %v10808_v63, %v1535_v53  ;;  %v1541_v53 = vmul.f32 %v10782_v44, %v10816_v50  ;;  %v10818_v63 = vld [vmem:[#allocation355_spill] sm:$0xff] }
 0xb77   :  { %v4343_v8 = vpop.permute.xlu1 %4342  ;;  %v4382_v11 = vpop.permute.xlu0 %4381 }
 0xb78   :  { %v4994_v36 = vperm.slane %v4343_v8, %v8540_v41 }
 0xb79   :  { %v4376_v16 = vpop.permute.xlu2 %4375 }
 0xb7a   :  { %v4995_v3 = vsel %vm10799_vm2, %v4994_v36, %v4993_v17  ;;  %v1537_v36 = vmul.f32 %v10810_v56, %v10809_v20  ;;  %vm10828_vm2 = vcmask 654912  }
 0xb7b   :  { %v4997_v15 = vsel %vm10801_vm5, %v4996_v40, %v4995_v3  ;;  %v1538_v40 = vmul.f32 %v10776_v59, %v10811_v10 }
 0xb7c   :  { %v4999_v35 = vsel %vm10802_vm3, %v4998_v62, %v4997_v15  ;;  %vm10830_vm3 = vcmask 720512  }
 0xb7d   :  { %4474 = vperm.xlu2 %5512, %v3597_v14   ;;  %v10812_v14 = vld [vmem:[#allocation213_spill] sm:$0xff] }
 0xb7e   :  { %4477 = vperm.xlu1 %5513, %v3598_v31   ;;  %v3603_v62 = vadd.f32 %v10812_v14, %v1537_v36  ;;  %v3604_v31 = vadd.f32 %v10813_v39, %v1538_v40 }
 0xb7f   :  { %v4352_v58 = vpop.permute.xlu1 %4351  ;;  %v9279_v54 = vpop.permute.xlu0 %4390 }
 0xb80   :  { %v5000_v52 = vperm.slane %v4352_v58, %v8588_v38 }
 0xb81   :  { %v4385_v9 = vpop.permute.xlu2 %4384 }
 0xb82   :  { %v5001_v23 = vsel %vm4748_vm6, %v5000_v52, %v4999_v35  ;;  %v1540_v52 = vmul.f32 %v10815_v18, %v10814_v55  ;;  %v5021_v39 = vperm.slane %v4385_v9, %v8611_v61 }
 0xb83   :  { %v5003_v1 = vsel %vm4752_vm7, %v5002_v47, %v5001_v23 }
 0xb84   :  { %v9282_v17 = vsel %vm4756_vm8, %v5004_v21, %v5003_v1  ;;  %v5015_v21 = vperm.slane %v4376_v16, %v8608_v28  ;;  %v5019_v16 = vperm.slane %v4382_v11, %v8537_v19 }
 0xb85   :  { %4483 = vperm.xlu2 %5512, %v3600_v27   ;;  %v3606_v27 = vadd.f32 %v10817_v51, %v1540_v52  ;;  %v10824_v51 = vld [vmem:[#allocation223_spill] sm:$0xff] }
 0xb86   :  { %4486 = vperm.xlu1 %5513, %v3601_v6   ;;  %v3607_v6 = vadd.f32 %v10818_v63, %v1541_v53 }
 0xb87   :  { %v4361_v8 = vpop.permute.xlu1 %4360  ;;  %v9296_v35 = vpop.permute.xlu0 %4399 }
 0xb88   :  { %v5006_v60 = vperm.slane %v4361_v8, %v8477_v33 }
 0xb89   :  { %v4394_v0 = vpop.permute.xlu2 %4393 }
 0xb8a   :  { %v5008_v3 = vsel %vm4700_vm10, %v5007_v22, %v5006_v60  ;;  %v10819_v22 = vld [vmem:[#allocation220_spill] sm:$0xff]  ;;  %v10820_v60 = vld [vmem:[#allocation185_spill] sm:$0xff] }
 0xb8b   :  { %v5010_v15 = vsel %vm4704_vm11, %v5009_v37, %v5008_v3  ;;  %v1543_v10 = vmul.f32 %v10820_v60, %v10819_v22  ;;  %v10821_v37 = vld [vmem:[#allocation123_spill] sm:$0xff] }
 0xb8c   :  { %v1544_v14 = vmul.f32 %v10788_v26, %v10821_v37 }
 0xb8d   :  { %4492 = vperm.xlu2 %5512, %v3603_v62   ;;  %v10822_v62 = vld [vmem:[#allocation201_spill] sm:$0xff] }
 0xb8e   :  { %4495 = vperm.xlu1 %5513, %v3604_v31   ;;  %v3609_v3 = vadd.f32 %v10822_v62, %v1543_v10  ;;  %v10829_v10 = vld [vmem:[#allocation231_spill] sm:$0xff] }
 0xb8f   :  { %v4370_v58 = vpop.permute.xlu1 %4369  ;;  %v4409_v8 = vpop.permute.xlu0 %4408 }
 0xb90   :  { %v5011_v47 = vperm.slane %v4370_v58, %v8591_v7  ;;  %v5037_v11 = vperm.slane %v4409_v8, %v8477_v33  ;;  %v5027_v8 = vperm.slane %v4394_v0, %v8614_v49  ;;  %v5031_v0 = vperm.slane %v9296_v35, %v8588_v38 }
 0xb91   :  { %v4403_v36 = vpop.permute.xlu2 %4402 }
 0xb92   :  { %v5012_v23 = vsel %vm4708_vm12, %v5011_v47, %v5010_v15  ;;  %v10823_v15 = vld [vmem:[#allocation356_spill] sm:$0xff] }
 0xb93   :  { %v5014_v1 = vsel %vm4712_vm13, %v5013_v32, %v5012_v23  ;;  %v3610_v58 = vadd.f32 %v10823_v15, %v1544_v14  ;;  %v10826_v23 = vld [vmem:[#allocation126_spill] sm:$0xff] }
 0xb94   :  { %v5016_v20 = vsel %vm4716_vm14, %v5015_v21, %v5014_v1  ;;  %v1547_v63 = vmul.f32 %v10795_v5, %v10826_v23 }
 0xb95   :  { %4501 = vperm.xlu2 %5512, %v3606_v27   ;;  %v10825_v27 = vld [vmem:[#allocation295_spill] sm:$0xff] }
 0xb96   :  { %4504 = vperm.xlu1 %5513, %v3607_v6   ;;  %v1546_v9 = vmul.f32 %v10825_v27, %v10824_v51  ;;  %v5025_v6 = vperm.slane %v9279_v54, %v8540_v41  ;;  %v10831_v54 = vld [vmem:[#allocation226_spill] sm:$0xff] }
 0xb97   :  { %v4379_v42 = vpop.permute.xlu1 %4378  ;;  %v4418_v47 = vpop.permute.xlu0 %4417 }
 0xb98   :  { %v5017_v40 = vperm.slane %v4379_v42, %v8594_v13 }
 0xb99   :  { %v4412_v32 = vpop.permute.xlu2 %4411 }
 0xb9a   :  { %v5018_v31 = vsel %vm4720_vm15, %v5017_v40, %v5016_v20  ;;  %v5038_v50 = vperm.slane %v4412_v32, %v8579_v24  ;;  %v10827_v20 = vld [vmem:[#allocation357_spill] sm:$0xff]  ;;  %v3613_v40 = vadd.f32 %v10829_v10, %v1547_v63  ;;  %v10840_v10 = vld [vmem:[#allocation238_spill] sm:$0xff] }
 0xb9b   :  { %v5020_v55 = vsel %vm4724_vm0, %v5019_v16, %v5018_v31  ;;  %v3612_v42 = vadd.f32 %v10827_v20, %v1546_v9  ;;  %v10838_v20 = vld [vmem:[#allocation299_spill] sm:$0xff] }
 0xb9c   :  { %v5022_v52 = vsel %vm4728_vm1, %v5021_v39, %v5020_v55  ;;  %v5039_v1 = vsel %vm4700_vm10, %v5038_v50, %v5037_v11  ;;  %v10832_v39 = vld [vmem:[#allocation296_spill] sm:$0xff]  ;;  %v5033_v11 = vperm.slane %v4403_v36, %v8617_v43 }
 0xb9d   :  { %4510 = vperm.xlu2 %5512, %v3609_v3   ;;  %v1549_v31 = vmul.f32 %v10832_v39, %v10831_v54 }
 0xb9e   :  { %4513 = vperm.xlu1 %5513, %v3610_v58   ;;  %v10833_v58 = vld [vmem:[#allocation129_spill] sm:$0xff] }
 0xb9f   :  { %v4388_v53 = vpop.permute.xlu1 %4387  ;;  %v4427_v14 = vpop.permute.xlu0 %4426  ;;  %v1550_v55 = vmul.f32 %v10804_v48, %v10833_v58  ;;  %v10843_v58 = vld [vmem:[#allocation232_spill] sm:$0xff] }
 0xba0   :  { %v5023_v21 = vperm.slane %v4388_v53, %v8597_v45  ;;  %v10836_v53 = vld [vmem:[#allocation359_spill] sm:$0xff] }
 0xba1   :  { %v4421_v62 = vpop.permute.xlu2 %4420  ;;  %v3616_v51 = vadd.f32 %v10836_v53, %v1550_v55  ;;  %v1555_v55 = vmul.f32 %v10778_v4, %v10843_v58  ;;  %v10845_v53 = vld [vmem:[#allocation236_spill] sm:$0xff] }
 0xba2   :  { %v5024_v22 = vsel %vm10828_vm2, %v5023_v21, %v5022_v52  ;;  %v10834_v52 = vld [vmem:[#allocation358_spill] sm:$0xff]  ;;  %vm10835_vm2 = vcmask 851712  }
 0xba3   :  { %v5026_v16 = vsel %vm10830_vm3, %v5025_v6, %v5024_v22  ;;  %v3615_v32 = vadd.f32 %v10834_v52, %v1549_v31  ;;  %v10837_v6 = vld [vmem:[#allocation229_spill] sm:$0xff]  ;;  %v10839_v22 = vld [vmem:[#allocation130_spill] sm:$0xff]  ;;  %vm10842_vm3 = vcmask 1041409  }
 0xba4   :  { %v5028_v37 = vsel %vm10801_vm5, %v5027_v8, %v5026_v16  ;;  %v1553_v36 = vmul.f32 %v10810_v56, %v10839_v22  ;;  %vm10855_vm5 = vcmask 654912  }
 0xba5   :  { %4519 = vperm.xlu2 %5512, %v3612_v42   ;;  %v1552_v42 = vmul.f32 %v10838_v20, %v10837_v6 }
 0xba6   :  { %4522 = vperm.xlu1 %5513, %v3613_v40  }
 0xba7   :  { %v4397_v3 = vpop.permute.xlu1 %4396  ;;  %v4436_v23 = vpop.permute.xlu0 %4435  ;;  %v3618_v40 = vadd.f32 %v10840_v10, %v1552_v42 }
 0xba8   :  { %v5029_v15 = vperm.slane %v4397_v3, %v8600_v34 }
 0xba9   :  { %v4430_v63 = vpop.permute.xlu2 %4429 }
 0xbaa   :  { %v5030_v50 = vsel %vm10835_vm2, %v5029_v15, %v5028_v37  ;;  %v10841_v37 = vld [vmem:[#allocation360_spill] sm:$0xff]  ;;  %vm10856_vm2 = vcmask 720512  }
 0xbab   :  { %v5032_v9 = vsel %vm4748_vm6, %v5031_v0, %v5030_v50  ;;  %v3619_v3 = vadd.f32 %v10841_v37, %v1553_v36  ;;  %v10847_v36 = vld [vmem:[#allocation235_spill] sm:$0xff]  ;;  %v10849_v37 = vld [vmem:[#allocation241_spill] sm:$0xff] }
 0xbac   :  { %v5034_v21 = vsel %vm4752_vm7, %v5033_v11, %v5032_v9  ;;  %v10844_v11 = vld [vmem:[#allocation131_spill] sm:$0xff]  ;;  %v1558_v10 = vmul.f32 %v10784_v29, %v10847_v36 }
 0xbad   :  { %4528 = vperm.xlu2 %5512, %v3615_v32   ;;  %v5042_v32 = vperm.slane %v4418_v47, %v8591_v7  ;;  %v1556_v50 = vmul.f32 %v10815_v18, %v10844_v11 }
 0xbae   :  { %4531 = vperm.xlu1 %5513, %v3616_v51   ;;  %v3621_v51 = vadd.f32 %v10845_v53, %v1555_v55  ;;  %v10850_v55 = vld [vmem:[#allocation361_spill] sm:$0xff] }
 0xbaf   :  { %v4406_v35 = vpop.permute.xlu1 %4405  ;;  %v4445_v31 = vpop.permute.xlu0 %4444 }
 0xbb0   :  { %v5035_v8 = vperm.slane %v4406_v35, %v10734_v25 }
 0xbb2   :  { %v5036_v16 = vsel %vm4756_vm8, %v5035_v8, %v5034_v21  ;;  %v10846_v21 = vld [vmem:[#allocation244_spill] sm:$0xff] }
 0xbb3   :  { %v9361_v54 = vsel %vm10842_vm3, %v5036_v16, %v9282_v17  ;;  %v5044_v17 = vperm.slane %v4421_v62, %v8629_v57  ;;  %v3622_v35 = vadd.f32 %v10846_v21, %v1556_v50  ;;  %v5048_v62 = vperm.slane %v4427_v14, %v8594_v13  ;;  %v10848_v16 = vld [vmem:[#allocation134_spill] sm:$0xff]  ;;  %v10852_v21 = vld [vmem:[#allocation137_spill] sm:$0xff] }
 0xbb4   :  { %vm10860_vm3 = vcmask 786112  }
 0xbb5   :  { %4537 = vperm.xlu2 %5512, %v3618_v40  }
 0xbb6   :  { %4540 = vperm.xlu1 %5513, %v3619_v3   ;;  %v3624_v3 = vadd.f32 %v10849_v37, %v1558_v10  ;;  %v10854_v10 = vld [vmem:[#allocation257_spill] sm:$0xff] }
 0xbb7   :  { %v4439_v15 = vpop.permute.xlu2 %4438  ;;  %v4415_v0 = vpop.permute.xlu1 %4414 }
 0xbb8   :  { %v5040_v52 = vperm.slane %v4415_v0, %v8519_v12  ;;  %v4454_v8 = vpop.permute.xlu0 %4453  ;;  %v5050_v0 = vperm.slane %v4430_v63, %v8537_v19  ;;  %v1562_v63 = vmul.f32 %v10825_v27, %v10852_v21 }
 0xbba   :  { %v5041_v9 = vsel %vm4704_vm11, %v5040_v52, %v5039_v1  ;;  %v1559_v1 = vmul.f32 %v10820_v60, %v10848_v16 }
 0xbbb   :  { %v5043_v6 = vsel %vm4708_vm12, %v5042_v32, %v5041_v9 }
 0xbbc   :  { %v5045_v42 = vsel %vm4712_vm13, %v5044_v17, %v5043_v6  ;;  %v3625_v52 = vadd.f32 %v10850_v55, %v1559_v1  ;;  %v10853_v6 = vld [vmem:[#allocation362_spill] sm:$0xff]  ;;  %v10858_v55 = vld [vmem:[#allocation141_spill] sm:$0xff] }
 0xbbd   :  { %4546 = vperm.xlu2 %5512, %v3621_v51   ;;  %v10851_v51 = vld [vmem:[#allocation239_spill] sm:$0xff] }
 0xbbe   :  { %4549 = vperm.xlu1 %5513, %v3622_v35   ;;  %v1561_v17 = vmul.f32 %v10790_v30, %v10851_v51  ;;  %v5054_v35 = vperm.slane %v4436_v23, %v8597_v45 }
 0xbbf   :  { %v4448_v22 = vpop.permute.xlu2 %4447  ;;  %v4424_v47 = vpop.permute.xlu1 %4423 }
 0xbc0   :  { %v5046_v40 = vperm.slane %v4424_v47, %v8608_v28  ;;  %v4463_v14 = vpop.permute.xlu0 %4462  ;;  %v5056_v47 = vperm.slane %v4439_v15, %v8540_v41  ;;  %v5060_v15 = vperm.slane %v4445_v31, %v8600_v34  ;;  %v10863_v31 = vld [vmem:[#allocation246_spill] sm:$0xff] }
 0xbc2   :  { %v5047_v58 = vsel %vm4716_vm14, %v5046_v40, %v5045_v42  ;;  %v3627_v42 = vadd.f32 %v10853_v6, %v1561_v17  ;;  %v3628_v40 = vadd.f32 %v10854_v10, %v1562_v63  ;;  %v10861_v17 = vld [vmem:[#allocation364_spill] sm:$0xff] }
 0xbc3   :  { %v5049_v32 = vsel %vm4720_vm15, %v5048_v62, %v5047_v58  ;;  %v10864_v10 = vld [vmem:[#allocation144_spill] sm:$0xff] }
 0xbc4   :  { %v5051_v11 = vsel %vm4724_vm0, %v5050_v0, %v5049_v32  ;;  %v10857_v0 = vld [vmem:[#allocation243_spill] sm:$0xff] }
 0xbc5   :  { %4555 = vperm.xlu2 %5512, %v3624_v3   ;;  %v1564_v23 = vmul.f32 %v10797_v46, %v10857_v0  ;;  %v10859_v32 = vld [vmem:[#allocation363_spill] sm:$0xff]  ;;  %v10866_v0 = vld [vmem:[#allocation365_spill] sm:$0xff] }
 0xbc6   :  { %4558 = vperm.xlu1 %5513, %v3625_v52   ;;  %v1565_v52 = vmul.f32 %v10832_v39, %v10858_v55 }
 0xbc7   :  { %v4457_v50 = vpop.permute.xlu2 %4456  ;;  %v4433_v53 = vpop.permute.xlu1 %4432 }
 0xbc8   :  { %v5052_v9 = vperm.slane %v4433_v53, %v8611_v61  ;;  %v4472_v3 = vpop.permute.xlu0 %4471  ;;  %v5062_v53 = vperm.slane %v4448_v22, %v8588_v38  ;;  %v5066_v22 = vperm.slane %v4454_v8, %v10734_v25 }
 0xbca   :  { %v5053_v36 = vsel %vm4728_vm1, %v5052_v9, %v5051_v11  ;;  %v3630_v11 = vadd.f32 %v10859_v32, %v1564_v23  ;;  %v3631_v9 = vadd.f32 %v10861_v17, %v1565_v52  ;;  %v10868_v32 = vld [vmem:[#allocation249_spill] sm:$0xff]  ;;  %v5071_v17 = vperm.slane %v4463_v14, %v8519_v12 }
 0xbcb   :  { %v5055_v62 = vsel %vm10855_vm5, %v5054_v35, %v5053_v36  ;;  %vm10862_vm5 = vcmask 851712  }
 0xbcc   :  { %v5057_v16 = vsel %vm10856_vm2, %v5056_v47, %v5055_v62  ;;  %v10865_v62 = vld [vmem:[#allocation266_spill] sm:$0xff]  ;;  %vm10867_vm2 = vcmask 1042434  }
 0xbcd   :  { %4564 = vperm.xlu2 %5512, %v3627_v42   ;;  %v1567_v42 = vmul.f32 %v10806_v2, %v10863_v31 }
 0xbce   :  { %4567 = vperm.xlu1 %5513, %v3628_v40   ;;  %v1568_v40 = vmul.f32 %v10838_v20, %v10864_v10 }
 0xbcf   :  { %v4466_v1 = vpop.permute.xlu2 %4465 }
 0xbd0   :  { %v4442_v37 = vpop.permute.xlu1 %4441  ;;  %v4481_v47 = vpop.permute.xlu0 %4480  ;;  %v3634_v23 = vadd.f32 %v10866_v0, %v1568_v40  ;;  %v10873_v0 = vld [vmem:[#allocation150_spill] sm:$0xff] }
 0xbd1   :  { %v5058_v58 = vperm.slane %v4442_v37, %v8614_v49 }
 0xbd3   :  { %v5059_v51 = vsel %vm10860_vm3, %v5058_v58, %v5057_v16  ;;  %v3633_v16 = vadd.f32 %v10865_v62, %v1567_v42  ;;  %v10871_v42 = vld [vmem:[#allocation256_spill] sm:$0xff]  ;;  %vm10880_vm3 = vcmask 654912  }
 0xbd4   :  { %v5061_v21 = vsel %vm10862_vm5, %v5060_v15, %v5059_v51  ;;  %v10872_v62 = vld [vmem:[#allocation252_spill] sm:$0xff]  ;;  %vm10884_vm5 = vcmask 720512  }
 0xbd5   :  { %4573 = vperm.xlu2 %5512, %v3630_v11   ;;  %v5063_v63 = vsel %vm4748_vm6, %v5062_v53, %v5061_v21  ;;  %v1570_v11 = vmul.f32 %v10776_v59, %v10868_v32  ;;  %v5068_v53 = vperm.slane %v4457_v50, %v8477_v33 }
 0xbd6   :  { %4576 = vperm.xlu1 %5513, %v3631_v9   ;;  %v10869_v9 = vld [vmem:[#allocation147_spill] sm:$0xff] }
 0xbd7   :  { %v4475_v35 = vpop.permute.xlu2 %4474  ;;  %v1571_v21 = vmul.f32 %v10778_v4, %v10869_v9 }
 0xbd8   :  { %v4451_v6 = vpop.permute.xlu1 %4450  ;;  %v4490_v8 = vpop.permute.xlu0 %4489  ;;  %v5079_v32 = vperm.slane %v4475_v35, %v8594_v13 }
 0xbd9   :  { %v5064_v36 = vperm.slane %v4451_v6, %v8617_v43  ;;  %v5073_v6 = vperm.slane %v4466_v1, %v8591_v7  ;;  %v5077_v1 = vperm.slane %v4472_v3, %v8608_v28  ;;  %v10876_v3 = vld [vmem:[#allocation255_spill] sm:$0xff] }
 0xbdb   :  { %v5065_v37 = vsel %vm4752_vm7, %v5064_v36, %v5063_v63  ;;  %v10870_v63 = vld [vmem:[#allocation250_spill] sm:$0xff]  ;;  %v3637_v36 = vadd.f32 %v10871_v42, %v1571_v21 }
 0xbdc   :  { %v5067_v58 = vsel %vm4756_vm8, %v5066_v22, %v5065_v37 }
 0xbdd   :  { %v9423_v15 = vsel %vm10867_vm2, %v5067_v58, %v9361_v54  ;;  %4582 = vperm.xlu2 %5512, %v3633_v16   ;;  %v3636_v54 = vadd.f32 %v10870_v63, %v1570_v11  ;;  %v1573_v16 = vmul.f32 %v10782_v44, %v10872_v62  ;;  %v10874_v58 = vld [vmem:[#allocation275_spill] sm:$0xff]  ;;  %v10879_v62 = vld [vmem:[#allocation284_spill] sm:$0xff]  ;;  %vm10886_vm2 = vcmask 786112  }
 0xbde   :  { %4585 = vperm.xlu1 %5513, %v3634_v23   ;;  %v1574_v23 = vmul.f32 %v10784_v29, %v10873_v0 }
 0xbdf   :  { %v4484_v55 = vpop.permute.xlu2 %4483 }
 0xbe0   :  { %v4460_v52 = vpop.permute.xlu1 %4459  ;;  %v4499_v14 = vpop.permute.xlu0 %4498 }
 0xbe1   :  { %v5069_v51 = vperm.slane %v4460_v52, %v8579_v24  ;;  %v3639_v52 = vadd.f32 %v10874_v58, %v1573_v16 }
 0xbe3   :  { %v5070_v31 = vsel %vm4700_vm10, %v5069_v51, %v5068_v53  ;;  %v10875_v53 = vld [vmem:[#allocation259_spill] sm:$0xff] }
 0xbe4   :  { %v5072_v22 = vsel %vm4704_vm11, %v5071_v17, %v5070_v31  ;;  %v3640_v51 = vadd.f32 %v10875_v53, %v1574_v23  ;;  %v5083_v31 = vperm.slane %v4481_v47, %v8611_v61  ;;  %v10883_v53 = vld [vmem:[#allocation367_spill] sm:$0xff] }
 0xbe5   :  { %4591 = vperm.xlu2 %5512, %v3636_v54   ;;  %v5074_v50 = vsel %vm4708_vm12, %v5073_v6, %v5072_v22  ;;  %v1576_v54 = vmul.f32 %v10788_v26, %v10876_v3  ;;  %v10877_v6 = vld [vmem:[#allocation153_spill] sm:$0xff] }
 0xbe6   :  { %4594 = vperm.xlu1 %5513, %v3637_v36   ;;  %v1577_v35 = vmul.f32 %v10790_v30, %v10877_v6  ;;  %v10878_v36 = vld [vmem:[#allocation366_spill] sm:$0xff] }
 0xbe7   :  { %v4493_v10 = vpop.permute.xlu2 %4492  ;;  %v3642_v22 = vadd.f32 %v10878_v36, %v1576_v54  ;;  %v10881_v30 = vld [vmem:[#allocation258_spill] sm:$0xff]  ;;  %v5095_v36 = vperm.slane %v4499_v14, %v8617_v43 }
 0xbe8   :  { %v4469_v40 = vpop.permute.xlu1 %4468  ;;  %v4508_v42 = vpop.permute.xlu0 %4507  ;;  %v3643_v16 = vadd.f32 %v10879_v62, %v1577_v35  ;;  %v1579_v47 = vmul.f32 %v10795_v5, %v10881_v30  ;;  %v10888_v35 = vld [vmem:[#allocation261_spill] sm:$0xff] }
 0xbe9   :  { %v5075_v37 = vperm.slane %v4469_v40, %v8629_v57 }
 0xbeb   :  { %v5076_v11 = vsel %vm4712_vm13, %v5075_v37, %v5074_v50  ;;  %v5085_v50 = vperm.slane %v4484_v55, %v8597_v45  ;;  %v10882_v55 = vld [vmem:[#allocation156_spill] sm:$0xff] }
 0xbec   :  { %v5078_v17 = vsel %vm4716_vm14, %v5077_v1, %v5076_v11 }
 0xbed   :  { %4600 = vperm.xlu2 %5512, %v3639_v52   ;;  %v5080_v9 = vsel %vm4720_vm15, %v5079_v32, %v5078_v17  ;;  %v5089_v52 = vperm.slane %v4490_v8, %v8614_v49  ;;  %v1580_v32 = vmul.f32 %v10797_v46, %v10882_v55  ;;  %v5091_v17 = vperm.slane %v4493_v10, %v8600_v34  ;;  %v10889_v10 = vld [vmem:[#allocation159_spill] sm:$0xff]  ;;  %v10892_v55 = vld [vmem:[#allocation264_spill] sm:$0xff] }
 0xbee   :  { %4603 = vperm.xlu1 %5513, %v3640_v51   ;;  %v3645_v51 = vadd.f32 %v10883_v53, %v1579_v47  ;;  %v1582_v46 = vmul.f32 %v10804_v48, %v10888_v35  ;;  %v10893_v53 = vld [vmem:[#allocation162_spill] sm:$0xff] }
 0xbef   :  { %v4502_v21 = vpop.permute.xlu2 %4501 }
 0xbf0   :  { %v4478_v63 = vpop.permute.xlu1 %4477  ;;  %v4517_v11 = vpop.permute.xlu0 %4516 }
 0xbf1   :  { %v5081_v29 = vperm.slane %v4478_v63, %v8537_v19  ;;  %v10885_v63 = vld [vmem:[#allocation262_spill] sm:$0xff] }
 0xbf2   :  { %v3646_v3 = vadd.f32 %v10885_v63, %v1580_v32  ;;  %v10894_v63 = vld [vmem:[#allocation265_spill] sm:$0xff] }
 0xbf3   :  { %v5082_v40 = vsel %vm4724_vm0, %v5081_v29, %v5080_v9 }
 0xbf4   :  { %v5084_v37 = vsel %vm4728_vm1, %v5083_v31, %v5082_v40 }
 0xbf5   :  { %4609 = vperm.xlu2 %5512, %v3642_v22   ;;  %v5086_v1 = vsel %vm10880_vm3, %v5085_v50, %v5084_v37  ;;  %vm10887_vm3 = vcmask 851712   ;;  %v1583_v22 = vmul.f32 %v10806_v2, %v10889_v10  ;;  %v10890_v50 = vld [vmem:[#allocation298_spill] sm:$0xff] }
 0xbf6   :  { %4612 = vperm.xlu1 %5513, %v3643_v16   ;;  %v3648_v40 = vadd.f32 %v10890_v50, %v1582_v46  ;;  %v5097_v16 = vperm.slane %v4502_v21, %v10734_v25  ;;  %v1585_v21 = vmul.f32 %v10810_v56, %v10892_v55  ;;  %v10896_v46 = vld [vmem:[#allocation267_spill] sm:$0xff]  ;;  %v10898_v50 = vld [vmem:[#allocation310_spill] sm:$0xff] }
 0xbf7   :  { %v4511_v0 = vpop.permute.xlu2 %4510 }
 0xbf8   :  { %v4487_v23 = vpop.permute.xlu1 %4486  ;;  %v4526_v62 = vpop.permute.xlu0 %4525 }
 0xbf9   :  { %v5087_v58 = vperm.slane %v4487_v23, %v8540_v41 }
 0xbfb   :  { %v5088_v9 = vsel %vm10884_vm5, %v5087_v58, %v5086_v1  ;;  %v10891_v1 = vld [vmem:[#allocation368_spill] sm:$0xff] }
 0xbfc   :  { %v5090_v54 = vsel %vm10886_vm2, %v5089_v52, %v5088_v9  ;;  %v3649_v23 = vadd.f32 %v10891_v1, %v1583_v22  ;;  %v5100_v52 = vperm.slane %v4508_v42, %v8579_v24  ;;  %v10899_v1 = vld [vmem:[#allocation305_spill] sm:$0xff] }
 0xbfd   :  { %4618 = vperm.xlu2 %5512, %v3645_v51   ;;  %v5092_v29 = vsel %vm10887_vm3, %v5091_v17, %v5090_v54  ;;  %v1586_v51 = vmul.f32 %v10776_v59, %v10893_v53  ;;  %v5102_v17 = vperm.slane %v4511_v0, %v8519_v12  ;;  %v10895_v54 = vld [vmem:[#allocation9_spill] sm:$0xff]  ;;  %v5106_v0 = vperm.slane %v4517_v11, %v8629_v57  ;;  %v10902_v53 = vld [vmem:[#allocation308_spill] sm:$0xff] }
 0xbfe   :  { %4621 = vperm.xlu1 %5513, %v3646_v3   ;;  %v3651_v3 = vadd.f32 %v10894_v63, %v1585_v21  ;;  %v10901_v21 = vld [vmem:[#allocation169_spill] sm:$0xff] }
 0xbff   :  { %v4520_v6 = vpop.permute.xlu2 %4519 }
 0xc00   :  { %v4496_v8 = vpop.permute.xlu1 %4495  ;;  %v4535_v9 = vpop.permute.xlu0 %4534 }
 0xc01   :  { %v5093_v31 = vperm.slane %v4496_v8, %v8588_v38 }
 0xc03   :  { %v5094_v37 = vsel %vm4748_vm6, %v5093_v31, %v5092_v29  ;;  %v3652_v29 = vadd.f32 %v10895_v54, %v1586_v51  ;;  %v1588_v31 = vmul.f32 %v10815_v18, %v10896_v46  ;;  %v10904_v46 = vld [vmem:[#allocation273_spill] sm:$0xff] }
 0xc04   :  { %v5096_v30 = vsel %vm4752_vm7, %v5095_v36, %v5094_v37  ;;  %v10897_v36 = vld [vmem:[#allocation165_spill] sm:$0xff] }
 0xc05   :  { %v5098_v47 = vsel %vm4756_vm8, %v5097_v16, %v5096_v30  ;;  %4627 = vperm.xlu2 %5512, %v3648_v40   ;;  %v1589_v10 = vmul.f32 %v10782_v44, %v10897_v36  ;;  %v3654_v40 = vadd.f32 %v10898_v50, %v1588_v31  ;;  %v5108_v16 = vperm.slane %v4520_v6, %v8608_v28  ;;  %v10906_v50 = vld [vmem:[#allocation271_spill] sm:$0xff] }
 0xc06   :  { %4630 = vperm.xlu1 %5513, %v3649_v23   ;;  %v9488_v14 = vsel %vm5227_vm9, %v5098_v47, %v9423_v15  ;;  %v1592_v6 = vmul.f32 %v10788_v26, %v10901_v21  ;;  %vm10907_vm9 = vcmask 654912   ;;  %v10911_v21 = vld [vmem:[#allocation330_spill] sm:$0xff] }
 0xc07   :  { %v4529_v2 = vpop.permute.xlu2 %4528  ;;  %v3655_v23 = vadd.f32 %v10899_v1, %v1589_v10  ;;  %v10908_v1 = vld [vmem:[#allocation37_spill] sm:$0xff] }
 0xc08   :  { %v4505_v58 = vpop.permute.xlu1 %4504  ;;  %v4544_v22 = vpop.permute.xlu0 %4543 }
 0xc09   :  { %v5099_v32 = vperm.slane %v4505_v58, %v8477_v33 }
 0xc0b   :  { %v5101_v15 = vsel %vm4700_vm10, %v5100_v52, %v5099_v32  ;;  %v10900_v52 = vld [vmem:[#allocation270_spill] sm:$0xff]  ;;  %v5112_v32 = vperm.slane %v4526_v62, %v8537_v19 }
 0xc0c   :  { %v5103_v8 = vsel %vm4704_vm11, %v5102_v17, %v5101_v15  ;;  %v1591_v44 = vmul.f32 %v10820_v60, %v10900_v52  ;;  %v5114_v17 = vperm.slane %v4529_v2, %v8611_v61  ;;  %v1594_v2 = vmul.f32 %v10825_v27, %v10904_v46 }
 0xc0d   :  { %4636 = vperm.xlu2 %5512, %v3651_v3   ;;  %v10903_v3 = vld [vmem:[#allocation320_spill] sm:$0xff] }
 0xc0e   :  { %4639 = vperm.xlu1 %5513, %v3652_v29   ;;  %v3657_v51 = vadd.f32 %v10902_v53, %v1591_v44  ;;  %v3658_v15 = vadd.f32 %v10903_v3, %v1592_v6  ;;  %v5124_v44 = vperm.slane %v4544_v22, %v8588_v38  ;;  %v10913_v22 = vld [vmem:[#allocation282_spill] sm:$0xff] }
 0xc0f   :  { %v4538_v42 = vpop.permute.xlu2 %4537 }
 0xc10   :  { %v4514_v35 = vpop.permute.xlu1 %4513  ;;  %v4553_v29 = vpop.permute.xlu0 %4552 }
 0xc11   :  { %v5104_v59 = vperm.slane %v4514_v35, %v8591_v7  ;;  %v5130_v26 = vperm.slane %v4553_v29, %v8477_v33  ;;  %v10914_v29 = vld [vmem:[#allocation179_spill] sm:$0xff] }
 0xc13   :  { %v5105_v37 = vsel %vm4708_vm12, %v5104_v59, %v5103_v8  ;;  %v5118_v59 = vperm.slane %v4535_v9, %v8540_v41 }
 0xc14   :  { %v5107_v30 = vsel %vm4712_vm13, %v5106_v0, %v5105_v37  ;;  %v10905_v0 = vld [vmem:[#allocation173_spill] sm:$0xff] }
 0xc15   :  { %4645 = vperm.xlu2 %5512, %v3654_v40   ;;  %v5109_v47 = vsel %vm4716_vm14, %v5108_v16, %v5107_v30  ;;  %v1595_v36 = vmul.f32 %v10795_v5, %v10905_v0  ;;  %v3660_v40 = vadd.f32 %v10906_v50, %v1594_v2  ;;  %v5120_v16 = vperm.slane %v4538_v42, %v8614_v49  ;;  %v10910_v42 = vld [vmem:[#allocation176_spill] sm:$0xff]  ;;  %v10918_v50 = vld [vmem:[#allocation182_spill] sm:$0xff] }
 0xc16   :  { %4648 = vperm.xlu1 %5513, %v3655_v23  }
 0xc17   :  { %v4547_v58 = vpop.permute.xlu2 %4546  ;;  %v3661_v23 = vadd.f32 %v10908_v1, %v1595_v36 }
 0xc18   :  { %v4523_v11 = vpop.permute.xlu1 %4522 }
 0xc19   :  { %v5110_v55 = vperm.slane %v4523_v11, %v8594_v13  ;;  %v10909_v11 = vld [vmem:[#allocation278_spill] sm:$0xff] }
 0xc1a   :  { %v1597_v5 = vmul.f32 %v10832_v39, %v10909_v11 }
 0xc1b   :  { %v5111_v63 = vsel %vm4720_vm15, %v5110_v55, %v5109_v47  ;;  %v1598_v55 = vmul.f32 %v10804_v48, %v10910_v42 }
 0xc1c   :  { %v5113_v54 = vsel %vm4724_vm0, %v5112_v32, %v5111_v63  ;;  %v3663_v6 = vadd.f32 %v10911_v21, %v1597_v5  ;;  %v5126_v32 = vperm.slane %v4547_v58, %v8617_v43  ;;  %v1601_v58 = vmul.f32 %v10810_v56, %v10914_v29 }
 0xc1d   :  { %4654 = vperm.xlu2 %5512, %v3657_v51   ;;  %v5115_v60 = vsel %vm4728_vm1, %v5114_v17, %v5113_v54  ;;  %v10912_v51 = vld [vmem:[#allocation34_spill] sm:$0xff]  ;;  %v1600_v54 = vmul.f32 %v10838_v20, %v10913_v22  ;;  %v10917_v20 = vld [vmem:[#allocation285_spill] sm:$0xff] }
 0xc1e   :  { %4657 = vperm.xlu1 %5513, %v3658_v15   ;;  %v3664_v17 = vadd.f32 %v10912_v51, %v1598_v55  ;;  %v1603_v0 = vmul.f32 %v10778_v4, %v10917_v20 }
 0xc1f   :  { %v4556_v8 = vpop.permute.xlu2 %4555 }
 0xc20   :  { %v5131_v62 = vperm.slane %v4556_v8, %v8579_v24  ;;  %v4532_v35 = vpop.permute.xlu1 %4531  ;;  %v10915_v8 = vld [vmem:[#allocation312_spill] sm:$0xff] }
 0xc21   :  { %v5116_v31 = vperm.slane %v4532_v35, %v8597_v45  ;;  %v10916_v35 = vld [vmem:[#allocation10_spill] sm:$0xff] }
 0xc22   :  { %v5132_v10 = vsel %vm4700_vm10, %v5131_v62, %v5130_v26  ;;  %v3666_v26 = vadd.f32 %v10915_v8, %v1600_v54  ;;  %v3667_v46 = vadd.f32 %v10916_v35, %v1601_v58 }
 0xc23   :  { %v5117_v37 = vsel %vm10907_vm9, %v5116_v31, %v5115_v60  ;;  %v4562_v60 = vpop.permute.xlu0 %4561 }
 0xc24   :  { %v5119_v30 = vsel %vm10884_vm5, %v5118_v59, %v5117_v37  ;;  %v5135_v56 = vperm.slane %v4562_v60, %v8591_v7  ;;  %v10919_v37 = vld [vmem:[#allocation311_spill] sm:$0xff] }
 0xc25   :  { %4663 = vperm.xlu2 %5512, %v3660_v40   ;;  %v5121_v27 = vsel %vm10886_vm2, %v5120_v16, %v5119_v30  ;;  %v1604_v40 = vmul.f32 %v10815_v18, %v10918_v50  ;;  %v3669_v1 = vadd.f32 %v10919_v37, %v1603_v0  ;;  %v10920_v30 = vld [vmem:[#allocation309_spill] sm:$0xff] }
 0xc26   :  { %4666 = vperm.xlu1 %5513, %v3661_v23  }
 0xc27   :  { %v4565_v9 = vpop.permute.xlu2 %4564 }
 0xc28   :  { %v4541_v47 = vpop.permute.xlu1 %4540  ;;  %v5137_v23 = vperm.slane %v4565_v9, %v8629_v57 }
 0xc29   :  { %v5122_v52 = vperm.slane %v4541_v47, %v8600_v34 }
 0xc2b   :  { %v5123_v53 = vsel %vm10887_vm3, %v5122_v52, %v5121_v27  ;;  %v4571_v16 = vpop.permute.xlu0 %4570  ;;  %v3670_v27 = vadd.f32 %v10920_v30, %v1604_v40 }
 0xc2c   :  { %v5125_v63 = vsel %vm4748_vm6, %v5124_v44, %v5123_v53  ;;  %v5141_v18 = vperm.slane %v4571_v16, %v8594_v13 }
 0xc2d   :  { %4672 = vperm.xlu2 %5512, %v3663_v6   ;;  %v5127_v39 = vsel %vm4752_vm7, %v5126_v32, %v5125_v63 }
 0xc2e   :  { %4675 = vperm.xlu1 %5513, %v3664_v17  }
 0xc2f   :  { %v4574_v3 = vpop.permute.xlu2 %4573 }
 0xc30   :  { %v4550_v15 = vpop.permute.xlu1 %4549  ;;  %v5143_v42 = vperm.slane %v4574_v3, %v8537_v19 }
 0xc31   :  { %v5128_v48 = vperm.slane %v4550_v15, %v10734_v25 }
 0xc33   :  { %v5129_v62 = vsel %vm4756_vm8, %v5128_v48, %v5127_v39  ;;  %v4580_v44 = vpop.permute.xlu0 %4579 }
 0xc34   :  { %v5240_v2 = vsel %vm5229_vm4, %v5129_v62, %v9488_v14  ;;  %v5147_v53 = vperm.slane %v4580_v44, %v8597_v45  ;;  %vm10921_vm4 = vmmov %vm10907_vm9 }
 0xc35   :  { %4681 = vperm.xlu2 %5512, %v3666_v26   ;;  %vm10922_vm9 = vmmov %vm10884_vm5 }
 0xc36   :  { %4684 = vperm.xlu1 %5513, %v3667_v46   ;;  %vm10923_vm5 = vmmov %vm10886_vm2 }
 0xc37   :  { %v4583_v31 = vpop.permute.xlu2 %4582  ;;  %vm10924_vm2 = vmmov %vm10887_vm3  ;;  %vm10925_vm3 = vcmask 1045509  }
 0xc38   :  { %v4559_v59 = vpop.permute.xlu1 %4558  ;;  %v5149_v17 = vperm.slane %v4583_v31, %v8540_v41 }
 0xc39   :  { %v5133_v36 = vperm.slane %v4559_v59, %v8519_v12 }
 0xc3b   :  { %v5134_v14 = vsel %vm4704_vm11, %v5133_v36, %v5132_v10  ;;  %v4589_v51 = vpop.permute.xlu0 %4588 }
 0xc3c   :  { %v5136_v47 = vsel %vm4708_vm12, %v5135_v56, %v5134_v14  ;;  %v5153_v54 = vperm.slane %v4589_v51, %v8600_v34 }
 0xc3d   :  { %4690 = vperm.xlu2 %5512, %v3669_v1   ;;  %v5138_v4 = vsel %vm4712_vm13, %v5137_v23, %v5136_v47 }
 0xc3e   :  { %4693 = vperm.xlu1 %5513, %v3670_v27  }
 0xc3f   :  { %v4592_v11 = vpop.permute.xlu2 %4591 }
 0xc40   :  { %v4568_v5 = vpop.permute.xlu1 %4567  ;;  %v5155_v48 = vperm.slane %v4592_v11, %v8588_v38 }
 0xc41   :  { %v5139_v52 = vperm.slane %v4568_v5, %v8608_v28 }
 0xc43   :  { %v5140_v9 = vsel %vm4716_vm14, %v5139_v52, %v5138_v4  ;;  %v4598_v8 = vpop.permute.xlu0 %4597 }
 0xc44   :  { %v5142_v10 = vsel %vm4720_vm15, %v5141_v18, %v5140_v9  ;;  %v5159_v46 = vperm.slane %v4598_v8, %v10734_v25 }
 0xc45   :  { %v5144_v55 = vsel %vm4724_vm0, %v5143_v42, %v5142_v10 }
 0xc47   :  { %v4601_v6 = vpop.permute.xlu2 %4600 }
 0xc48   :  { %v4577_v21 = vpop.permute.xlu1 %4576  ;;  %v5161_v50 = vperm.slane %v4601_v6, %v8477_v33 }
 0xc49   :  { %v5145_v32 = vperm.slane %v4577_v21, %v8611_v61 }
 0xc4b   :  { %v5146_v63 = vsel %vm4728_vm1, %v5145_v32, %v5144_v55  ;;  %v4607_v20 = vpop.permute.xlu0 %4606 }
 0xc4c   :  { %v5148_v39 = vsel %vm10921_vm4, %v5147_v53, %v5146_v63  ;;  %v5164_v23 = vperm.slane %v4607_v20, %v8519_v12 }
 0xc4d   :  { %v5150_v3 = vsel %vm10922_vm9, %v5149_v17, %v5148_v39 }
 0xc4f   :  { %v4610_v29 = vpop.permute.xlu2 %4609 }
 0xc50   :  { %v4586_v15 = vpop.permute.xlu1 %4585  ;;  %v5166_v47 = vperm.slane %v4610_v29, %v8591_v7 }
 0xc51   :  { %v5151_v22 = vperm.slane %v4586_v15, %v8614_v49 }
 0xc53   :  { %v5152_v58 = vsel %vm10923_vm5, %v5151_v22, %v5150_v3  ;;  %v4616_v37 = vpop.permute.xlu0 %4615 }
 0xc54   :  { %v5154_v60 = vsel %vm10924_vm2, %v5153_v54, %v5152_v58  ;;  %v5170_v5 = vperm.slane %v4616_v37, %v8608_v28 }
 0xc55   :  { %v5156_v26 = vsel %vm4748_vm6, %v5155_v48, %v5154_v60 }
 0xc57   :  { %v4619_v0 = vpop.permute.xlu2 %4618 }
 0xc58   :  { %v4595_v62 = vpop.permute.xlu1 %4594  ;;  %v5172_v9 = vperm.slane %v4619_v0, %v8594_v13 }
 0xc59   :  { %v5157_v35 = vperm.slane %v4595_v62, %v8617_v43 }
 0xc5b   :  { %v5158_v31 = vsel %vm4752_vm7, %v5157_v35, %v5156_v26  ;;  %v4625_v4 = vpop.permute.xlu0 %4624 }
 0xc5c   :  { %v5160_v59 = vsel %vm4756_vm8, %v5159_v46, %v5158_v31  ;;  %v5176_v6 = vperm.slane %v4625_v4, %v8611_v61 }
 0xc5d   :  { %v5241_v36 = vsel %vm10925_vm3, %v5160_v59, %v5240_v2  ;;  %vm10926_vm3 = vcmask 1046534  }
 0xc5f   :  { %v4628_v1 = vpop.permute.xlu2 %4627 }
 0xc60   :  { %v4604_v56 = vpop.permute.xlu1 %4603  ;;  %v5178_v51 = vperm.slane %v4628_v1, %v8597_v45 }
 0xc61   :  { %v5162_v40 = vperm.slane %v4604_v56, %v8579_v24 }
 0xc63   :  { %v5163_v16 = vsel %vm4700_vm10, %v5162_v40, %v5161_v50  ;;  %v4634_v55 = vpop.permute.xlu0 %4633 }
 0xc64   :  { %v5165_v30 = vsel %vm4704_vm11, %v5164_v23, %v5163_v16  ;;  %v5182_v15 = vperm.slane %v4634_v55, %v8614_v49 }
 0xc65   :  { %v5167_v2 = vsel %vm4708_vm12, %v5166_v47, %v5165_v30 }
 0xc67   :  { %v4637_v18 = vpop.permute.xlu2 %4636 }
 0xc68   :  { %v4613_v14 = vpop.permute.xlu1 %4612  ;;  %v5184_v48 = vperm.slane %v4637_v18, %v8600_v34 }
 0xc69   :  { %v5168_v27 = vperm.slane %v4613_v14, %v8629_v57 }
 0xc6b   :  { %v5169_v11 = vsel %vm4712_vm13, %v5168_v27, %v5167_v2  ;;  %v4643_v22 = vpop.permute.xlu0 %4642 }
 0xc6c   :  { %v5171_v44 = vsel %vm4716_vm14, %v5170_v5, %v5169_v11  ;;  %v5188_v60 = vperm.slane %v4643_v22, %v8617_v43 }
 0xc6d   :  { %v5173_v10 = vsel %vm4720_vm15, %v5172_v9, %v5171_v44 }
 0xc6f   :  { %v4646_v63 = vpop.permute.xlu2 %4645 }
 0xc70   :  { %v4622_v52 = vpop.permute.xlu1 %4621  ;;  %v5190_v26 = vperm.slane %v4646_v63, %v10734_v25 }
 0xc71   :  { %v5174_v42 = vperm.slane %v4622_v52, %v8537_v19 }
 0xc73   :  { %v5175_v21 = vsel %vm4724_vm0, %v5174_v42, %v5173_v10  ;;  %v4652_v20 = vpop.permute.xlu0 %4651 }
 0xc74   :  { %v5177_v32 = vsel %vm4728_vm1, %v5176_v6, %v5175_v21  ;;  %v5193_v37 = vperm.slane %v4652_v20, %v8579_v24 }
 0xc75   :  { %v5179_v39 = vsel %vm10921_vm4, %v5178_v51, %v5177_v32 }
 0xc77   :  { %v4655_v46 = vpop.permute.xlu2 %4654 }
 0xc78   :  { %v4631_v53 = vpop.permute.xlu1 %4630  ;;  %v5195_v14 = vperm.slane %v4655_v46, %v8519_v12 }
 0xc79   :  { %v5180_v17 = vperm.slane %v4631_v53, %v8540_v41 }
 0xc7b   :  { %v5181_v3 = vsel %vm10922_vm9, %v5180_v17, %v5179_v39  ;;  %v4661_v40 = vpop.permute.xlu0 %4660 }
 0xc7c   :  { %v5183_v54 = vsel %vm10923_vm5, %v5182_v15, %v5181_v3 }
 0xc7d   :  { %v5185_v8 = vsel %vm10924_vm2, %v5184_v48, %v5183_v54 }
 0xc7f   :  { %v4664_v56 = vpop.permute.xlu2 %4663 }
 0xc80   :  { %v4640_v29 = vpop.permute.xlu1 %4639  ;;  %v5201_v24 = vperm.slane %v4664_v56, %v8608_v28 }
 0xc81   :  { %v5186_v58 = vperm.slane %v4640_v29, %v8588_v38 }
 0xc83   :  { %v5187_v62 = vsel %vm4748_vm6, %v5186_v58, %v5185_v8  ;;  %v4670_v47 = vpop.permute.xlu0 %4669 }
 0xc84   :  { %v5189_v35 = vsel %vm4752_vm7, %v5188_v60, %v5187_v62  ;;  %v5205_v12 = vperm.slane %v4670_v47, %v8537_v19 }
 0xc85   :  { %v5191_v31 = vsel %vm4756_vm8, %v5190_v26, %v5189_v35 }
 0xc86   :  { %v5242_v59 = vsel %vm10926_vm3, %v5191_v31, %v5241_v36  ;;  %v5199_v36 = vperm.slane %v4661_v40, %v8629_v57 }
 0xc87   :  { %v4673_v2 = vpop.permute.xlu2 %4672 }
 0xc88   :  { %v4649_v0 = vpop.permute.xlu1 %4648  ;;  %v5207_v42 = vperm.slane %v4673_v2, %v8611_v61 }
 0xc89   :  { %v5192_v50 = vperm.slane %v4649_v0, %v8477_v33 }
 0xc8b   :  { %v5194_v1 = vsel %vm4700_vm10, %v5193_v37, %v5192_v50  ;;  %v4679_v52 = vpop.permute.xlu0 %4678  ;;  %vm10927_vm10 = vmmov %vm10921_vm4 }
 0xc8c   :  { %v5196_v30 = vsel %vm4704_vm11, %v5195_v14, %v5194_v1  ;;  %v5211_v28 = vperm.slane %v4679_v52, %v8540_v41  ;;  %vm10928_vm11 = vmmov %vm10922_vm9 }
 0xc8f   :  { %v4682_v9 = vpop.permute.xlu2 %4681 }
 0xc90   :  { %v4658_v16 = vpop.permute.xlu1 %4657  ;;  %v5213_v19 = vperm.slane %v4682_v9, %v8614_v49 }
 0xc91   :  { %v5197_v23 = vperm.slane %v4658_v16, %v8591_v7 }
 0xc93   :  { %v5198_v27 = vsel %vm4708_vm12, %v5197_v23, %v5196_v30  ;;  %v4688_v32 = vpop.permute.xlu0 %4687  ;;  %vm10929_vm12 = vmmov %vm10923_vm5 }
 0xc94   :  { %v5200_v33 = vsel %vm4712_vm13, %v5199_v36, %v5198_v27  ;;  %vm10930_vm13 = vmmov %vm10924_vm2  ;;  %v5217_v61 = vperm.slane %v4688_v32, %v8588_v38 }
 0xc95   :  { %v5202_v5 = vsel %vm4716_vm14, %v5201_v24, %v5200_v33  ;;  %vm10931_vm14 = vcmask 1047559  }
 0xc97   :  { %v4691_v51 = vpop.permute.xlu2 %4690 }
 0xc98   :  { %v4667_v4 = vpop.permute.xlu1 %4666  ;;  %v5219_v63 = vperm.slane %v4691_v51, %v8617_v43 }
 0xc99   :  { %v5203_v11 = vperm.slane %v4667_v4, %v8594_v13 }
 0xc9b   :  { %v5204_v7 = vsel %vm4720_vm15, %v5203_v11, %v5202_v5 }
 0xc9c   :  { %v5206_v44 = vsel %vm4724_vm0, %v5205_v12, %v5204_v7 }
 0xc9d   :  { %v5208_v10 = vsel %vm4728_vm1, %v5207_v42, %v5206_v44 }
 0xca0   :  { %v4676_v18 = vpop.permute.xlu1 %4675 }
 0xca1   :  { %v5209_v57 = vperm.slane %v4676_v18, %v8597_v45 }
 0xca3   :  { %v5210_v13 = vsel %vm10927_vm10, %v5209_v57, %v5208_v10 }
 0xca4   :  { %v5212_v55 = vsel %vm10928_vm11, %v5211_v28, %v5210_v13 }
 0xca5   :  { %v5214_v53 = vsel %vm10929_vm12, %v5213_v19, %v5212_v55 }
 0xca8   :  { %v4685_v21 = vpop.permute.xlu1 %4684 }
 0xca9   :  { %v5215_v6 = vperm.slane %v4685_v21, %v8600_v34 }
 0xcab   :  { %v5216_v45 = vsel %vm10930_vm13, %v5215_v6, %v5214_v53 }
 0xcac   :  { %v5218_v17 = vsel %vm4748_vm6, %v5217_v61, %v5216_v45 }
 0xcad   :  { %v5220_v34 = vsel %vm4752_vm7, %v5219_v63, %v5218_v17 }
 0xcb0   :  { %v4694_v41 = vpop.permute.xlu1 %4693 }
 0xcb1   :  { %v5221_v49 = vperm.slane %v4694_v41, %v10734_v25 }
 0xcb3   :  { %v5222_v39 = vsel %vm4756_vm8, %v5221_v49, %v5220_v34 }
 0xcb4   :  { %v5243_v38 = vsel %vm10931_vm14, %v5222_v39, %v5242_v59 }
 0xcb5   :  { %5247 = vst [vmem:[#allocation5 + $0x8] sm:$0xff] %v5243_v38 }
 0xcb6   :  { %5260 = dma.vmem_to_hbm [thread:$0]  %s5253_s10, 256, %s5255_s13, [#allocation4], %s5602_s23, %s5602_s23, %s5603_s24  }
 0xcb7   :  { %5599 = dma.done.wait [#allocation4], 256  }
 0xcb8   :  { %5600 = vsyncadd [#allocation4], 4294967040 }
 0xcb9   :  { %5265 = vsyncpa [#allocation3], 1 }
 0xcba   :  { %5266 = vsyncpa [#allocation4], 1 }

</bundles_post_ra>
